<compile_context>
chip_gen: v7x
topology: tpu7x:2x2x1
jax: 0.10.0
libtpu: 0.0.40
codegen_flags: <defaults>
</compile_context>

<pallas_src>
import functools
import math

import numpy as np
import jax
import jax.numpy as jnp
from jax.experimental import pallas as pl
from jax.experimental.pallas import tpu as pltpu


_LANE = 128                               # TPU vreg lane width
_COL_CANDIDATES = (1024, 512, 256, 128)   # lane-dense widths (multiples of 128)
_PAD_COLS = 512                           # width used when nothing divides n
_SMALL_BYTES = 1 << 20                    # below this, skip Pallas (launch-dominated)


def _round_up(x, m):
    return ((x + m - 1) // m) * m


def _sublane(dtype):
    # Native second-minor tile: 8 rows for 32-bit, 16 for 16-bit, 32 for 8-bit.
    bits = jnp.dtype(dtype).itemsize * 8
    return max(8, 256 // bits)


def _default_vmem_limit():
    cap = 128 * 1024 * 1024
    try:
        info = pltpu.get_tpu_info()
        cap = int(getattr(info, "vmem_capacity_bytes", cap))
    except Exception:
        pass
    # Half of physical VMEM, capped at 64 MiB: 64 MiB on v5e/v6e, 32 MiB on v7x.
    return int(min(max(cap // 2, 16 * 1024 * 1024), 64 * 1024 * 1024))


_VMEM_LIMIT = _default_vmem_limit()


def _apply_op(op, x, v):
    if op == "ge":            # GreaterThan:  trace - val
        return x - v
    if op == "le":            # LessThan:     val - trace
        return v - x
    if op == "eq":            # Equal:       -|trace - val|
        return -jnp.abs(x - v)
    raise ValueError(f"unknown predicate op: {op}")


# ----------------------------- Pallas kernels -------------------------------

def _const_kernel(x_ref, *out_refs, ops, vals):
    """RHS constants baked in as weak-typed Python floats (common case)."""
    x = x_ref[...]
    for op, v, o_ref in zip(ops, vals, out_refs):
        o_ref[...] = _apply_op(op, x, v)


def _smem_kernel(vals_ref, x_ref, *out_refs, ops):
    """RHS constants held as f32 in SMEM (traced / array RHS); cast in-kernel."""
    x = x_ref[...]
    for i, (op, o_ref) in enumerate(zip(ops, out_refs)):
        v = vals_ref[i].astype(x.dtype)
        o_ref[...] = _apply_op(op, x, v)


# ------------------------------ core wrapper --------------------------------

@functools.partial(jax.jit, static_argnames=("ops", "const_vals"))
def _predicate_core(trace, vals, ops, const_vals):
    """Evaluate predicates `ops` elementwise over `trace`.

    const_vals: tuple of Python floats baked into the kernel, or None.
    vals:       f32 (n_ops,) array used when const_vals is None, else None.
    """
    if not jnp.issubdtype(trace.dtype, jnp.floating):
        trace = trace.astype(jnp.float32)
    orig_shape = trace.shape
    n = math.prod(orig_shape) if orig_shape else 1
    dtype = trace.dtype
    itemsize = jnp.dtype(dtype).itemsize
    n_ops = len(ops)

    def rhs(i):
        if const_vals is not None:
            return const_vals[i]
        return vals[i].astype(dtype)

    # Tiny traces: fixed pallas_call + reshape overhead dominates -> plain jnp.
    if n * itemsize < _SMALL_BYTES:
        return tuple(_apply_op(op, trace, rhs(i)) for i, op in enumerate(ops))

    flat = trace.reshape((n,))

    # Lane-dense slab [rows, cols], cols a multiple of 128.  Prefer a width
    # that divides n exactly so no pad / un-pad copies are needed at all.
    cols = None
    for c in _COL_CANDIDATES:
        if n % c == 0:
            cols = c
            break
    sub = _sublane(dtype)
    if cols is None:
        cols = _PAD_COLS
        rows = _round_up(pl.cdiv(n, cols), sub)
        flat = jnp.pad(flat, (0, rows * cols - n))      # minimal pad only
        padded = True
    else:
        rows = n // cols
        padded = False
    x2d = flat.reshape(rows, cols)

    # Tile rows so input + all outputs, double-buffered, fit the per-generation
    # VMEM budget.  The last grid block may be partial; Pallas masks edge
    # reads/writes, so rows need not be a multiple of tile_rows.
    per_row_bytes = 2 * (1 + n_ops) * cols * itemsize
    budget_rows = max(sub, (_VMEM_LIMIT * 3 // 4) // per_row_bytes)
    tile_rows = min(budget_rows, rows)
    tile_rows = max(sub, (tile_rows // sub) * sub)
    grid = (pl.cdiv(rows, tile_rows),)

    tile_spec = pl.BlockSpec((tile_rows, cols), lambda i: (i, 0))
    out_shape = tuple(jax.ShapeDtypeStruct((rows, cols), dtype) for _ in ops)
    out_specs = tuple(pl.BlockSpec((tile_rows, cols), lambda i: (i, 0)) for _ in ops)

    compiler_params = pltpu.CompilerParams(
        dimension_semantics=("parallel",),
        vmem_limit_bytes=_VMEM_LIMIT,
    )

    if const_vals is not None:
        kern = functools.partial(_const_kernel, ops=ops, vals=const_vals)
        outs = pl.pallas_call(
            kern,
            out_shape=out_shape,
            grid=grid,
            in_specs=[tile_spec],
            out_specs=out_specs,
            compiler_params=compiler_params,
        )(x2d)
    else:
        kern = functools.partial(_smem_kernel, ops=ops)
        outs = pl.pallas_call(
            kern,
            out_shape=out_shape,
            grid=grid,
            in_specs=[
                pl.BlockSpec((n_ops,), lambda i: (0,),
                             memory_space=pltpu.MemorySpace.SMEM),
                tile_spec,
            ],
            out_specs=out_specs,
            compiler_params=compiler_params,
        )(vals.astype(jnp.float32), x2d)

    if padded:
        return tuple(o.reshape((rows * cols,))[:n].reshape(orig_shape) for o in outs)
    return tuple(o.reshape(orig_shape) for o in outs)


# --------------------------- WSTL module mirror ------------------------------

class Expression:
    """Named signal wrapper (numeric glue only)."""

    def __init__(self, name, value):
        self.name = name
        self.value = value

    def set_name(self, new_name):
        self.name = new_name

    def set_value(self, new_value):
        self.value = new_value


def convert_inputs(inputs):
    _x, _y = inputs

    def conv(v):
        if isinstance(v, Expression):
            if v.value is None:
                raise ValueError("Input Expression does not have numerical values")
            return v.value
        if isinstance(v, (jnp.ndarray, np.ndarray)):
            return v
        if isinstance(v, tuple):
            return convert_inputs(v)
        raise ValueError("Invalid input trace")

    return (conv(_x), conv(_y))


class WSTLFormula:
    """JAX/Pallas mirror of WSTL_Formula (predicate leaves only)."""

    def __init__(self):
        self.weights = {}  # torch.nn.ParameterDict({}) equivalent (empty for predicates)

    def forward(self, inputs, **kwargs):
        sc = kwargs.get("scale", -1)
        if isinstance(inputs, Expression):
            if inputs.value is None:
                raise TypeError("Input Expression does not have numerical values")
            return self.robustness_value(inputs.value, scale=sc)
        elif isinstance(inputs, (jnp.ndarray, np.ndarray)):
            return self.robustness_value(inputs, scale=sc)
        elif isinstance(inputs, tuple):
            return self.robustness_value(convert_inputs(inputs), scale=sc)
        else:
            raise ValueError("Invalid input trace")

    __call__ = forward

    def robustness(self, inputs, scale=-1, t=0):
        # forward(...)[:, t, :, :].unsqueeze(1)
        full = self.forward(inputs, scale=scale)
        return full[:, t, :, :][:, None, :, :]

    def set_weights(self, *args, **kwargs):
        # Predicates carry no weights -> no-op (matches PyTorch Predicate).
        pass

    def update_weights(self):
        pass


class Predicate(WSTLFormula):
    _op = None  # set by subclasses

    def __init__(self, lhs, val=0):
        if isinstance(val, str):
            raise TypeError("RHS value cannot be a string.")
        if not isinstance(lhs, Expression):
            raise TypeError("LHS should be an Expression.")
        super().__init__()
        self.lhs = lhs
        self.val = val

    def _rhs(self):
        """Return (python_float, None) for bake-able RHS, (None, f32[1]) otherwise."""
        v = self.val
        if isinstance(v, Expression):
            v = v.value
        if isinstance(v, (bool, int, float, np.integer, np.floating)):
            return float(v), None
        arr = jnp.asarray(v, dtype=jnp.float32)
        if arr.size != 1:
            # TODO(synk): tensor-valued (broadcasting) RHS not supported in the Pallas path.
            raise TypeError("Predicate RHS must be a scalar for the Pallas kernel.")
        return None, arr.reshape((1,))

    def robustness_value(self, trace, **kwargs):
        if isinstance(trace, Expression):
            trace = trace.value
        trace = jnp.asarray(trace)
        const_v, arr_v = self._rhs()
        if const_v is not None:
            (out,) = _predicate_core(trace, vals=None, ops=(self._op,),
                                     const_vals=(const_v,))
        else:
            (out,) = _predicate_core(trace, vals=arr_v, ops=(self._op,),
                                     const_vals=None)
        return out

    def robustness(self, inputs, scale=-1, t=0):
        # Predicates are elementwise: slice timestep t BEFORE the kernel so only
        # 1/T of the trace is read/written.  Result matches
        # forward(inputs)[:, t, :, :].unsqueeze(1).
        trace = inputs.value if isinstance(inputs, Expression) else inputs
        if isinstance(trace, tuple):
            return super().robustness(inputs, scale=scale, t=t)
        trace = jnp.asarray(trace)
        return self.forward(trace[:, t:t + 1, :, :], scale=scale)

    def __str__(self):
        lhs = self.lhs.name if isinstance(self.lhs, Expression) else self.lhs
        sym = {"ge": ">=", "le": "<=", "eq": "="}[self._op]
        val = self.val.name if isinstance(self.val, Expression) else self.val
        return f"{lhs} {sym} {val}"


class GreaterThan(Predicate):
    _op = "ge"


class LessThan(Predicate):
    _op = "le"


class Equal(Predicate):
    _op = "eq"


def fused_predicate_forward(predicates, trace):
    """Evaluate several predicates on the SAME trace with one kernel launch.

    The trace is read from HBM once and one lane-dense output slab is written
    per predicate (Nx fewer input bytes / launches than separate forwards).
    """
    if isinstance(trace, Expression):
        trace = trace.value
    trace = jnp.asarray(trace)
    ops = tuple(p._op for p in predicates)
    rhs = [p._rhs() for p in predicates]
    if all(c is not None for c, _ in rhs):
        return _predicate_core(trace, vals=None, ops=ops,
                               const_vals=tuple(c for c, _ in rhs))
    vals = jnp.concatenate(
        [a if a is not None else jnp.asarray([c], jnp.float32) for c, a in rhs])
    return _predicate_core(trace, vals=vals, ops=ops, const_vals=None)


# --------------------------------- main --------------------------------------

if __name__ == "__main__":
    key = jax.random.PRNGKey(0)
    k1, k2, k3 = jax.random.split(key, 3)

    # Typical small WSTL trace: [batch=2, time=8, n_weight_samples=4, 1]
    # -> pure-jnp fallback (launch overhead would dominate a Pallas call).
    x_small = jax.random.normal(k1, (2, 8, 4, 1), dtype=jnp.float32)

    # Medium trace: exercises the Pallas path (lane-dense slab, no pad/unpad).
    x_med = jax.random.normal(k2, (2, 512, 512, 1), dtype=jnp.float32)

    # Misaligned trace: exercises the minimal-pad path.
    x_odd = jax.random.normal(k3, (3, 500, 200, 1), dtype=jnp.float32)

    sig_s = Expression("x_small", x_small)
    sig_m = Expression("x_med", x_med)

    phi_ge = GreaterThan(sig_m, 0.5)
    phi_le = LessThan(sig_m, 0.5)
    phi_eq = Equal(sig_m, 0.5)

    # Fused: one pallas_call, trace read from HBM once, three outputs.
    r_ge, r_le, r_eq = fused_predicate_forward((phi_ge, phi_le, phi_eq), x_med)

    # Per-formula API (single-op kernel, RHS baked in as a constant).
    r_single = phi_ge.forward(x_med)

    # Array (traced) RHS -> f32 SMEM path, cast in-kernel.
    phi_arr = GreaterThan(sig_m, jnp.asarray(0.25, dtype=jnp.float32))
    r_arr = phi_arr.forward(x_med)

    # Misaligned size -> minimal pad + masked edge blocks.
    phi_odd = LessThan(Expression("x_odd", x_odd), -0.1)
    r_odd = phi_odd.forward(x_odd)

    # Tiny trace -> pure-jnp fallback.
    r_tiny = GreaterThan(sig_s, 0.5).forward(x_small)

    # bf16 trace -> 16-row sublane tiling.
    x_bf = x_med.astype(jnp.bfloat16)
    r_bf = Equal(Expression("x_bf", x_bf), 0.5).forward(x_bf)

    # robustness at t=0 (shape [B,1,S,1]); slices the timestep before the kernel.
    rob0 = phi_ge.robustness(x_med, t=0)

    jax.block_until_ready((r_ge, r_le, r_eq, r_single, r_arr, r_odd,
                           r_tiny, r_bf, rob0))

    # Correctness checks against pure-JAX reference semantics.
    assert r_ge.shape == x_med.shape and r_le.shape == x_med.shape
    assert jnp.allclose(r_ge, x_med - 0.5, atol=1e-6)
    assert jnp.allclose(r_le, 0.5 - x_med, atol=1e-6)
    assert jnp.allclose(r_eq, -jnp.abs(x_med - 0.5), atol=1e-6)
    assert jnp.allclose(r_single, x_med - 0.5, atol=1e-6)
    assert jnp.allclose(r_arr, x_med - 0.25, atol=1e-6)
    assert r_odd.shape == x_odd.shape
    assert jnp.allclose(r_odd, -0.1 - x_odd, atol=1e-6)
    assert r_tiny.shape == x_small.shape
    assert jnp.allclose(r_tiny, x_small - 0.5, atol=1e-6)
    assert r_bf.dtype == jnp.bfloat16 and r_bf.shape == x_bf.shape
    assert jnp.allclose(r_bf.astype(jnp.float32),
                        -jnp.abs(x_bf.astype(jnp.float32) - 0.5), atol=5e-2)
    assert rob0.shape == (2, 1, 512, 1)
    assert jnp.allclose(rob0, (x_med - 0.5)[:, 0:1, :, :], atol=1e-6)

    print("KERNEL_OK")
</pallas_src>

<mosaic_0001>
module attributes {stable_mosaic.version = 11 : i64} {
  func.func @_const_kernel(%arg0: i32, %arg1: memref<512x1024xf32, #tpu.memory_space<vmem>>, %arg2: memref<512x1024xf32, #tpu.memory_space<vmem>>, %arg3: memref<512x1024xf32, #tpu.memory_space<vmem>>, %arg4: memref<512x1024xf32, #tpu.memory_space<vmem>>) attributes {dimension_semantics = [#tpu.dimension_semantics<parallel>], iteration_bounds = array<i64: 1>, scalar_prefetch = 0 : i64, scratch_operands = 0 : i64, tpu.core_type = #tpu.core_type<tc>, window_params = [{transform_indices = @transform_0, window_bounds = array<i64: 512, 1024>}, {transform_indices = @transform_1, window_bounds = array<i64: 512, 1024>}, {transform_indices = @transform_2, window_bounds = array<i64: 512, 1024>}, {transform_indices = @transform_3, window_bounds = array<i64: 512, 1024>}]} {
    %c0 = arith.constant 0 : index
    %c0_0 = arith.constant 0 : index
    %0 = vector.load %arg1[%c0, %c0_0] : memref<512x1024xf32, #tpu.memory_space<vmem>>, vector<512x1024xf32>
    %cst = arith.constant 5.000000e-01 : f32
    %1 = vector.broadcast %cst : f32 to vector<512x1024xf32>
    %2 = arith.subf %0, %1 : vector<512x1024xf32>
    %c0_1 = arith.constant 0 : index
    %c0_2 = arith.constant 0 : index
    %3 = vector.load %arg2[%c0_1, %c0_2] : memref<512x1024xf32, #tpu.memory_space<vmem>>, vector<512x1024xf32>
    tpu.vector_store %arg2[%c0_1, %c0_2], %2 {strides = array<i32>} : memref<512x1024xf32, #tpu.memory_space<vmem>>, vector<512x1024xf32>,
    %cst_3 = arith.constant 5.000000e-01 : f32
    %4 = vector.broadcast %cst_3 : f32 to vector<512x1024xf32>
    %5 = arith.subf %4, %0 : vector<512x1024xf32>
    %c0_4 = arith.constant 0 : index
    %c0_5 = arith.constant 0 : index
    %6 = vector.load %arg3[%c0_4, %c0_5] : memref<512x1024xf32, #tpu.memory_space<vmem>>, vector<512x1024xf32>
    tpu.vector_store %arg3[%c0_4, %c0_5], %5 {strides = array<i32>} : memref<512x1024xf32, #tpu.memory_space<vmem>>, vector<512x1024xf32>,
    %cst_6 = arith.constant 5.000000e-01 : f32
    %7 = vector.broadcast %cst_6 : f32 to vector<512x1024xf32>
    %8 = arith.subf %0, %7 : vector<512x1024xf32>
    %9 = math.absf %8 : vector<512x1024xf32>
    %cst_7 = arith.constant 0.000000e+00 : f32
    %10 = vector.broadcast %cst_7 : f32 to vector<512x1024xf32>
    %11 = arith.subf %10, %9 : vector<512x1024xf32>
    %c0_8 = arith.constant 0 : index
    %c0_9 = arith.constant 0 : index
    %12 = vector.load %arg4[%c0_8, %c0_9] : memref<512x1024xf32, #tpu.memory_space<vmem>>, vector<512x1024xf32>
    tpu.vector_store %arg4[%c0_8, %c0_9], %11 {strides = array<i32>} : memref<512x1024xf32, #tpu.memory_space<vmem>>, vector<512x1024xf32>,
    return
  }
  func.func @transform_0(%arg0: i32) -> (i32, i32) {
    %c0_i32 = arith.constant 0 : i32
    %c0_i32_0 = arith.constant 0 : i32
    return %arg0, %c0_i32 : i32, i32
  }
  func.func @transform_1(%arg0: i32) -> (i32, i32) {
    %c0_i32 = arith.constant 0 : i32
    %c0_i32_0 = arith.constant 0 : i32
    return %arg0, %c0_i32 : i32, i32
  }
  func.func @transform_2(%arg0: i32) -> (i32, i32) {
    %c0_i32 = arith.constant 0 : i32
    %c0_i32_0 = arith.constant 0 : i32
    return %arg0, %c0_i32 : i32, i32
  }
  func.func @transform_3(%arg0: i32) -> (i32, i32) {
    %c0_i32 = arith.constant 0 : i32
    %c0_i32_0 = arith.constant 0 : i32
    return %arg0, %c0_i32 : i32, i32
  }
}

</mosaic_0001>

<bundles_post_ra>
// kernel: _predicate_core.1
= control target key start
LH: loop header
LB: loop body
LE: loop exit
PB: predicated region body
PF: predicated region fallthrough
CT: control target
= control target key end

     0   :  { %9 = vsyncpa [#allocation3], 0  ;;  %s5900_s0 = inlined_call_operand.hbm [shape: f32[512,1024], index: 0, kind: input, shape index: {}]   ;;  %s5901_s1 = inlined_call_operand.hbm [shape: f32[512,1024], index: 1, kind: output, shape index: {0}]   ;;  %s5902_s2 = inlined_call_operand.hbm [shape: f32[512,1024], index: 2, kind: output, shape index: {1}]   ;;  %s5903_s3 = inlined_call_operand.hbm [shape: f32[512,1024], index: 3, kind: output, shape index: {2}]  }
   0x1   :  { %10 = vsyncpa [#allocation4], 0 }
   0x2   :  { %11 = vsyncpa [#allocation7], 0  ;;  %s5807_s12 = smov [#allocation2]   ;;  %s5713_s16 = scalar_lea.hbm %s5900_s0, 65536 }
   0x3   :  { %s17_s13 = sshll.u32 %s5807_s12, 4  ;;  %p5714_p0 = scmp.ne.s32.totalorder %s5900_s0, %s5713_s16  ;;  %s18_s13 = int_to_ptr.vmem [resolvable:$true] %s17_s13 }
   0x4   :  { %p5717_p1 = scmp.lt.u32.totalorder %s5713_s16, %s5900_s0 }
   0x6   :  { %p5719_p2 = pnand %p5717_p1, %p5714_p0 }
   0x8   :  { %5722 = shalt.err (!%p5719_p2)
}
   0x9   :  { %s5723_s21 = scalar_lea.vmem %s18_s13, 65536  ;;  %p5728_p4 = scmp.lt.s32.totalorder %s18_s13, %s18_s13 }
   0xa   :  { %p5724_p3 = scmp.ne.s32.totalorder %s18_s13, %s5723_s21  ;;  %p5729_p5 = scmp.lt.s32.totalorder %s5723_s21, %s5723_s21 }
   0xc   :  { %p5730_p6 = por %p5729_p5, %p5728_p4 }
   0xe   :  { %p5731_p7 = pnand %p5730_p6, %p5724_p3 }
  0x10   :  { %5734 = shalt.err (!%p5731_p7)
}
  0x11   :  { %s5808_s22 = smov 1024   ;;  %s5809_s23 = smov 64  }
  0x12   :  { %23 = dma.hbm_to_vmem [thread:$0]  %s5900_s0, 65536, %s18_s13, [#allocation3], %s5808_s22, %s5808_s22, %s5809_s23  }
  0x13   :  { %5801 = dma.done.wait [#allocation3], 65536  }
  0x14   :  { %5802 = vsyncadd [#allocation3], 4294901760  ;;  %v27_v0 = vld [vmem:[#allocation2] sm:$0xff]  ;;  %v28_v1 = vld [vmem:[#allocation2 + $0x8] sm:$0xff]  ;;  %s5810_s0 = smov [#allocation6]   ;;  %s5811_s27 = smov [#allocation5]  }
  0x15   :  { %v29_v2 = vld [vmem:[#allocation2 + $0x10] sm:$0xff]  ;;  %v1563_v3 = vsub.f32 0.5, %v27_v0  ;;  %v1564_v4 = vsub.f32 0.5, %v28_v1  ;;  %v30_v6 = vld [vmem:[#allocation2 + $0x18] sm:$0xff]  ;;  %v31_v7 = vld [vmem:[#allocation2 + $0x20] sm:$0xff]  ;;  %s4140_s26 = sshll.u32 %s5810_s0, 4  ;;  %s4141_s26 = int_to_ptr.vmem [resolvable:$true] %s4140_s26 }
  0x16   :  { %v1565_v5 = vsub.f32 0.5, %v29_v2  ;;  %v32_v8 = vld [vmem:[#allocation2 + $0x28] sm:$0xff]  ;;  %v1566_v9 = vsub.f32 0.5, %v30_v6  ;;  %v1567_v10 = vsub.f32 0.5, %v31_v7  ;;  %v33_v12 = vld [vmem:[#allocation2 + $0x30] sm:$0xff]  ;;  %v34_v13 = vld [vmem:[#allocation2 + $0x38] sm:$0xff]  ;;  %p5740_p9 = scmp.lt.s32.totalorder %s4141_s26, %s4141_s26 }
  0x17   :  { %v1568_v11 = vsub.f32 0.5, %v32_v8  ;;  %v35_v14 = vld [vmem:[#allocation2 + $0x40] sm:$0xff]  ;;  %2075 = vst [vmem:[#allocation6] sm:$0xff] %v1563_v3  ;;  %2076 = vst [vmem:[#allocation6 + $0x8] sm:$0xff] %v1564_v4  ;;  %v1569_v15 = vsub.f32 0.5, %v33_v12  ;;  %v1570_v16 = vsub.f32 0.5, %v34_v13 }
  0x18   :  { %2077 = vst [vmem:[#allocation6 + $0x10] sm:$0xff] %v1565_v5  ;;  %v1571_v17 = vsub.f32 0.5, %v35_v14  ;;  %v36_v18 = vld [vmem:[#allocation2 + $0x48] sm:$0xff]  ;;  %v37_v19 = vld [vmem:[#allocation2 + $0x50] sm:$0xff]  ;;  %v38_v20 = vld [vmem:[#allocation2 + $0x58] sm:$0xff]  ;;  %s4128_s28 = sshll.u32 %s5811_s27, 4  ;;  %s5848_s28 = int_to_ptr.vmem [resolvable:$true] %s4128_s28 }
  0x19   :  { %2078 = vst [vmem:[#allocation6 + $0x18] sm:$0xff] %v1566_v9  ;;  %2079 = vst [vmem:[#allocation6 + $0x20] sm:$0xff] %v1567_v10  ;;  %v1572_v21 = vsub.f32 0.5, %v36_v18  ;;  %v1573_v22 = vsub.f32 0.5, %v37_v19  ;;  %v1574_v23 = vsub.f32 0.5, %v38_v20  ;;  %v39_v24 = vld [vmem:[#allocation2 + $0x60] sm:$0xff] }
  0x1a   :  { %2080 = vst [vmem:[#allocation6 + $0x28] sm:$0xff] %v1568_v11  ;;  %v40_v25 = vld [vmem:[#allocation2 + $0x68] sm:$0xff]  ;;  %v41_v26 = vld [vmem:[#allocation2 + $0x70] sm:$0xff]  ;;  %2081 = vst [vmem:[#allocation6 + $0x30] sm:$0xff] %v1569_v15  ;;  %v1575_v27 = vsub.f32 0.5, %v39_v24  ;;  %s5735_s29 = scalar_lea.vmem %s4141_s26, 65536 }
  0x1b   :  { %2082 = vst [vmem:[#allocation6 + $0x38] sm:$0xff] %v1570_v16  ;;  %2083 = vst [vmem:[#allocation6 + $0x40] sm:$0xff] %v1571_v17  ;;  %v1576_v28 = vsub.f32 0.5, %v40_v25  ;;  %v1577_v29 = vsub.f32 0.5, %v41_v26  ;;  %v42_v30 = vld [vmem:[#allocation2 + $0x78] sm:$0xff]  ;;  %v43_v31 = vld [vmem:[#allocation2 + $0x80] sm:$0xff]  ;;  %p5736_p8 = scmp.ne.s32.totalorder %s4141_s26, %s5735_s29  ;;  %p5741_p10 = scmp.lt.s32.totalorder %s5735_s29, %s5735_s29 }
  0x1c   :  { %v44_v32 = vld [vmem:[#allocation2 + $0x88] sm:$0xff]  ;;  %2084 = vst [vmem:[#allocation6 + $0x48] sm:$0xff] %v1572_v21  ;;  %2085 = vst [vmem:[#allocation6 + $0x50] sm:$0xff] %v1573_v22  ;;  %v1578_v33 = vsub.f32 0.5, %v42_v30  ;;  %v1579_v34 = vsub.f32 0.5, %v43_v31  ;;  %v45_v36 = vld [vmem:[#allocation2 + $0x90] sm:$0xff] }
  0x1d   :  { %2086 = vst [vmem:[#allocation6 + $0x58] sm:$0xff] %v1574_v23  ;;  %v1580_v35 = vsub.f32 0.5, %v44_v32  ;;  %v46_v37 = vld [vmem:[#allocation2 + $0x98] sm:$0xff]  ;;  %v47_v38 = vld [vmem:[#allocation2 + $0xa0] sm:$0xff]  ;;  %2087 = vst [vmem:[#allocation6 + $0x60] sm:$0xff] %v1575_v27  ;;  %v1581_v39 = vsub.f32 0.5, %v45_v36  ;;  %p5742_p11 = por %p5741_p10, %p5740_p9 }
  0x1e   :  { %2088 = vst [vmem:[#allocation6 + $0x68] sm:$0xff] %v1576_v28  ;;  %2089 = vst [vmem:[#allocation6 + $0x70] sm:$0xff] %v1577_v29  ;;  %v1582_v40 = vsub.f32 0.5, %v46_v37  ;;  %v1583_v41 = vsub.f32 0.5, %v47_v38  ;;  %v48_v42 = vld [vmem:[#allocation2 + $0xa8] sm:$0xff]  ;;  %v49_v43 = vld [vmem:[#allocation2 + $0xb0] sm:$0xff] }
  0x1f   :  { %v50_v44 = vld [vmem:[#allocation2 + $0xb8] sm:$0xff]  ;;  %2090 = vst [vmem:[#allocation6 + $0x78] sm:$0xff] %v1578_v33  ;;  %2091 = vst [vmem:[#allocation6 + $0x80] sm:$0xff] %v1579_v34  ;;  %v1584_v45 = vsub.f32 0.5, %v48_v42  ;;  %v1585_v46 = vsub.f32 0.5, %v49_v43  ;;  %v51_v48 = vld [vmem:[#allocation2 + $0xc0] sm:$0xff]  ;;  %p5743_p12 = pnand %p5742_p11, %p5736_p8 }
  0x20   :  { %2092 = vst [vmem:[#allocation6 + $0x88] sm:$0xff] %v1580_v35  ;;  %v1586_v47 = vsub.f32 0.5, %v50_v44  ;;  %v52_v49 = vld [vmem:[#allocation2 + $0xc8] sm:$0xff]  ;;  %v53_v50 = vld [vmem:[#allocation2 + $0xd0] sm:$0xff]  ;;  %2093 = vst [vmem:[#allocation6 + $0x90] sm:$0xff] %v1581_v39  ;;  %v1587_v51 = vsub.f32 0.5, %v51_v48 }
  0x21   :  { %2094 = vst [vmem:[#allocation6 + $0x98] sm:$0xff] %v1582_v40  ;;  %2095 = vst [vmem:[#allocation6 + $0xa0] sm:$0xff] %v1583_v41  ;;  %v1588_v52 = vsub.f32 0.5, %v52_v49  ;;  %v1589_v53 = vsub.f32 0.5, %v53_v50  ;;  %v54_v54 = vld [vmem:[#allocation2 + $0xd8] sm:$0xff]  ;;  %v55_v55 = vld [vmem:[#allocation2 + $0xe0] sm:$0xff] }
  0x22   :  { %v56_v56 = vld [vmem:[#allocation2 + $0xe8] sm:$0xff]  ;;  %2096 = vst [vmem:[#allocation6 + $0xa8] sm:$0xff] %v1584_v45  ;;  %2097 = vst [vmem:[#allocation6 + $0xb0] sm:$0xff] %v1585_v46  ;;  %v1590_v57 = vsub.f32 0.5, %v54_v54  ;;  %v1591_v58 = vsub.f32 0.5, %v55_v55  ;;  %v57_v60 = vld [vmem:[#allocation2 + $0xf0] sm:$0xff] }
  0x23   :  { %2098 = vst [vmem:[#allocation6 + $0xb8] sm:$0xff] %v1586_v47  ;;  %v1592_v59 = vsub.f32 0.5, %v56_v56  ;;  %v58_v61 = vld [vmem:[#allocation2 + $0xf8] sm:$0xff]  ;;  %v59_v62 = vld [vmem:[#allocation2 + $0x100] sm:$0xff]  ;;  %2099 = vst [vmem:[#allocation6 + $0xc0] sm:$0xff] %v1587_v51  ;;  %v1593_v63 = vsub.f32 0.5, %v57_v60 }
  0x24   :  { %2100 = vst [vmem:[#allocation6 + $0xc8] sm:$0xff] %v1588_v52  ;;  %2101 = vst [vmem:[#allocation6 + $0xd0] sm:$0xff] %v1589_v53  ;;  %v1594_v0 = vsub.f32 0.5, %v58_v61  ;;  %v1595_v1 = vsub.f32 0.5, %v59_v62  ;;  %v60_v2 = vld [vmem:[#allocation2 + $0x108] sm:$0xff]  ;;  %v61_v3 = vld [vmem:[#allocation2 + $0x110] sm:$0xff] }
  0x25   :  { %v62_v4 = vld [vmem:[#allocation2 + $0x118] sm:$0xff]  ;;  %2102 = vst [vmem:[#allocation6 + $0xd8] sm:$0xff] %v1590_v57  ;;  %2103 = vst [vmem:[#allocation6 + $0xe0] sm:$0xff] %v1591_v58  ;;  %v1596_v5 = vsub.f32 0.5, %v60_v2  ;;  %v1597_v6 = vsub.f32 0.5, %v61_v3  ;;  %v63_v8 = vld [vmem:[#allocation2 + $0x120] sm:$0xff] }
  0x26   :  { %2104 = vst [vmem:[#allocation6 + $0xe8] sm:$0xff] %v1592_v59  ;;  %v1598_v7 = vsub.f32 0.5, %v62_v4  ;;  %v64_v9 = vld [vmem:[#allocation2 + $0x128] sm:$0xff]  ;;  %v65_v10 = vld [vmem:[#allocation2 + $0x130] sm:$0xff]  ;;  %2105 = vst [vmem:[#allocation6 + $0xf0] sm:$0xff] %v1593_v63  ;;  %v1599_v11 = vsub.f32 0.5, %v63_v8 }
  0x27   :  { %2106 = vst [vmem:[#allocation6 + $0xf8] sm:$0xff] %v1594_v0  ;;  %2107 = vst [vmem:[#allocation6 + $0x100] sm:$0xff] %v1595_v1  ;;  %v1600_v12 = vsub.f32 0.5, %v64_v9  ;;  %v1601_v13 = vsub.f32 0.5, %v65_v10  ;;  %v66_v14 = vld [vmem:[#allocation2 + $0x138] sm:$0xff]  ;;  %v67_v15 = vld [vmem:[#allocation2 + $0x140] sm:$0xff] }
  0x28   :  { %v68_v16 = vld [vmem:[#allocation2 + $0x148] sm:$0xff]  ;;  %2108 = vst [vmem:[#allocation6 + $0x108] sm:$0xff] %v1596_v5  ;;  %2109 = vst [vmem:[#allocation6 + $0x110] sm:$0xff] %v1597_v6  ;;  %v1602_v17 = vsub.f32 0.5, %v66_v14  ;;  %v1603_v18 = vsub.f32 0.5, %v67_v15  ;;  %v69_v20 = vld [vmem:[#allocation2 + $0x150] sm:$0xff] }
  0x29   :  { %2110 = vst [vmem:[#allocation6 + $0x118] sm:$0xff] %v1598_v7  ;;  %v1604_v19 = vsub.f32 0.5, %v68_v16  ;;  %v70_v21 = vld [vmem:[#allocation2 + $0x158] sm:$0xff]  ;;  %v71_v22 = vld [vmem:[#allocation2 + $0x160] sm:$0xff]  ;;  %2111 = vst [vmem:[#allocation6 + $0x120] sm:$0xff] %v1599_v11  ;;  %v1605_v23 = vsub.f32 0.5, %v69_v20 }
  0x2a   :  { %2112 = vst [vmem:[#allocation6 + $0x128] sm:$0xff] %v1600_v12  ;;  %2113 = vst [vmem:[#allocation6 + $0x130] sm:$0xff] %v1601_v13  ;;  %v1606_v24 = vsub.f32 0.5, %v70_v21  ;;  %v1607_v25 = vsub.f32 0.5, %v71_v22  ;;  %v72_v26 = vld [vmem:[#allocation2 + $0x168] sm:$0xff]  ;;  %v73_v27 = vld [vmem:[#allocation2 + $0x170] sm:$0xff] }
  0x2b   :  { %v74_v28 = vld [vmem:[#allocation2 + $0x178] sm:$0xff]  ;;  %2114 = vst [vmem:[#allocation6 + $0x138] sm:$0xff] %v1602_v17  ;;  %2115 = vst [vmem:[#allocation6 + $0x140] sm:$0xff] %v1603_v18  ;;  %v1608_v29 = vsub.f32 0.5, %v72_v26  ;;  %v1609_v30 = vsub.f32 0.5, %v73_v27  ;;  %v75_v32 = vld [vmem:[#allocation2 + $0x180] sm:$0xff] }
  0x2c   :  { %2116 = vst [vmem:[#allocation6 + $0x148] sm:$0xff] %v1604_v19  ;;  %v1610_v31 = vsub.f32 0.5, %v74_v28  ;;  %v76_v33 = vld [vmem:[#allocation2 + $0x188] sm:$0xff]  ;;  %v77_v34 = vld [vmem:[#allocation2 + $0x190] sm:$0xff]  ;;  %2117 = vst [vmem:[#allocation6 + $0x150] sm:$0xff] %v1605_v23  ;;  %v1611_v35 = vsub.f32 0.5, %v75_v32 }
  0x2d   :  { %2118 = vst [vmem:[#allocation6 + $0x158] sm:$0xff] %v1606_v24  ;;  %2119 = vst [vmem:[#allocation6 + $0x160] sm:$0xff] %v1607_v25  ;;  %v1612_v36 = vsub.f32 0.5, %v76_v33  ;;  %v1613_v37 = vsub.f32 0.5, %v77_v34  ;;  %v78_v38 = vld [vmem:[#allocation2 + $0x198] sm:$0xff]  ;;  %v79_v39 = vld [vmem:[#allocation2 + $0x1a0] sm:$0xff] }
  0x2e   :  { %v80_v40 = vld [vmem:[#allocation2 + $0x1a8] sm:$0xff]  ;;  %2120 = vst [vmem:[#allocation6 + $0x168] sm:$0xff] %v1608_v29  ;;  %2121 = vst [vmem:[#allocation6 + $0x170] sm:$0xff] %v1609_v30  ;;  %v1614_v41 = vsub.f32 0.5, %v78_v38  ;;  %v1615_v42 = vsub.f32 0.5, %v79_v39  ;;  %v81_v44 = vld [vmem:[#allocation2 + $0x1b0] sm:$0xff] }
  0x2f   :  { %2122 = vst [vmem:[#allocation6 + $0x178] sm:$0xff] %v1610_v31  ;;  %v1616_v43 = vsub.f32 0.5, %v80_v40  ;;  %v82_v45 = vld [vmem:[#allocation2 + $0x1b8] sm:$0xff]  ;;  %v83_v46 = vld [vmem:[#allocation2 + $0x1c0] sm:$0xff]  ;;  %2123 = vst [vmem:[#allocation6 + $0x180] sm:$0xff] %v1611_v35  ;;  %v1617_v47 = vsub.f32 0.5, %v81_v44 }
  0x30   :  { %2124 = vst [vmem:[#allocation6 + $0x188] sm:$0xff] %v1612_v36  ;;  %2125 = vst [vmem:[#allocation6 + $0x190] sm:$0xff] %v1613_v37  ;;  %v1618_v48 = vsub.f32 0.5, %v82_v45  ;;  %v1619_v49 = vsub.f32 0.5, %v83_v46  ;;  %v84_v50 = vld [vmem:[#allocation2 + $0x1c8] sm:$0xff]  ;;  %v85_v51 = vld [vmem:[#allocation2 + $0x1d0] sm:$0xff] }
  0x31   :  { %v86_v52 = vld [vmem:[#allocation2 + $0x1d8] sm:$0xff]  ;;  %2126 = vst [vmem:[#allocation6 + $0x198] sm:$0xff] %v1614_v41  ;;  %2127 = vst [vmem:[#allocation6 + $0x1a0] sm:$0xff] %v1615_v42  ;;  %v1620_v53 = vsub.f32 0.5, %v84_v50  ;;  %v1621_v54 = vsub.f32 0.5, %v85_v51  ;;  %v87_v56 = vld [vmem:[#allocation2 + $0x1e0] sm:$0xff] }
  0x32   :  { %2128 = vst [vmem:[#allocation6 + $0x1a8] sm:$0xff] %v1616_v43  ;;  %v1622_v55 = vsub.f32 0.5, %v86_v52  ;;  %v88_v57 = vld [vmem:[#allocation2 + $0x1e8] sm:$0xff]  ;;  %v89_v58 = vld [vmem:[#allocation2 + $0x1f0] sm:$0xff]  ;;  %2129 = vst [vmem:[#allocation6 + $0x1b0] sm:$0xff] %v1617_v47  ;;  %v1623_v59 = vsub.f32 0.5, %v87_v56 }
  0x33   :  { %2130 = vst [vmem:[#allocation6 + $0x1b8] sm:$0xff] %v1618_v48  ;;  %2131 = vst [vmem:[#allocation6 + $0x1c0] sm:$0xff] %v1619_v49  ;;  %v1624_v60 = vsub.f32 0.5, %v88_v57  ;;  %v1625_v61 = vsub.f32 0.5, %v89_v58  ;;  %v90_v62 = vld [vmem:[#allocation2 + $0x1f8] sm:$0xff]  ;;  %v91_v63 = vld [vmem:[#allocation2 + $0x200] sm:$0xff] }
  0x34   :  { %v92_v0 = vld [vmem:[#allocation2 + $0x208] sm:$0xff]  ;;  %2132 = vst [vmem:[#allocation6 + $0x1c8] sm:$0xff] %v1620_v53  ;;  %2133 = vst [vmem:[#allocation6 + $0x1d0] sm:$0xff] %v1621_v54  ;;  %v1626_v1 = vsub.f32 0.5, %v90_v62  ;;  %v1627_v2 = vsub.f32 0.5, %v91_v63  ;;  %v93_v4 = vld [vmem:[#allocation2 + $0x210] sm:$0xff] }
  0x35   :  { %2134 = vst [vmem:[#allocation6 + $0x1d8] sm:$0xff] %v1622_v55  ;;  %v1628_v3 = vsub.f32 0.5, %v92_v0  ;;  %v94_v5 = vld [vmem:[#allocation2 + $0x218] sm:$0xff]  ;;  %v95_v6 = vld [vmem:[#allocation2 + $0x220] sm:$0xff]  ;;  %2135 = vst [vmem:[#allocation6 + $0x1e0] sm:$0xff] %v1623_v59  ;;  %v1629_v7 = vsub.f32 0.5, %v93_v4 }
  0x36   :  { %2136 = vst [vmem:[#allocation6 + $0x1e8] sm:$0xff] %v1624_v60  ;;  %2137 = vst [vmem:[#allocation6 + $0x1f0] sm:$0xff] %v1625_v61  ;;  %v1630_v8 = vsub.f32 0.5, %v94_v5  ;;  %v1631_v9 = vsub.f32 0.5, %v95_v6  ;;  %v96_v10 = vld [vmem:[#allocation2 + $0x228] sm:$0xff]  ;;  %v97_v11 = vld [vmem:[#allocation2 + $0x230] sm:$0xff] }
  0x37   :  { %v98_v12 = vld [vmem:[#allocation2 + $0x238] sm:$0xff]  ;;  %2138 = vst [vmem:[#allocation6 + $0x1f8] sm:$0xff] %v1626_v1  ;;  %2139 = vst [vmem:[#allocation6 + $0x200] sm:$0xff] %v1627_v2  ;;  %v1632_v13 = vsub.f32 0.5, %v96_v10  ;;  %v1633_v14 = vsub.f32 0.5, %v97_v11  ;;  %v99_v16 = vld [vmem:[#allocation2 + $0x240] sm:$0xff] }
  0x38   :  { %2140 = vst [vmem:[#allocation6 + $0x208] sm:$0xff] %v1628_v3  ;;  %v1634_v15 = vsub.f32 0.5, %v98_v12  ;;  %v100_v17 = vld [vmem:[#allocation2 + $0x248] sm:$0xff]  ;;  %v101_v18 = vld [vmem:[#allocation2 + $0x250] sm:$0xff]  ;;  %2141 = vst [vmem:[#allocation6 + $0x210] sm:$0xff] %v1629_v7  ;;  %v1635_v19 = vsub.f32 0.5, %v99_v16 }
  0x39   :  { %2142 = vst [vmem:[#allocation6 + $0x218] sm:$0xff] %v1630_v8  ;;  %2143 = vst [vmem:[#allocation6 + $0x220] sm:$0xff] %v1631_v9  ;;  %v1636_v20 = vsub.f32 0.5, %v100_v17  ;;  %v1637_v21 = vsub.f32 0.5, %v101_v18  ;;  %v102_v22 = vld [vmem:[#allocation2 + $0x258] sm:$0xff]  ;;  %v103_v23 = vld [vmem:[#allocation2 + $0x260] sm:$0xff] }
  0x3a   :  { %v104_v24 = vld [vmem:[#allocation2 + $0x268] sm:$0xff]  ;;  %2144 = vst [vmem:[#allocation6 + $0x228] sm:$0xff] %v1632_v13  ;;  %2145 = vst [vmem:[#allocation6 + $0x230] sm:$0xff] %v1633_v14  ;;  %v1638_v25 = vsub.f32 0.5, %v102_v22  ;;  %v1639_v26 = vsub.f32 0.5, %v103_v23  ;;  %v105_v28 = vld [vmem:[#allocation2 + $0x270] sm:$0xff] }
  0x3b   :  { %2146 = vst [vmem:[#allocation6 + $0x238] sm:$0xff] %v1634_v15  ;;  %v1640_v27 = vsub.f32 0.5, %v104_v24  ;;  %v106_v29 = vld [vmem:[#allocation2 + $0x278] sm:$0xff]  ;;  %v107_v30 = vld [vmem:[#allocation2 + $0x280] sm:$0xff]  ;;  %2147 = vst [vmem:[#allocation6 + $0x240] sm:$0xff] %v1635_v19  ;;  %v1641_v31 = vsub.f32 0.5, %v105_v28 }
  0x3c   :  { %2148 = vst [vmem:[#allocation6 + $0x248] sm:$0xff] %v1636_v20  ;;  %2149 = vst [vmem:[#allocation6 + $0x250] sm:$0xff] %v1637_v21  ;;  %v1642_v32 = vsub.f32 0.5, %v106_v29  ;;  %v1643_v33 = vsub.f32 0.5, %v107_v30  ;;  %v108_v34 = vld [vmem:[#allocation2 + $0x288] sm:$0xff]  ;;  %v109_v35 = vld [vmem:[#allocation2 + $0x290] sm:$0xff] }
  0x3d   :  { %v110_v36 = vld [vmem:[#allocation2 + $0x298] sm:$0xff]  ;;  %2150 = vst [vmem:[#allocation6 + $0x258] sm:$0xff] %v1638_v25  ;;  %2151 = vst [vmem:[#allocation6 + $0x260] sm:$0xff] %v1639_v26  ;;  %v1644_v37 = vsub.f32 0.5, %v108_v34  ;;  %v1645_v38 = vsub.f32 0.5, %v109_v35  ;;  %v111_v40 = vld [vmem:[#allocation2 + $0x2a0] sm:$0xff] }
  0x3e   :  { %2152 = vst [vmem:[#allocation6 + $0x268] sm:$0xff] %v1640_v27  ;;  %v1646_v39 = vsub.f32 0.5, %v110_v36  ;;  %v112_v41 = vld [vmem:[#allocation2 + $0x2a8] sm:$0xff]  ;;  %v113_v42 = vld [vmem:[#allocation2 + $0x2b0] sm:$0xff]  ;;  %2153 = vst [vmem:[#allocation6 + $0x270] sm:$0xff] %v1641_v31  ;;  %v1647_v43 = vsub.f32 0.5, %v111_v40 }
  0x3f   :  { %2154 = vst [vmem:[#allocation6 + $0x278] sm:$0xff] %v1642_v32  ;;  %2155 = vst [vmem:[#allocation6 + $0x280] sm:$0xff] %v1643_v33  ;;  %v1648_v44 = vsub.f32 0.5, %v112_v41  ;;  %v1649_v45 = vsub.f32 0.5, %v113_v42  ;;  %v114_v46 = vld [vmem:[#allocation2 + $0x2b8] sm:$0xff]  ;;  %v115_v47 = vld [vmem:[#allocation2 + $0x2c0] sm:$0xff] }
  0x40   :  { %v116_v48 = vld [vmem:[#allocation2 + $0x2c8] sm:$0xff]  ;;  %2156 = vst [vmem:[#allocation6 + $0x288] sm:$0xff] %v1644_v37  ;;  %2157 = vst [vmem:[#allocation6 + $0x290] sm:$0xff] %v1645_v38  ;;  %v1650_v49 = vsub.f32 0.5, %v114_v46  ;;  %v1651_v50 = vsub.f32 0.5, %v115_v47  ;;  %v117_v52 = vld [vmem:[#allocation2 + $0x2d0] sm:$0xff] }
  0x41   :  { %2158 = vst [vmem:[#allocation6 + $0x298] sm:$0xff] %v1646_v39  ;;  %v1652_v51 = vsub.f32 0.5, %v116_v48  ;;  %v118_v53 = vld [vmem:[#allocation2 + $0x2d8] sm:$0xff]  ;;  %v119_v54 = vld [vmem:[#allocation2 + $0x2e0] sm:$0xff]  ;;  %2159 = vst [vmem:[#allocation6 + $0x2a0] sm:$0xff] %v1647_v43  ;;  %v1653_v55 = vsub.f32 0.5, %v117_v52 }
  0x42   :  { %2160 = vst [vmem:[#allocation6 + $0x2a8] sm:$0xff] %v1648_v44  ;;  %2161 = vst [vmem:[#allocation6 + $0x2b0] sm:$0xff] %v1649_v45  ;;  %v1654_v56 = vsub.f32 0.5, %v118_v53  ;;  %v1655_v57 = vsub.f32 0.5, %v119_v54  ;;  %v120_v58 = vld [vmem:[#allocation2 + $0x2e8] sm:$0xff]  ;;  %v121_v59 = vld [vmem:[#allocation2 + $0x2f0] sm:$0xff] }
  0x43   :  { %v122_v60 = vld [vmem:[#allocation2 + $0x2f8] sm:$0xff]  ;;  %2162 = vst [vmem:[#allocation6 + $0x2b8] sm:$0xff] %v1650_v49  ;;  %2163 = vst [vmem:[#allocation6 + $0x2c0] sm:$0xff] %v1651_v50  ;;  %v1656_v61 = vsub.f32 0.5, %v120_v58  ;;  %v1657_v62 = vsub.f32 0.5, %v121_v59  ;;  %v123_v0 = vld [vmem:[#allocation2 + $0x300] sm:$0xff] }
  0x44   :  { %2164 = vst [vmem:[#allocation6 + $0x2c8] sm:$0xff] %v1652_v51  ;;  %v1658_v63 = vsub.f32 0.5, %v122_v60  ;;  %v124_v1 = vld [vmem:[#allocation2 + $0x308] sm:$0xff]  ;;  %v125_v2 = vld [vmem:[#allocation2 + $0x310] sm:$0xff]  ;;  %2165 = vst [vmem:[#allocation6 + $0x2d0] sm:$0xff] %v1653_v55  ;;  %v1659_v3 = vsub.f32 0.5, %v123_v0 }
  0x45   :  { %2166 = vst [vmem:[#allocation6 + $0x2d8] sm:$0xff] %v1654_v56  ;;  %2167 = vst [vmem:[#allocation6 + $0x2e0] sm:$0xff] %v1655_v57  ;;  %v1660_v4 = vsub.f32 0.5, %v124_v1  ;;  %v1661_v5 = vsub.f32 0.5, %v125_v2  ;;  %v126_v6 = vld [vmem:[#allocation2 + $0x318] sm:$0xff]  ;;  %v127_v7 = vld [vmem:[#allocation2 + $0x320] sm:$0xff] }
  0x46   :  { %v128_v8 = vld [vmem:[#allocation2 + $0x328] sm:$0xff]  ;;  %2168 = vst [vmem:[#allocation6 + $0x2e8] sm:$0xff] %v1656_v61  ;;  %2169 = vst [vmem:[#allocation6 + $0x2f0] sm:$0xff] %v1657_v62  ;;  %v1662_v9 = vsub.f32 0.5, %v126_v6  ;;  %v1663_v10 = vsub.f32 0.5, %v127_v7  ;;  %v129_v12 = vld [vmem:[#allocation2 + $0x330] sm:$0xff] }
  0x47   :  { %2170 = vst [vmem:[#allocation6 + $0x2f8] sm:$0xff] %v1658_v63  ;;  %v1664_v11 = vsub.f32 0.5, %v128_v8  ;;  %v130_v13 = vld [vmem:[#allocation2 + $0x338] sm:$0xff]  ;;  %v131_v14 = vld [vmem:[#allocation2 + $0x340] sm:$0xff]  ;;  %2171 = vst [vmem:[#allocation6 + $0x300] sm:$0xff] %v1659_v3  ;;  %v1665_v15 = vsub.f32 0.5, %v129_v12 }
  0x48   :  { %2172 = vst [vmem:[#allocation6 + $0x308] sm:$0xff] %v1660_v4  ;;  %2173 = vst [vmem:[#allocation6 + $0x310] sm:$0xff] %v1661_v5  ;;  %v1666_v16 = vsub.f32 0.5, %v130_v13  ;;  %v1667_v17 = vsub.f32 0.5, %v131_v14  ;;  %v132_v18 = vld [vmem:[#allocation2 + $0x348] sm:$0xff]  ;;  %v133_v19 = vld [vmem:[#allocation2 + $0x350] sm:$0xff] }
  0x49   :  { %v134_v20 = vld [vmem:[#allocation2 + $0x358] sm:$0xff]  ;;  %2174 = vst [vmem:[#allocation6 + $0x318] sm:$0xff] %v1662_v9  ;;  %2175 = vst [vmem:[#allocation6 + $0x320] sm:$0xff] %v1663_v10  ;;  %v1668_v21 = vsub.f32 0.5, %v132_v18  ;;  %v1669_v22 = vsub.f32 0.5, %v133_v19  ;;  %v135_v24 = vld [vmem:[#allocation2 + $0x360] sm:$0xff] }
  0x4a   :  { %2176 = vst [vmem:[#allocation6 + $0x328] sm:$0xff] %v1664_v11  ;;  %v1670_v23 = vsub.f32 0.5, %v134_v20  ;;  %v136_v25 = vld [vmem:[#allocation2 + $0x368] sm:$0xff]  ;;  %v137_v26 = vld [vmem:[#allocation2 + $0x370] sm:$0xff]  ;;  %2177 = vst [vmem:[#allocation6 + $0x330] sm:$0xff] %v1665_v15  ;;  %v1671_v27 = vsub.f32 0.5, %v135_v24 }
  0x4b   :  { %2178 = vst [vmem:[#allocation6 + $0x338] sm:$0xff] %v1666_v16  ;;  %2179 = vst [vmem:[#allocation6 + $0x340] sm:$0xff] %v1667_v17  ;;  %v1672_v28 = vsub.f32 0.5, %v136_v25  ;;  %v1673_v29 = vsub.f32 0.5, %v137_v26  ;;  %v138_v30 = vld [vmem:[#allocation2 + $0x378] sm:$0xff]  ;;  %v139_v31 = vld [vmem:[#allocation2 + $0x380] sm:$0xff] }
  0x4c   :  { %v140_v32 = vld [vmem:[#allocation2 + $0x388] sm:$0xff]  ;;  %2180 = vst [vmem:[#allocation6 + $0x348] sm:$0xff] %v1668_v21  ;;  %2181 = vst [vmem:[#allocation6 + $0x350] sm:$0xff] %v1669_v22  ;;  %v1674_v33 = vsub.f32 0.5, %v138_v30  ;;  %v1675_v34 = vsub.f32 0.5, %v139_v31  ;;  %v141_v36 = vld [vmem:[#allocation2 + $0x390] sm:$0xff] }
  0x4d   :  { %2182 = vst [vmem:[#allocation6 + $0x358] sm:$0xff] %v1670_v23  ;;  %v1676_v35 = vsub.f32 0.5, %v140_v32  ;;  %v142_v37 = vld [vmem:[#allocation2 + $0x398] sm:$0xff]  ;;  %v143_v38 = vld [vmem:[#allocation2 + $0x3a0] sm:$0xff]  ;;  %2183 = vst [vmem:[#allocation6 + $0x360] sm:$0xff] %v1671_v27  ;;  %v1677_v39 = vsub.f32 0.5, %v141_v36 }
  0x4e   :  { %2184 = vst [vmem:[#allocation6 + $0x368] sm:$0xff] %v1672_v28  ;;  %2185 = vst [vmem:[#allocation6 + $0x370] sm:$0xff] %v1673_v29  ;;  %v1678_v40 = vsub.f32 0.5, %v142_v37  ;;  %v1679_v41 = vsub.f32 0.5, %v143_v38  ;;  %v144_v42 = vld [vmem:[#allocation2 + $0x3a8] sm:$0xff]  ;;  %v145_v43 = vld [vmem:[#allocation2 + $0x3b0] sm:$0xff] }
  0x4f   :  { %v146_v44 = vld [vmem:[#allocation2 + $0x3b8] sm:$0xff]  ;;  %2186 = vst [vmem:[#allocation6 + $0x378] sm:$0xff] %v1674_v33  ;;  %2187 = vst [vmem:[#allocation6 + $0x380] sm:$0xff] %v1675_v34  ;;  %v1680_v45 = vsub.f32 0.5, %v144_v42  ;;  %v1681_v46 = vsub.f32 0.5, %v145_v43  ;;  %v147_v48 = vld [vmem:[#allocation2 + $0x3c0] sm:$0xff] }
  0x50   :  { %2188 = vst [vmem:[#allocation6 + $0x388] sm:$0xff] %v1676_v35  ;;  %v1682_v47 = vsub.f32 0.5, %v146_v44  ;;  %v148_v49 = vld [vmem:[#allocation2 + $0x3c8] sm:$0xff]  ;;  %v149_v50 = vld [vmem:[#allocation2 + $0x3d0] sm:$0xff]  ;;  %2189 = vst [vmem:[#allocation6 + $0x390] sm:$0xff] %v1677_v39  ;;  %v1683_v51 = vsub.f32 0.5, %v147_v48 }
  0x51   :  { %2190 = vst [vmem:[#allocation6 + $0x398] sm:$0xff] %v1678_v40  ;;  %2191 = vst [vmem:[#allocation6 + $0x3a0] sm:$0xff] %v1679_v41  ;;  %v1684_v52 = vsub.f32 0.5, %v148_v49  ;;  %v1685_v53 = vsub.f32 0.5, %v149_v50  ;;  %v150_v54 = vld [vmem:[#allocation2 + $0x3d8] sm:$0xff]  ;;  %v151_v55 = vld [vmem:[#allocation2 + $0x3e0] sm:$0xff] }
  0x52   :  { %v152_v56 = vld [vmem:[#allocation2 + $0x3e8] sm:$0xff]  ;;  %2192 = vst [vmem:[#allocation6 + $0x3a8] sm:$0xff] %v1680_v45  ;;  %2193 = vst [vmem:[#allocation6 + $0x3b0] sm:$0xff] %v1681_v46  ;;  %v1686_v57 = vsub.f32 0.5, %v150_v54  ;;  %v1687_v58 = vsub.f32 0.5, %v151_v55  ;;  %v153_v60 = vld [vmem:[#allocation2 + $0x3f0] sm:$0xff] }
  0x53   :  { %2194 = vst [vmem:[#allocation6 + $0x3b8] sm:$0xff] %v1682_v47  ;;  %v1688_v59 = vsub.f32 0.5, %v152_v56  ;;  %v154_v61 = vld [vmem:[#allocation2 + $0x3f8] sm:$0xff]  ;;  %v155_v62 = vld [vmem:[#allocation2 + $0x400] sm:$0xff]  ;;  %2195 = vst [vmem:[#allocation6 + $0x3c0] sm:$0xff] %v1683_v51  ;;  %v1689_v63 = vsub.f32 0.5, %v153_v60 }
  0x54   :  { %2196 = vst [vmem:[#allocation6 + $0x3c8] sm:$0xff] %v1684_v52  ;;  %2197 = vst [vmem:[#allocation6 + $0x3d0] sm:$0xff] %v1685_v53  ;;  %v1690_v0 = vsub.f32 0.5, %v154_v61  ;;  %v1691_v1 = vsub.f32 0.5, %v155_v62  ;;  %v156_v2 = vld [vmem:[#allocation2 + $0x408] sm:$0xff]  ;;  %v157_v3 = vld [vmem:[#allocation2 + $0x410] sm:$0xff] }
  0x55   :  { %v158_v4 = vld [vmem:[#allocation2 + $0x418] sm:$0xff]  ;;  %2198 = vst [vmem:[#allocation6 + $0x3d8] sm:$0xff] %v1686_v57  ;;  %2199 = vst [vmem:[#allocation6 + $0x3e0] sm:$0xff] %v1687_v58  ;;  %v1692_v5 = vsub.f32 0.5, %v156_v2  ;;  %v1693_v6 = vsub.f32 0.5, %v157_v3  ;;  %v159_v8 = vld [vmem:[#allocation2 + $0x420] sm:$0xff] }
  0x56   :  { %2200 = vst [vmem:[#allocation6 + $0x3e8] sm:$0xff] %v1688_v59  ;;  %v1694_v7 = vsub.f32 0.5, %v158_v4  ;;  %v160_v9 = vld [vmem:[#allocation2 + $0x428] sm:$0xff]  ;;  %v161_v10 = vld [vmem:[#allocation2 + $0x430] sm:$0xff]  ;;  %2201 = vst [vmem:[#allocation6 + $0x3f0] sm:$0xff] %v1689_v63  ;;  %v1695_v11 = vsub.f32 0.5, %v159_v8 }
  0x57   :  { %2202 = vst [vmem:[#allocation6 + $0x3f8] sm:$0xff] %v1690_v0  ;;  %2203 = vst [vmem:[#allocation6 + $0x400] sm:$0xff] %v1691_v1  ;;  %v1696_v12 = vsub.f32 0.5, %v160_v9  ;;  %v1697_v13 = vsub.f32 0.5, %v161_v10  ;;  %v162_v14 = vld [vmem:[#allocation2 + $0x438] sm:$0xff]  ;;  %v163_v15 = vld [vmem:[#allocation2 + $0x440] sm:$0xff] }
  0x58   :  { %v164_v16 = vld [vmem:[#allocation2 + $0x448] sm:$0xff]  ;;  %2204 = vst [vmem:[#allocation6 + $0x408] sm:$0xff] %v1692_v5  ;;  %2205 = vst [vmem:[#allocation6 + $0x410] sm:$0xff] %v1693_v6  ;;  %v1698_v17 = vsub.f32 0.5, %v162_v14  ;;  %v1699_v18 = vsub.f32 0.5, %v163_v15  ;;  %v165_v20 = vld [vmem:[#allocation2 + $0x450] sm:$0xff] }
  0x59   :  { %2206 = vst [vmem:[#allocation6 + $0x418] sm:$0xff] %v1694_v7  ;;  %v1700_v19 = vsub.f32 0.5, %v164_v16  ;;  %v166_v21 = vld [vmem:[#allocation2 + $0x458] sm:$0xff]  ;;  %v167_v22 = vld [vmem:[#allocation2 + $0x460] sm:$0xff]  ;;  %2207 = vst [vmem:[#allocation6 + $0x420] sm:$0xff] %v1695_v11  ;;  %v1701_v23 = vsub.f32 0.5, %v165_v20 }
  0x5a   :  { %2208 = vst [vmem:[#allocation6 + $0x428] sm:$0xff] %v1696_v12  ;;  %2209 = vst [vmem:[#allocation6 + $0x430] sm:$0xff] %v1697_v13  ;;  %v1702_v24 = vsub.f32 0.5, %v166_v21  ;;  %v1703_v25 = vsub.f32 0.5, %v167_v22  ;;  %v168_v26 = vld [vmem:[#allocation2 + $0x468] sm:$0xff]  ;;  %v169_v27 = vld [vmem:[#allocation2 + $0x470] sm:$0xff] }
  0x5b   :  { %v170_v28 = vld [vmem:[#allocation2 + $0x478] sm:$0xff]  ;;  %2210 = vst [vmem:[#allocation6 + $0x438] sm:$0xff] %v1698_v17  ;;  %2211 = vst [vmem:[#allocation6 + $0x440] sm:$0xff] %v1699_v18  ;;  %v1704_v29 = vsub.f32 0.5, %v168_v26  ;;  %v1705_v30 = vsub.f32 0.5, %v169_v27  ;;  %v171_v32 = vld [vmem:[#allocation2 + $0x480] sm:$0xff] }
  0x5c   :  { %2212 = vst [vmem:[#allocation6 + $0x448] sm:$0xff] %v1700_v19  ;;  %v1706_v31 = vsub.f32 0.5, %v170_v28  ;;  %v172_v33 = vld [vmem:[#allocation2 + $0x488] sm:$0xff]  ;;  %v173_v34 = vld [vmem:[#allocation2 + $0x490] sm:$0xff]  ;;  %2213 = vst [vmem:[#allocation6 + $0x450] sm:$0xff] %v1701_v23  ;;  %v1707_v35 = vsub.f32 0.5, %v171_v32 }
  0x5d   :  { %2214 = vst [vmem:[#allocation6 + $0x458] sm:$0xff] %v1702_v24  ;;  %2215 = vst [vmem:[#allocation6 + $0x460] sm:$0xff] %v1703_v25  ;;  %v1708_v36 = vsub.f32 0.5, %v172_v33  ;;  %v1709_v37 = vsub.f32 0.5, %v173_v34  ;;  %v174_v38 = vld [vmem:[#allocation2 + $0x498] sm:$0xff]  ;;  %v175_v39 = vld [vmem:[#allocation2 + $0x4a0] sm:$0xff] }
  0x5e   :  { %v176_v40 = vld [vmem:[#allocation2 + $0x4a8] sm:$0xff]  ;;  %2216 = vst [vmem:[#allocation6 + $0x468] sm:$0xff] %v1704_v29  ;;  %2217 = vst [vmem:[#allocation6 + $0x470] sm:$0xff] %v1705_v30  ;;  %v1710_v41 = vsub.f32 0.5, %v174_v38  ;;  %v1711_v42 = vsub.f32 0.5, %v175_v39  ;;  %v177_v44 = vld [vmem:[#allocation2 + $0x4b0] sm:$0xff] }
  0x5f   :  { %2218 = vst [vmem:[#allocation6 + $0x478] sm:$0xff] %v1706_v31  ;;  %v1712_v43 = vsub.f32 0.5, %v176_v40  ;;  %v178_v45 = vld [vmem:[#allocation2 + $0x4b8] sm:$0xff]  ;;  %v179_v46 = vld [vmem:[#allocation2 + $0x4c0] sm:$0xff]  ;;  %2219 = vst [vmem:[#allocation6 + $0x480] sm:$0xff] %v1707_v35  ;;  %v1713_v47 = vsub.f32 0.5, %v177_v44 }
  0x60   :  { %2220 = vst [vmem:[#allocation6 + $0x488] sm:$0xff] %v1708_v36  ;;  %2221 = vst [vmem:[#allocation6 + $0x490] sm:$0xff] %v1709_v37  ;;  %v1714_v48 = vsub.f32 0.5, %v178_v45  ;;  %v1715_v49 = vsub.f32 0.5, %v179_v46  ;;  %v180_v50 = vld [vmem:[#allocation2 + $0x4c8] sm:$0xff]  ;;  %v181_v51 = vld [vmem:[#allocation2 + $0x4d0] sm:$0xff] }
  0x61   :  { %v182_v52 = vld [vmem:[#allocation2 + $0x4d8] sm:$0xff]  ;;  %2222 = vst [vmem:[#allocation6 + $0x498] sm:$0xff] %v1710_v41  ;;  %2223 = vst [vmem:[#allocation6 + $0x4a0] sm:$0xff] %v1711_v42  ;;  %v1716_v53 = vsub.f32 0.5, %v180_v50  ;;  %v1717_v54 = vsub.f32 0.5, %v181_v51  ;;  %v183_v56 = vld [vmem:[#allocation2 + $0x4e0] sm:$0xff] }
  0x62   :  { %2224 = vst [vmem:[#allocation6 + $0x4a8] sm:$0xff] %v1712_v43  ;;  %v1718_v55 = vsub.f32 0.5, %v182_v52  ;;  %v184_v57 = vld [vmem:[#allocation2 + $0x4e8] sm:$0xff]  ;;  %v185_v58 = vld [vmem:[#allocation2 + $0x4f0] sm:$0xff]  ;;  %2225 = vst [vmem:[#allocation6 + $0x4b0] sm:$0xff] %v1713_v47  ;;  %v1719_v59 = vsub.f32 0.5, %v183_v56 }
  0x63   :  { %2226 = vst [vmem:[#allocation6 + $0x4b8] sm:$0xff] %v1714_v48  ;;  %2227 = vst [vmem:[#allocation6 + $0x4c0] sm:$0xff] %v1715_v49  ;;  %v1720_v60 = vsub.f32 0.5, %v184_v57  ;;  %v1721_v61 = vsub.f32 0.5, %v185_v58  ;;  %v186_v62 = vld [vmem:[#allocation2 + $0x4f8] sm:$0xff]  ;;  %v187_v63 = vld [vmem:[#allocation2 + $0x500] sm:$0xff] }
  0x64   :  { %v188_v0 = vld [vmem:[#allocation2 + $0x508] sm:$0xff]  ;;  %2228 = vst [vmem:[#allocation6 + $0x4c8] sm:$0xff] %v1716_v53  ;;  %2229 = vst [vmem:[#allocation6 + $0x4d0] sm:$0xff] %v1717_v54  ;;  %v1722_v1 = vsub.f32 0.5, %v186_v62  ;;  %v1723_v2 = vsub.f32 0.5, %v187_v63  ;;  %v189_v4 = vld [vmem:[#allocation2 + $0x510] sm:$0xff] }
  0x65   :  { %2230 = vst [vmem:[#allocation6 + $0x4d8] sm:$0xff] %v1718_v55  ;;  %v1724_v3 = vsub.f32 0.5, %v188_v0  ;;  %v190_v5 = vld [vmem:[#allocation2 + $0x518] sm:$0xff]  ;;  %v191_v6 = vld [vmem:[#allocation2 + $0x520] sm:$0xff]  ;;  %2231 = vst [vmem:[#allocation6 + $0x4e0] sm:$0xff] %v1719_v59  ;;  %v1725_v7 = vsub.f32 0.5, %v189_v4 }
  0x66   :  { %2232 = vst [vmem:[#allocation6 + $0x4e8] sm:$0xff] %v1720_v60  ;;  %2233 = vst [vmem:[#allocation6 + $0x4f0] sm:$0xff] %v1721_v61  ;;  %v1726_v8 = vsub.f32 0.5, %v190_v5  ;;  %v1727_v9 = vsub.f32 0.5, %v191_v6  ;;  %v192_v10 = vld [vmem:[#allocation2 + $0x528] sm:$0xff]  ;;  %v193_v11 = vld [vmem:[#allocation2 + $0x530] sm:$0xff] }
  0x67   :  { %v194_v12 = vld [vmem:[#allocation2 + $0x538] sm:$0xff]  ;;  %2234 = vst [vmem:[#allocation6 + $0x4f8] sm:$0xff] %v1722_v1  ;;  %2235 = vst [vmem:[#allocation6 + $0x500] sm:$0xff] %v1723_v2  ;;  %v1728_v13 = vsub.f32 0.5, %v192_v10  ;;  %v1729_v14 = vsub.f32 0.5, %v193_v11  ;;  %v195_v16 = vld [vmem:[#allocation2 + $0x540] sm:$0xff] }
  0x68   :  { %2236 = vst [vmem:[#allocation6 + $0x508] sm:$0xff] %v1724_v3  ;;  %v1730_v15 = vsub.f32 0.5, %v194_v12  ;;  %v196_v17 = vld [vmem:[#allocation2 + $0x548] sm:$0xff]  ;;  %v197_v18 = vld [vmem:[#allocation2 + $0x550] sm:$0xff]  ;;  %2237 = vst [vmem:[#allocation6 + $0x510] sm:$0xff] %v1725_v7  ;;  %v1731_v19 = vsub.f32 0.5, %v195_v16 }
  0x69   :  { %2238 = vst [vmem:[#allocation6 + $0x518] sm:$0xff] %v1726_v8  ;;  %2239 = vst [vmem:[#allocation6 + $0x520] sm:$0xff] %v1727_v9  ;;  %v1732_v20 = vsub.f32 0.5, %v196_v17  ;;  %v1733_v21 = vsub.f32 0.5, %v197_v18  ;;  %v198_v22 = vld [vmem:[#allocation2 + $0x558] sm:$0xff]  ;;  %v199_v23 = vld [vmem:[#allocation2 + $0x560] sm:$0xff] }
  0x6a   :  { %v200_v24 = vld [vmem:[#allocation2 + $0x568] sm:$0xff]  ;;  %2240 = vst [vmem:[#allocation6 + $0x528] sm:$0xff] %v1728_v13  ;;  %2241 = vst [vmem:[#allocation6 + $0x530] sm:$0xff] %v1729_v14  ;;  %v1734_v25 = vsub.f32 0.5, %v198_v22  ;;  %v1735_v26 = vsub.f32 0.5, %v199_v23  ;;  %v201_v28 = vld [vmem:[#allocation2 + $0x570] sm:$0xff] }
  0x6b   :  { %2242 = vst [vmem:[#allocation6 + $0x538] sm:$0xff] %v1730_v15  ;;  %v1736_v27 = vsub.f32 0.5, %v200_v24  ;;  %v202_v29 = vld [vmem:[#allocation2 + $0x578] sm:$0xff]  ;;  %v203_v30 = vld [vmem:[#allocation2 + $0x580] sm:$0xff]  ;;  %2243 = vst [vmem:[#allocation6 + $0x540] sm:$0xff] %v1731_v19  ;;  %v1737_v31 = vsub.f32 0.5, %v201_v28 }
  0x6c   :  { %2244 = vst [vmem:[#allocation6 + $0x548] sm:$0xff] %v1732_v20  ;;  %2245 = vst [vmem:[#allocation6 + $0x550] sm:$0xff] %v1733_v21  ;;  %v1738_v32 = vsub.f32 0.5, %v202_v29  ;;  %v1739_v33 = vsub.f32 0.5, %v203_v30  ;;  %v204_v34 = vld [vmem:[#allocation2 + $0x588] sm:$0xff]  ;;  %v205_v35 = vld [vmem:[#allocation2 + $0x590] sm:$0xff] }
  0x6d   :  { %v206_v36 = vld [vmem:[#allocation2 + $0x598] sm:$0xff]  ;;  %2246 = vst [vmem:[#allocation6 + $0x558] sm:$0xff] %v1734_v25  ;;  %2247 = vst [vmem:[#allocation6 + $0x560] sm:$0xff] %v1735_v26  ;;  %v1740_v37 = vsub.f32 0.5, %v204_v34  ;;  %v1741_v38 = vsub.f32 0.5, %v205_v35  ;;  %v207_v40 = vld [vmem:[#allocation2 + $0x5a0] sm:$0xff] }
  0x6e   :  { %2248 = vst [vmem:[#allocation6 + $0x568] sm:$0xff] %v1736_v27  ;;  %v1742_v39 = vsub.f32 0.5, %v206_v36  ;;  %v208_v41 = vld [vmem:[#allocation2 + $0x5a8] sm:$0xff]  ;;  %v209_v42 = vld [vmem:[#allocation2 + $0x5b0] sm:$0xff]  ;;  %2249 = vst [vmem:[#allocation6 + $0x570] sm:$0xff] %v1737_v31  ;;  %v1743_v43 = vsub.f32 0.5, %v207_v40 }
  0x6f   :  { %2250 = vst [vmem:[#allocation6 + $0x578] sm:$0xff] %v1738_v32  ;;  %2251 = vst [vmem:[#allocation6 + $0x580] sm:$0xff] %v1739_v33  ;;  %v1744_v44 = vsub.f32 0.5, %v208_v41  ;;  %v1745_v45 = vsub.f32 0.5, %v209_v42  ;;  %v210_v46 = vld [vmem:[#allocation2 + $0x5b8] sm:$0xff]  ;;  %v211_v47 = vld [vmem:[#allocation2 + $0x5c0] sm:$0xff] }
  0x70   :  { %v212_v48 = vld [vmem:[#allocation2 + $0x5c8] sm:$0xff]  ;;  %2252 = vst [vmem:[#allocation6 + $0x588] sm:$0xff] %v1740_v37  ;;  %2253 = vst [vmem:[#allocation6 + $0x590] sm:$0xff] %v1741_v38  ;;  %v1746_v49 = vsub.f32 0.5, %v210_v46  ;;  %v1747_v50 = vsub.f32 0.5, %v211_v47  ;;  %v213_v52 = vld [vmem:[#allocation2 + $0x5d0] sm:$0xff] }
  0x71   :  { %2254 = vst [vmem:[#allocation6 + $0x598] sm:$0xff] %v1742_v39  ;;  %v1748_v51 = vsub.f32 0.5, %v212_v48  ;;  %v214_v53 = vld [vmem:[#allocation2 + $0x5d8] sm:$0xff]  ;;  %v215_v54 = vld [vmem:[#allocation2 + $0x5e0] sm:$0xff]  ;;  %2255 = vst [vmem:[#allocation6 + $0x5a0] sm:$0xff] %v1743_v43  ;;  %v1749_v55 = vsub.f32 0.5, %v213_v52 }
  0x72   :  { %2256 = vst [vmem:[#allocation6 + $0x5a8] sm:$0xff] %v1744_v44  ;;  %2257 = vst [vmem:[#allocation6 + $0x5b0] sm:$0xff] %v1745_v45  ;;  %v1750_v56 = vsub.f32 0.5, %v214_v53  ;;  %v1751_v57 = vsub.f32 0.5, %v215_v54  ;;  %v216_v58 = vld [vmem:[#allocation2 + $0x5e8] sm:$0xff]  ;;  %v217_v59 = vld [vmem:[#allocation2 + $0x5f0] sm:$0xff] }
  0x73   :  { %v218_v60 = vld [vmem:[#allocation2 + $0x5f8] sm:$0xff]  ;;  %2258 = vst [vmem:[#allocation6 + $0x5b8] sm:$0xff] %v1746_v49  ;;  %2259 = vst [vmem:[#allocation6 + $0x5c0] sm:$0xff] %v1747_v50  ;;  %v1752_v61 = vsub.f32 0.5, %v216_v58  ;;  %v1753_v62 = vsub.f32 0.5, %v217_v59  ;;  %v219_v0 = vld [vmem:[#allocation2 + $0x600] sm:$0xff] }
  0x74   :  { %2260 = vst [vmem:[#allocation6 + $0x5c8] sm:$0xff] %v1748_v51  ;;  %v1754_v63 = vsub.f32 0.5, %v218_v60  ;;  %v220_v1 = vld [vmem:[#allocation2 + $0x608] sm:$0xff]  ;;  %v221_v2 = vld [vmem:[#allocation2 + $0x610] sm:$0xff]  ;;  %2261 = vst [vmem:[#allocation6 + $0x5d0] sm:$0xff] %v1749_v55  ;;  %v1755_v3 = vsub.f32 0.5, %v219_v0 }
  0x75   :  { %2262 = vst [vmem:[#allocation6 + $0x5d8] sm:$0xff] %v1750_v56  ;;  %2263 = vst [vmem:[#allocation6 + $0x5e0] sm:$0xff] %v1751_v57  ;;  %v1756_v4 = vsub.f32 0.5, %v220_v1  ;;  %v1757_v5 = vsub.f32 0.5, %v221_v2  ;;  %v222_v6 = vld [vmem:[#allocation2 + $0x618] sm:$0xff]  ;;  %v223_v7 = vld [vmem:[#allocation2 + $0x620] sm:$0xff] }
  0x76   :  { %v224_v8 = vld [vmem:[#allocation2 + $0x628] sm:$0xff]  ;;  %2264 = vst [vmem:[#allocation6 + $0x5e8] sm:$0xff] %v1752_v61  ;;  %2265 = vst [vmem:[#allocation6 + $0x5f0] sm:$0xff] %v1753_v62  ;;  %v1758_v9 = vsub.f32 0.5, %v222_v6  ;;  %v1759_v10 = vsub.f32 0.5, %v223_v7  ;;  %v225_v12 = vld [vmem:[#allocation2 + $0x630] sm:$0xff] }
  0x77   :  { %2266 = vst [vmem:[#allocation6 + $0x5f8] sm:$0xff] %v1754_v63  ;;  %v1760_v11 = vsub.f32 0.5, %v224_v8  ;;  %v226_v13 = vld [vmem:[#allocation2 + $0x638] sm:$0xff]  ;;  %v227_v14 = vld [vmem:[#allocation2 + $0x640] sm:$0xff]  ;;  %2267 = vst [vmem:[#allocation6 + $0x600] sm:$0xff] %v1755_v3  ;;  %v1761_v15 = vsub.f32 0.5, %v225_v12 }
  0x78   :  { %2268 = vst [vmem:[#allocation6 + $0x608] sm:$0xff] %v1756_v4  ;;  %2269 = vst [vmem:[#allocation6 + $0x610] sm:$0xff] %v1757_v5  ;;  %v1762_v16 = vsub.f32 0.5, %v226_v13  ;;  %v1763_v17 = vsub.f32 0.5, %v227_v14  ;;  %v228_v18 = vld [vmem:[#allocation2 + $0x648] sm:$0xff]  ;;  %v229_v19 = vld [vmem:[#allocation2 + $0x650] sm:$0xff] }
  0x79   :  { %v230_v20 = vld [vmem:[#allocation2 + $0x658] sm:$0xff]  ;;  %2270 = vst [vmem:[#allocation6 + $0x618] sm:$0xff] %v1758_v9  ;;  %2271 = vst [vmem:[#allocation6 + $0x620] sm:$0xff] %v1759_v10  ;;  %v1764_v21 = vsub.f32 0.5, %v228_v18  ;;  %v1765_v22 = vsub.f32 0.5, %v229_v19  ;;  %v231_v24 = vld [vmem:[#allocation2 + $0x660] sm:$0xff] }
  0x7a   :  { %2272 = vst [vmem:[#allocation6 + $0x628] sm:$0xff] %v1760_v11  ;;  %v1766_v23 = vsub.f32 0.5, %v230_v20  ;;  %v232_v25 = vld [vmem:[#allocation2 + $0x668] sm:$0xff]  ;;  %v233_v26 = vld [vmem:[#allocation2 + $0x670] sm:$0xff]  ;;  %2273 = vst [vmem:[#allocation6 + $0x630] sm:$0xff] %v1761_v15  ;;  %v1767_v27 = vsub.f32 0.5, %v231_v24 }
  0x7b   :  { %2274 = vst [vmem:[#allocation6 + $0x638] sm:$0xff] %v1762_v16  ;;  %2275 = vst [vmem:[#allocation6 + $0x640] sm:$0xff] %v1763_v17  ;;  %v1768_v28 = vsub.f32 0.5, %v232_v25  ;;  %v1769_v29 = vsub.f32 0.5, %v233_v26  ;;  %v234_v30 = vld [vmem:[#allocation2 + $0x678] sm:$0xff]  ;;  %v235_v31 = vld [vmem:[#allocation2 + $0x680] sm:$0xff] }
  0x7c   :  { %v236_v32 = vld [vmem:[#allocation2 + $0x688] sm:$0xff]  ;;  %2276 = vst [vmem:[#allocation6 + $0x648] sm:$0xff] %v1764_v21  ;;  %2277 = vst [vmem:[#allocation6 + $0x650] sm:$0xff] %v1765_v22  ;;  %v1770_v33 = vsub.f32 0.5, %v234_v30  ;;  %v1771_v34 = vsub.f32 0.5, %v235_v31  ;;  %v237_v36 = vld [vmem:[#allocation2 + $0x690] sm:$0xff] }
  0x7d   :  { %2278 = vst [vmem:[#allocation6 + $0x658] sm:$0xff] %v1766_v23  ;;  %v1772_v35 = vsub.f32 0.5, %v236_v32  ;;  %v238_v37 = vld [vmem:[#allocation2 + $0x698] sm:$0xff]  ;;  %v239_v38 = vld [vmem:[#allocation2 + $0x6a0] sm:$0xff]  ;;  %2279 = vst [vmem:[#allocation6 + $0x660] sm:$0xff] %v1767_v27  ;;  %v1773_v39 = vsub.f32 0.5, %v237_v36 }
  0x7e   :  { %2280 = vst [vmem:[#allocation6 + $0x668] sm:$0xff] %v1768_v28  ;;  %2281 = vst [vmem:[#allocation6 + $0x670] sm:$0xff] %v1769_v29  ;;  %v1774_v40 = vsub.f32 0.5, %v238_v37  ;;  %v1775_v41 = vsub.f32 0.5, %v239_v38  ;;  %v240_v42 = vld [vmem:[#allocation2 + $0x6a8] sm:$0xff]  ;;  %v241_v43 = vld [vmem:[#allocation2 + $0x6b0] sm:$0xff] }
  0x7f   :  { %v242_v44 = vld [vmem:[#allocation2 + $0x6b8] sm:$0xff]  ;;  %2282 = vst [vmem:[#allocation6 + $0x678] sm:$0xff] %v1770_v33  ;;  %2283 = vst [vmem:[#allocation6 + $0x680] sm:$0xff] %v1771_v34  ;;  %v1776_v45 = vsub.f32 0.5, %v240_v42  ;;  %v1777_v46 = vsub.f32 0.5, %v241_v43  ;;  %v243_v48 = vld [vmem:[#allocation2 + $0x6c0] sm:$0xff] }
  0x80   :  { %2284 = vst [vmem:[#allocation6 + $0x688] sm:$0xff] %v1772_v35  ;;  %v1778_v47 = vsub.f32 0.5, %v242_v44  ;;  %v244_v49 = vld [vmem:[#allocation2 + $0x6c8] sm:$0xff]  ;;  %v245_v50 = vld [vmem:[#allocation2 + $0x6d0] sm:$0xff]  ;;  %2285 = vst [vmem:[#allocation6 + $0x690] sm:$0xff] %v1773_v39  ;;  %v1779_v51 = vsub.f32 0.5, %v243_v48 }
  0x81   :  { %2286 = vst [vmem:[#allocation6 + $0x698] sm:$0xff] %v1774_v40  ;;  %2287 = vst [vmem:[#allocation6 + $0x6a0] sm:$0xff] %v1775_v41  ;;  %v1780_v52 = vsub.f32 0.5, %v244_v49  ;;  %v1781_v53 = vsub.f32 0.5, %v245_v50  ;;  %v246_v54 = vld [vmem:[#allocation2 + $0x6d8] sm:$0xff]  ;;  %v247_v55 = vld [vmem:[#allocation2 + $0x6e0] sm:$0xff] }
  0x82   :  { %v248_v56 = vld [vmem:[#allocation2 + $0x6e8] sm:$0xff]  ;;  %2288 = vst [vmem:[#allocation6 + $0x6a8] sm:$0xff] %v1776_v45  ;;  %2289 = vst [vmem:[#allocation6 + $0x6b0] sm:$0xff] %v1777_v46  ;;  %v1782_v57 = vsub.f32 0.5, %v246_v54  ;;  %v1783_v58 = vsub.f32 0.5, %v247_v55  ;;  %v249_v60 = vld [vmem:[#allocation2 + $0x6f0] sm:$0xff] }
  0x83   :  { %2290 = vst [vmem:[#allocation6 + $0x6b8] sm:$0xff] %v1778_v47  ;;  %v1784_v59 = vsub.f32 0.5, %v248_v56  ;;  %v250_v61 = vld [vmem:[#allocation2 + $0x6f8] sm:$0xff]  ;;  %v251_v62 = vld [vmem:[#allocation2 + $0x700] sm:$0xff]  ;;  %2291 = vst [vmem:[#allocation6 + $0x6c0] sm:$0xff] %v1779_v51  ;;  %v1785_v63 = vsub.f32 0.5, %v249_v60 }
  0x84   :  { %2292 = vst [vmem:[#allocation6 + $0x6c8] sm:$0xff] %v1780_v52  ;;  %2293 = vst [vmem:[#allocation6 + $0x6d0] sm:$0xff] %v1781_v53  ;;  %v1786_v0 = vsub.f32 0.5, %v250_v61  ;;  %v1787_v1 = vsub.f32 0.5, %v251_v62  ;;  %v252_v2 = vld [vmem:[#allocation2 + $0x708] sm:$0xff]  ;;  %v253_v3 = vld [vmem:[#allocation2 + $0x710] sm:$0xff] }
  0x85   :  { %v254_v4 = vld [vmem:[#allocation2 + $0x718] sm:$0xff]  ;;  %2294 = vst [vmem:[#allocation6 + $0x6d8] sm:$0xff] %v1782_v57  ;;  %2295 = vst [vmem:[#allocation6 + $0x6e0] sm:$0xff] %v1783_v58  ;;  %v1788_v5 = vsub.f32 0.5, %v252_v2  ;;  %v1789_v6 = vsub.f32 0.5, %v253_v3  ;;  %v255_v8 = vld [vmem:[#allocation2 + $0x720] sm:$0xff] }
  0x86   :  { %2296 = vst [vmem:[#allocation6 + $0x6e8] sm:$0xff] %v1784_v59  ;;  %v1790_v7 = vsub.f32 0.5, %v254_v4  ;;  %v256_v9 = vld [vmem:[#allocation2 + $0x728] sm:$0xff]  ;;  %v257_v10 = vld [vmem:[#allocation2 + $0x730] sm:$0xff]  ;;  %2297 = vst [vmem:[#allocation6 + $0x6f0] sm:$0xff] %v1785_v63  ;;  %v1791_v11 = vsub.f32 0.5, %v255_v8 }
  0x87   :  { %2298 = vst [vmem:[#allocation6 + $0x6f8] sm:$0xff] %v1786_v0  ;;  %2299 = vst [vmem:[#allocation6 + $0x700] sm:$0xff] %v1787_v1  ;;  %v1792_v12 = vsub.f32 0.5, %v256_v9  ;;  %v1793_v13 = vsub.f32 0.5, %v257_v10  ;;  %v258_v14 = vld [vmem:[#allocation2 + $0x738] sm:$0xff]  ;;  %v259_v15 = vld [vmem:[#allocation2 + $0x740] sm:$0xff] }
  0x88   :  { %v260_v16 = vld [vmem:[#allocation2 + $0x748] sm:$0xff]  ;;  %2300 = vst [vmem:[#allocation6 + $0x708] sm:$0xff] %v1788_v5  ;;  %2301 = vst [vmem:[#allocation6 + $0x710] sm:$0xff] %v1789_v6  ;;  %v1794_v17 = vsub.f32 0.5, %v258_v14  ;;  %v1795_v18 = vsub.f32 0.5, %v259_v15  ;;  %v261_v20 = vld [vmem:[#allocation2 + $0x750] sm:$0xff] }
  0x89   :  { %2302 = vst [vmem:[#allocation6 + $0x718] sm:$0xff] %v1790_v7  ;;  %v1796_v19 = vsub.f32 0.5, %v260_v16  ;;  %v262_v21 = vld [vmem:[#allocation2 + $0x758] sm:$0xff]  ;;  %v263_v22 = vld [vmem:[#allocation2 + $0x760] sm:$0xff]  ;;  %2303 = vst [vmem:[#allocation6 + $0x720] sm:$0xff] %v1791_v11  ;;  %v1797_v23 = vsub.f32 0.5, %v261_v20 }
  0x8a   :  { %2304 = vst [vmem:[#allocation6 + $0x728] sm:$0xff] %v1792_v12  ;;  %2305 = vst [vmem:[#allocation6 + $0x730] sm:$0xff] %v1793_v13  ;;  %v1798_v24 = vsub.f32 0.5, %v262_v21  ;;  %v1799_v25 = vsub.f32 0.5, %v263_v22  ;;  %v264_v26 = vld [vmem:[#allocation2 + $0x768] sm:$0xff]  ;;  %v265_v27 = vld [vmem:[#allocation2 + $0x770] sm:$0xff] }
  0x8b   :  { %v266_v28 = vld [vmem:[#allocation2 + $0x778] sm:$0xff]  ;;  %2306 = vst [vmem:[#allocation6 + $0x738] sm:$0xff] %v1794_v17  ;;  %2307 = vst [vmem:[#allocation6 + $0x740] sm:$0xff] %v1795_v18  ;;  %v1800_v29 = vsub.f32 0.5, %v264_v26  ;;  %v1801_v30 = vsub.f32 0.5, %v265_v27  ;;  %v267_v32 = vld [vmem:[#allocation2 + $0x780] sm:$0xff] }
  0x8c   :  { %2308 = vst [vmem:[#allocation6 + $0x748] sm:$0xff] %v1796_v19  ;;  %v1802_v31 = vsub.f32 0.5, %v266_v28  ;;  %v268_v33 = vld [vmem:[#allocation2 + $0x788] sm:$0xff]  ;;  %v269_v34 = vld [vmem:[#allocation2 + $0x790] sm:$0xff]  ;;  %2309 = vst [vmem:[#allocation6 + $0x750] sm:$0xff] %v1797_v23  ;;  %v1803_v35 = vsub.f32 0.5, %v267_v32 }
  0x8d   :  { %2310 = vst [vmem:[#allocation6 + $0x758] sm:$0xff] %v1798_v24  ;;  %2311 = vst [vmem:[#allocation6 + $0x760] sm:$0xff] %v1799_v25  ;;  %v1804_v36 = vsub.f32 0.5, %v268_v33  ;;  %v1805_v37 = vsub.f32 0.5, %v269_v34  ;;  %v270_v38 = vld [vmem:[#allocation2 + $0x798] sm:$0xff]  ;;  %v271_v39 = vld [vmem:[#allocation2 + $0x7a0] sm:$0xff] }
  0x8e   :  { %v272_v40 = vld [vmem:[#allocation2 + $0x7a8] sm:$0xff]  ;;  %2312 = vst [vmem:[#allocation6 + $0x768] sm:$0xff] %v1800_v29  ;;  %2313 = vst [vmem:[#allocation6 + $0x770] sm:$0xff] %v1801_v30  ;;  %v1806_v41 = vsub.f32 0.5, %v270_v38  ;;  %v1807_v42 = vsub.f32 0.5, %v271_v39  ;;  %v273_v44 = vld [vmem:[#allocation2 + $0x7b0] sm:$0xff] }
  0x8f   :  { %2314 = vst [vmem:[#allocation6 + $0x778] sm:$0xff] %v1802_v31  ;;  %v1808_v43 = vsub.f32 0.5, %v272_v40  ;;  %v274_v45 = vld [vmem:[#allocation2 + $0x7b8] sm:$0xff]  ;;  %v275_v46 = vld [vmem:[#allocation2 + $0x7c0] sm:$0xff]  ;;  %2315 = vst [vmem:[#allocation6 + $0x780] sm:$0xff] %v1803_v35  ;;  %v1809_v47 = vsub.f32 0.5, %v273_v44 }
  0x90   :  { %2316 = vst [vmem:[#allocation6 + $0x788] sm:$0xff] %v1804_v36  ;;  %2317 = vst [vmem:[#allocation6 + $0x790] sm:$0xff] %v1805_v37  ;;  %v1810_v48 = vsub.f32 0.5, %v274_v45  ;;  %v1811_v49 = vsub.f32 0.5, %v275_v46  ;;  %v276_v50 = vld [vmem:[#allocation2 + $0x7c8] sm:$0xff]  ;;  %v277_v51 = vld [vmem:[#allocation2 + $0x7d0] sm:$0xff] }
  0x91   :  { %v278_v52 = vld [vmem:[#allocation2 + $0x7d8] sm:$0xff]  ;;  %2318 = vst [vmem:[#allocation6 + $0x798] sm:$0xff] %v1806_v41  ;;  %2319 = vst [vmem:[#allocation6 + $0x7a0] sm:$0xff] %v1807_v42  ;;  %v1812_v53 = vsub.f32 0.5, %v276_v50  ;;  %v1813_v54 = vsub.f32 0.5, %v277_v51  ;;  %v279_v56 = vld [vmem:[#allocation2 + $0x7e0] sm:$0xff] }
  0x92   :  { %2320 = vst [vmem:[#allocation6 + $0x7a8] sm:$0xff] %v1808_v43  ;;  %v1814_v55 = vsub.f32 0.5, %v278_v52  ;;  %v280_v57 = vld [vmem:[#allocation2 + $0x7e8] sm:$0xff]  ;;  %v281_v58 = vld [vmem:[#allocation2 + $0x7f0] sm:$0xff]  ;;  %2321 = vst [vmem:[#allocation6 + $0x7b0] sm:$0xff] %v1809_v47  ;;  %v1815_v59 = vsub.f32 0.5, %v279_v56 }
  0x93   :  { %2322 = vst [vmem:[#allocation6 + $0x7b8] sm:$0xff] %v1810_v48  ;;  %2323 = vst [vmem:[#allocation6 + $0x7c0] sm:$0xff] %v1811_v49  ;;  %v1816_v60 = vsub.f32 0.5, %v280_v57  ;;  %v1817_v61 = vsub.f32 0.5, %v281_v58  ;;  %v282_v62 = vld [vmem:[#allocation2 + $0x7f8] sm:$0xff]  ;;  %v283_v63 = vld [vmem:[#allocation2 + $0x800] sm:$0xff] }
  0x94   :  { %v284_v0 = vld [vmem:[#allocation2 + $0x808] sm:$0xff]  ;;  %2324 = vst [vmem:[#allocation6 + $0x7c8] sm:$0xff] %v1812_v53  ;;  %2325 = vst [vmem:[#allocation6 + $0x7d0] sm:$0xff] %v1813_v54  ;;  %v1818_v1 = vsub.f32 0.5, %v282_v62  ;;  %v1819_v2 = vsub.f32 0.5, %v283_v63  ;;  %v285_v4 = vld [vmem:[#allocation2 + $0x810] sm:$0xff] }
  0x95   :  { %2326 = vst [vmem:[#allocation6 + $0x7d8] sm:$0xff] %v1814_v55  ;;  %v1820_v3 = vsub.f32 0.5, %v284_v0  ;;  %v286_v5 = vld [vmem:[#allocation2 + $0x818] sm:$0xff]  ;;  %v287_v6 = vld [vmem:[#allocation2 + $0x820] sm:$0xff]  ;;  %2327 = vst [vmem:[#allocation6 + $0x7e0] sm:$0xff] %v1815_v59  ;;  %v1821_v7 = vsub.f32 0.5, %v285_v4 }
  0x96   :  { %2328 = vst [vmem:[#allocation6 + $0x7e8] sm:$0xff] %v1816_v60  ;;  %2329 = vst [vmem:[#allocation6 + $0x7f0] sm:$0xff] %v1817_v61  ;;  %v1822_v8 = vsub.f32 0.5, %v286_v5  ;;  %v1823_v9 = vsub.f32 0.5, %v287_v6  ;;  %v288_v10 = vld [vmem:[#allocation2 + $0x828] sm:$0xff]  ;;  %v289_v11 = vld [vmem:[#allocation2 + $0x830] sm:$0xff] }
  0x97   :  { %v290_v12 = vld [vmem:[#allocation2 + $0x838] sm:$0xff]  ;;  %2330 = vst [vmem:[#allocation6 + $0x7f8] sm:$0xff] %v1818_v1  ;;  %2331 = vst [vmem:[#allocation6 + $0x800] sm:$0xff] %v1819_v2  ;;  %v1824_v13 = vsub.f32 0.5, %v288_v10  ;;  %v1825_v14 = vsub.f32 0.5, %v289_v11  ;;  %v291_v16 = vld [vmem:[#allocation2 + $0x840] sm:$0xff] }
  0x98   :  { %2332 = vst [vmem:[#allocation6 + $0x808] sm:$0xff] %v1820_v3  ;;  %v1826_v15 = vsub.f32 0.5, %v290_v12  ;;  %v292_v17 = vld [vmem:[#allocation2 + $0x848] sm:$0xff]  ;;  %v293_v18 = vld [vmem:[#allocation2 + $0x850] sm:$0xff]  ;;  %2333 = vst [vmem:[#allocation6 + $0x810] sm:$0xff] %v1821_v7  ;;  %v1827_v19 = vsub.f32 0.5, %v291_v16 }
  0x99   :  { %2334 = vst [vmem:[#allocation6 + $0x818] sm:$0xff] %v1822_v8  ;;  %2335 = vst [vmem:[#allocation6 + $0x820] sm:$0xff] %v1823_v9  ;;  %v1828_v20 = vsub.f32 0.5, %v292_v17  ;;  %v1829_v21 = vsub.f32 0.5, %v293_v18  ;;  %v294_v22 = vld [vmem:[#allocation2 + $0x858] sm:$0xff]  ;;  %v295_v23 = vld [vmem:[#allocation2 + $0x860] sm:$0xff] }
  0x9a   :  { %v296_v24 = vld [vmem:[#allocation2 + $0x868] sm:$0xff]  ;;  %2336 = vst [vmem:[#allocation6 + $0x828] sm:$0xff] %v1824_v13  ;;  %2337 = vst [vmem:[#allocation6 + $0x830] sm:$0xff] %v1825_v14  ;;  %v1830_v25 = vsub.f32 0.5, %v294_v22  ;;  %v1831_v26 = vsub.f32 0.5, %v295_v23  ;;  %v297_v28 = vld [vmem:[#allocation2 + $0x870] sm:$0xff] }
  0x9b   :  { %2338 = vst [vmem:[#allocation6 + $0x838] sm:$0xff] %v1826_v15  ;;  %v1832_v27 = vsub.f32 0.5, %v296_v24  ;;  %v298_v29 = vld [vmem:[#allocation2 + $0x878] sm:$0xff]  ;;  %v299_v30 = vld [vmem:[#allocation2 + $0x880] sm:$0xff]  ;;  %2339 = vst [vmem:[#allocation6 + $0x840] sm:$0xff] %v1827_v19  ;;  %v1833_v31 = vsub.f32 0.5, %v297_v28 }
  0x9c   :  { %2340 = vst [vmem:[#allocation6 + $0x848] sm:$0xff] %v1828_v20  ;;  %2341 = vst [vmem:[#allocation6 + $0x850] sm:$0xff] %v1829_v21  ;;  %v1834_v32 = vsub.f32 0.5, %v298_v29  ;;  %v1835_v33 = vsub.f32 0.5, %v299_v30  ;;  %v300_v34 = vld [vmem:[#allocation2 + $0x888] sm:$0xff]  ;;  %v301_v35 = vld [vmem:[#allocation2 + $0x890] sm:$0xff] }
  0x9d   :  { %v302_v36 = vld [vmem:[#allocation2 + $0x898] sm:$0xff]  ;;  %2342 = vst [vmem:[#allocation6 + $0x858] sm:$0xff] %v1830_v25  ;;  %2343 = vst [vmem:[#allocation6 + $0x860] sm:$0xff] %v1831_v26  ;;  %v1836_v37 = vsub.f32 0.5, %v300_v34  ;;  %v1837_v38 = vsub.f32 0.5, %v301_v35  ;;  %v303_v40 = vld [vmem:[#allocation2 + $0x8a0] sm:$0xff] }
  0x9e   :  { %2344 = vst [vmem:[#allocation6 + $0x868] sm:$0xff] %v1832_v27  ;;  %v1838_v39 = vsub.f32 0.5, %v302_v36  ;;  %v304_v41 = vld [vmem:[#allocation2 + $0x8a8] sm:$0xff]  ;;  %v305_v42 = vld [vmem:[#allocation2 + $0x8b0] sm:$0xff]  ;;  %2345 = vst [vmem:[#allocation6 + $0x870] sm:$0xff] %v1833_v31  ;;  %v1839_v43 = vsub.f32 0.5, %v303_v40 }
  0x9f   :  { %2346 = vst [vmem:[#allocation6 + $0x878] sm:$0xff] %v1834_v32  ;;  %2347 = vst [vmem:[#allocation6 + $0x880] sm:$0xff] %v1835_v33  ;;  %v1840_v44 = vsub.f32 0.5, %v304_v41  ;;  %v1841_v45 = vsub.f32 0.5, %v305_v42  ;;  %v306_v46 = vld [vmem:[#allocation2 + $0x8b8] sm:$0xff]  ;;  %v307_v47 = vld [vmem:[#allocation2 + $0x8c0] sm:$0xff] }
  0xa0   :  { %v308_v48 = vld [vmem:[#allocation2 + $0x8c8] sm:$0xff]  ;;  %2348 = vst [vmem:[#allocation6 + $0x888] sm:$0xff] %v1836_v37  ;;  %2349 = vst [vmem:[#allocation6 + $0x890] sm:$0xff] %v1837_v38  ;;  %v1842_v49 = vsub.f32 0.5, %v306_v46  ;;  %v1843_v50 = vsub.f32 0.5, %v307_v47  ;;  %v309_v52 = vld [vmem:[#allocation2 + $0x8d0] sm:$0xff] }
  0xa1   :  { %2350 = vst [vmem:[#allocation6 + $0x898] sm:$0xff] %v1838_v39  ;;  %v1844_v51 = vsub.f32 0.5, %v308_v48  ;;  %v310_v53 = vld [vmem:[#allocation2 + $0x8d8] sm:$0xff]  ;;  %v311_v54 = vld [vmem:[#allocation2 + $0x8e0] sm:$0xff]  ;;  %2351 = vst [vmem:[#allocation6 + $0x8a0] sm:$0xff] %v1839_v43  ;;  %v1845_v55 = vsub.f32 0.5, %v309_v52 }
  0xa2   :  { %2352 = vst [vmem:[#allocation6 + $0x8a8] sm:$0xff] %v1840_v44  ;;  %2353 = vst [vmem:[#allocation6 + $0x8b0] sm:$0xff] %v1841_v45  ;;  %v1846_v56 = vsub.f32 0.5, %v310_v53  ;;  %v1847_v57 = vsub.f32 0.5, %v311_v54  ;;  %v312_v58 = vld [vmem:[#allocation2 + $0x8e8] sm:$0xff]  ;;  %v313_v59 = vld [vmem:[#allocation2 + $0x8f0] sm:$0xff] }
  0xa3   :  { %v314_v60 = vld [vmem:[#allocation2 + $0x8f8] sm:$0xff]  ;;  %2354 = vst [vmem:[#allocation6 + $0x8b8] sm:$0xff] %v1842_v49  ;;  %2355 = vst [vmem:[#allocation6 + $0x8c0] sm:$0xff] %v1843_v50  ;;  %v1848_v61 = vsub.f32 0.5, %v312_v58  ;;  %v1849_v62 = vsub.f32 0.5, %v313_v59  ;;  %v315_v0 = vld [vmem:[#allocation2 + $0x900] sm:$0xff] }
  0xa4   :  { %2356 = vst [vmem:[#allocation6 + $0x8c8] sm:$0xff] %v1844_v51  ;;  %v1850_v63 = vsub.f32 0.5, %v314_v60  ;;  %v316_v1 = vld [vmem:[#allocation2 + $0x908] sm:$0xff]  ;;  %v317_v2 = vld [vmem:[#allocation2 + $0x910] sm:$0xff]  ;;  %2357 = vst [vmem:[#allocation6 + $0x8d0] sm:$0xff] %v1845_v55  ;;  %v1851_v3 = vsub.f32 0.5, %v315_v0 }
  0xa5   :  { %2358 = vst [vmem:[#allocation6 + $0x8d8] sm:$0xff] %v1846_v56  ;;  %2359 = vst [vmem:[#allocation6 + $0x8e0] sm:$0xff] %v1847_v57  ;;  %v1852_v4 = vsub.f32 0.5, %v316_v1  ;;  %v1853_v5 = vsub.f32 0.5, %v317_v2  ;;  %v318_v6 = vld [vmem:[#allocation2 + $0x918] sm:$0xff]  ;;  %v319_v7 = vld [vmem:[#allocation2 + $0x920] sm:$0xff] }
  0xa6   :  { %v320_v8 = vld [vmem:[#allocation2 + $0x928] sm:$0xff]  ;;  %2360 = vst [vmem:[#allocation6 + $0x8e8] sm:$0xff] %v1848_v61  ;;  %2361 = vst [vmem:[#allocation6 + $0x8f0] sm:$0xff] %v1849_v62  ;;  %v1854_v9 = vsub.f32 0.5, %v318_v6  ;;  %v1855_v10 = vsub.f32 0.5, %v319_v7  ;;  %v321_v12 = vld [vmem:[#allocation2 + $0x930] sm:$0xff] }
  0xa7   :  { %2362 = vst [vmem:[#allocation6 + $0x8f8] sm:$0xff] %v1850_v63  ;;  %v1856_v11 = vsub.f32 0.5, %v320_v8  ;;  %v322_v13 = vld [vmem:[#allocation2 + $0x938] sm:$0xff]  ;;  %v323_v14 = vld [vmem:[#allocation2 + $0x940] sm:$0xff]  ;;  %2363 = vst [vmem:[#allocation6 + $0x900] sm:$0xff] %v1851_v3  ;;  %v1857_v15 = vsub.f32 0.5, %v321_v12 }
  0xa8   :  { %2364 = vst [vmem:[#allocation6 + $0x908] sm:$0xff] %v1852_v4  ;;  %2365 = vst [vmem:[#allocation6 + $0x910] sm:$0xff] %v1853_v5  ;;  %v1858_v16 = vsub.f32 0.5, %v322_v13  ;;  %v1859_v17 = vsub.f32 0.5, %v323_v14  ;;  %v324_v18 = vld [vmem:[#allocation2 + $0x948] sm:$0xff]  ;;  %v325_v19 = vld [vmem:[#allocation2 + $0x950] sm:$0xff] }
  0xa9   :  { %v326_v20 = vld [vmem:[#allocation2 + $0x958] sm:$0xff]  ;;  %2366 = vst [vmem:[#allocation6 + $0x918] sm:$0xff] %v1854_v9  ;;  %2367 = vst [vmem:[#allocation6 + $0x920] sm:$0xff] %v1855_v10  ;;  %v1860_v21 = vsub.f32 0.5, %v324_v18  ;;  %v1861_v22 = vsub.f32 0.5, %v325_v19  ;;  %v327_v24 = vld [vmem:[#allocation2 + $0x960] sm:$0xff] }
  0xaa   :  { %2368 = vst [vmem:[#allocation6 + $0x928] sm:$0xff] %v1856_v11  ;;  %v1862_v23 = vsub.f32 0.5, %v326_v20  ;;  %v328_v25 = vld [vmem:[#allocation2 + $0x968] sm:$0xff]  ;;  %v329_v26 = vld [vmem:[#allocation2 + $0x970] sm:$0xff]  ;;  %2369 = vst [vmem:[#allocation6 + $0x930] sm:$0xff] %v1857_v15  ;;  %v1863_v27 = vsub.f32 0.5, %v327_v24 }
  0xab   :  { %2370 = vst [vmem:[#allocation6 + $0x938] sm:$0xff] %v1858_v16  ;;  %2371 = vst [vmem:[#allocation6 + $0x940] sm:$0xff] %v1859_v17  ;;  %v1864_v28 = vsub.f32 0.5, %v328_v25  ;;  %v1865_v29 = vsub.f32 0.5, %v329_v26  ;;  %v330_v30 = vld [vmem:[#allocation2 + $0x978] sm:$0xff]  ;;  %v331_v31 = vld [vmem:[#allocation2 + $0x980] sm:$0xff] }
  0xac   :  { %v332_v32 = vld [vmem:[#allocation2 + $0x988] sm:$0xff]  ;;  %2372 = vst [vmem:[#allocation6 + $0x948] sm:$0xff] %v1860_v21  ;;  %2373 = vst [vmem:[#allocation6 + $0x950] sm:$0xff] %v1861_v22  ;;  %v1866_v33 = vsub.f32 0.5, %v330_v30  ;;  %v1867_v34 = vsub.f32 0.5, %v331_v31  ;;  %v333_v36 = vld [vmem:[#allocation2 + $0x990] sm:$0xff] }
  0xad   :  { %2374 = vst [vmem:[#allocation6 + $0x958] sm:$0xff] %v1862_v23  ;;  %v1868_v35 = vsub.f32 0.5, %v332_v32  ;;  %v334_v37 = vld [vmem:[#allocation2 + $0x998] sm:$0xff]  ;;  %v335_v38 = vld [vmem:[#allocation2 + $0x9a0] sm:$0xff]  ;;  %2375 = vst [vmem:[#allocation6 + $0x960] sm:$0xff] %v1863_v27  ;;  %v1869_v39 = vsub.f32 0.5, %v333_v36 }
  0xae   :  { %2376 = vst [vmem:[#allocation6 + $0x968] sm:$0xff] %v1864_v28  ;;  %2377 = vst [vmem:[#allocation6 + $0x970] sm:$0xff] %v1865_v29  ;;  %v1870_v40 = vsub.f32 0.5, %v334_v37  ;;  %v1871_v41 = vsub.f32 0.5, %v335_v38  ;;  %v336_v42 = vld [vmem:[#allocation2 + $0x9a8] sm:$0xff]  ;;  %v337_v43 = vld [vmem:[#allocation2 + $0x9b0] sm:$0xff] }
  0xaf   :  { %v338_v44 = vld [vmem:[#allocation2 + $0x9b8] sm:$0xff]  ;;  %2378 = vst [vmem:[#allocation6 + $0x978] sm:$0xff] %v1866_v33  ;;  %2379 = vst [vmem:[#allocation6 + $0x980] sm:$0xff] %v1867_v34  ;;  %v1872_v45 = vsub.f32 0.5, %v336_v42  ;;  %v1873_v46 = vsub.f32 0.5, %v337_v43  ;;  %v339_v48 = vld [vmem:[#allocation2 + $0x9c0] sm:$0xff] }
  0xb0   :  { %2380 = vst [vmem:[#allocation6 + $0x988] sm:$0xff] %v1868_v35  ;;  %v1874_v47 = vsub.f32 0.5, %v338_v44  ;;  %v340_v49 = vld [vmem:[#allocation2 + $0x9c8] sm:$0xff]  ;;  %v341_v50 = vld [vmem:[#allocation2 + $0x9d0] sm:$0xff]  ;;  %2381 = vst [vmem:[#allocation6 + $0x990] sm:$0xff] %v1869_v39  ;;  %v1875_v51 = vsub.f32 0.5, %v339_v48 }
  0xb1   :  { %2382 = vst [vmem:[#allocation6 + $0x998] sm:$0xff] %v1870_v40  ;;  %2383 = vst [vmem:[#allocation6 + $0x9a0] sm:$0xff] %v1871_v41  ;;  %v1876_v52 = vsub.f32 0.5, %v340_v49  ;;  %v1877_v53 = vsub.f32 0.5, %v341_v50  ;;  %v342_v54 = vld [vmem:[#allocation2 + $0x9d8] sm:$0xff]  ;;  %v343_v55 = vld [vmem:[#allocation2 + $0x9e0] sm:$0xff] }
  0xb2   :  { %v344_v56 = vld [vmem:[#allocation2 + $0x9e8] sm:$0xff]  ;;  %2384 = vst [vmem:[#allocation6 + $0x9a8] sm:$0xff] %v1872_v45  ;;  %2385 = vst [vmem:[#allocation6 + $0x9b0] sm:$0xff] %v1873_v46  ;;  %v1878_v57 = vsub.f32 0.5, %v342_v54  ;;  %v1879_v58 = vsub.f32 0.5, %v343_v55  ;;  %v345_v60 = vld [vmem:[#allocation2 + $0x9f0] sm:$0xff] }
  0xb3   :  { %2386 = vst [vmem:[#allocation6 + $0x9b8] sm:$0xff] %v1874_v47  ;;  %v1880_v59 = vsub.f32 0.5, %v344_v56  ;;  %v346_v61 = vld [vmem:[#allocation2 + $0x9f8] sm:$0xff]  ;;  %v347_v62 = vld [vmem:[#allocation2 + $0xa00] sm:$0xff]  ;;  %2387 = vst [vmem:[#allocation6 + $0x9c0] sm:$0xff] %v1875_v51  ;;  %v1881_v63 = vsub.f32 0.5, %v345_v60 }
  0xb4   :  { %2388 = vst [vmem:[#allocation6 + $0x9c8] sm:$0xff] %v1876_v52  ;;  %2389 = vst [vmem:[#allocation6 + $0x9d0] sm:$0xff] %v1877_v53  ;;  %v1882_v0 = vsub.f32 0.5, %v346_v61  ;;  %v1883_v1 = vsub.f32 0.5, %v347_v62  ;;  %v348_v2 = vld [vmem:[#allocation2 + $0xa08] sm:$0xff]  ;;  %v349_v3 = vld [vmem:[#allocation2 + $0xa10] sm:$0xff] }
  0xb5   :  { %v350_v4 = vld [vmem:[#allocation2 + $0xa18] sm:$0xff]  ;;  %2390 = vst [vmem:[#allocation6 + $0x9d8] sm:$0xff] %v1878_v57  ;;  %2391 = vst [vmem:[#allocation6 + $0x9e0] sm:$0xff] %v1879_v58  ;;  %v1884_v5 = vsub.f32 0.5, %v348_v2  ;;  %v1885_v6 = vsub.f32 0.5, %v349_v3  ;;  %v351_v8 = vld [vmem:[#allocation2 + $0xa20] sm:$0xff] }
  0xb6   :  { %2392 = vst [vmem:[#allocation6 + $0x9e8] sm:$0xff] %v1880_v59  ;;  %v1886_v7 = vsub.f32 0.5, %v350_v4  ;;  %v352_v9 = vld [vmem:[#allocation2 + $0xa28] sm:$0xff]  ;;  %v353_v10 = vld [vmem:[#allocation2 + $0xa30] sm:$0xff]  ;;  %2393 = vst [vmem:[#allocation6 + $0x9f0] sm:$0xff] %v1881_v63  ;;  %v1887_v11 = vsub.f32 0.5, %v351_v8 }
  0xb7   :  { %2394 = vst [vmem:[#allocation6 + $0x9f8] sm:$0xff] %v1882_v0  ;;  %2395 = vst [vmem:[#allocation6 + $0xa00] sm:$0xff] %v1883_v1  ;;  %v1888_v12 = vsub.f32 0.5, %v352_v9  ;;  %v1889_v13 = vsub.f32 0.5, %v353_v10  ;;  %v354_v14 = vld [vmem:[#allocation2 + $0xa38] sm:$0xff]  ;;  %v355_v15 = vld [vmem:[#allocation2 + $0xa40] sm:$0xff] }
  0xb8   :  { %v356_v16 = vld [vmem:[#allocation2 + $0xa48] sm:$0xff]  ;;  %2396 = vst [vmem:[#allocation6 + $0xa08] sm:$0xff] %v1884_v5  ;;  %2397 = vst [vmem:[#allocation6 + $0xa10] sm:$0xff] %v1885_v6  ;;  %v1890_v17 = vsub.f32 0.5, %v354_v14  ;;  %v1891_v18 = vsub.f32 0.5, %v355_v15  ;;  %v357_v20 = vld [vmem:[#allocation2 + $0xa50] sm:$0xff] }
  0xb9   :  { %2398 = vst [vmem:[#allocation6 + $0xa18] sm:$0xff] %v1886_v7  ;;  %v1892_v19 = vsub.f32 0.5, %v356_v16  ;;  %v358_v21 = vld [vmem:[#allocation2 + $0xa58] sm:$0xff]  ;;  %v359_v22 = vld [vmem:[#allocation2 + $0xa60] sm:$0xff]  ;;  %2399 = vst [vmem:[#allocation6 + $0xa20] sm:$0xff] %v1887_v11  ;;  %v1893_v23 = vsub.f32 0.5, %v357_v20 }
  0xba   :  { %2400 = vst [vmem:[#allocation6 + $0xa28] sm:$0xff] %v1888_v12  ;;  %2401 = vst [vmem:[#allocation6 + $0xa30] sm:$0xff] %v1889_v13  ;;  %v1894_v24 = vsub.f32 0.5, %v358_v21  ;;  %v1895_v25 = vsub.f32 0.5, %v359_v22  ;;  %v360_v26 = vld [vmem:[#allocation2 + $0xa68] sm:$0xff]  ;;  %v361_v27 = vld [vmem:[#allocation2 + $0xa70] sm:$0xff] }
  0xbb   :  { %v362_v28 = vld [vmem:[#allocation2 + $0xa78] sm:$0xff]  ;;  %2402 = vst [vmem:[#allocation6 + $0xa38] sm:$0xff] %v1890_v17  ;;  %2403 = vst [vmem:[#allocation6 + $0xa40] sm:$0xff] %v1891_v18  ;;  %v1896_v29 = vsub.f32 0.5, %v360_v26  ;;  %v1897_v30 = vsub.f32 0.5, %v361_v27  ;;  %v363_v32 = vld [vmem:[#allocation2 + $0xa80] sm:$0xff] }
  0xbc   :  { %2404 = vst [vmem:[#allocation6 + $0xa48] sm:$0xff] %v1892_v19  ;;  %v1898_v31 = vsub.f32 0.5, %v362_v28  ;;  %v364_v33 = vld [vmem:[#allocation2 + $0xa88] sm:$0xff]  ;;  %v365_v34 = vld [vmem:[#allocation2 + $0xa90] sm:$0xff]  ;;  %2405 = vst [vmem:[#allocation6 + $0xa50] sm:$0xff] %v1893_v23  ;;  %v1899_v35 = vsub.f32 0.5, %v363_v32 }
  0xbd   :  { %2406 = vst [vmem:[#allocation6 + $0xa58] sm:$0xff] %v1894_v24  ;;  %2407 = vst [vmem:[#allocation6 + $0xa60] sm:$0xff] %v1895_v25  ;;  %v1900_v36 = vsub.f32 0.5, %v364_v33  ;;  %v1901_v37 = vsub.f32 0.5, %v365_v34  ;;  %v366_v38 = vld [vmem:[#allocation2 + $0xa98] sm:$0xff]  ;;  %v367_v39 = vld [vmem:[#allocation2 + $0xaa0] sm:$0xff] }
  0xbe   :  { %v368_v40 = vld [vmem:[#allocation2 + $0xaa8] sm:$0xff]  ;;  %2408 = vst [vmem:[#allocation6 + $0xa68] sm:$0xff] %v1896_v29  ;;  %2409 = vst [vmem:[#allocation6 + $0xa70] sm:$0xff] %v1897_v30  ;;  %v1902_v41 = vsub.f32 0.5, %v366_v38  ;;  %v1903_v42 = vsub.f32 0.5, %v367_v39  ;;  %v369_v44 = vld [vmem:[#allocation2 + $0xab0] sm:$0xff] }
  0xbf   :  { %2410 = vst [vmem:[#allocation6 + $0xa78] sm:$0xff] %v1898_v31  ;;  %v1904_v43 = vsub.f32 0.5, %v368_v40  ;;  %v370_v45 = vld [vmem:[#allocation2 + $0xab8] sm:$0xff]  ;;  %v371_v46 = vld [vmem:[#allocation2 + $0xac0] sm:$0xff]  ;;  %2411 = vst [vmem:[#allocation6 + $0xa80] sm:$0xff] %v1899_v35  ;;  %v1905_v47 = vsub.f32 0.5, %v369_v44 }
  0xc0   :  { %2412 = vst [vmem:[#allocation6 + $0xa88] sm:$0xff] %v1900_v36  ;;  %2413 = vst [vmem:[#allocation6 + $0xa90] sm:$0xff] %v1901_v37  ;;  %v1906_v48 = vsub.f32 0.5, %v370_v45  ;;  %v1907_v49 = vsub.f32 0.5, %v371_v46  ;;  %v372_v50 = vld [vmem:[#allocation2 + $0xac8] sm:$0xff]  ;;  %v373_v51 = vld [vmem:[#allocation2 + $0xad0] sm:$0xff] }
  0xc1   :  { %v374_v52 = vld [vmem:[#allocation2 + $0xad8] sm:$0xff]  ;;  %2414 = vst [vmem:[#allocation6 + $0xa98] sm:$0xff] %v1902_v41  ;;  %2415 = vst [vmem:[#allocation6 + $0xaa0] sm:$0xff] %v1903_v42  ;;  %v1908_v53 = vsub.f32 0.5, %v372_v50  ;;  %v1909_v54 = vsub.f32 0.5, %v373_v51  ;;  %v375_v56 = vld [vmem:[#allocation2 + $0xae0] sm:$0xff] }
  0xc2   :  { %2416 = vst [vmem:[#allocation6 + $0xaa8] sm:$0xff] %v1904_v43  ;;  %v1910_v55 = vsub.f32 0.5, %v374_v52  ;;  %v376_v57 = vld [vmem:[#allocation2 + $0xae8] sm:$0xff]  ;;  %v377_v58 = vld [vmem:[#allocation2 + $0xaf0] sm:$0xff]  ;;  %2417 = vst [vmem:[#allocation6 + $0xab0] sm:$0xff] %v1905_v47  ;;  %v1911_v59 = vsub.f32 0.5, %v375_v56 }
  0xc3   :  { %2418 = vst [vmem:[#allocation6 + $0xab8] sm:$0xff] %v1906_v48  ;;  %2419 = vst [vmem:[#allocation6 + $0xac0] sm:$0xff] %v1907_v49  ;;  %v1912_v60 = vsub.f32 0.5, %v376_v57  ;;  %v1913_v61 = vsub.f32 0.5, %v377_v58  ;;  %v378_v62 = vld [vmem:[#allocation2 + $0xaf8] sm:$0xff]  ;;  %v379_v63 = vld [vmem:[#allocation2 + $0xb00] sm:$0xff] }
  0xc4   :  { %v380_v0 = vld [vmem:[#allocation2 + $0xb08] sm:$0xff]  ;;  %2420 = vst [vmem:[#allocation6 + $0xac8] sm:$0xff] %v1908_v53  ;;  %2421 = vst [vmem:[#allocation6 + $0xad0] sm:$0xff] %v1909_v54  ;;  %v1914_v1 = vsub.f32 0.5, %v378_v62  ;;  %v1915_v2 = vsub.f32 0.5, %v379_v63  ;;  %v381_v4 = vld [vmem:[#allocation2 + $0xb10] sm:$0xff] }
  0xc5   :  { %2422 = vst [vmem:[#allocation6 + $0xad8] sm:$0xff] %v1910_v55  ;;  %v1916_v3 = vsub.f32 0.5, %v380_v0  ;;  %v382_v5 = vld [vmem:[#allocation2 + $0xb18] sm:$0xff]  ;;  %v383_v6 = vld [vmem:[#allocation2 + $0xb20] sm:$0xff]  ;;  %2423 = vst [vmem:[#allocation6 + $0xae0] sm:$0xff] %v1911_v59  ;;  %v1917_v7 = vsub.f32 0.5, %v381_v4 }
  0xc6   :  { %2424 = vst [vmem:[#allocation6 + $0xae8] sm:$0xff] %v1912_v60  ;;  %2425 = vst [vmem:[#allocation6 + $0xaf0] sm:$0xff] %v1913_v61  ;;  %v1918_v8 = vsub.f32 0.5, %v382_v5  ;;  %v1919_v9 = vsub.f32 0.5, %v383_v6  ;;  %v384_v10 = vld [vmem:[#allocation2 + $0xb28] sm:$0xff]  ;;  %v385_v11 = vld [vmem:[#allocation2 + $0xb30] sm:$0xff] }
  0xc7   :  { %v386_v12 = vld [vmem:[#allocation2 + $0xb38] sm:$0xff]  ;;  %2426 = vst [vmem:[#allocation6 + $0xaf8] sm:$0xff] %v1914_v1  ;;  %2427 = vst [vmem:[#allocation6 + $0xb00] sm:$0xff] %v1915_v2  ;;  %v1920_v13 = vsub.f32 0.5, %v384_v10  ;;  %v1921_v14 = vsub.f32 0.5, %v385_v11  ;;  %v387_v16 = vld [vmem:[#allocation2 + $0xb40] sm:$0xff] }
  0xc8   :  { %2428 = vst [vmem:[#allocation6 + $0xb08] sm:$0xff] %v1916_v3  ;;  %v1922_v15 = vsub.f32 0.5, %v386_v12  ;;  %v388_v17 = vld [vmem:[#allocation2 + $0xb48] sm:$0xff]  ;;  %v389_v18 = vld [vmem:[#allocation2 + $0xb50] sm:$0xff]  ;;  %2429 = vst [vmem:[#allocation6 + $0xb10] sm:$0xff] %v1917_v7  ;;  %v1923_v19 = vsub.f32 0.5, %v387_v16 }
  0xc9   :  { %2430 = vst [vmem:[#allocation6 + $0xb18] sm:$0xff] %v1918_v8  ;;  %2431 = vst [vmem:[#allocation6 + $0xb20] sm:$0xff] %v1919_v9  ;;  %v1924_v20 = vsub.f32 0.5, %v388_v17  ;;  %v1925_v21 = vsub.f32 0.5, %v389_v18  ;;  %v390_v22 = vld [vmem:[#allocation2 + $0xb58] sm:$0xff]  ;;  %v391_v23 = vld [vmem:[#allocation2 + $0xb60] sm:$0xff] }
  0xca   :  { %v392_v24 = vld [vmem:[#allocation2 + $0xb68] sm:$0xff]  ;;  %2432 = vst [vmem:[#allocation6 + $0xb28] sm:$0xff] %v1920_v13  ;;  %2433 = vst [vmem:[#allocation6 + $0xb30] sm:$0xff] %v1921_v14  ;;  %v1926_v25 = vsub.f32 0.5, %v390_v22  ;;  %v1927_v26 = vsub.f32 0.5, %v391_v23  ;;  %v393_v28 = vld [vmem:[#allocation2 + $0xb70] sm:$0xff] }
  0xcb   :  { %2434 = vst [vmem:[#allocation6 + $0xb38] sm:$0xff] %v1922_v15  ;;  %v1928_v27 = vsub.f32 0.5, %v392_v24  ;;  %v394_v29 = vld [vmem:[#allocation2 + $0xb78] sm:$0xff]  ;;  %v395_v30 = vld [vmem:[#allocation2 + $0xb80] sm:$0xff]  ;;  %2435 = vst [vmem:[#allocation6 + $0xb40] sm:$0xff] %v1923_v19  ;;  %v1929_v31 = vsub.f32 0.5, %v393_v28 }
  0xcc   :  { %2436 = vst [vmem:[#allocation6 + $0xb48] sm:$0xff] %v1924_v20  ;;  %2437 = vst [vmem:[#allocation6 + $0xb50] sm:$0xff] %v1925_v21  ;;  %v1930_v32 = vsub.f32 0.5, %v394_v29  ;;  %v1931_v33 = vsub.f32 0.5, %v395_v30  ;;  %v396_v34 = vld [vmem:[#allocation2 + $0xb88] sm:$0xff]  ;;  %v397_v35 = vld [vmem:[#allocation2 + $0xb90] sm:$0xff] }
  0xcd   :  { %v398_v36 = vld [vmem:[#allocation2 + $0xb98] sm:$0xff]  ;;  %2438 = vst [vmem:[#allocation6 + $0xb58] sm:$0xff] %v1926_v25  ;;  %2439 = vst [vmem:[#allocation6 + $0xb60] sm:$0xff] %v1927_v26  ;;  %v1932_v37 = vsub.f32 0.5, %v396_v34  ;;  %v1933_v38 = vsub.f32 0.5, %v397_v35  ;;  %v399_v40 = vld [vmem:[#allocation2 + $0xba0] sm:$0xff] }
  0xce   :  { %2440 = vst [vmem:[#allocation6 + $0xb68] sm:$0xff] %v1928_v27  ;;  %v1934_v39 = vsub.f32 0.5, %v398_v36  ;;  %v400_v41 = vld [vmem:[#allocation2 + $0xba8] sm:$0xff]  ;;  %v401_v42 = vld [vmem:[#allocation2 + $0xbb0] sm:$0xff]  ;;  %2441 = vst [vmem:[#allocation6 + $0xb70] sm:$0xff] %v1929_v31  ;;  %v1935_v43 = vsub.f32 0.5, %v399_v40 }
  0xcf   :  { %2442 = vst [vmem:[#allocation6 + $0xb78] sm:$0xff] %v1930_v32  ;;  %2443 = vst [vmem:[#allocation6 + $0xb80] sm:$0xff] %v1931_v33  ;;  %v1936_v44 = vsub.f32 0.5, %v400_v41  ;;  %v1937_v45 = vsub.f32 0.5, %v401_v42  ;;  %v402_v46 = vld [vmem:[#allocation2 + $0xbb8] sm:$0xff]  ;;  %v403_v47 = vld [vmem:[#allocation2 + $0xbc0] sm:$0xff] }
  0xd0   :  { %v404_v48 = vld [vmem:[#allocation2 + $0xbc8] sm:$0xff]  ;;  %2444 = vst [vmem:[#allocation6 + $0xb88] sm:$0xff] %v1932_v37  ;;  %2445 = vst [vmem:[#allocation6 + $0xb90] sm:$0xff] %v1933_v38  ;;  %v1938_v49 = vsub.f32 0.5, %v402_v46  ;;  %v1939_v50 = vsub.f32 0.5, %v403_v47  ;;  %v405_v52 = vld [vmem:[#allocation2 + $0xbd0] sm:$0xff] }
  0xd1   :  { %2446 = vst [vmem:[#allocation6 + $0xb98] sm:$0xff] %v1934_v39  ;;  %v1940_v51 = vsub.f32 0.5, %v404_v48  ;;  %v406_v53 = vld [vmem:[#allocation2 + $0xbd8] sm:$0xff]  ;;  %v407_v54 = vld [vmem:[#allocation2 + $0xbe0] sm:$0xff]  ;;  %2447 = vst [vmem:[#allocation6 + $0xba0] sm:$0xff] %v1935_v43  ;;  %v1941_v55 = vsub.f32 0.5, %v405_v52 }
  0xd2   :  { %2448 = vst [vmem:[#allocation6 + $0xba8] sm:$0xff] %v1936_v44  ;;  %2449 = vst [vmem:[#allocation6 + $0xbb0] sm:$0xff] %v1937_v45  ;;  %v1942_v56 = vsub.f32 0.5, %v406_v53  ;;  %v1943_v57 = vsub.f32 0.5, %v407_v54  ;;  %v408_v58 = vld [vmem:[#allocation2 + $0xbe8] sm:$0xff]  ;;  %v409_v59 = vld [vmem:[#allocation2 + $0xbf0] sm:$0xff] }
  0xd3   :  { %v410_v60 = vld [vmem:[#allocation2 + $0xbf8] sm:$0xff]  ;;  %2450 = vst [vmem:[#allocation6 + $0xbb8] sm:$0xff] %v1938_v49  ;;  %2451 = vst [vmem:[#allocation6 + $0xbc0] sm:$0xff] %v1939_v50  ;;  %v1944_v61 = vsub.f32 0.5, %v408_v58  ;;  %v1945_v62 = vsub.f32 0.5, %v409_v59  ;;  %v411_v0 = vld [vmem:[#allocation2 + $0xc00] sm:$0xff] }
  0xd4   :  { %2452 = vst [vmem:[#allocation6 + $0xbc8] sm:$0xff] %v1940_v51  ;;  %v1946_v63 = vsub.f32 0.5, %v410_v60  ;;  %v412_v1 = vld [vmem:[#allocation2 + $0xc08] sm:$0xff]  ;;  %v413_v2 = vld [vmem:[#allocation2 + $0xc10] sm:$0xff]  ;;  %2453 = vst [vmem:[#allocation6 + $0xbd0] sm:$0xff] %v1941_v55  ;;  %v1947_v3 = vsub.f32 0.5, %v411_v0 }
  0xd5   :  { %2454 = vst [vmem:[#allocation6 + $0xbd8] sm:$0xff] %v1942_v56  ;;  %2455 = vst [vmem:[#allocation6 + $0xbe0] sm:$0xff] %v1943_v57  ;;  %v1948_v4 = vsub.f32 0.5, %v412_v1  ;;  %v1949_v5 = vsub.f32 0.5, %v413_v2  ;;  %v414_v6 = vld [vmem:[#allocation2 + $0xc18] sm:$0xff]  ;;  %v415_v7 = vld [vmem:[#allocation2 + $0xc20] sm:$0xff] }
  0xd6   :  { %v416_v8 = vld [vmem:[#allocation2 + $0xc28] sm:$0xff]  ;;  %2456 = vst [vmem:[#allocation6 + $0xbe8] sm:$0xff] %v1944_v61  ;;  %2457 = vst [vmem:[#allocation6 + $0xbf0] sm:$0xff] %v1945_v62  ;;  %v1950_v9 = vsub.f32 0.5, %v414_v6  ;;  %v1951_v10 = vsub.f32 0.5, %v415_v7  ;;  %v417_v12 = vld [vmem:[#allocation2 + $0xc30] sm:$0xff] }
  0xd7   :  { %2458 = vst [vmem:[#allocation6 + $0xbf8] sm:$0xff] %v1946_v63  ;;  %v1952_v11 = vsub.f32 0.5, %v416_v8  ;;  %v418_v13 = vld [vmem:[#allocation2 + $0xc38] sm:$0xff]  ;;  %v419_v14 = vld [vmem:[#allocation2 + $0xc40] sm:$0xff]  ;;  %2459 = vst [vmem:[#allocation6 + $0xc00] sm:$0xff] %v1947_v3  ;;  %v1953_v15 = vsub.f32 0.5, %v417_v12 }
  0xd8   :  { %2460 = vst [vmem:[#allocation6 + $0xc08] sm:$0xff] %v1948_v4  ;;  %2461 = vst [vmem:[#allocation6 + $0xc10] sm:$0xff] %v1949_v5  ;;  %v1954_v16 = vsub.f32 0.5, %v418_v13  ;;  %v1955_v17 = vsub.f32 0.5, %v419_v14  ;;  %v420_v18 = vld [vmem:[#allocation2 + $0xc48] sm:$0xff]  ;;  %v421_v19 = vld [vmem:[#allocation2 + $0xc50] sm:$0xff] }
  0xd9   :  { %v422_v20 = vld [vmem:[#allocation2 + $0xc58] sm:$0xff]  ;;  %2462 = vst [vmem:[#allocation6 + $0xc18] sm:$0xff] %v1950_v9  ;;  %2463 = vst [vmem:[#allocation6 + $0xc20] sm:$0xff] %v1951_v10  ;;  %v1956_v21 = vsub.f32 0.5, %v420_v18  ;;  %v1957_v22 = vsub.f32 0.5, %v421_v19  ;;  %v423_v24 = vld [vmem:[#allocation2 + $0xc60] sm:$0xff] }
  0xda   :  { %2464 = vst [vmem:[#allocation6 + $0xc28] sm:$0xff] %v1952_v11  ;;  %v1958_v23 = vsub.f32 0.5, %v422_v20  ;;  %v424_v25 = vld [vmem:[#allocation2 + $0xc68] sm:$0xff]  ;;  %v425_v26 = vld [vmem:[#allocation2 + $0xc70] sm:$0xff]  ;;  %2465 = vst [vmem:[#allocation6 + $0xc30] sm:$0xff] %v1953_v15  ;;  %v1959_v27 = vsub.f32 0.5, %v423_v24 }
  0xdb   :  { %2466 = vst [vmem:[#allocation6 + $0xc38] sm:$0xff] %v1954_v16  ;;  %2467 = vst [vmem:[#allocation6 + $0xc40] sm:$0xff] %v1955_v17  ;;  %v1960_v28 = vsub.f32 0.5, %v424_v25  ;;  %v1961_v29 = vsub.f32 0.5, %v425_v26  ;;  %v426_v30 = vld [vmem:[#allocation2 + $0xc78] sm:$0xff]  ;;  %v427_v31 = vld [vmem:[#allocation2 + $0xc80] sm:$0xff] }
  0xdc   :  { %v428_v32 = vld [vmem:[#allocation2 + $0xc88] sm:$0xff]  ;;  %2468 = vst [vmem:[#allocation6 + $0xc48] sm:$0xff] %v1956_v21  ;;  %2469 = vst [vmem:[#allocation6 + $0xc50] sm:$0xff] %v1957_v22  ;;  %v1962_v33 = vsub.f32 0.5, %v426_v30  ;;  %v1963_v34 = vsub.f32 0.5, %v427_v31  ;;  %v429_v36 = vld [vmem:[#allocation2 + $0xc90] sm:$0xff] }
  0xdd   :  { %2470 = vst [vmem:[#allocation6 + $0xc58] sm:$0xff] %v1958_v23  ;;  %v1964_v35 = vsub.f32 0.5, %v428_v32  ;;  %v430_v37 = vld [vmem:[#allocation2 + $0xc98] sm:$0xff]  ;;  %v431_v38 = vld [vmem:[#allocation2 + $0xca0] sm:$0xff]  ;;  %2471 = vst [vmem:[#allocation6 + $0xc60] sm:$0xff] %v1959_v27  ;;  %v1965_v39 = vsub.f32 0.5, %v429_v36 }
  0xde   :  { %2472 = vst [vmem:[#allocation6 + $0xc68] sm:$0xff] %v1960_v28  ;;  %2473 = vst [vmem:[#allocation6 + $0xc70] sm:$0xff] %v1961_v29  ;;  %v1966_v40 = vsub.f32 0.5, %v430_v37  ;;  %v1967_v41 = vsub.f32 0.5, %v431_v38  ;;  %v432_v42 = vld [vmem:[#allocation2 + $0xca8] sm:$0xff]  ;;  %v433_v43 = vld [vmem:[#allocation2 + $0xcb0] sm:$0xff] }
  0xdf   :  { %v434_v44 = vld [vmem:[#allocation2 + $0xcb8] sm:$0xff]  ;;  %2474 = vst [vmem:[#allocation6 + $0xc78] sm:$0xff] %v1962_v33  ;;  %2475 = vst [vmem:[#allocation6 + $0xc80] sm:$0xff] %v1963_v34  ;;  %v1968_v45 = vsub.f32 0.5, %v432_v42  ;;  %v1969_v46 = vsub.f32 0.5, %v433_v43  ;;  %v435_v48 = vld [vmem:[#allocation2 + $0xcc0] sm:$0xff] }
  0xe0   :  { %2476 = vst [vmem:[#allocation6 + $0xc88] sm:$0xff] %v1964_v35  ;;  %v1970_v47 = vsub.f32 0.5, %v434_v44  ;;  %v436_v49 = vld [vmem:[#allocation2 + $0xcc8] sm:$0xff]  ;;  %v437_v50 = vld [vmem:[#allocation2 + $0xcd0] sm:$0xff]  ;;  %2477 = vst [vmem:[#allocation6 + $0xc90] sm:$0xff] %v1965_v39  ;;  %v1971_v51 = vsub.f32 0.5, %v435_v48 }
  0xe1   :  { %2478 = vst [vmem:[#allocation6 + $0xc98] sm:$0xff] %v1966_v40  ;;  %2479 = vst [vmem:[#allocation6 + $0xca0] sm:$0xff] %v1967_v41  ;;  %v1972_v52 = vsub.f32 0.5, %v436_v49  ;;  %v1973_v53 = vsub.f32 0.5, %v437_v50  ;;  %v438_v54 = vld [vmem:[#allocation2 + $0xcd8] sm:$0xff]  ;;  %v439_v55 = vld [vmem:[#allocation2 + $0xce0] sm:$0xff] }
  0xe2   :  { %v440_v56 = vld [vmem:[#allocation2 + $0xce8] sm:$0xff]  ;;  %2480 = vst [vmem:[#allocation6 + $0xca8] sm:$0xff] %v1968_v45  ;;  %2481 = vst [vmem:[#allocation6 + $0xcb0] sm:$0xff] %v1969_v46  ;;  %v1974_v57 = vsub.f32 0.5, %v438_v54  ;;  %v1975_v58 = vsub.f32 0.5, %v439_v55  ;;  %v441_v60 = vld [vmem:[#allocation2 + $0xcf0] sm:$0xff] }
  0xe3   :  { %2482 = vst [vmem:[#allocation6 + $0xcb8] sm:$0xff] %v1970_v47  ;;  %v1976_v59 = vsub.f32 0.5, %v440_v56  ;;  %v442_v61 = vld [vmem:[#allocation2 + $0xcf8] sm:$0xff]  ;;  %v443_v62 = vld [vmem:[#allocation2 + $0xd00] sm:$0xff]  ;;  %2483 = vst [vmem:[#allocation6 + $0xcc0] sm:$0xff] %v1971_v51  ;;  %v1977_v63 = vsub.f32 0.5, %v441_v60 }
  0xe4   :  { %2484 = vst [vmem:[#allocation6 + $0xcc8] sm:$0xff] %v1972_v52  ;;  %2485 = vst [vmem:[#allocation6 + $0xcd0] sm:$0xff] %v1973_v53  ;;  %v1978_v0 = vsub.f32 0.5, %v442_v61  ;;  %v1979_v1 = vsub.f32 0.5, %v443_v62  ;;  %v444_v2 = vld [vmem:[#allocation2 + $0xd08] sm:$0xff]  ;;  %v445_v3 = vld [vmem:[#allocation2 + $0xd10] sm:$0xff] }
  0xe5   :  { %v446_v4 = vld [vmem:[#allocation2 + $0xd18] sm:$0xff]  ;;  %2486 = vst [vmem:[#allocation6 + $0xcd8] sm:$0xff] %v1974_v57  ;;  %2487 = vst [vmem:[#allocation6 + $0xce0] sm:$0xff] %v1975_v58  ;;  %v1980_v5 = vsub.f32 0.5, %v444_v2  ;;  %v1981_v6 = vsub.f32 0.5, %v445_v3  ;;  %v447_v8 = vld [vmem:[#allocation2 + $0xd20] sm:$0xff] }
  0xe6   :  { %2488 = vst [vmem:[#allocation6 + $0xce8] sm:$0xff] %v1976_v59  ;;  %v1982_v7 = vsub.f32 0.5, %v446_v4  ;;  %v448_v9 = vld [vmem:[#allocation2 + $0xd28] sm:$0xff]  ;;  %v449_v10 = vld [vmem:[#allocation2 + $0xd30] sm:$0xff]  ;;  %2489 = vst [vmem:[#allocation6 + $0xcf0] sm:$0xff] %v1977_v63  ;;  %v1983_v11 = vsub.f32 0.5, %v447_v8 }
  0xe7   :  { %2490 = vst [vmem:[#allocation6 + $0xcf8] sm:$0xff] %v1978_v0  ;;  %2491 = vst [vmem:[#allocation6 + $0xd00] sm:$0xff] %v1979_v1  ;;  %v1984_v12 = vsub.f32 0.5, %v448_v9  ;;  %v1985_v13 = vsub.f32 0.5, %v449_v10  ;;  %v450_v14 = vld [vmem:[#allocation2 + $0xd38] sm:$0xff]  ;;  %v451_v15 = vld [vmem:[#allocation2 + $0xd40] sm:$0xff] }
  0xe8   :  { %v452_v16 = vld [vmem:[#allocation2 + $0xd48] sm:$0xff]  ;;  %2492 = vst [vmem:[#allocation6 + $0xd08] sm:$0xff] %v1980_v5  ;;  %2493 = vst [vmem:[#allocation6 + $0xd10] sm:$0xff] %v1981_v6  ;;  %v1986_v17 = vsub.f32 0.5, %v450_v14  ;;  %v1987_v18 = vsub.f32 0.5, %v451_v15  ;;  %v453_v20 = vld [vmem:[#allocation2 + $0xd50] sm:$0xff] }
  0xe9   :  { %2494 = vst [vmem:[#allocation6 + $0xd18] sm:$0xff] %v1982_v7  ;;  %v1988_v19 = vsub.f32 0.5, %v452_v16  ;;  %v454_v21 = vld [vmem:[#allocation2 + $0xd58] sm:$0xff]  ;;  %v455_v22 = vld [vmem:[#allocation2 + $0xd60] sm:$0xff]  ;;  %2495 = vst [vmem:[#allocation6 + $0xd20] sm:$0xff] %v1983_v11  ;;  %v1989_v23 = vsub.f32 0.5, %v453_v20 }
  0xea   :  { %2496 = vst [vmem:[#allocation6 + $0xd28] sm:$0xff] %v1984_v12  ;;  %2497 = vst [vmem:[#allocation6 + $0xd30] sm:$0xff] %v1985_v13  ;;  %v1990_v24 = vsub.f32 0.5, %v454_v21  ;;  %v1991_v25 = vsub.f32 0.5, %v455_v22  ;;  %v456_v26 = vld [vmem:[#allocation2 + $0xd68] sm:$0xff]  ;;  %v457_v27 = vld [vmem:[#allocation2 + $0xd70] sm:$0xff] }
  0xeb   :  { %v458_v28 = vld [vmem:[#allocation2 + $0xd78] sm:$0xff]  ;;  %2498 = vst [vmem:[#allocation6 + $0xd38] sm:$0xff] %v1986_v17  ;;  %2499 = vst [vmem:[#allocation6 + $0xd40] sm:$0xff] %v1987_v18  ;;  %v1992_v29 = vsub.f32 0.5, %v456_v26  ;;  %v1993_v30 = vsub.f32 0.5, %v457_v27  ;;  %v459_v32 = vld [vmem:[#allocation2 + $0xd80] sm:$0xff] }
  0xec   :  { %2500 = vst [vmem:[#allocation6 + $0xd48] sm:$0xff] %v1988_v19  ;;  %v1994_v31 = vsub.f32 0.5, %v458_v28  ;;  %v460_v33 = vld [vmem:[#allocation2 + $0xd88] sm:$0xff]  ;;  %v461_v34 = vld [vmem:[#allocation2 + $0xd90] sm:$0xff]  ;;  %2501 = vst [vmem:[#allocation6 + $0xd50] sm:$0xff] %v1989_v23  ;;  %v1995_v35 = vsub.f32 0.5, %v459_v32 }
  0xed   :  { %2502 = vst [vmem:[#allocation6 + $0xd58] sm:$0xff] %v1990_v24  ;;  %2503 = vst [vmem:[#allocation6 + $0xd60] sm:$0xff] %v1991_v25  ;;  %v1996_v36 = vsub.f32 0.5, %v460_v33  ;;  %v1997_v37 = vsub.f32 0.5, %v461_v34  ;;  %v462_v38 = vld [vmem:[#allocation2 + $0xd98] sm:$0xff]  ;;  %v463_v39 = vld [vmem:[#allocation2 + $0xda0] sm:$0xff] }
  0xee   :  { %v464_v40 = vld [vmem:[#allocation2 + $0xda8] sm:$0xff]  ;;  %2504 = vst [vmem:[#allocation6 + $0xd68] sm:$0xff] %v1992_v29  ;;  %2505 = vst [vmem:[#allocation6 + $0xd70] sm:$0xff] %v1993_v30  ;;  %v1998_v41 = vsub.f32 0.5, %v462_v38  ;;  %v1999_v42 = vsub.f32 0.5, %v463_v39  ;;  %v465_v44 = vld [vmem:[#allocation2 + $0xdb0] sm:$0xff] }
  0xef   :  { %2506 = vst [vmem:[#allocation6 + $0xd78] sm:$0xff] %v1994_v31  ;;  %v2000_v43 = vsub.f32 0.5, %v464_v40  ;;  %v466_v45 = vld [vmem:[#allocation2 + $0xdb8] sm:$0xff]  ;;  %v467_v46 = vld [vmem:[#allocation2 + $0xdc0] sm:$0xff]  ;;  %2507 = vst [vmem:[#allocation6 + $0xd80] sm:$0xff] %v1995_v35  ;;  %v2001_v47 = vsub.f32 0.5, %v465_v44 }
  0xf0   :  { %2508 = vst [vmem:[#allocation6 + $0xd88] sm:$0xff] %v1996_v36  ;;  %2509 = vst [vmem:[#allocation6 + $0xd90] sm:$0xff] %v1997_v37  ;;  %v2002_v48 = vsub.f32 0.5, %v466_v45  ;;  %v2003_v49 = vsub.f32 0.5, %v467_v46  ;;  %v468_v50 = vld [vmem:[#allocation2 + $0xdc8] sm:$0xff]  ;;  %v469_v51 = vld [vmem:[#allocation2 + $0xdd0] sm:$0xff] }
  0xf1   :  { %v470_v52 = vld [vmem:[#allocation2 + $0xdd8] sm:$0xff]  ;;  %2510 = vst [vmem:[#allocation6 + $0xd98] sm:$0xff] %v1998_v41  ;;  %2511 = vst [vmem:[#allocation6 + $0xda0] sm:$0xff] %v1999_v42  ;;  %v2004_v53 = vsub.f32 0.5, %v468_v50  ;;  %v2005_v54 = vsub.f32 0.5, %v469_v51  ;;  %v471_v56 = vld [vmem:[#allocation2 + $0xde0] sm:$0xff] }
  0xf2   :  { %2512 = vst [vmem:[#allocation6 + $0xda8] sm:$0xff] %v2000_v43  ;;  %v2006_v55 = vsub.f32 0.5, %v470_v52  ;;  %v472_v57 = vld [vmem:[#allocation2 + $0xde8] sm:$0xff]  ;;  %v473_v58 = vld [vmem:[#allocation2 + $0xdf0] sm:$0xff]  ;;  %2513 = vst [vmem:[#allocation6 + $0xdb0] sm:$0xff] %v2001_v47  ;;  %v2007_v59 = vsub.f32 0.5, %v471_v56 }
  0xf3   :  { %2514 = vst [vmem:[#allocation6 + $0xdb8] sm:$0xff] %v2002_v48  ;;  %2515 = vst [vmem:[#allocation6 + $0xdc0] sm:$0xff] %v2003_v49  ;;  %v2008_v60 = vsub.f32 0.5, %v472_v57  ;;  %v2009_v61 = vsub.f32 0.5, %v473_v58  ;;  %v474_v62 = vld [vmem:[#allocation2 + $0xdf8] sm:$0xff]  ;;  %v475_v63 = vld [vmem:[#allocation2 + $0xe00] sm:$0xff] }
  0xf4   :  { %v476_v0 = vld [vmem:[#allocation2 + $0xe08] sm:$0xff]  ;;  %2516 = vst [vmem:[#allocation6 + $0xdc8] sm:$0xff] %v2004_v53  ;;  %2517 = vst [vmem:[#allocation6 + $0xdd0] sm:$0xff] %v2005_v54  ;;  %v2010_v1 = vsub.f32 0.5, %v474_v62  ;;  %v2011_v2 = vsub.f32 0.5, %v475_v63  ;;  %v477_v4 = vld [vmem:[#allocation2 + $0xe10] sm:$0xff] }
  0xf5   :  { %2518 = vst [vmem:[#allocation6 + $0xdd8] sm:$0xff] %v2006_v55  ;;  %v2012_v3 = vsub.f32 0.5, %v476_v0  ;;  %v478_v5 = vld [vmem:[#allocation2 + $0xe18] sm:$0xff]  ;;  %v479_v6 = vld [vmem:[#allocation2 + $0xe20] sm:$0xff]  ;;  %2519 = vst [vmem:[#allocation6 + $0xde0] sm:$0xff] %v2007_v59  ;;  %v2013_v7 = vsub.f32 0.5, %v477_v4 }
  0xf6   :  { %2520 = vst [vmem:[#allocation6 + $0xde8] sm:$0xff] %v2008_v60  ;;  %2521 = vst [vmem:[#allocation6 + $0xdf0] sm:$0xff] %v2009_v61  ;;  %v2014_v8 = vsub.f32 0.5, %v478_v5  ;;  %v2015_v9 = vsub.f32 0.5, %v479_v6  ;;  %v480_v10 = vld [vmem:[#allocation2 + $0xe28] sm:$0xff]  ;;  %v481_v11 = vld [vmem:[#allocation2 + $0xe30] sm:$0xff] }
  0xf7   :  { %v482_v12 = vld [vmem:[#allocation2 + $0xe38] sm:$0xff]  ;;  %2522 = vst [vmem:[#allocation6 + $0xdf8] sm:$0xff] %v2010_v1  ;;  %2523 = vst [vmem:[#allocation6 + $0xe00] sm:$0xff] %v2011_v2  ;;  %v2016_v13 = vsub.f32 0.5, %v480_v10  ;;  %v2017_v14 = vsub.f32 0.5, %v481_v11  ;;  %v483_v16 = vld [vmem:[#allocation2 + $0xe40] sm:$0xff] }
  0xf8   :  { %2524 = vst [vmem:[#allocation6 + $0xe08] sm:$0xff] %v2012_v3  ;;  %v2018_v15 = vsub.f32 0.5, %v482_v12  ;;  %v484_v17 = vld [vmem:[#allocation2 + $0xe48] sm:$0xff]  ;;  %v485_v18 = vld [vmem:[#allocation2 + $0xe50] sm:$0xff]  ;;  %2525 = vst [vmem:[#allocation6 + $0xe10] sm:$0xff] %v2013_v7  ;;  %v2019_v19 = vsub.f32 0.5, %v483_v16 }
  0xf9   :  { %2526 = vst [vmem:[#allocation6 + $0xe18] sm:$0xff] %v2014_v8  ;;  %2527 = vst [vmem:[#allocation6 + $0xe20] sm:$0xff] %v2015_v9  ;;  %v2020_v20 = vsub.f32 0.5, %v484_v17  ;;  %v2021_v21 = vsub.f32 0.5, %v485_v18  ;;  %v486_v22 = vld [vmem:[#allocation2 + $0xe58] sm:$0xff]  ;;  %v487_v23 = vld [vmem:[#allocation2 + $0xe60] sm:$0xff] }
  0xfa   :  { %v488_v24 = vld [vmem:[#allocation2 + $0xe68] sm:$0xff]  ;;  %2528 = vst [vmem:[#allocation6 + $0xe28] sm:$0xff] %v2016_v13  ;;  %2529 = vst [vmem:[#allocation6 + $0xe30] sm:$0xff] %v2017_v14  ;;  %v2022_v25 = vsub.f32 0.5, %v486_v22  ;;  %v2023_v26 = vsub.f32 0.5, %v487_v23  ;;  %v489_v28 = vld [vmem:[#allocation2 + $0xe70] sm:$0xff] }
  0xfb   :  { %2530 = vst [vmem:[#allocation6 + $0xe38] sm:$0xff] %v2018_v15  ;;  %v2024_v27 = vsub.f32 0.5, %v488_v24  ;;  %v490_v29 = vld [vmem:[#allocation2 + $0xe78] sm:$0xff]  ;;  %v491_v30 = vld [vmem:[#allocation2 + $0xe80] sm:$0xff]  ;;  %2531 = vst [vmem:[#allocation6 + $0xe40] sm:$0xff] %v2019_v19  ;;  %v2025_v31 = vsub.f32 0.5, %v489_v28 }
  0xfc   :  { %2532 = vst [vmem:[#allocation6 + $0xe48] sm:$0xff] %v2020_v20  ;;  %2533 = vst [vmem:[#allocation6 + $0xe50] sm:$0xff] %v2021_v21  ;;  %v2026_v32 = vsub.f32 0.5, %v490_v29  ;;  %v2027_v33 = vsub.f32 0.5, %v491_v30  ;;  %v492_v34 = vld [vmem:[#allocation2 + $0xe88] sm:$0xff]  ;;  %v493_v35 = vld [vmem:[#allocation2 + $0xe90] sm:$0xff] }
  0xfd   :  { %v494_v36 = vld [vmem:[#allocation2 + $0xe98] sm:$0xff]  ;;  %2534 = vst [vmem:[#allocation6 + $0xe58] sm:$0xff] %v2022_v25  ;;  %2535 = vst [vmem:[#allocation6 + $0xe60] sm:$0xff] %v2023_v26  ;;  %v2028_v37 = vsub.f32 0.5, %v492_v34  ;;  %v2029_v38 = vsub.f32 0.5, %v493_v35  ;;  %v495_v40 = vld [vmem:[#allocation2 + $0xea0] sm:$0xff] }
  0xfe   :  { %2536 = vst [vmem:[#allocation6 + $0xe68] sm:$0xff] %v2024_v27  ;;  %v2030_v39 = vsub.f32 0.5, %v494_v36  ;;  %v496_v41 = vld [vmem:[#allocation2 + $0xea8] sm:$0xff]  ;;  %v497_v42 = vld [vmem:[#allocation2 + $0xeb0] sm:$0xff]  ;;  %2537 = vst [vmem:[#allocation6 + $0xe70] sm:$0xff] %v2025_v31  ;;  %v2031_v43 = vsub.f32 0.5, %v495_v40 }
  0xff   :  { %2538 = vst [vmem:[#allocation6 + $0xe78] sm:$0xff] %v2026_v32  ;;  %2539 = vst [vmem:[#allocation6 + $0xe80] sm:$0xff] %v2027_v33  ;;  %v2032_v44 = vsub.f32 0.5, %v496_v41  ;;  %v2033_v45 = vsub.f32 0.5, %v497_v42  ;;  %v498_v46 = vld [vmem:[#allocation2 + $0xeb8] sm:$0xff]  ;;  %v499_v47 = vld [vmem:[#allocation2 + $0xec0] sm:$0xff] }
 0x100   :  { %v500_v48 = vld [vmem:[#allocation2 + $0xec8] sm:$0xff]  ;;  %2540 = vst [vmem:[#allocation6 + $0xe88] sm:$0xff] %v2028_v37  ;;  %2541 = vst [vmem:[#allocation6 + $0xe90] sm:$0xff] %v2029_v38  ;;  %v2034_v49 = vsub.f32 0.5, %v498_v46  ;;  %v2035_v50 = vsub.f32 0.5, %v499_v47  ;;  %v501_v52 = vld [vmem:[#allocation2 + $0xed0] sm:$0xff] }
 0x101   :  { %2542 = vst [vmem:[#allocation6 + $0xe98] sm:$0xff] %v2030_v39  ;;  %v2036_v51 = vsub.f32 0.5, %v500_v48  ;;  %v502_v53 = vld [vmem:[#allocation2 + $0xed8] sm:$0xff]  ;;  %v503_v54 = vld [vmem:[#allocation2 + $0xee0] sm:$0xff]  ;;  %2543 = vst [vmem:[#allocation6 + $0xea0] sm:$0xff] %v2031_v43  ;;  %v2037_v55 = vsub.f32 0.5, %v501_v52 }
 0x102   :  { %2544 = vst [vmem:[#allocation6 + $0xea8] sm:$0xff] %v2032_v44  ;;  %2545 = vst [vmem:[#allocation6 + $0xeb0] sm:$0xff] %v2033_v45  ;;  %v2038_v56 = vsub.f32 0.5, %v502_v53  ;;  %v2039_v57 = vsub.f32 0.5, %v503_v54  ;;  %v504_v58 = vld [vmem:[#allocation2 + $0xee8] sm:$0xff]  ;;  %v505_v59 = vld [vmem:[#allocation2 + $0xef0] sm:$0xff] }
 0x103   :  { %v506_v60 = vld [vmem:[#allocation2 + $0xef8] sm:$0xff]  ;;  %2546 = vst [vmem:[#allocation6 + $0xeb8] sm:$0xff] %v2034_v49  ;;  %2547 = vst [vmem:[#allocation6 + $0xec0] sm:$0xff] %v2035_v50  ;;  %v2040_v61 = vsub.f32 0.5, %v504_v58  ;;  %v2041_v62 = vsub.f32 0.5, %v505_v59  ;;  %v507_v0 = vld [vmem:[#allocation2 + $0xf00] sm:$0xff] }
 0x104   :  { %2548 = vst [vmem:[#allocation6 + $0xec8] sm:$0xff] %v2036_v51  ;;  %v2042_v63 = vsub.f32 0.5, %v506_v60  ;;  %v508_v1 = vld [vmem:[#allocation2 + $0xf08] sm:$0xff]  ;;  %v509_v2 = vld [vmem:[#allocation2 + $0xf10] sm:$0xff]  ;;  %2549 = vst [vmem:[#allocation6 + $0xed0] sm:$0xff] %v2037_v55  ;;  %v2043_v3 = vsub.f32 0.5, %v507_v0 }
 0x105   :  { %2550 = vst [vmem:[#allocation6 + $0xed8] sm:$0xff] %v2038_v56  ;;  %2551 = vst [vmem:[#allocation6 + $0xee0] sm:$0xff] %v2039_v57  ;;  %v2044_v4 = vsub.f32 0.5, %v508_v1  ;;  %v2045_v5 = vsub.f32 0.5, %v509_v2  ;;  %v510_v6 = vld [vmem:[#allocation2 + $0xf18] sm:$0xff]  ;;  %v511_v7 = vld [vmem:[#allocation2 + $0xf20] sm:$0xff] }
 0x106   :  { %v512_v8 = vld [vmem:[#allocation2 + $0xf28] sm:$0xff]  ;;  %2552 = vst [vmem:[#allocation6 + $0xee8] sm:$0xff] %v2040_v61  ;;  %2553 = vst [vmem:[#allocation6 + $0xef0] sm:$0xff] %v2041_v62  ;;  %v2046_v9 = vsub.f32 0.5, %v510_v6  ;;  %v2047_v10 = vsub.f32 0.5, %v511_v7  ;;  %v513_v12 = vld [vmem:[#allocation2 + $0xf30] sm:$0xff] }
 0x107   :  { %2554 = vst [vmem:[#allocation6 + $0xef8] sm:$0xff] %v2042_v63  ;;  %v2048_v11 = vsub.f32 0.5, %v512_v8  ;;  %v514_v13 = vld [vmem:[#allocation2 + $0xf38] sm:$0xff]  ;;  %v515_v14 = vld [vmem:[#allocation2 + $0xf40] sm:$0xff]  ;;  %2555 = vst [vmem:[#allocation6 + $0xf00] sm:$0xff] %v2043_v3  ;;  %v2049_v15 = vsub.f32 0.5, %v513_v12 }
 0x108   :  { %2556 = vst [vmem:[#allocation6 + $0xf08] sm:$0xff] %v2044_v4  ;;  %2557 = vst [vmem:[#allocation6 + $0xf10] sm:$0xff] %v2045_v5  ;;  %v2050_v16 = vsub.f32 0.5, %v514_v13  ;;  %v2051_v17 = vsub.f32 0.5, %v515_v14  ;;  %v516_v18 = vld [vmem:[#allocation2 + $0xf48] sm:$0xff]  ;;  %v517_v19 = vld [vmem:[#allocation2 + $0xf50] sm:$0xff] }
 0x109   :  { %v518_v20 = vld [vmem:[#allocation2 + $0xf58] sm:$0xff]  ;;  %2558 = vst [vmem:[#allocation6 + $0xf18] sm:$0xff] %v2046_v9  ;;  %2559 = vst [vmem:[#allocation6 + $0xf20] sm:$0xff] %v2047_v10  ;;  %v2052_v21 = vsub.f32 0.5, %v516_v18  ;;  %v2053_v22 = vsub.f32 0.5, %v517_v19  ;;  %v519_v24 = vld [vmem:[#allocation2 + $0xf60] sm:$0xff] }
 0x10a   :  { %2560 = vst [vmem:[#allocation6 + $0xf28] sm:$0xff] %v2048_v11  ;;  %v2054_v23 = vsub.f32 0.5, %v518_v20  ;;  %v520_v25 = vld [vmem:[#allocation2 + $0xf68] sm:$0xff]  ;;  %v521_v26 = vld [vmem:[#allocation2 + $0xf70] sm:$0xff]  ;;  %2561 = vst [vmem:[#allocation6 + $0xf30] sm:$0xff] %v2049_v15  ;;  %v2055_v27 = vsub.f32 0.5, %v519_v24 }
 0x10b   :  { %2562 = vst [vmem:[#allocation6 + $0xf38] sm:$0xff] %v2050_v16  ;;  %2563 = vst [vmem:[#allocation6 + $0xf40] sm:$0xff] %v2051_v17  ;;  %v2056_v28 = vsub.f32 0.5, %v520_v25  ;;  %v2057_v29 = vsub.f32 0.5, %v521_v26  ;;  %v522_v30 = vld [vmem:[#allocation2 + $0xf78] sm:$0xff]  ;;  %v523_v31 = vld [vmem:[#allocation2 + $0xf80] sm:$0xff] }
 0x10c   :  { %v524_v32 = vld [vmem:[#allocation2 + $0xf88] sm:$0xff]  ;;  %2564 = vst [vmem:[#allocation6 + $0xf48] sm:$0xff] %v2052_v21  ;;  %2565 = vst [vmem:[#allocation6 + $0xf50] sm:$0xff] %v2053_v22  ;;  %v2058_v33 = vsub.f32 0.5, %v522_v30  ;;  %v2059_v34 = vsub.f32 0.5, %v523_v31  ;;  %v525_v36 = vld [vmem:[#allocation2 + $0xf90] sm:$0xff] }
 0x10d   :  { %2566 = vst [vmem:[#allocation6 + $0xf58] sm:$0xff] %v2054_v23  ;;  %v2060_v35 = vsub.f32 0.5, %v524_v32  ;;  %v526_v37 = vld [vmem:[#allocation2 + $0xf98] sm:$0xff]  ;;  %v527_v38 = vld [vmem:[#allocation2 + $0xfa0] sm:$0xff]  ;;  %2567 = vst [vmem:[#allocation6 + $0xf60] sm:$0xff] %v2055_v27  ;;  %v2061_v39 = vsub.f32 0.5, %v525_v36 }
 0x10e   :  { %2568 = vst [vmem:[#allocation6 + $0xf68] sm:$0xff] %v2056_v28  ;;  %2569 = vst [vmem:[#allocation6 + $0xf70] sm:$0xff] %v2057_v29  ;;  %v2062_v40 = vsub.f32 0.5, %v526_v37  ;;  %v2063_v41 = vsub.f32 0.5, %v527_v38  ;;  %v528_v42 = vld [vmem:[#allocation2 + $0xfa8] sm:$0xff]  ;;  %v529_v43 = vld [vmem:[#allocation2 + $0xfb0] sm:$0xff] }
 0x10f   :  { %v530_v44 = vld [vmem:[#allocation2 + $0xfb8] sm:$0xff]  ;;  %2570 = vst [vmem:[#allocation6 + $0xf78] sm:$0xff] %v2058_v33  ;;  %2571 = vst [vmem:[#allocation6 + $0xf80] sm:$0xff] %v2059_v34  ;;  %v2064_v45 = vsub.f32 0.5, %v528_v42  ;;  %v2065_v46 = vsub.f32 0.5, %v529_v43  ;;  %v531_v48 = vld [vmem:[#allocation2 + $0xfc0] sm:$0xff] }
 0x110   :  { %2572 = vst [vmem:[#allocation6 + $0xf88] sm:$0xff] %v2060_v35  ;;  %v2066_v47 = vsub.f32 0.5, %v530_v44  ;;  %v532_v49 = vld [vmem:[#allocation2 + $0xfc8] sm:$0xff]  ;;  %v533_v50 = vld [vmem:[#allocation2 + $0xfd0] sm:$0xff]  ;;  %2573 = vst [vmem:[#allocation6 + $0xf90] sm:$0xff] %v2061_v39  ;;  %v2067_v51 = vsub.f32 0.5, %v531_v48 }
 0x111   :  { %2574 = vst [vmem:[#allocation6 + $0xf98] sm:$0xff] %v2062_v40  ;;  %2575 = vst [vmem:[#allocation6 + $0xfa0] sm:$0xff] %v2063_v41  ;;  %v2068_v52 = vsub.f32 0.5, %v532_v49  ;;  %v2069_v53 = vsub.f32 0.5, %v533_v50  ;;  %v534_v54 = vld [vmem:[#allocation2 + $0xfd8] sm:$0xff]  ;;  %v535_v55 = vld [vmem:[#allocation2 + $0xfe0] sm:$0xff] }
 0x112   :  { %v536_v56 = vld [vmem:[#allocation2 + $0xfe8] sm:$0xff]  ;;  %2576 = vst [vmem:[#allocation6 + $0xfa8] sm:$0xff] %v2064_v45  ;;  %2577 = vst [vmem:[#allocation6 + $0xfb0] sm:$0xff] %v2065_v46  ;;  %v2070_v57 = vsub.f32 0.5, %v534_v54  ;;  %v2071_v58 = vsub.f32 0.5, %v535_v55  ;;  %v537_v60 = vld [vmem:[#allocation2 + $0xff0] sm:$0xff] }
 0x113   :  { %2578 = vst [vmem:[#allocation6 + $0xfb8] sm:$0xff] %v2066_v47  ;;  %v2072_v59 = vsub.f32 0.5, %v536_v56  ;;  %v538_v61 = vld [vmem:[#allocation2 + $0xff8] sm:$0xff]  ;;  %v4689_v62 = vld [vmem:[#allocation2] sm:$0xff]  ;;  %2579 = vst [vmem:[#allocation6 + $0xfc0] sm:$0xff] %v2067_v51  ;;  %v2073_v0 = vsub.f32 0.5, %v537_v60 }
 0x114   :  { %v4171_v63 = vadd.f32 -0.5, %v4689_v62  ;;  %2580 = vst [vmem:[#allocation6 + $0xfc8] sm:$0xff] %v2068_v52  ;;  %2581 = vst [vmem:[#allocation6 + $0xfd0] sm:$0xff] %v2069_v53  ;;  %v2074_v1 = vsub.f32 0.5, %v538_v61  ;;  %v4690_v2 = vld [vmem:[#allocation2 + $0x8] sm:$0xff]  ;;  %v4691_v4 = vld [vmem:[#allocation2 + $0x10] sm:$0xff] }
 0x115   :  { %v4172_v3 = vadd.f32 -0.5, %v4690_v2  ;;  %v4173_v5 = vadd.f32 -0.5, %v4691_v4  ;;  %2582 = vst [vmem:[#allocation6 + $0xfd8] sm:$0xff] %v2070_v57  ;;  %2583 = vst [vmem:[#allocation6 + $0xfe0] sm:$0xff] %v2071_v58  ;;  %v4692_v6 = vld [vmem:[#allocation2 + $0x18] sm:$0xff]  ;;  %v4693_v8 = vld [vmem:[#allocation2 + $0x20] sm:$0xff] }
 0x116   :  { %2584 = vst [vmem:[#allocation6 + $0xfe8] sm:$0xff] %v2072_v59  ;;  %1051 = vst [vmem:[#allocation5] sm:$0xff] %v4171_v63  ;;  %v4174_v7 = vadd.f32 -0.5, %v4692_v6  ;;  %v4175_v9 = vadd.f32 -0.5, %v4693_v8  ;;  %v4694_v10 = vld [vmem:[#allocation2 + $0x28] sm:$0xff]  ;;  %v4695_v12 = vld [vmem:[#allocation2 + $0x30] sm:$0xff] }
 0x117   :  { %v4176_v11 = vadd.f32 -0.5, %v4694_v10  ;;  %v4177_v13 = vadd.f32 -0.5, %v4695_v12  ;;  %2585 = vst [vmem:[#allocation6 + $0xff0] sm:$0xff] %v2073_v0  ;;  %2586 = vst [vmem:[#allocation6 + $0xff8] sm:$0xff] %v2074_v1  ;;  %v4696_v14 = vld [vmem:[#allocation2 + $0x38] sm:$0xff]  ;;  %v4697_v16 = vld [vmem:[#allocation2 + $0x40] sm:$0xff] }
 0x118   :  { %1052 = vst [vmem:[#allocation5 + $0x8] sm:$0xff] %v4172_v3  ;;  %1053 = vst [vmem:[#allocation5 + $0x10] sm:$0xff] %v4173_v5  ;;  %v4178_v15 = vadd.f32 -0.5, %v4696_v14  ;;  %v4179_v17 = vadd.f32 -0.5, %v4697_v16  ;;  %v4698_v18 = vld [vmem:[#allocation2 + $0x48] sm:$0xff]  ;;  %v4699_v20 = vld [vmem:[#allocation2 + $0x50] sm:$0xff] }
 0x119   :  { %v4180_v19 = vadd.f32 -0.5, %v4698_v18  ;;  %v4181_v21 = vadd.f32 -0.5, %v4699_v20  ;;  %1054 = vst [vmem:[#allocation5 + $0x18] sm:$0xff] %v4174_v7  ;;  %1055 = vst [vmem:[#allocation5 + $0x20] sm:$0xff] %v4175_v9  ;;  %v4700_v22 = vld [vmem:[#allocation2 + $0x58] sm:$0xff]  ;;  %v4701_v24 = vld [vmem:[#allocation2 + $0x60] sm:$0xff] }
 0x11a   :  { %1056 = vst [vmem:[#allocation5 + $0x28] sm:$0xff] %v4176_v11  ;;  %1057 = vst [vmem:[#allocation5 + $0x30] sm:$0xff] %v4177_v13  ;;  %v4182_v23 = vadd.f32 -0.5, %v4700_v22  ;;  %v4183_v25 = vadd.f32 -0.5, %v4701_v24  ;;  %v4702_v26 = vld [vmem:[#allocation2 + $0x68] sm:$0xff]  ;;  %v4703_v28 = vld [vmem:[#allocation2 + $0x70] sm:$0xff] }
 0x11b   :  { %v4184_v27 = vadd.f32 -0.5, %v4702_v26  ;;  %v4185_v29 = vadd.f32 -0.5, %v4703_v28  ;;  %1058 = vst [vmem:[#allocation5 + $0x38] sm:$0xff] %v4178_v15  ;;  %1059 = vst [vmem:[#allocation5 + $0x40] sm:$0xff] %v4179_v17  ;;  %v4704_v30 = vld [vmem:[#allocation2 + $0x78] sm:$0xff]  ;;  %v4705_v32 = vld [vmem:[#allocation2 + $0x80] sm:$0xff] }
 0x11c   :  { %1060 = vst [vmem:[#allocation5 + $0x48] sm:$0xff] %v4180_v19  ;;  %1061 = vst [vmem:[#allocation5 + $0x50] sm:$0xff] %v4181_v21  ;;  %v4186_v31 = vadd.f32 -0.5, %v4704_v30  ;;  %v4187_v33 = vadd.f32 -0.5, %v4705_v32  ;;  %v4706_v34 = vld [vmem:[#allocation2 + $0x88] sm:$0xff]  ;;  %v4707_v36 = vld [vmem:[#allocation2 + $0x90] sm:$0xff] }
 0x11d   :  { %v4188_v35 = vadd.f32 -0.5, %v4706_v34  ;;  %v4189_v37 = vadd.f32 -0.5, %v4707_v36  ;;  %1062 = vst [vmem:[#allocation5 + $0x58] sm:$0xff] %v4182_v23  ;;  %1063 = vst [vmem:[#allocation5 + $0x60] sm:$0xff] %v4183_v25  ;;  %v4708_v38 = vld [vmem:[#allocation2 + $0x98] sm:$0xff]  ;;  %v4709_v40 = vld [vmem:[#allocation2 + $0xa0] sm:$0xff] }
 0x11e   :  { %1064 = vst [vmem:[#allocation5 + $0x68] sm:$0xff] %v4184_v27  ;;  %1065 = vst [vmem:[#allocation5 + $0x70] sm:$0xff] %v4185_v29  ;;  %v4190_v39 = vadd.f32 -0.5, %v4708_v38  ;;  %v4191_v41 = vadd.f32 -0.5, %v4709_v40  ;;  %v4710_v42 = vld [vmem:[#allocation2 + $0xa8] sm:$0xff]  ;;  %v4711_v44 = vld [vmem:[#allocation2 + $0xb0] sm:$0xff] }
 0x11f   :  { %v4192_v43 = vadd.f32 -0.5, %v4710_v42  ;;  %v4193_v45 = vadd.f32 -0.5, %v4711_v44  ;;  %1066 = vst [vmem:[#allocation5 + $0x78] sm:$0xff] %v4186_v31  ;;  %1067 = vst [vmem:[#allocation5 + $0x80] sm:$0xff] %v4187_v33  ;;  %v4712_v46 = vld [vmem:[#allocation2 + $0xb8] sm:$0xff]  ;;  %v4713_v48 = vld [vmem:[#allocation2 + $0xc0] sm:$0xff] }
 0x120   :  { %1068 = vst [vmem:[#allocation5 + $0x88] sm:$0xff] %v4188_v35  ;;  %1069 = vst [vmem:[#allocation5 + $0x90] sm:$0xff] %v4189_v37  ;;  %v4194_v47 = vadd.f32 -0.5, %v4712_v46  ;;  %v4195_v49 = vadd.f32 -0.5, %v4713_v48  ;;  %v4714_v50 = vld [vmem:[#allocation2 + $0xc8] sm:$0xff]  ;;  %v4715_v52 = vld [vmem:[#allocation2 + $0xd0] sm:$0xff] }
 0x121   :  { %v4196_v51 = vadd.f32 -0.5, %v4714_v50  ;;  %v4197_v53 = vadd.f32 -0.5, %v4715_v52  ;;  %1070 = vst [vmem:[#allocation5 + $0x98] sm:$0xff] %v4190_v39  ;;  %1071 = vst [vmem:[#allocation5 + $0xa0] sm:$0xff] %v4191_v41  ;;  %v4716_v54 = vld [vmem:[#allocation2 + $0xd8] sm:$0xff]  ;;  %v4717_v56 = vld [vmem:[#allocation2 + $0xe0] sm:$0xff] }
 0x122   :  { %1072 = vst [vmem:[#allocation5 + $0xa8] sm:$0xff] %v4192_v43  ;;  %1073 = vst [vmem:[#allocation5 + $0xb0] sm:$0xff] %v4193_v45  ;;  %v4198_v55 = vadd.f32 -0.5, %v4716_v54  ;;  %v4199_v57 = vadd.f32 -0.5, %v4717_v56  ;;  %v4718_v58 = vld [vmem:[#allocation2 + $0xe8] sm:$0xff]  ;;  %v4719_v60 = vld [vmem:[#allocation2 + $0xf0] sm:$0xff] }
 0x123   :  { %v4200_v59 = vadd.f32 -0.5, %v4718_v58  ;;  %v4201_v61 = vadd.f32 -0.5, %v4719_v60  ;;  %1074 = vst [vmem:[#allocation5 + $0xb8] sm:$0xff] %v4194_v47  ;;  %1075 = vst [vmem:[#allocation5 + $0xc0] sm:$0xff] %v4195_v49  ;;  %v4720_v62 = vld [vmem:[#allocation2 + $0xf8] sm:$0xff]  ;;  %v4721_v0 = vld [vmem:[#allocation2 + $0x100] sm:$0xff] }
 0x124   :  { %1076 = vst [vmem:[#allocation5 + $0xc8] sm:$0xff] %v4196_v51  ;;  %1077 = vst [vmem:[#allocation5 + $0xd0] sm:$0xff] %v4197_v53  ;;  %v4202_v63 = vadd.f32 -0.5, %v4720_v62  ;;  %v4203_v1 = vadd.f32 -0.5, %v4721_v0  ;;  %v4722_v2 = vld [vmem:[#allocation2 + $0x108] sm:$0xff]  ;;  %v4723_v4 = vld [vmem:[#allocation2 + $0x110] sm:$0xff] }
 0x125   :  { %v4204_v3 = vadd.f32 -0.5, %v4722_v2  ;;  %v4205_v5 = vadd.f32 -0.5, %v4723_v4  ;;  %1078 = vst [vmem:[#allocation5 + $0xd8] sm:$0xff] %v4198_v55  ;;  %1079 = vst [vmem:[#allocation5 + $0xe0] sm:$0xff] %v4199_v57  ;;  %v4724_v6 = vld [vmem:[#allocation2 + $0x118] sm:$0xff]  ;;  %v4725_v8 = vld [vmem:[#allocation2 + $0x120] sm:$0xff] }
 0x126   :  { %1080 = vst [vmem:[#allocation5 + $0xe8] sm:$0xff] %v4200_v59  ;;  %1081 = vst [vmem:[#allocation5 + $0xf0] sm:$0xff] %v4201_v61  ;;  %v4206_v7 = vadd.f32 -0.5, %v4724_v6  ;;  %v4207_v9 = vadd.f32 -0.5, %v4725_v8  ;;  %v4726_v10 = vld [vmem:[#allocation2 + $0x128] sm:$0xff]  ;;  %v4727_v12 = vld [vmem:[#allocation2 + $0x130] sm:$0xff] }
 0x127   :  { %v4208_v11 = vadd.f32 -0.5, %v4726_v10  ;;  %v4209_v13 = vadd.f32 -0.5, %v4727_v12  ;;  %1082 = vst [vmem:[#allocation5 + $0xf8] sm:$0xff] %v4202_v63  ;;  %1083 = vst [vmem:[#allocation5 + $0x100] sm:$0xff] %v4203_v1  ;;  %v4728_v14 = vld [vmem:[#allocation2 + $0x138] sm:$0xff]  ;;  %v4729_v16 = vld [vmem:[#allocation2 + $0x140] sm:$0xff] }
 0x128   :  { %1084 = vst [vmem:[#allocation5 + $0x108] sm:$0xff] %v4204_v3  ;;  %1085 = vst [vmem:[#allocation5 + $0x110] sm:$0xff] %v4205_v5  ;;  %v4210_v15 = vadd.f32 -0.5, %v4728_v14  ;;  %v4211_v17 = vadd.f32 -0.5, %v4729_v16  ;;  %v4730_v18 = vld [vmem:[#allocation2 + $0x148] sm:$0xff]  ;;  %v4731_v20 = vld [vmem:[#allocation2 + $0x150] sm:$0xff] }
 0x129   :  { %v4212_v19 = vadd.f32 -0.5, %v4730_v18  ;;  %v4213_v21 = vadd.f32 -0.5, %v4731_v20  ;;  %1086 = vst [vmem:[#allocation5 + $0x118] sm:$0xff] %v4206_v7  ;;  %1087 = vst [vmem:[#allocation5 + $0x120] sm:$0xff] %v4207_v9  ;;  %v4732_v22 = vld [vmem:[#allocation2 + $0x158] sm:$0xff]  ;;  %v4733_v24 = vld [vmem:[#allocation2 + $0x160] sm:$0xff] }
 0x12a   :  { %1088 = vst [vmem:[#allocation5 + $0x128] sm:$0xff] %v4208_v11  ;;  %1089 = vst [vmem:[#allocation5 + $0x130] sm:$0xff] %v4209_v13  ;;  %v4214_v23 = vadd.f32 -0.5, %v4732_v22  ;;  %v4215_v25 = vadd.f32 -0.5, %v4733_v24  ;;  %v4734_v26 = vld [vmem:[#allocation2 + $0x168] sm:$0xff]  ;;  %v4735_v28 = vld [vmem:[#allocation2 + $0x170] sm:$0xff] }
 0x12b   :  { %v4216_v27 = vadd.f32 -0.5, %v4734_v26  ;;  %v4217_v29 = vadd.f32 -0.5, %v4735_v28  ;;  %1090 = vst [vmem:[#allocation5 + $0x138] sm:$0xff] %v4210_v15  ;;  %1091 = vst [vmem:[#allocation5 + $0x140] sm:$0xff] %v4211_v17  ;;  %v4736_v30 = vld [vmem:[#allocation2 + $0x178] sm:$0xff]  ;;  %v4737_v32 = vld [vmem:[#allocation2 + $0x180] sm:$0xff] }
 0x12c   :  { %1092 = vst [vmem:[#allocation5 + $0x148] sm:$0xff] %v4212_v19  ;;  %1093 = vst [vmem:[#allocation5 + $0x150] sm:$0xff] %v4213_v21  ;;  %v4218_v31 = vadd.f32 -0.5, %v4736_v30  ;;  %v4219_v33 = vadd.f32 -0.5, %v4737_v32  ;;  %v4738_v34 = vld [vmem:[#allocation2 + $0x188] sm:$0xff]  ;;  %v4739_v36 = vld [vmem:[#allocation2 + $0x190] sm:$0xff] }
 0x12d   :  { %v4220_v35 = vadd.f32 -0.5, %v4738_v34  ;;  %v4221_v37 = vadd.f32 -0.5, %v4739_v36  ;;  %1094 = vst [vmem:[#allocation5 + $0x158] sm:$0xff] %v4214_v23  ;;  %1095 = vst [vmem:[#allocation5 + $0x160] sm:$0xff] %v4215_v25  ;;  %v4740_v38 = vld [vmem:[#allocation2 + $0x198] sm:$0xff]  ;;  %v4741_v40 = vld [vmem:[#allocation2 + $0x1a0] sm:$0xff] }
 0x12e   :  { %1096 = vst [vmem:[#allocation5 + $0x168] sm:$0xff] %v4216_v27  ;;  %1097 = vst [vmem:[#allocation5 + $0x170] sm:$0xff] %v4217_v29  ;;  %v4222_v39 = vadd.f32 -0.5, %v4740_v38  ;;  %v4223_v41 = vadd.f32 -0.5, %v4741_v40  ;;  %v4742_v42 = vld [vmem:[#allocation2 + $0x1a8] sm:$0xff]  ;;  %v4743_v44 = vld [vmem:[#allocation2 + $0x1b0] sm:$0xff] }
 0x12f   :  { %v4224_v43 = vadd.f32 -0.5, %v4742_v42  ;;  %v4225_v45 = vadd.f32 -0.5, %v4743_v44  ;;  %1098 = vst [vmem:[#allocation5 + $0x178] sm:$0xff] %v4218_v31  ;;  %1099 = vst [vmem:[#allocation5 + $0x180] sm:$0xff] %v4219_v33  ;;  %v4744_v46 = vld [vmem:[#allocation2 + $0x1b8] sm:$0xff]  ;;  %v4745_v48 = vld [vmem:[#allocation2 + $0x1c0] sm:$0xff] }
 0x130   :  { %1100 = vst [vmem:[#allocation5 + $0x188] sm:$0xff] %v4220_v35  ;;  %1101 = vst [vmem:[#allocation5 + $0x190] sm:$0xff] %v4221_v37  ;;  %v4226_v47 = vadd.f32 -0.5, %v4744_v46  ;;  %v4227_v49 = vadd.f32 -0.5, %v4745_v48  ;;  %v4746_v50 = vld [vmem:[#allocation2 + $0x1c8] sm:$0xff]  ;;  %v4747_v52 = vld [vmem:[#allocation2 + $0x1d0] sm:$0xff] }
 0x131   :  { %v4228_v51 = vadd.f32 -0.5, %v4746_v50  ;;  %v4229_v53 = vadd.f32 -0.5, %v4747_v52  ;;  %1102 = vst [vmem:[#allocation5 + $0x198] sm:$0xff] %v4222_v39  ;;  %1103 = vst [vmem:[#allocation5 + $0x1a0] sm:$0xff] %v4223_v41  ;;  %v4748_v54 = vld [vmem:[#allocation2 + $0x1d8] sm:$0xff]  ;;  %v4749_v56 = vld [vmem:[#allocation2 + $0x1e0] sm:$0xff] }
 0x132   :  { %1104 = vst [vmem:[#allocation5 + $0x1a8] sm:$0xff] %v4224_v43  ;;  %1105 = vst [vmem:[#allocation5 + $0x1b0] sm:$0xff] %v4225_v45  ;;  %v4230_v55 = vadd.f32 -0.5, %v4748_v54  ;;  %v4231_v57 = vadd.f32 -0.5, %v4749_v56  ;;  %v4750_v58 = vld [vmem:[#allocation2 + $0x1e8] sm:$0xff]  ;;  %v4751_v60 = vld [vmem:[#allocation2 + $0x1f0] sm:$0xff] }
 0x133   :  { %v4232_v59 = vadd.f32 -0.5, %v4750_v58  ;;  %v4233_v61 = vadd.f32 -0.5, %v4751_v60  ;;  %1106 = vst [vmem:[#allocation5 + $0x1b8] sm:$0xff] %v4226_v47  ;;  %1107 = vst [vmem:[#allocation5 + $0x1c0] sm:$0xff] %v4227_v49  ;;  %v4752_v62 = vld [vmem:[#allocation2 + $0x1f8] sm:$0xff]  ;;  %v4753_v0 = vld [vmem:[#allocation2 + $0x200] sm:$0xff] }
 0x134   :  { %1108 = vst [vmem:[#allocation5 + $0x1c8] sm:$0xff] %v4228_v51  ;;  %1109 = vst [vmem:[#allocation5 + $0x1d0] sm:$0xff] %v4229_v53  ;;  %v4234_v63 = vadd.f32 -0.5, %v4752_v62  ;;  %v4235_v1 = vadd.f32 -0.5, %v4753_v0  ;;  %v4754_v2 = vld [vmem:[#allocation2 + $0x208] sm:$0xff]  ;;  %v4755_v4 = vld [vmem:[#allocation2 + $0x210] sm:$0xff] }
 0x135   :  { %v4236_v3 = vadd.f32 -0.5, %v4754_v2  ;;  %v4237_v5 = vadd.f32 -0.5, %v4755_v4  ;;  %1110 = vst [vmem:[#allocation5 + $0x1d8] sm:$0xff] %v4230_v55  ;;  %1111 = vst [vmem:[#allocation5 + $0x1e0] sm:$0xff] %v4231_v57  ;;  %v4756_v6 = vld [vmem:[#allocation2 + $0x218] sm:$0xff]  ;;  %v4757_v8 = vld [vmem:[#allocation2 + $0x220] sm:$0xff] }
 0x136   :  { %1112 = vst [vmem:[#allocation5 + $0x1e8] sm:$0xff] %v4232_v59  ;;  %1113 = vst [vmem:[#allocation5 + $0x1f0] sm:$0xff] %v4233_v61  ;;  %v4238_v7 = vadd.f32 -0.5, %v4756_v6  ;;  %v4239_v9 = vadd.f32 -0.5, %v4757_v8  ;;  %v4758_v10 = vld [vmem:[#allocation2 + $0x228] sm:$0xff]  ;;  %v4759_v12 = vld [vmem:[#allocation2 + $0x230] sm:$0xff] }
 0x137   :  { %v4240_v11 = vadd.f32 -0.5, %v4758_v10  ;;  %v4241_v13 = vadd.f32 -0.5, %v4759_v12  ;;  %1114 = vst [vmem:[#allocation5 + $0x1f8] sm:$0xff] %v4234_v63  ;;  %1115 = vst [vmem:[#allocation5 + $0x200] sm:$0xff] %v4235_v1  ;;  %v4760_v14 = vld [vmem:[#allocation2 + $0x238] sm:$0xff]  ;;  %v4761_v16 = vld [vmem:[#allocation2 + $0x240] sm:$0xff] }
 0x138   :  { %1116 = vst [vmem:[#allocation5 + $0x208] sm:$0xff] %v4236_v3  ;;  %1117 = vst [vmem:[#allocation5 + $0x210] sm:$0xff] %v4237_v5  ;;  %v4242_v15 = vadd.f32 -0.5, %v4760_v14  ;;  %v4243_v17 = vadd.f32 -0.5, %v4761_v16  ;;  %v4762_v18 = vld [vmem:[#allocation2 + $0x248] sm:$0xff]  ;;  %v4763_v20 = vld [vmem:[#allocation2 + $0x250] sm:$0xff] }
 0x139   :  { %v4244_v19 = vadd.f32 -0.5, %v4762_v18  ;;  %v4245_v21 = vadd.f32 -0.5, %v4763_v20  ;;  %1118 = vst [vmem:[#allocation5 + $0x218] sm:$0xff] %v4238_v7  ;;  %1119 = vst [vmem:[#allocation5 + $0x220] sm:$0xff] %v4239_v9  ;;  %v4764_v22 = vld [vmem:[#allocation2 + $0x258] sm:$0xff]  ;;  %v4765_v24 = vld [vmem:[#allocation2 + $0x260] sm:$0xff] }
 0x13a   :  { %1120 = vst [vmem:[#allocation5 + $0x228] sm:$0xff] %v4240_v11  ;;  %1121 = vst [vmem:[#allocation5 + $0x230] sm:$0xff] %v4241_v13  ;;  %v4246_v23 = vadd.f32 -0.5, %v4764_v22  ;;  %v4247_v25 = vadd.f32 -0.5, %v4765_v24  ;;  %v4766_v26 = vld [vmem:[#allocation2 + $0x268] sm:$0xff]  ;;  %v4767_v28 = vld [vmem:[#allocation2 + $0x270] sm:$0xff] }
 0x13b   :  { %v4248_v27 = vadd.f32 -0.5, %v4766_v26  ;;  %v4249_v29 = vadd.f32 -0.5, %v4767_v28  ;;  %1122 = vst [vmem:[#allocation5 + $0x238] sm:$0xff] %v4242_v15  ;;  %1123 = vst [vmem:[#allocation5 + $0x240] sm:$0xff] %v4243_v17  ;;  %v4768_v30 = vld [vmem:[#allocation2 + $0x278] sm:$0xff]  ;;  %v4769_v32 = vld [vmem:[#allocation2 + $0x280] sm:$0xff] }
 0x13c   :  { %1124 = vst [vmem:[#allocation5 + $0x248] sm:$0xff] %v4244_v19  ;;  %1125 = vst [vmem:[#allocation5 + $0x250] sm:$0xff] %v4245_v21  ;;  %v4250_v31 = vadd.f32 -0.5, %v4768_v30  ;;  %v4251_v33 = vadd.f32 -0.5, %v4769_v32  ;;  %v4770_v34 = vld [vmem:[#allocation2 + $0x288] sm:$0xff]  ;;  %v4771_v36 = vld [vmem:[#allocation2 + $0x290] sm:$0xff] }
 0x13d   :  { %v4252_v35 = vadd.f32 -0.5, %v4770_v34  ;;  %v4253_v37 = vadd.f32 -0.5, %v4771_v36  ;;  %1126 = vst [vmem:[#allocation5 + $0x258] sm:$0xff] %v4246_v23  ;;  %1127 = vst [vmem:[#allocation5 + $0x260] sm:$0xff] %v4247_v25  ;;  %v4772_v38 = vld [vmem:[#allocation2 + $0x298] sm:$0xff]  ;;  %v4773_v40 = vld [vmem:[#allocation2 + $0x2a0] sm:$0xff] }
 0x13e   :  { %1128 = vst [vmem:[#allocation5 + $0x268] sm:$0xff] %v4248_v27  ;;  %1129 = vst [vmem:[#allocation5 + $0x270] sm:$0xff] %v4249_v29  ;;  %v4254_v39 = vadd.f32 -0.5, %v4772_v38  ;;  %v4255_v41 = vadd.f32 -0.5, %v4773_v40  ;;  %v4774_v42 = vld [vmem:[#allocation2 + $0x2a8] sm:$0xff]  ;;  %v4775_v44 = vld [vmem:[#allocation2 + $0x2b0] sm:$0xff] }
 0x13f   :  { %v4256_v43 = vadd.f32 -0.5, %v4774_v42  ;;  %v4257_v45 = vadd.f32 -0.5, %v4775_v44  ;;  %1130 = vst [vmem:[#allocation5 + $0x278] sm:$0xff] %v4250_v31  ;;  %1131 = vst [vmem:[#allocation5 + $0x280] sm:$0xff] %v4251_v33  ;;  %v4776_v46 = vld [vmem:[#allocation2 + $0x2b8] sm:$0xff]  ;;  %v4777_v48 = vld [vmem:[#allocation2 + $0x2c0] sm:$0xff] }
 0x140   :  { %1132 = vst [vmem:[#allocation5 + $0x288] sm:$0xff] %v4252_v35  ;;  %1133 = vst [vmem:[#allocation5 + $0x290] sm:$0xff] %v4253_v37  ;;  %v4258_v47 = vadd.f32 -0.5, %v4776_v46  ;;  %v4259_v49 = vadd.f32 -0.5, %v4777_v48  ;;  %v4778_v50 = vld [vmem:[#allocation2 + $0x2c8] sm:$0xff]  ;;  %v4779_v52 = vld [vmem:[#allocation2 + $0x2d0] sm:$0xff] }
 0x141   :  { %v4260_v51 = vadd.f32 -0.5, %v4778_v50  ;;  %v4261_v53 = vadd.f32 -0.5, %v4779_v52  ;;  %1134 = vst [vmem:[#allocation5 + $0x298] sm:$0xff] %v4254_v39  ;;  %1135 = vst [vmem:[#allocation5 + $0x2a0] sm:$0xff] %v4255_v41  ;;  %v4780_v54 = vld [vmem:[#allocation2 + $0x2d8] sm:$0xff]  ;;  %v4781_v56 = vld [vmem:[#allocation2 + $0x2e0] sm:$0xff] }
 0x142   :  { %1136 = vst [vmem:[#allocation5 + $0x2a8] sm:$0xff] %v4256_v43  ;;  %1137 = vst [vmem:[#allocation5 + $0x2b0] sm:$0xff] %v4257_v45  ;;  %v4262_v55 = vadd.f32 -0.5, %v4780_v54  ;;  %v4263_v57 = vadd.f32 -0.5, %v4781_v56  ;;  %v4782_v58 = vld [vmem:[#allocation2 + $0x2e8] sm:$0xff]  ;;  %v4783_v60 = vld [vmem:[#allocation2 + $0x2f0] sm:$0xff] }
 0x143   :  { %v4264_v59 = vadd.f32 -0.5, %v4782_v58  ;;  %v4265_v61 = vadd.f32 -0.5, %v4783_v60  ;;  %1138 = vst [vmem:[#allocation5 + $0x2b8] sm:$0xff] %v4258_v47  ;;  %1139 = vst [vmem:[#allocation5 + $0x2c0] sm:$0xff] %v4259_v49  ;;  %v4784_v62 = vld [vmem:[#allocation2 + $0x2f8] sm:$0xff]  ;;  %v4785_v0 = vld [vmem:[#allocation2 + $0x300] sm:$0xff] }
 0x144   :  { %1140 = vst [vmem:[#allocation5 + $0x2c8] sm:$0xff] %v4260_v51  ;;  %1141 = vst [vmem:[#allocation5 + $0x2d0] sm:$0xff] %v4261_v53  ;;  %v4266_v63 = vadd.f32 -0.5, %v4784_v62  ;;  %v4267_v1 = vadd.f32 -0.5, %v4785_v0  ;;  %v4786_v2 = vld [vmem:[#allocation2 + $0x308] sm:$0xff]  ;;  %v4787_v4 = vld [vmem:[#allocation2 + $0x310] sm:$0xff] }
 0x145   :  { %v4268_v3 = vadd.f32 -0.5, %v4786_v2  ;;  %v4269_v5 = vadd.f32 -0.5, %v4787_v4  ;;  %1142 = vst [vmem:[#allocation5 + $0x2d8] sm:$0xff] %v4262_v55  ;;  %1143 = vst [vmem:[#allocation5 + $0x2e0] sm:$0xff] %v4263_v57  ;;  %v4788_v6 = vld [vmem:[#allocation2 + $0x318] sm:$0xff]  ;;  %v4789_v8 = vld [vmem:[#allocation2 + $0x320] sm:$0xff] }
 0x146   :  { %1144 = vst [vmem:[#allocation5 + $0x2e8] sm:$0xff] %v4264_v59  ;;  %1145 = vst [vmem:[#allocation5 + $0x2f0] sm:$0xff] %v4265_v61  ;;  %v4270_v7 = vadd.f32 -0.5, %v4788_v6  ;;  %v4271_v9 = vadd.f32 -0.5, %v4789_v8  ;;  %v4790_v10 = vld [vmem:[#allocation2 + $0x328] sm:$0xff]  ;;  %v4791_v12 = vld [vmem:[#allocation2 + $0x330] sm:$0xff] }
 0x147   :  { %v4272_v11 = vadd.f32 -0.5, %v4790_v10  ;;  %v4273_v13 = vadd.f32 -0.5, %v4791_v12  ;;  %1146 = vst [vmem:[#allocation5 + $0x2f8] sm:$0xff] %v4266_v63  ;;  %1147 = vst [vmem:[#allocation5 + $0x300] sm:$0xff] %v4267_v1  ;;  %v4792_v14 = vld [vmem:[#allocation2 + $0x338] sm:$0xff]  ;;  %v4793_v16 = vld [vmem:[#allocation2 + $0x340] sm:$0xff] }
 0x148   :  { %1148 = vst [vmem:[#allocation5 + $0x308] sm:$0xff] %v4268_v3  ;;  %1149 = vst [vmem:[#allocation5 + $0x310] sm:$0xff] %v4269_v5  ;;  %v4274_v15 = vadd.f32 -0.5, %v4792_v14  ;;  %v4275_v17 = vadd.f32 -0.5, %v4793_v16  ;;  %v4794_v18 = vld [vmem:[#allocation2 + $0x348] sm:$0xff]  ;;  %v4795_v20 = vld [vmem:[#allocation2 + $0x350] sm:$0xff] }
 0x149   :  { %v4276_v19 = vadd.f32 -0.5, %v4794_v18  ;;  %v4277_v21 = vadd.f32 -0.5, %v4795_v20  ;;  %1150 = vst [vmem:[#allocation5 + $0x318] sm:$0xff] %v4270_v7  ;;  %1151 = vst [vmem:[#allocation5 + $0x320] sm:$0xff] %v4271_v9  ;;  %v4796_v22 = vld [vmem:[#allocation2 + $0x358] sm:$0xff]  ;;  %v4797_v24 = vld [vmem:[#allocation2 + $0x360] sm:$0xff] }
 0x14a   :  { %1152 = vst [vmem:[#allocation5 + $0x328] sm:$0xff] %v4272_v11  ;;  %1153 = vst [vmem:[#allocation5 + $0x330] sm:$0xff] %v4273_v13  ;;  %v4278_v23 = vadd.f32 -0.5, %v4796_v22  ;;  %v4279_v25 = vadd.f32 -0.5, %v4797_v24  ;;  %v4798_v26 = vld [vmem:[#allocation2 + $0x368] sm:$0xff]  ;;  %v4799_v28 = vld [vmem:[#allocation2 + $0x370] sm:$0xff] }
 0x14b   :  { %v4280_v27 = vadd.f32 -0.5, %v4798_v26  ;;  %v4281_v29 = vadd.f32 -0.5, %v4799_v28  ;;  %1154 = vst [vmem:[#allocation5 + $0x338] sm:$0xff] %v4274_v15  ;;  %1155 = vst [vmem:[#allocation5 + $0x340] sm:$0xff] %v4275_v17  ;;  %v4800_v30 = vld [vmem:[#allocation2 + $0x378] sm:$0xff]  ;;  %v4801_v32 = vld [vmem:[#allocation2 + $0x380] sm:$0xff] }
 0x14c   :  { %1156 = vst [vmem:[#allocation5 + $0x348] sm:$0xff] %v4276_v19  ;;  %1157 = vst [vmem:[#allocation5 + $0x350] sm:$0xff] %v4277_v21  ;;  %v4282_v31 = vadd.f32 -0.5, %v4800_v30  ;;  %v4283_v33 = vadd.f32 -0.5, %v4801_v32  ;;  %v4802_v34 = vld [vmem:[#allocation2 + $0x388] sm:$0xff]  ;;  %v4803_v36 = vld [vmem:[#allocation2 + $0x390] sm:$0xff] }
 0x14d   :  { %v4284_v35 = vadd.f32 -0.5, %v4802_v34  ;;  %v4285_v37 = vadd.f32 -0.5, %v4803_v36  ;;  %1158 = vst [vmem:[#allocation5 + $0x358] sm:$0xff] %v4278_v23  ;;  %1159 = vst [vmem:[#allocation5 + $0x360] sm:$0xff] %v4279_v25  ;;  %v4804_v38 = vld [vmem:[#allocation2 + $0x398] sm:$0xff]  ;;  %v4805_v40 = vld [vmem:[#allocation2 + $0x3a0] sm:$0xff] }
 0x14e   :  { %1160 = vst [vmem:[#allocation5 + $0x368] sm:$0xff] %v4280_v27  ;;  %1161 = vst [vmem:[#allocation5 + $0x370] sm:$0xff] %v4281_v29  ;;  %v4286_v39 = vadd.f32 -0.5, %v4804_v38  ;;  %v4287_v41 = vadd.f32 -0.5, %v4805_v40  ;;  %v4806_v42 = vld [vmem:[#allocation2 + $0x3a8] sm:$0xff]  ;;  %v4807_v44 = vld [vmem:[#allocation2 + $0x3b0] sm:$0xff] }
 0x14f   :  { %v4288_v43 = vadd.f32 -0.5, %v4806_v42  ;;  %v4289_v45 = vadd.f32 -0.5, %v4807_v44  ;;  %1162 = vst [vmem:[#allocation5 + $0x378] sm:$0xff] %v4282_v31  ;;  %1163 = vst [vmem:[#allocation5 + $0x380] sm:$0xff] %v4283_v33  ;;  %v4808_v46 = vld [vmem:[#allocation2 + $0x3b8] sm:$0xff]  ;;  %v4809_v48 = vld [vmem:[#allocation2 + $0x3c0] sm:$0xff] }
 0x150   :  { %1164 = vst [vmem:[#allocation5 + $0x388] sm:$0xff] %v4284_v35  ;;  %1165 = vst [vmem:[#allocation5 + $0x390] sm:$0xff] %v4285_v37  ;;  %v4290_v47 = vadd.f32 -0.5, %v4808_v46  ;;  %v4291_v49 = vadd.f32 -0.5, %v4809_v48  ;;  %v4810_v50 = vld [vmem:[#allocation2 + $0x3c8] sm:$0xff]  ;;  %v4811_v52 = vld [vmem:[#allocation2 + $0x3d0] sm:$0xff] }
 0x151   :  { %v4292_v51 = vadd.f32 -0.5, %v4810_v50  ;;  %v4293_v53 = vadd.f32 -0.5, %v4811_v52  ;;  %1166 = vst [vmem:[#allocation5 + $0x398] sm:$0xff] %v4286_v39  ;;  %1167 = vst [vmem:[#allocation5 + $0x3a0] sm:$0xff] %v4287_v41  ;;  %v4812_v54 = vld [vmem:[#allocation2 + $0x3d8] sm:$0xff]  ;;  %v4813_v56 = vld [vmem:[#allocation2 + $0x3e0] sm:$0xff] }
 0x152   :  { %1168 = vst [vmem:[#allocation5 + $0x3a8] sm:$0xff] %v4288_v43  ;;  %1169 = vst [vmem:[#allocation5 + $0x3b0] sm:$0xff] %v4289_v45  ;;  %v4294_v55 = vadd.f32 -0.5, %v4812_v54  ;;  %v4295_v57 = vadd.f32 -0.5, %v4813_v56  ;;  %v4814_v58 = vld [vmem:[#allocation2 + $0x3e8] sm:$0xff]  ;;  %v4815_v60 = vld [vmem:[#allocation2 + $0x3f0] sm:$0xff] }
 0x153   :  { %v4296_v59 = vadd.f32 -0.5, %v4814_v58  ;;  %v4297_v61 = vadd.f32 -0.5, %v4815_v60  ;;  %1170 = vst [vmem:[#allocation5 + $0x3b8] sm:$0xff] %v4290_v47  ;;  %1171 = vst [vmem:[#allocation5 + $0x3c0] sm:$0xff] %v4291_v49  ;;  %v4816_v62 = vld [vmem:[#allocation2 + $0x3f8] sm:$0xff]  ;;  %v4817_v0 = vld [vmem:[#allocation2 + $0x400] sm:$0xff] }
 0x154   :  { %1172 = vst [vmem:[#allocation5 + $0x3c8] sm:$0xff] %v4292_v51  ;;  %1173 = vst [vmem:[#allocation5 + $0x3d0] sm:$0xff] %v4293_v53  ;;  %v4298_v63 = vadd.f32 -0.5, %v4816_v62  ;;  %v4299_v1 = vadd.f32 -0.5, %v4817_v0  ;;  %v4818_v2 = vld [vmem:[#allocation2 + $0x408] sm:$0xff]  ;;  %v4819_v4 = vld [vmem:[#allocation2 + $0x410] sm:$0xff] }
 0x155   :  { %v4300_v3 = vadd.f32 -0.5, %v4818_v2  ;;  %v4301_v5 = vadd.f32 -0.5, %v4819_v4  ;;  %1174 = vst [vmem:[#allocation5 + $0x3d8] sm:$0xff] %v4294_v55  ;;  %1175 = vst [vmem:[#allocation5 + $0x3e0] sm:$0xff] %v4295_v57  ;;  %v4820_v6 = vld [vmem:[#allocation2 + $0x418] sm:$0xff]  ;;  %v4821_v8 = vld [vmem:[#allocation2 + $0x420] sm:$0xff] }
 0x156   :  { %1176 = vst [vmem:[#allocation5 + $0x3e8] sm:$0xff] %v4296_v59  ;;  %1177 = vst [vmem:[#allocation5 + $0x3f0] sm:$0xff] %v4297_v61  ;;  %v4302_v7 = vadd.f32 -0.5, %v4820_v6  ;;  %v4303_v9 = vadd.f32 -0.5, %v4821_v8  ;;  %v4822_v10 = vld [vmem:[#allocation2 + $0x428] sm:$0xff]  ;;  %v4823_v12 = vld [vmem:[#allocation2 + $0x430] sm:$0xff] }
 0x157   :  { %v4304_v11 = vadd.f32 -0.5, %v4822_v10  ;;  %v4305_v13 = vadd.f32 -0.5, %v4823_v12  ;;  %1178 = vst [vmem:[#allocation5 + $0x3f8] sm:$0xff] %v4298_v63  ;;  %1179 = vst [vmem:[#allocation5 + $0x400] sm:$0xff] %v4299_v1  ;;  %v4824_v14 = vld [vmem:[#allocation2 + $0x438] sm:$0xff]  ;;  %v4825_v16 = vld [vmem:[#allocation2 + $0x440] sm:$0xff] }
 0x158   :  { %1180 = vst [vmem:[#allocation5 + $0x408] sm:$0xff] %v4300_v3  ;;  %1181 = vst [vmem:[#allocation5 + $0x410] sm:$0xff] %v4301_v5  ;;  %v4306_v15 = vadd.f32 -0.5, %v4824_v14  ;;  %v4307_v17 = vadd.f32 -0.5, %v4825_v16  ;;  %v4826_v18 = vld [vmem:[#allocation2 + $0x448] sm:$0xff]  ;;  %v4827_v20 = vld [vmem:[#allocation2 + $0x450] sm:$0xff] }
 0x159   :  { %v4308_v19 = vadd.f32 -0.5, %v4826_v18  ;;  %v4309_v21 = vadd.f32 -0.5, %v4827_v20  ;;  %1182 = vst [vmem:[#allocation5 + $0x418] sm:$0xff] %v4302_v7  ;;  %1183 = vst [vmem:[#allocation5 + $0x420] sm:$0xff] %v4303_v9  ;;  %v4828_v22 = vld [vmem:[#allocation2 + $0x458] sm:$0xff]  ;;  %v4829_v24 = vld [vmem:[#allocation2 + $0x460] sm:$0xff] }
 0x15a   :  { %1184 = vst [vmem:[#allocation5 + $0x428] sm:$0xff] %v4304_v11  ;;  %1185 = vst [vmem:[#allocation5 + $0x430] sm:$0xff] %v4305_v13  ;;  %v4310_v23 = vadd.f32 -0.5, %v4828_v22  ;;  %v4311_v25 = vadd.f32 -0.5, %v4829_v24  ;;  %v4830_v26 = vld [vmem:[#allocation2 + $0x468] sm:$0xff]  ;;  %v4831_v28 = vld [vmem:[#allocation2 + $0x470] sm:$0xff] }
 0x15b   :  { %v4312_v27 = vadd.f32 -0.5, %v4830_v26  ;;  %v4313_v29 = vadd.f32 -0.5, %v4831_v28  ;;  %1186 = vst [vmem:[#allocation5 + $0x438] sm:$0xff] %v4306_v15  ;;  %1187 = vst [vmem:[#allocation5 + $0x440] sm:$0xff] %v4307_v17  ;;  %v4832_v30 = vld [vmem:[#allocation2 + $0x478] sm:$0xff]  ;;  %v4833_v32 = vld [vmem:[#allocation2 + $0x480] sm:$0xff] }
 0x15c   :  { %1188 = vst [vmem:[#allocation5 + $0x448] sm:$0xff] %v4308_v19  ;;  %1189 = vst [vmem:[#allocation5 + $0x450] sm:$0xff] %v4309_v21  ;;  %v4314_v31 = vadd.f32 -0.5, %v4832_v30  ;;  %v4315_v33 = vadd.f32 -0.5, %v4833_v32  ;;  %v4834_v34 = vld [vmem:[#allocation2 + $0x488] sm:$0xff]  ;;  %v4835_v36 = vld [vmem:[#allocation2 + $0x490] sm:$0xff] }
 0x15d   :  { %v4316_v35 = vadd.f32 -0.5, %v4834_v34  ;;  %v4317_v37 = vadd.f32 -0.5, %v4835_v36  ;;  %1190 = vst [vmem:[#allocation5 + $0x458] sm:$0xff] %v4310_v23  ;;  %1191 = vst [vmem:[#allocation5 + $0x460] sm:$0xff] %v4311_v25  ;;  %v4836_v38 = vld [vmem:[#allocation2 + $0x498] sm:$0xff]  ;;  %v4837_v40 = vld [vmem:[#allocation2 + $0x4a0] sm:$0xff] }
 0x15e   :  { %1192 = vst [vmem:[#allocation5 + $0x468] sm:$0xff] %v4312_v27  ;;  %1193 = vst [vmem:[#allocation5 + $0x470] sm:$0xff] %v4313_v29  ;;  %v4318_v39 = vadd.f32 -0.5, %v4836_v38  ;;  %v4319_v41 = vadd.f32 -0.5, %v4837_v40  ;;  %v4838_v42 = vld [vmem:[#allocation2 + $0x4a8] sm:$0xff]  ;;  %v4839_v44 = vld [vmem:[#allocation2 + $0x4b0] sm:$0xff] }
 0x15f   :  { %v4320_v43 = vadd.f32 -0.5, %v4838_v42  ;;  %v4321_v45 = vadd.f32 -0.5, %v4839_v44  ;;  %1194 = vst [vmem:[#allocation5 + $0x478] sm:$0xff] %v4314_v31  ;;  %1195 = vst [vmem:[#allocation5 + $0x480] sm:$0xff] %v4315_v33  ;;  %v4840_v46 = vld [vmem:[#allocation2 + $0x4b8] sm:$0xff]  ;;  %v4841_v48 = vld [vmem:[#allocation2 + $0x4c0] sm:$0xff] }
 0x160   :  { %1196 = vst [vmem:[#allocation5 + $0x488] sm:$0xff] %v4316_v35  ;;  %1197 = vst [vmem:[#allocation5 + $0x490] sm:$0xff] %v4317_v37  ;;  %v4322_v47 = vadd.f32 -0.5, %v4840_v46  ;;  %v4323_v49 = vadd.f32 -0.5, %v4841_v48  ;;  %v4842_v50 = vld [vmem:[#allocation2 + $0x4c8] sm:$0xff]  ;;  %v4843_v52 = vld [vmem:[#allocation2 + $0x4d0] sm:$0xff] }
 0x161   :  { %v4324_v51 = vadd.f32 -0.5, %v4842_v50  ;;  %v4325_v53 = vadd.f32 -0.5, %v4843_v52  ;;  %1198 = vst [vmem:[#allocation5 + $0x498] sm:$0xff] %v4318_v39  ;;  %1199 = vst [vmem:[#allocation5 + $0x4a0] sm:$0xff] %v4319_v41  ;;  %v4844_v54 = vld [vmem:[#allocation2 + $0x4d8] sm:$0xff]  ;;  %v4845_v56 = vld [vmem:[#allocation2 + $0x4e0] sm:$0xff] }
 0x162   :  { %1200 = vst [vmem:[#allocation5 + $0x4a8] sm:$0xff] %v4320_v43  ;;  %1201 = vst [vmem:[#allocation5 + $0x4b0] sm:$0xff] %v4321_v45  ;;  %v4326_v55 = vadd.f32 -0.5, %v4844_v54  ;;  %v4327_v57 = vadd.f32 -0.5, %v4845_v56  ;;  %v4846_v58 = vld [vmem:[#allocation2 + $0x4e8] sm:$0xff]  ;;  %v4847_v60 = vld [vmem:[#allocation2 + $0x4f0] sm:$0xff] }
 0x163   :  { %v4328_v59 = vadd.f32 -0.5, %v4846_v58  ;;  %v4329_v61 = vadd.f32 -0.5, %v4847_v60  ;;  %1202 = vst [vmem:[#allocation5 + $0x4b8] sm:$0xff] %v4322_v47  ;;  %1203 = vst [vmem:[#allocation5 + $0x4c0] sm:$0xff] %v4323_v49  ;;  %v4848_v62 = vld [vmem:[#allocation2 + $0x4f8] sm:$0xff]  ;;  %v4849_v0 = vld [vmem:[#allocation2 + $0x500] sm:$0xff] }
 0x164   :  { %1204 = vst [vmem:[#allocation5 + $0x4c8] sm:$0xff] %v4324_v51  ;;  %1205 = vst [vmem:[#allocation5 + $0x4d0] sm:$0xff] %v4325_v53  ;;  %v4330_v63 = vadd.f32 -0.5, %v4848_v62  ;;  %v4331_v1 = vadd.f32 -0.5, %v4849_v0  ;;  %v4850_v2 = vld [vmem:[#allocation2 + $0x508] sm:$0xff]  ;;  %v4851_v4 = vld [vmem:[#allocation2 + $0x510] sm:$0xff] }
 0x165   :  { %v4332_v3 = vadd.f32 -0.5, %v4850_v2  ;;  %v4333_v5 = vadd.f32 -0.5, %v4851_v4  ;;  %1206 = vst [vmem:[#allocation5 + $0x4d8] sm:$0xff] %v4326_v55  ;;  %1207 = vst [vmem:[#allocation5 + $0x4e0] sm:$0xff] %v4327_v57  ;;  %v4852_v6 = vld [vmem:[#allocation2 + $0x518] sm:$0xff]  ;;  %v4853_v8 = vld [vmem:[#allocation2 + $0x520] sm:$0xff] }
 0x166   :  { %1208 = vst [vmem:[#allocation5 + $0x4e8] sm:$0xff] %v4328_v59  ;;  %1209 = vst [vmem:[#allocation5 + $0x4f0] sm:$0xff] %v4329_v61  ;;  %v4334_v7 = vadd.f32 -0.5, %v4852_v6  ;;  %v4335_v9 = vadd.f32 -0.5, %v4853_v8  ;;  %v4854_v10 = vld [vmem:[#allocation2 + $0x528] sm:$0xff]  ;;  %v4855_v12 = vld [vmem:[#allocation2 + $0x530] sm:$0xff] }
 0x167   :  { %v4336_v11 = vadd.f32 -0.5, %v4854_v10  ;;  %v4337_v13 = vadd.f32 -0.5, %v4855_v12  ;;  %1210 = vst [vmem:[#allocation5 + $0x4f8] sm:$0xff] %v4330_v63  ;;  %1211 = vst [vmem:[#allocation5 + $0x500] sm:$0xff] %v4331_v1  ;;  %v4856_v14 = vld [vmem:[#allocation2 + $0x538] sm:$0xff]  ;;  %v4857_v16 = vld [vmem:[#allocation2 + $0x540] sm:$0xff] }
 0x168   :  { %1212 = vst [vmem:[#allocation5 + $0x508] sm:$0xff] %v4332_v3  ;;  %1213 = vst [vmem:[#allocation5 + $0x510] sm:$0xff] %v4333_v5  ;;  %v4338_v15 = vadd.f32 -0.5, %v4856_v14  ;;  %v4339_v17 = vadd.f32 -0.5, %v4857_v16  ;;  %v4858_v18 = vld [vmem:[#allocation2 + $0x548] sm:$0xff]  ;;  %v4859_v20 = vld [vmem:[#allocation2 + $0x550] sm:$0xff] }
 0x169   :  { %v4340_v19 = vadd.f32 -0.5, %v4858_v18  ;;  %v4341_v21 = vadd.f32 -0.5, %v4859_v20  ;;  %1214 = vst [vmem:[#allocation5 + $0x518] sm:$0xff] %v4334_v7  ;;  %1215 = vst [vmem:[#allocation5 + $0x520] sm:$0xff] %v4335_v9  ;;  %v4860_v22 = vld [vmem:[#allocation2 + $0x558] sm:$0xff]  ;;  %v4861_v24 = vld [vmem:[#allocation2 + $0x560] sm:$0xff] }
 0x16a   :  { %1216 = vst [vmem:[#allocation5 + $0x528] sm:$0xff] %v4336_v11  ;;  %1217 = vst [vmem:[#allocation5 + $0x530] sm:$0xff] %v4337_v13  ;;  %v4342_v23 = vadd.f32 -0.5, %v4860_v22  ;;  %v4343_v25 = vadd.f32 -0.5, %v4861_v24  ;;  %v4862_v26 = vld [vmem:[#allocation2 + $0x568] sm:$0xff]  ;;  %v4863_v28 = vld [vmem:[#allocation2 + $0x570] sm:$0xff] }
 0x16b   :  { %v4344_v27 = vadd.f32 -0.5, %v4862_v26  ;;  %v4345_v29 = vadd.f32 -0.5, %v4863_v28  ;;  %1218 = vst [vmem:[#allocation5 + $0x538] sm:$0xff] %v4338_v15  ;;  %1219 = vst [vmem:[#allocation5 + $0x540] sm:$0xff] %v4339_v17  ;;  %v4864_v30 = vld [vmem:[#allocation2 + $0x578] sm:$0xff]  ;;  %v4865_v32 = vld [vmem:[#allocation2 + $0x580] sm:$0xff] }
 0x16c   :  { %1220 = vst [vmem:[#allocation5 + $0x548] sm:$0xff] %v4340_v19  ;;  %1221 = vst [vmem:[#allocation5 + $0x550] sm:$0xff] %v4341_v21  ;;  %v4346_v31 = vadd.f32 -0.5, %v4864_v30  ;;  %v4347_v33 = vadd.f32 -0.5, %v4865_v32  ;;  %v4866_v34 = vld [vmem:[#allocation2 + $0x588] sm:$0xff]  ;;  %v4867_v36 = vld [vmem:[#allocation2 + $0x590] sm:$0xff] }
 0x16d   :  { %v4348_v35 = vadd.f32 -0.5, %v4866_v34  ;;  %v4349_v37 = vadd.f32 -0.5, %v4867_v36  ;;  %1222 = vst [vmem:[#allocation5 + $0x558] sm:$0xff] %v4342_v23  ;;  %1223 = vst [vmem:[#allocation5 + $0x560] sm:$0xff] %v4343_v25  ;;  %v4868_v38 = vld [vmem:[#allocation2 + $0x598] sm:$0xff]  ;;  %v4869_v40 = vld [vmem:[#allocation2 + $0x5a0] sm:$0xff] }
 0x16e   :  { %1224 = vst [vmem:[#allocation5 + $0x568] sm:$0xff] %v4344_v27  ;;  %1225 = vst [vmem:[#allocation5 + $0x570] sm:$0xff] %v4345_v29  ;;  %v4350_v39 = vadd.f32 -0.5, %v4868_v38  ;;  %v4351_v41 = vadd.f32 -0.5, %v4869_v40  ;;  %v4870_v42 = vld [vmem:[#allocation2 + $0x5a8] sm:$0xff]  ;;  %v4871_v44 = vld [vmem:[#allocation2 + $0x5b0] sm:$0xff] }
 0x16f   :  { %v4352_v43 = vadd.f32 -0.5, %v4870_v42  ;;  %v4353_v45 = vadd.f32 -0.5, %v4871_v44  ;;  %1226 = vst [vmem:[#allocation5 + $0x578] sm:$0xff] %v4346_v31  ;;  %1227 = vst [vmem:[#allocation5 + $0x580] sm:$0xff] %v4347_v33  ;;  %v4872_v46 = vld [vmem:[#allocation2 + $0x5b8] sm:$0xff]  ;;  %v4873_v48 = vld [vmem:[#allocation2 + $0x5c0] sm:$0xff] }
 0x170   :  { %1228 = vst [vmem:[#allocation5 + $0x588] sm:$0xff] %v4348_v35  ;;  %1229 = vst [vmem:[#allocation5 + $0x590] sm:$0xff] %v4349_v37  ;;  %v4354_v47 = vadd.f32 -0.5, %v4872_v46  ;;  %v4355_v49 = vadd.f32 -0.5, %v4873_v48  ;;  %v4874_v50 = vld [vmem:[#allocation2 + $0x5c8] sm:$0xff]  ;;  %v4875_v52 = vld [vmem:[#allocation2 + $0x5d0] sm:$0xff] }
 0x171   :  { %v4356_v51 = vadd.f32 -0.5, %v4874_v50  ;;  %v4357_v53 = vadd.f32 -0.5, %v4875_v52  ;;  %1230 = vst [vmem:[#allocation5 + $0x598] sm:$0xff] %v4350_v39  ;;  %1231 = vst [vmem:[#allocation5 + $0x5a0] sm:$0xff] %v4351_v41  ;;  %v4876_v54 = vld [vmem:[#allocation2 + $0x5d8] sm:$0xff]  ;;  %v4877_v56 = vld [vmem:[#allocation2 + $0x5e0] sm:$0xff] }
 0x172   :  { %1232 = vst [vmem:[#allocation5 + $0x5a8] sm:$0xff] %v4352_v43  ;;  %1233 = vst [vmem:[#allocation5 + $0x5b0] sm:$0xff] %v4353_v45  ;;  %v4358_v55 = vadd.f32 -0.5, %v4876_v54  ;;  %v4359_v57 = vadd.f32 -0.5, %v4877_v56  ;;  %v4878_v58 = vld [vmem:[#allocation2 + $0x5e8] sm:$0xff]  ;;  %v4879_v60 = vld [vmem:[#allocation2 + $0x5f0] sm:$0xff] }
 0x173   :  { %v4360_v59 = vadd.f32 -0.5, %v4878_v58  ;;  %v4361_v61 = vadd.f32 -0.5, %v4879_v60  ;;  %1234 = vst [vmem:[#allocation5 + $0x5b8] sm:$0xff] %v4354_v47  ;;  %1235 = vst [vmem:[#allocation5 + $0x5c0] sm:$0xff] %v4355_v49  ;;  %v4880_v62 = vld [vmem:[#allocation2 + $0x5f8] sm:$0xff]  ;;  %v4881_v0 = vld [vmem:[#allocation2 + $0x600] sm:$0xff] }
 0x174   :  { %1236 = vst [vmem:[#allocation5 + $0x5c8] sm:$0xff] %v4356_v51  ;;  %1237 = vst [vmem:[#allocation5 + $0x5d0] sm:$0xff] %v4357_v53  ;;  %v4362_v63 = vadd.f32 -0.5, %v4880_v62  ;;  %v4363_v1 = vadd.f32 -0.5, %v4881_v0  ;;  %v4882_v2 = vld [vmem:[#allocation2 + $0x608] sm:$0xff]  ;;  %v4883_v4 = vld [vmem:[#allocation2 + $0x610] sm:$0xff] }
 0x175   :  { %v4364_v3 = vadd.f32 -0.5, %v4882_v2  ;;  %v4365_v5 = vadd.f32 -0.5, %v4883_v4  ;;  %1238 = vst [vmem:[#allocation5 + $0x5d8] sm:$0xff] %v4358_v55  ;;  %1239 = vst [vmem:[#allocation5 + $0x5e0] sm:$0xff] %v4359_v57  ;;  %v4884_v6 = vld [vmem:[#allocation2 + $0x618] sm:$0xff]  ;;  %v4885_v8 = vld [vmem:[#allocation2 + $0x620] sm:$0xff] }
 0x176   :  { %1240 = vst [vmem:[#allocation5 + $0x5e8] sm:$0xff] %v4360_v59  ;;  %1241 = vst [vmem:[#allocation5 + $0x5f0] sm:$0xff] %v4361_v61  ;;  %v4366_v7 = vadd.f32 -0.5, %v4884_v6  ;;  %v4367_v9 = vadd.f32 -0.5, %v4885_v8  ;;  %v4886_v10 = vld [vmem:[#allocation2 + $0x628] sm:$0xff]  ;;  %v4887_v12 = vld [vmem:[#allocation2 + $0x630] sm:$0xff] }
 0x177   :  { %v4368_v11 = vadd.f32 -0.5, %v4886_v10  ;;  %v4369_v13 = vadd.f32 -0.5, %v4887_v12  ;;  %1242 = vst [vmem:[#allocation5 + $0x5f8] sm:$0xff] %v4362_v63  ;;  %1243 = vst [vmem:[#allocation5 + $0x600] sm:$0xff] %v4363_v1  ;;  %v4888_v14 = vld [vmem:[#allocation2 + $0x638] sm:$0xff]  ;;  %v4889_v16 = vld [vmem:[#allocation2 + $0x640] sm:$0xff] }
 0x178   :  { %1244 = vst [vmem:[#allocation5 + $0x608] sm:$0xff] %v4364_v3  ;;  %1245 = vst [vmem:[#allocation5 + $0x610] sm:$0xff] %v4365_v5  ;;  %v4370_v15 = vadd.f32 -0.5, %v4888_v14  ;;  %v4371_v17 = vadd.f32 -0.5, %v4889_v16  ;;  %v4890_v18 = vld [vmem:[#allocation2 + $0x648] sm:$0xff]  ;;  %v4891_v20 = vld [vmem:[#allocation2 + $0x650] sm:$0xff] }
 0x179   :  { %v4372_v19 = vadd.f32 -0.5, %v4890_v18  ;;  %v4373_v21 = vadd.f32 -0.5, %v4891_v20  ;;  %1246 = vst [vmem:[#allocation5 + $0x618] sm:$0xff] %v4366_v7  ;;  %1247 = vst [vmem:[#allocation5 + $0x620] sm:$0xff] %v4367_v9  ;;  %v4892_v22 = vld [vmem:[#allocation2 + $0x658] sm:$0xff]  ;;  %v4893_v24 = vld [vmem:[#allocation2 + $0x660] sm:$0xff] }
 0x17a   :  { %1248 = vst [vmem:[#allocation5 + $0x628] sm:$0xff] %v4368_v11  ;;  %1249 = vst [vmem:[#allocation5 + $0x630] sm:$0xff] %v4369_v13  ;;  %v4374_v23 = vadd.f32 -0.5, %v4892_v22  ;;  %v4375_v25 = vadd.f32 -0.5, %v4893_v24  ;;  %v4894_v26 = vld [vmem:[#allocation2 + $0x668] sm:$0xff]  ;;  %v4895_v28 = vld [vmem:[#allocation2 + $0x670] sm:$0xff] }
 0x17b   :  { %v4376_v27 = vadd.f32 -0.5, %v4894_v26  ;;  %v4377_v29 = vadd.f32 -0.5, %v4895_v28  ;;  %1250 = vst [vmem:[#allocation5 + $0x638] sm:$0xff] %v4370_v15  ;;  %1251 = vst [vmem:[#allocation5 + $0x640] sm:$0xff] %v4371_v17  ;;  %v4896_v30 = vld [vmem:[#allocation2 + $0x678] sm:$0xff]  ;;  %v4897_v32 = vld [vmem:[#allocation2 + $0x680] sm:$0xff] }
 0x17c   :  { %1252 = vst [vmem:[#allocation5 + $0x648] sm:$0xff] %v4372_v19  ;;  %1253 = vst [vmem:[#allocation5 + $0x650] sm:$0xff] %v4373_v21  ;;  %v4378_v31 = vadd.f32 -0.5, %v4896_v30  ;;  %v4379_v33 = vadd.f32 -0.5, %v4897_v32  ;;  %v4898_v34 = vld [vmem:[#allocation2 + $0x688] sm:$0xff]  ;;  %v4899_v36 = vld [vmem:[#allocation2 + $0x690] sm:$0xff] }
 0x17d   :  { %v4380_v35 = vadd.f32 -0.5, %v4898_v34  ;;  %v4381_v37 = vadd.f32 -0.5, %v4899_v36  ;;  %1254 = vst [vmem:[#allocation5 + $0x658] sm:$0xff] %v4374_v23  ;;  %1255 = vst [vmem:[#allocation5 + $0x660] sm:$0xff] %v4375_v25  ;;  %v4900_v38 = vld [vmem:[#allocation2 + $0x698] sm:$0xff]  ;;  %v4901_v40 = vld [vmem:[#allocation2 + $0x6a0] sm:$0xff] }
 0x17e   :  { %1256 = vst [vmem:[#allocation5 + $0x668] sm:$0xff] %v4376_v27  ;;  %1257 = vst [vmem:[#allocation5 + $0x670] sm:$0xff] %v4377_v29  ;;  %v4382_v39 = vadd.f32 -0.5, %v4900_v38  ;;  %v4383_v41 = vadd.f32 -0.5, %v4901_v40  ;;  %v4902_v42 = vld [vmem:[#allocation2 + $0x6a8] sm:$0xff]  ;;  %v4903_v44 = vld [vmem:[#allocation2 + $0x6b0] sm:$0xff] }
 0x17f   :  { %v4384_v43 = vadd.f32 -0.5, %v4902_v42  ;;  %v4385_v45 = vadd.f32 -0.5, %v4903_v44  ;;  %1258 = vst [vmem:[#allocation5 + $0x678] sm:$0xff] %v4378_v31  ;;  %1259 = vst [vmem:[#allocation5 + $0x680] sm:$0xff] %v4379_v33  ;;  %v4904_v46 = vld [vmem:[#allocation2 + $0x6b8] sm:$0xff]  ;;  %v4905_v48 = vld [vmem:[#allocation2 + $0x6c0] sm:$0xff] }
 0x180   :  { %1260 = vst [vmem:[#allocation5 + $0x688] sm:$0xff] %v4380_v35  ;;  %1261 = vst [vmem:[#allocation5 + $0x690] sm:$0xff] %v4381_v37  ;;  %v4386_v47 = vadd.f32 -0.5, %v4904_v46  ;;  %v4387_v49 = vadd.f32 -0.5, %v4905_v48  ;;  %v4906_v50 = vld [vmem:[#allocation2 + $0x6c8] sm:$0xff]  ;;  %v4907_v52 = vld [vmem:[#allocation2 + $0x6d0] sm:$0xff] }
 0x181   :  { %v4388_v51 = vadd.f32 -0.5, %v4906_v50  ;;  %v4389_v53 = vadd.f32 -0.5, %v4907_v52  ;;  %1262 = vst [vmem:[#allocation5 + $0x698] sm:$0xff] %v4382_v39  ;;  %1263 = vst [vmem:[#allocation5 + $0x6a0] sm:$0xff] %v4383_v41  ;;  %v4908_v54 = vld [vmem:[#allocation2 + $0x6d8] sm:$0xff]  ;;  %v4909_v56 = vld [vmem:[#allocation2 + $0x6e0] sm:$0xff] }
 0x182   :  { %1264 = vst [vmem:[#allocation5 + $0x6a8] sm:$0xff] %v4384_v43  ;;  %1265 = vst [vmem:[#allocation5 + $0x6b0] sm:$0xff] %v4385_v45  ;;  %v4390_v55 = vadd.f32 -0.5, %v4908_v54  ;;  %v4391_v57 = vadd.f32 -0.5, %v4909_v56  ;;  %v4910_v58 = vld [vmem:[#allocation2 + $0x6e8] sm:$0xff]  ;;  %v4911_v60 = vld [vmem:[#allocation2 + $0x6f0] sm:$0xff] }
 0x183   :  { %v4392_v59 = vadd.f32 -0.5, %v4910_v58  ;;  %v4393_v61 = vadd.f32 -0.5, %v4911_v60  ;;  %1266 = vst [vmem:[#allocation5 + $0x6b8] sm:$0xff] %v4386_v47  ;;  %1267 = vst [vmem:[#allocation5 + $0x6c0] sm:$0xff] %v4387_v49  ;;  %v4912_v62 = vld [vmem:[#allocation2 + $0x6f8] sm:$0xff]  ;;  %v4913_v0 = vld [vmem:[#allocation2 + $0x700] sm:$0xff] }
 0x184   :  { %1268 = vst [vmem:[#allocation5 + $0x6c8] sm:$0xff] %v4388_v51  ;;  %1269 = vst [vmem:[#allocation5 + $0x6d0] sm:$0xff] %v4389_v53  ;;  %v4394_v63 = vadd.f32 -0.5, %v4912_v62  ;;  %v4395_v1 = vadd.f32 -0.5, %v4913_v0  ;;  %v4914_v2 = vld [vmem:[#allocation2 + $0x708] sm:$0xff]  ;;  %v4915_v4 = vld [vmem:[#allocation2 + $0x710] sm:$0xff] }
 0x185   :  { %v4396_v3 = vadd.f32 -0.5, %v4914_v2  ;;  %v4397_v5 = vadd.f32 -0.5, %v4915_v4  ;;  %1270 = vst [vmem:[#allocation5 + $0x6d8] sm:$0xff] %v4390_v55  ;;  %1271 = vst [vmem:[#allocation5 + $0x6e0] sm:$0xff] %v4391_v57  ;;  %v4916_v6 = vld [vmem:[#allocation2 + $0x718] sm:$0xff]  ;;  %v4917_v8 = vld [vmem:[#allocation2 + $0x720] sm:$0xff] }
 0x186   :  { %1272 = vst [vmem:[#allocation5 + $0x6e8] sm:$0xff] %v4392_v59  ;;  %1273 = vst [vmem:[#allocation5 + $0x6f0] sm:$0xff] %v4393_v61  ;;  %v4398_v7 = vadd.f32 -0.5, %v4916_v6  ;;  %v4399_v9 = vadd.f32 -0.5, %v4917_v8  ;;  %v4918_v10 = vld [vmem:[#allocation2 + $0x728] sm:$0xff]  ;;  %v4919_v12 = vld [vmem:[#allocation2 + $0x730] sm:$0xff] }
 0x187   :  { %v4400_v11 = vadd.f32 -0.5, %v4918_v10  ;;  %v4401_v13 = vadd.f32 -0.5, %v4919_v12  ;;  %1274 = vst [vmem:[#allocation5 + $0x6f8] sm:$0xff] %v4394_v63  ;;  %1275 = vst [vmem:[#allocation5 + $0x700] sm:$0xff] %v4395_v1  ;;  %v4920_v14 = vld [vmem:[#allocation2 + $0x738] sm:$0xff]  ;;  %v4921_v16 = vld [vmem:[#allocation2 + $0x740] sm:$0xff] }
 0x188   :  { %1276 = vst [vmem:[#allocation5 + $0x708] sm:$0xff] %v4396_v3  ;;  %1277 = vst [vmem:[#allocation5 + $0x710] sm:$0xff] %v4397_v5  ;;  %v4402_v15 = vadd.f32 -0.5, %v4920_v14  ;;  %v4403_v17 = vadd.f32 -0.5, %v4921_v16  ;;  %v4922_v18 = vld [vmem:[#allocation2 + $0x748] sm:$0xff]  ;;  %v4923_v20 = vld [vmem:[#allocation2 + $0x750] sm:$0xff] }
 0x189   :  { %v4404_v19 = vadd.f32 -0.5, %v4922_v18  ;;  %v4405_v21 = vadd.f32 -0.5, %v4923_v20  ;;  %1278 = vst [vmem:[#allocation5 + $0x718] sm:$0xff] %v4398_v7  ;;  %1279 = vst [vmem:[#allocation5 + $0x720] sm:$0xff] %v4399_v9  ;;  %v4924_v22 = vld [vmem:[#allocation2 + $0x758] sm:$0xff]  ;;  %v4925_v24 = vld [vmem:[#allocation2 + $0x760] sm:$0xff] }
 0x18a   :  { %1280 = vst [vmem:[#allocation5 + $0x728] sm:$0xff] %v4400_v11  ;;  %1281 = vst [vmem:[#allocation5 + $0x730] sm:$0xff] %v4401_v13  ;;  %v4406_v23 = vadd.f32 -0.5, %v4924_v22  ;;  %v4407_v25 = vadd.f32 -0.5, %v4925_v24  ;;  %v4926_v26 = vld [vmem:[#allocation2 + $0x768] sm:$0xff]  ;;  %v4927_v28 = vld [vmem:[#allocation2 + $0x770] sm:$0xff] }
 0x18b   :  { %v4408_v27 = vadd.f32 -0.5, %v4926_v26  ;;  %v4409_v29 = vadd.f32 -0.5, %v4927_v28  ;;  %1282 = vst [vmem:[#allocation5 + $0x738] sm:$0xff] %v4402_v15  ;;  %1283 = vst [vmem:[#allocation5 + $0x740] sm:$0xff] %v4403_v17  ;;  %v4928_v30 = vld [vmem:[#allocation2 + $0x778] sm:$0xff]  ;;  %v4929_v32 = vld [vmem:[#allocation2 + $0x780] sm:$0xff] }
 0x18c   :  { %1284 = vst [vmem:[#allocation5 + $0x748] sm:$0xff] %v4404_v19  ;;  %1285 = vst [vmem:[#allocation5 + $0x750] sm:$0xff] %v4405_v21  ;;  %v4410_v31 = vadd.f32 -0.5, %v4928_v30  ;;  %v4411_v33 = vadd.f32 -0.5, %v4929_v32  ;;  %v4930_v34 = vld [vmem:[#allocation2 + $0x788] sm:$0xff]  ;;  %v4931_v36 = vld [vmem:[#allocation2 + $0x790] sm:$0xff] }
 0x18d   :  { %v4412_v35 = vadd.f32 -0.5, %v4930_v34  ;;  %v4413_v37 = vadd.f32 -0.5, %v4931_v36  ;;  %1286 = vst [vmem:[#allocation5 + $0x758] sm:$0xff] %v4406_v23  ;;  %1287 = vst [vmem:[#allocation5 + $0x760] sm:$0xff] %v4407_v25  ;;  %v4932_v38 = vld [vmem:[#allocation2 + $0x798] sm:$0xff]  ;;  %v4933_v40 = vld [vmem:[#allocation2 + $0x7a0] sm:$0xff] }
 0x18e   :  { %1288 = vst [vmem:[#allocation5 + $0x768] sm:$0xff] %v4408_v27  ;;  %1289 = vst [vmem:[#allocation5 + $0x770] sm:$0xff] %v4409_v29  ;;  %v4414_v39 = vadd.f32 -0.5, %v4932_v38  ;;  %v4415_v41 = vadd.f32 -0.5, %v4933_v40  ;;  %v4934_v42 = vld [vmem:[#allocation2 + $0x7a8] sm:$0xff]  ;;  %v4935_v44 = vld [vmem:[#allocation2 + $0x7b0] sm:$0xff] }
 0x18f   :  { %v4416_v43 = vadd.f32 -0.5, %v4934_v42  ;;  %v4417_v45 = vadd.f32 -0.5, %v4935_v44  ;;  %1290 = vst [vmem:[#allocation5 + $0x778] sm:$0xff] %v4410_v31  ;;  %1291 = vst [vmem:[#allocation5 + $0x780] sm:$0xff] %v4411_v33  ;;  %v4936_v46 = vld [vmem:[#allocation2 + $0x7b8] sm:$0xff]  ;;  %v4937_v48 = vld [vmem:[#allocation2 + $0x7c0] sm:$0xff] }
 0x190   :  { %1292 = vst [vmem:[#allocation5 + $0x788] sm:$0xff] %v4412_v35  ;;  %1293 = vst [vmem:[#allocation5 + $0x790] sm:$0xff] %v4413_v37  ;;  %v4418_v47 = vadd.f32 -0.5, %v4936_v46  ;;  %v4419_v49 = vadd.f32 -0.5, %v4937_v48  ;;  %v4938_v50 = vld [vmem:[#allocation2 + $0x7c8] sm:$0xff]  ;;  %v4939_v52 = vld [vmem:[#allocation2 + $0x7d0] sm:$0xff] }
 0x191   :  { %v4420_v51 = vadd.f32 -0.5, %v4938_v50  ;;  %v4421_v53 = vadd.f32 -0.5, %v4939_v52  ;;  %1294 = vst [vmem:[#allocation5 + $0x798] sm:$0xff] %v4414_v39  ;;  %1295 = vst [vmem:[#allocation5 + $0x7a0] sm:$0xff] %v4415_v41  ;;  %v4940_v54 = vld [vmem:[#allocation2 + $0x7d8] sm:$0xff]  ;;  %v4941_v56 = vld [vmem:[#allocation2 + $0x7e0] sm:$0xff] }
 0x192   :  { %1296 = vst [vmem:[#allocation5 + $0x7a8] sm:$0xff] %v4416_v43  ;;  %1297 = vst [vmem:[#allocation5 + $0x7b0] sm:$0xff] %v4417_v45  ;;  %v4422_v55 = vadd.f32 -0.5, %v4940_v54  ;;  %v4423_v57 = vadd.f32 -0.5, %v4941_v56  ;;  %v4942_v58 = vld [vmem:[#allocation2 + $0x7e8] sm:$0xff]  ;;  %v4943_v60 = vld [vmem:[#allocation2 + $0x7f0] sm:$0xff] }
 0x193   :  { %v4424_v59 = vadd.f32 -0.5, %v4942_v58  ;;  %v4425_v61 = vadd.f32 -0.5, %v4943_v60  ;;  %1298 = vst [vmem:[#allocation5 + $0x7b8] sm:$0xff] %v4418_v47  ;;  %1299 = vst [vmem:[#allocation5 + $0x7c0] sm:$0xff] %v4419_v49  ;;  %v4944_v62 = vld [vmem:[#allocation2 + $0x7f8] sm:$0xff]  ;;  %v4945_v0 = vld [vmem:[#allocation2 + $0x800] sm:$0xff] }
 0x194   :  { %1300 = vst [vmem:[#allocation5 + $0x7c8] sm:$0xff] %v4420_v51  ;;  %1301 = vst [vmem:[#allocation5 + $0x7d0] sm:$0xff] %v4421_v53  ;;  %v4426_v63 = vadd.f32 -0.5, %v4944_v62  ;;  %v4427_v1 = vadd.f32 -0.5, %v4945_v0  ;;  %v4946_v2 = vld [vmem:[#allocation2 + $0x808] sm:$0xff]  ;;  %v4947_v4 = vld [vmem:[#allocation2 + $0x810] sm:$0xff] }
 0x195   :  { %v4428_v3 = vadd.f32 -0.5, %v4946_v2  ;;  %v4429_v5 = vadd.f32 -0.5, %v4947_v4  ;;  %1302 = vst [vmem:[#allocation5 + $0x7d8] sm:$0xff] %v4422_v55  ;;  %1303 = vst [vmem:[#allocation5 + $0x7e0] sm:$0xff] %v4423_v57  ;;  %v4948_v6 = vld [vmem:[#allocation2 + $0x818] sm:$0xff]  ;;  %v4949_v8 = vld [vmem:[#allocation2 + $0x820] sm:$0xff] }
 0x196   :  { %1304 = vst [vmem:[#allocation5 + $0x7e8] sm:$0xff] %v4424_v59  ;;  %1305 = vst [vmem:[#allocation5 + $0x7f0] sm:$0xff] %v4425_v61  ;;  %v4430_v7 = vadd.f32 -0.5, %v4948_v6  ;;  %v4431_v9 = vadd.f32 -0.5, %v4949_v8  ;;  %v4950_v10 = vld [vmem:[#allocation2 + $0x828] sm:$0xff]  ;;  %v4951_v12 = vld [vmem:[#allocation2 + $0x830] sm:$0xff] }
 0x197   :  { %v4432_v11 = vadd.f32 -0.5, %v4950_v10  ;;  %v4433_v13 = vadd.f32 -0.5, %v4951_v12  ;;  %1306 = vst [vmem:[#allocation5 + $0x7f8] sm:$0xff] %v4426_v63  ;;  %1307 = vst [vmem:[#allocation5 + $0x800] sm:$0xff] %v4427_v1  ;;  %v4952_v14 = vld [vmem:[#allocation2 + $0x838] sm:$0xff]  ;;  %v4953_v16 = vld [vmem:[#allocation2 + $0x840] sm:$0xff] }
 0x198   :  { %1308 = vst [vmem:[#allocation5 + $0x808] sm:$0xff] %v4428_v3  ;;  %1309 = vst [vmem:[#allocation5 + $0x810] sm:$0xff] %v4429_v5  ;;  %v4434_v15 = vadd.f32 -0.5, %v4952_v14  ;;  %v4435_v17 = vadd.f32 -0.5, %v4953_v16  ;;  %v4954_v18 = vld [vmem:[#allocation2 + $0x848] sm:$0xff]  ;;  %v4955_v20 = vld [vmem:[#allocation2 + $0x850] sm:$0xff] }
 0x199   :  { %v4436_v19 = vadd.f32 -0.5, %v4954_v18  ;;  %v4437_v21 = vadd.f32 -0.5, %v4955_v20  ;;  %1310 = vst [vmem:[#allocation5 + $0x818] sm:$0xff] %v4430_v7  ;;  %1311 = vst [vmem:[#allocation5 + $0x820] sm:$0xff] %v4431_v9  ;;  %v4956_v22 = vld [vmem:[#allocation2 + $0x858] sm:$0xff]  ;;  %v4957_v24 = vld [vmem:[#allocation2 + $0x860] sm:$0xff] }
 0x19a   :  { %1312 = vst [vmem:[#allocation5 + $0x828] sm:$0xff] %v4432_v11  ;;  %1313 = vst [vmem:[#allocation5 + $0x830] sm:$0xff] %v4433_v13  ;;  %v4438_v23 = vadd.f32 -0.5, %v4956_v22  ;;  %v4439_v25 = vadd.f32 -0.5, %v4957_v24  ;;  %v4958_v26 = vld [vmem:[#allocation2 + $0x868] sm:$0xff]  ;;  %v4959_v28 = vld [vmem:[#allocation2 + $0x870] sm:$0xff] }
 0x19b   :  { %v4440_v27 = vadd.f32 -0.5, %v4958_v26  ;;  %v4441_v29 = vadd.f32 -0.5, %v4959_v28  ;;  %1314 = vst [vmem:[#allocation5 + $0x838] sm:$0xff] %v4434_v15  ;;  %1315 = vst [vmem:[#allocation5 + $0x840] sm:$0xff] %v4435_v17  ;;  %v4960_v30 = vld [vmem:[#allocation2 + $0x878] sm:$0xff]  ;;  %v4961_v32 = vld [vmem:[#allocation2 + $0x880] sm:$0xff] }
 0x19c   :  { %1316 = vst [vmem:[#allocation5 + $0x848] sm:$0xff] %v4436_v19  ;;  %1317 = vst [vmem:[#allocation5 + $0x850] sm:$0xff] %v4437_v21  ;;  %v4442_v31 = vadd.f32 -0.5, %v4960_v30  ;;  %v4443_v33 = vadd.f32 -0.5, %v4961_v32  ;;  %v4962_v34 = vld [vmem:[#allocation2 + $0x888] sm:$0xff]  ;;  %v4963_v36 = vld [vmem:[#allocation2 + $0x890] sm:$0xff] }
 0x19d   :  { %v4444_v35 = vadd.f32 -0.5, %v4962_v34  ;;  %v4445_v37 = vadd.f32 -0.5, %v4963_v36  ;;  %1318 = vst [vmem:[#allocation5 + $0x858] sm:$0xff] %v4438_v23  ;;  %1319 = vst [vmem:[#allocation5 + $0x860] sm:$0xff] %v4439_v25  ;;  %v4964_v38 = vld [vmem:[#allocation2 + $0x898] sm:$0xff]  ;;  %v4965_v40 = vld [vmem:[#allocation2 + $0x8a0] sm:$0xff] }
 0x19e   :  { %1320 = vst [vmem:[#allocation5 + $0x868] sm:$0xff] %v4440_v27  ;;  %1321 = vst [vmem:[#allocation5 + $0x870] sm:$0xff] %v4441_v29  ;;  %v4446_v39 = vadd.f32 -0.5, %v4964_v38  ;;  %v4447_v41 = vadd.f32 -0.5, %v4965_v40  ;;  %v4966_v42 = vld [vmem:[#allocation2 + $0x8a8] sm:$0xff]  ;;  %v4967_v44 = vld [vmem:[#allocation2 + $0x8b0] sm:$0xff] }
 0x19f   :  { %v4448_v43 = vadd.f32 -0.5, %v4966_v42  ;;  %v4449_v45 = vadd.f32 -0.5, %v4967_v44  ;;  %1322 = vst [vmem:[#allocation5 + $0x878] sm:$0xff] %v4442_v31  ;;  %1323 = vst [vmem:[#allocation5 + $0x880] sm:$0xff] %v4443_v33  ;;  %v4968_v46 = vld [vmem:[#allocation2 + $0x8b8] sm:$0xff]  ;;  %v4969_v48 = vld [vmem:[#allocation2 + $0x8c0] sm:$0xff] }
 0x1a0   :  { %1324 = vst [vmem:[#allocation5 + $0x888] sm:$0xff] %v4444_v35  ;;  %1325 = vst [vmem:[#allocation5 + $0x890] sm:$0xff] %v4445_v37  ;;  %v4450_v47 = vadd.f32 -0.5, %v4968_v46  ;;  %v4451_v49 = vadd.f32 -0.5, %v4969_v48  ;;  %v4970_v50 = vld [vmem:[#allocation2 + $0x8c8] sm:$0xff]  ;;  %v4971_v52 = vld [vmem:[#allocation2 + $0x8d0] sm:$0xff] }
 0x1a1   :  { %v4452_v51 = vadd.f32 -0.5, %v4970_v50  ;;  %v4453_v53 = vadd.f32 -0.5, %v4971_v52  ;;  %1326 = vst [vmem:[#allocation5 + $0x898] sm:$0xff] %v4446_v39  ;;  %1327 = vst [vmem:[#allocation5 + $0x8a0] sm:$0xff] %v4447_v41  ;;  %v4972_v54 = vld [vmem:[#allocation2 + $0x8d8] sm:$0xff]  ;;  %v4973_v56 = vld [vmem:[#allocation2 + $0x8e0] sm:$0xff] }
 0x1a2   :  { %1328 = vst [vmem:[#allocation5 + $0x8a8] sm:$0xff] %v4448_v43  ;;  %1329 = vst [vmem:[#allocation5 + $0x8b0] sm:$0xff] %v4449_v45  ;;  %v4454_v55 = vadd.f32 -0.5, %v4972_v54  ;;  %v4455_v57 = vadd.f32 -0.5, %v4973_v56  ;;  %v4974_v58 = vld [vmem:[#allocation2 + $0x8e8] sm:$0xff]  ;;  %v4975_v60 = vld [vmem:[#allocation2 + $0x8f0] sm:$0xff] }
 0x1a3   :  { %v4456_v59 = vadd.f32 -0.5, %v4974_v58  ;;  %v4457_v61 = vadd.f32 -0.5, %v4975_v60  ;;  %1330 = vst [vmem:[#allocation5 + $0x8b8] sm:$0xff] %v4450_v47  ;;  %1331 = vst [vmem:[#allocation5 + $0x8c0] sm:$0xff] %v4451_v49  ;;  %v4976_v62 = vld [vmem:[#allocation2 + $0x8f8] sm:$0xff]  ;;  %v4977_v0 = vld [vmem:[#allocation2 + $0x900] sm:$0xff] }
 0x1a4   :  { %1332 = vst [vmem:[#allocation5 + $0x8c8] sm:$0xff] %v4452_v51  ;;  %1333 = vst [vmem:[#allocation5 + $0x8d0] sm:$0xff] %v4453_v53  ;;  %v4458_v63 = vadd.f32 -0.5, %v4976_v62  ;;  %v4459_v1 = vadd.f32 -0.5, %v4977_v0  ;;  %v4978_v2 = vld [vmem:[#allocation2 + $0x908] sm:$0xff]  ;;  %v4979_v4 = vld [vmem:[#allocation2 + $0x910] sm:$0xff] }
 0x1a5   :  { %v4460_v3 = vadd.f32 -0.5, %v4978_v2  ;;  %v4461_v5 = vadd.f32 -0.5, %v4979_v4  ;;  %1334 = vst [vmem:[#allocation5 + $0x8d8] sm:$0xff] %v4454_v55  ;;  %1335 = vst [vmem:[#allocation5 + $0x8e0] sm:$0xff] %v4455_v57  ;;  %v4980_v6 = vld [vmem:[#allocation2 + $0x918] sm:$0xff]  ;;  %v4981_v8 = vld [vmem:[#allocation2 + $0x920] sm:$0xff] }
 0x1a6   :  { %1336 = vst [vmem:[#allocation5 + $0x8e8] sm:$0xff] %v4456_v59  ;;  %1337 = vst [vmem:[#allocation5 + $0x8f0] sm:$0xff] %v4457_v61  ;;  %v4462_v7 = vadd.f32 -0.5, %v4980_v6  ;;  %v4463_v9 = vadd.f32 -0.5, %v4981_v8  ;;  %v4982_v10 = vld [vmem:[#allocation2 + $0x928] sm:$0xff]  ;;  %v4983_v12 = vld [vmem:[#allocation2 + $0x930] sm:$0xff] }
 0x1a7   :  { %v4464_v11 = vadd.f32 -0.5, %v4982_v10  ;;  %v4465_v13 = vadd.f32 -0.5, %v4983_v12  ;;  %1338 = vst [vmem:[#allocation5 + $0x8f8] sm:$0xff] %v4458_v63  ;;  %1339 = vst [vmem:[#allocation5 + $0x900] sm:$0xff] %v4459_v1  ;;  %v4984_v14 = vld [vmem:[#allocation2 + $0x938] sm:$0xff]  ;;  %v4985_v16 = vld [vmem:[#allocation2 + $0x940] sm:$0xff] }
 0x1a8   :  { %1340 = vst [vmem:[#allocation5 + $0x908] sm:$0xff] %v4460_v3  ;;  %1341 = vst [vmem:[#allocation5 + $0x910] sm:$0xff] %v4461_v5  ;;  %v4466_v15 = vadd.f32 -0.5, %v4984_v14  ;;  %v4467_v17 = vadd.f32 -0.5, %v4985_v16  ;;  %v4986_v18 = vld [vmem:[#allocation2 + $0x948] sm:$0xff]  ;;  %v4987_v20 = vld [vmem:[#allocation2 + $0x950] sm:$0xff] }
 0x1a9   :  { %v4468_v19 = vadd.f32 -0.5, %v4986_v18  ;;  %v4469_v21 = vadd.f32 -0.5, %v4987_v20  ;;  %1342 = vst [vmem:[#allocation5 + $0x918] sm:$0xff] %v4462_v7  ;;  %1343 = vst [vmem:[#allocation5 + $0x920] sm:$0xff] %v4463_v9  ;;  %v4988_v22 = vld [vmem:[#allocation2 + $0x958] sm:$0xff]  ;;  %v4989_v24 = vld [vmem:[#allocation2 + $0x960] sm:$0xff] }
 0x1aa   :  { %1344 = vst [vmem:[#allocation5 + $0x928] sm:$0xff] %v4464_v11  ;;  %1345 = vst [vmem:[#allocation5 + $0x930] sm:$0xff] %v4465_v13  ;;  %v4470_v23 = vadd.f32 -0.5, %v4988_v22  ;;  %v4471_v25 = vadd.f32 -0.5, %v4989_v24  ;;  %v4990_v26 = vld [vmem:[#allocation2 + $0x968] sm:$0xff]  ;;  %v4991_v28 = vld [vmem:[#allocation2 + $0x970] sm:$0xff] }
 0x1ab   :  { %v4472_v27 = vadd.f32 -0.5, %v4990_v26  ;;  %v4473_v29 = vadd.f32 -0.5, %v4991_v28  ;;  %1346 = vst [vmem:[#allocation5 + $0x938] sm:$0xff] %v4466_v15  ;;  %1347 = vst [vmem:[#allocation5 + $0x940] sm:$0xff] %v4467_v17  ;;  %v4992_v30 = vld [vmem:[#allocation2 + $0x978] sm:$0xff]  ;;  %v4993_v32 = vld [vmem:[#allocation2 + $0x980] sm:$0xff] }
 0x1ac   :  { %1348 = vst [vmem:[#allocation5 + $0x948] sm:$0xff] %v4468_v19  ;;  %1349 = vst [vmem:[#allocation5 + $0x950] sm:$0xff] %v4469_v21  ;;  %v4474_v31 = vadd.f32 -0.5, %v4992_v30  ;;  %v4475_v33 = vadd.f32 -0.5, %v4993_v32  ;;  %v4994_v34 = vld [vmem:[#allocation2 + $0x988] sm:$0xff]  ;;  %v4995_v36 = vld [vmem:[#allocation2 + $0x990] sm:$0xff] }
 0x1ad   :  { %v4476_v35 = vadd.f32 -0.5, %v4994_v34  ;;  %v4477_v37 = vadd.f32 -0.5, %v4995_v36  ;;  %1350 = vst [vmem:[#allocation5 + $0x958] sm:$0xff] %v4470_v23  ;;  %1351 = vst [vmem:[#allocation5 + $0x960] sm:$0xff] %v4471_v25  ;;  %v4996_v38 = vld [vmem:[#allocation2 + $0x998] sm:$0xff]  ;;  %v4997_v40 = vld [vmem:[#allocation2 + $0x9a0] sm:$0xff] }
 0x1ae   :  { %1352 = vst [vmem:[#allocation5 + $0x968] sm:$0xff] %v4472_v27  ;;  %1353 = vst [vmem:[#allocation5 + $0x970] sm:$0xff] %v4473_v29  ;;  %v4478_v39 = vadd.f32 -0.5, %v4996_v38  ;;  %v4479_v41 = vadd.f32 -0.5, %v4997_v40  ;;  %v4998_v42 = vld [vmem:[#allocation2 + $0x9a8] sm:$0xff]  ;;  %v4999_v44 = vld [vmem:[#allocation2 + $0x9b0] sm:$0xff] }
 0x1af   :  { %v4480_v43 = vadd.f32 -0.5, %v4998_v42  ;;  %v4481_v45 = vadd.f32 -0.5, %v4999_v44  ;;  %1354 = vst [vmem:[#allocation5 + $0x978] sm:$0xff] %v4474_v31  ;;  %1355 = vst [vmem:[#allocation5 + $0x980] sm:$0xff] %v4475_v33  ;;  %v5000_v46 = vld [vmem:[#allocation2 + $0x9b8] sm:$0xff]  ;;  %v5001_v48 = vld [vmem:[#allocation2 + $0x9c0] sm:$0xff] }
 0x1b0   :  { %1356 = vst [vmem:[#allocation5 + $0x988] sm:$0xff] %v4476_v35  ;;  %1357 = vst [vmem:[#allocation5 + $0x990] sm:$0xff] %v4477_v37  ;;  %v4482_v47 = vadd.f32 -0.5, %v5000_v46  ;;  %v4483_v49 = vadd.f32 -0.5, %v5001_v48  ;;  %v5002_v50 = vld [vmem:[#allocation2 + $0x9c8] sm:$0xff]  ;;  %v5003_v52 = vld [vmem:[#allocation2 + $0x9d0] sm:$0xff] }
 0x1b1   :  { %v4484_v51 = vadd.f32 -0.5, %v5002_v50  ;;  %v4485_v53 = vadd.f32 -0.5, %v5003_v52  ;;  %1358 = vst [vmem:[#allocation5 + $0x998] sm:$0xff] %v4478_v39  ;;  %1359 = vst [vmem:[#allocation5 + $0x9a0] sm:$0xff] %v4479_v41  ;;  %v5004_v54 = vld [vmem:[#allocation2 + $0x9d8] sm:$0xff]  ;;  %v5005_v56 = vld [vmem:[#allocation2 + $0x9e0] sm:$0xff] }
 0x1b2   :  { %1360 = vst [vmem:[#allocation5 + $0x9a8] sm:$0xff] %v4480_v43  ;;  %1361 = vst [vmem:[#allocation5 + $0x9b0] sm:$0xff] %v4481_v45  ;;  %v4486_v55 = vadd.f32 -0.5, %v5004_v54  ;;  %v4487_v57 = vadd.f32 -0.5, %v5005_v56  ;;  %v5006_v58 = vld [vmem:[#allocation2 + $0x9e8] sm:$0xff]  ;;  %v5007_v60 = vld [vmem:[#allocation2 + $0x9f0] sm:$0xff] }
 0x1b3   :  { %v4488_v59 = vadd.f32 -0.5, %v5006_v58  ;;  %v4489_v61 = vadd.f32 -0.5, %v5007_v60  ;;  %1362 = vst [vmem:[#allocation5 + $0x9b8] sm:$0xff] %v4482_v47  ;;  %1363 = vst [vmem:[#allocation5 + $0x9c0] sm:$0xff] %v4483_v49  ;;  %v5008_v62 = vld [vmem:[#allocation2 + $0x9f8] sm:$0xff]  ;;  %v5009_v0 = vld [vmem:[#allocation2 + $0xa00] sm:$0xff] }
 0x1b4   :  { %1364 = vst [vmem:[#allocation5 + $0x9c8] sm:$0xff] %v4484_v51  ;;  %1365 = vst [vmem:[#allocation5 + $0x9d0] sm:$0xff] %v4485_v53  ;;  %v4490_v63 = vadd.f32 -0.5, %v5008_v62  ;;  %v4491_v1 = vadd.f32 -0.5, %v5009_v0  ;;  %v5010_v2 = vld [vmem:[#allocation2 + $0xa08] sm:$0xff]  ;;  %v5011_v4 = vld [vmem:[#allocation2 + $0xa10] sm:$0xff] }
 0x1b5   :  { %v4492_v3 = vadd.f32 -0.5, %v5010_v2  ;;  %v4493_v5 = vadd.f32 -0.5, %v5011_v4  ;;  %1366 = vst [vmem:[#allocation5 + $0x9d8] sm:$0xff] %v4486_v55  ;;  %1367 = vst [vmem:[#allocation5 + $0x9e0] sm:$0xff] %v4487_v57  ;;  %v5012_v6 = vld [vmem:[#allocation2 + $0xa18] sm:$0xff]  ;;  %v5013_v8 = vld [vmem:[#allocation2 + $0xa20] sm:$0xff] }
 0x1b6   :  { %1368 = vst [vmem:[#allocation5 + $0x9e8] sm:$0xff] %v4488_v59  ;;  %1369 = vst [vmem:[#allocation5 + $0x9f0] sm:$0xff] %v4489_v61  ;;  %v4494_v7 = vadd.f32 -0.5, %v5012_v6  ;;  %v4495_v9 = vadd.f32 -0.5, %v5013_v8  ;;  %v5014_v10 = vld [vmem:[#allocation2 + $0xa28] sm:$0xff]  ;;  %v5015_v12 = vld [vmem:[#allocation2 + $0xa30] sm:$0xff] }
 0x1b7   :  { %v4496_v11 = vadd.f32 -0.5, %v5014_v10  ;;  %v4497_v13 = vadd.f32 -0.5, %v5015_v12  ;;  %1370 = vst [vmem:[#allocation5 + $0x9f8] sm:$0xff] %v4490_v63  ;;  %1371 = vst [vmem:[#allocation5 + $0xa00] sm:$0xff] %v4491_v1  ;;  %v5016_v14 = vld [vmem:[#allocation2 + $0xa38] sm:$0xff]  ;;  %v5017_v16 = vld [vmem:[#allocation2 + $0xa40] sm:$0xff] }
 0x1b8   :  { %1372 = vst [vmem:[#allocation5 + $0xa08] sm:$0xff] %v4492_v3  ;;  %1373 = vst [vmem:[#allocation5 + $0xa10] sm:$0xff] %v4493_v5  ;;  %v4498_v15 = vadd.f32 -0.5, %v5016_v14  ;;  %v4499_v17 = vadd.f32 -0.5, %v5017_v16  ;;  %v5018_v18 = vld [vmem:[#allocation2 + $0xa48] sm:$0xff]  ;;  %v5019_v20 = vld [vmem:[#allocation2 + $0xa50] sm:$0xff] }
 0x1b9   :  { %v4500_v19 = vadd.f32 -0.5, %v5018_v18  ;;  %v4501_v21 = vadd.f32 -0.5, %v5019_v20  ;;  %1374 = vst [vmem:[#allocation5 + $0xa18] sm:$0xff] %v4494_v7  ;;  %1375 = vst [vmem:[#allocation5 + $0xa20] sm:$0xff] %v4495_v9  ;;  %v5020_v22 = vld [vmem:[#allocation2 + $0xa58] sm:$0xff]  ;;  %v5021_v24 = vld [vmem:[#allocation2 + $0xa60] sm:$0xff] }
 0x1ba   :  { %1376 = vst [vmem:[#allocation5 + $0xa28] sm:$0xff] %v4496_v11  ;;  %1377 = vst [vmem:[#allocation5 + $0xa30] sm:$0xff] %v4497_v13  ;;  %v4502_v23 = vadd.f32 -0.5, %v5020_v22  ;;  %v4503_v25 = vadd.f32 -0.5, %v5021_v24  ;;  %v5022_v26 = vld [vmem:[#allocation2 + $0xa68] sm:$0xff]  ;;  %v5023_v28 = vld [vmem:[#allocation2 + $0xa70] sm:$0xff] }
 0x1bb   :  { %v4504_v27 = vadd.f32 -0.5, %v5022_v26  ;;  %v4505_v29 = vadd.f32 -0.5, %v5023_v28  ;;  %1378 = vst [vmem:[#allocation5 + $0xa38] sm:$0xff] %v4498_v15  ;;  %1379 = vst [vmem:[#allocation5 + $0xa40] sm:$0xff] %v4499_v17  ;;  %v5024_v30 = vld [vmem:[#allocation2 + $0xa78] sm:$0xff]  ;;  %v5025_v32 = vld [vmem:[#allocation2 + $0xa80] sm:$0xff] }
 0x1bc   :  { %1380 = vst [vmem:[#allocation5 + $0xa48] sm:$0xff] %v4500_v19  ;;  %1381 = vst [vmem:[#allocation5 + $0xa50] sm:$0xff] %v4501_v21  ;;  %v4506_v31 = vadd.f32 -0.5, %v5024_v30  ;;  %v4507_v33 = vadd.f32 -0.5, %v5025_v32  ;;  %v5026_v34 = vld [vmem:[#allocation2 + $0xa88] sm:$0xff]  ;;  %v5027_v36 = vld [vmem:[#allocation2 + $0xa90] sm:$0xff] }
 0x1bd   :  { %v4508_v35 = vadd.f32 -0.5, %v5026_v34  ;;  %v4509_v37 = vadd.f32 -0.5, %v5027_v36  ;;  %1382 = vst [vmem:[#allocation5 + $0xa58] sm:$0xff] %v4502_v23  ;;  %1383 = vst [vmem:[#allocation5 + $0xa60] sm:$0xff] %v4503_v25  ;;  %v5028_v38 = vld [vmem:[#allocation2 + $0xa98] sm:$0xff]  ;;  %v5029_v40 = vld [vmem:[#allocation2 + $0xaa0] sm:$0xff] }
 0x1be   :  { %1384 = vst [vmem:[#allocation5 + $0xa68] sm:$0xff] %v4504_v27  ;;  %1385 = vst [vmem:[#allocation5 + $0xa70] sm:$0xff] %v4505_v29  ;;  %v4510_v39 = vadd.f32 -0.5, %v5028_v38  ;;  %v4511_v41 = vadd.f32 -0.5, %v5029_v40  ;;  %v5030_v42 = vld [vmem:[#allocation2 + $0xaa8] sm:$0xff]  ;;  %v5031_v44 = vld [vmem:[#allocation2 + $0xab0] sm:$0xff] }
 0x1bf   :  { %v4512_v43 = vadd.f32 -0.5, %v5030_v42  ;;  %v4513_v45 = vadd.f32 -0.5, %v5031_v44  ;;  %1386 = vst [vmem:[#allocation5 + $0xa78] sm:$0xff] %v4506_v31  ;;  %1387 = vst [vmem:[#allocation5 + $0xa80] sm:$0xff] %v4507_v33  ;;  %v5032_v46 = vld [vmem:[#allocation2 + $0xab8] sm:$0xff]  ;;  %v5033_v48 = vld [vmem:[#allocation2 + $0xac0] sm:$0xff] }
 0x1c0   :  { %1388 = vst [vmem:[#allocation5 + $0xa88] sm:$0xff] %v4508_v35  ;;  %1389 = vst [vmem:[#allocation5 + $0xa90] sm:$0xff] %v4509_v37  ;;  %v4514_v47 = vadd.f32 -0.5, %v5032_v46  ;;  %v4515_v49 = vadd.f32 -0.5, %v5033_v48  ;;  %v5034_v50 = vld [vmem:[#allocation2 + $0xac8] sm:$0xff]  ;;  %v5035_v52 = vld [vmem:[#allocation2 + $0xad0] sm:$0xff] }
 0x1c1   :  { %v4516_v51 = vadd.f32 -0.5, %v5034_v50  ;;  %v4517_v53 = vadd.f32 -0.5, %v5035_v52  ;;  %1390 = vst [vmem:[#allocation5 + $0xa98] sm:$0xff] %v4510_v39  ;;  %1391 = vst [vmem:[#allocation5 + $0xaa0] sm:$0xff] %v4511_v41  ;;  %v5036_v54 = vld [vmem:[#allocation2 + $0xad8] sm:$0xff]  ;;  %v5037_v56 = vld [vmem:[#allocation2 + $0xae0] sm:$0xff] }
 0x1c2   :  { %1392 = vst [vmem:[#allocation5 + $0xaa8] sm:$0xff] %v4512_v43  ;;  %1393 = vst [vmem:[#allocation5 + $0xab0] sm:$0xff] %v4513_v45  ;;  %v4518_v55 = vadd.f32 -0.5, %v5036_v54  ;;  %v4519_v57 = vadd.f32 -0.5, %v5037_v56  ;;  %v5038_v58 = vld [vmem:[#allocation2 + $0xae8] sm:$0xff]  ;;  %v5039_v60 = vld [vmem:[#allocation2 + $0xaf0] sm:$0xff] }
 0x1c3   :  { %v4520_v59 = vadd.f32 -0.5, %v5038_v58  ;;  %v4521_v61 = vadd.f32 -0.5, %v5039_v60  ;;  %1394 = vst [vmem:[#allocation5 + $0xab8] sm:$0xff] %v4514_v47  ;;  %1395 = vst [vmem:[#allocation5 + $0xac0] sm:$0xff] %v4515_v49  ;;  %v5040_v62 = vld [vmem:[#allocation2 + $0xaf8] sm:$0xff]  ;;  %v5041_v0 = vld [vmem:[#allocation2 + $0xb00] sm:$0xff] }
 0x1c4   :  { %1396 = vst [vmem:[#allocation5 + $0xac8] sm:$0xff] %v4516_v51  ;;  %1397 = vst [vmem:[#allocation5 + $0xad0] sm:$0xff] %v4517_v53  ;;  %v4522_v63 = vadd.f32 -0.5, %v5040_v62  ;;  %v4523_v1 = vadd.f32 -0.5, %v5041_v0  ;;  %v5042_v2 = vld [vmem:[#allocation2 + $0xb08] sm:$0xff]  ;;  %v5043_v4 = vld [vmem:[#allocation2 + $0xb10] sm:$0xff] }
 0x1c5   :  { %v4524_v3 = vadd.f32 -0.5, %v5042_v2  ;;  %v4525_v5 = vadd.f32 -0.5, %v5043_v4  ;;  %1398 = vst [vmem:[#allocation5 + $0xad8] sm:$0xff] %v4518_v55  ;;  %1399 = vst [vmem:[#allocation5 + $0xae0] sm:$0xff] %v4519_v57  ;;  %v5044_v6 = vld [vmem:[#allocation2 + $0xb18] sm:$0xff]  ;;  %v5045_v8 = vld [vmem:[#allocation2 + $0xb20] sm:$0xff] }
 0x1c6   :  { %1400 = vst [vmem:[#allocation5 + $0xae8] sm:$0xff] %v4520_v59  ;;  %1401 = vst [vmem:[#allocation5 + $0xaf0] sm:$0xff] %v4521_v61  ;;  %v4526_v7 = vadd.f32 -0.5, %v5044_v6  ;;  %v4527_v9 = vadd.f32 -0.5, %v5045_v8  ;;  %v5046_v10 = vld [vmem:[#allocation2 + $0xb28] sm:$0xff]  ;;  %v5047_v12 = vld [vmem:[#allocation2 + $0xb30] sm:$0xff] }
 0x1c7   :  { %v4528_v11 = vadd.f32 -0.5, %v5046_v10  ;;  %v4529_v13 = vadd.f32 -0.5, %v5047_v12  ;;  %1402 = vst [vmem:[#allocation5 + $0xaf8] sm:$0xff] %v4522_v63  ;;  %1403 = vst [vmem:[#allocation5 + $0xb00] sm:$0xff] %v4523_v1  ;;  %v5048_v14 = vld [vmem:[#allocation2 + $0xb38] sm:$0xff]  ;;  %v5049_v16 = vld [vmem:[#allocation2 + $0xb40] sm:$0xff] }
 0x1c8   :  { %1404 = vst [vmem:[#allocation5 + $0xb08] sm:$0xff] %v4524_v3  ;;  %1405 = vst [vmem:[#allocation5 + $0xb10] sm:$0xff] %v4525_v5  ;;  %v4530_v15 = vadd.f32 -0.5, %v5048_v14  ;;  %v4531_v17 = vadd.f32 -0.5, %v5049_v16  ;;  %v5050_v18 = vld [vmem:[#allocation2 + $0xb48] sm:$0xff]  ;;  %v5051_v20 = vld [vmem:[#allocation2 + $0xb50] sm:$0xff] }
 0x1c9   :  { %v4532_v19 = vadd.f32 -0.5, %v5050_v18  ;;  %v4533_v21 = vadd.f32 -0.5, %v5051_v20  ;;  %1406 = vst [vmem:[#allocation5 + $0xb18] sm:$0xff] %v4526_v7  ;;  %1407 = vst [vmem:[#allocation5 + $0xb20] sm:$0xff] %v4527_v9  ;;  %v5052_v22 = vld [vmem:[#allocation2 + $0xb58] sm:$0xff]  ;;  %v5053_v24 = vld [vmem:[#allocation2 + $0xb60] sm:$0xff] }
 0x1ca   :  { %1408 = vst [vmem:[#allocation5 + $0xb28] sm:$0xff] %v4528_v11  ;;  %1409 = vst [vmem:[#allocation5 + $0xb30] sm:$0xff] %v4529_v13  ;;  %v4534_v23 = vadd.f32 -0.5, %v5052_v22  ;;  %v4535_v25 = vadd.f32 -0.5, %v5053_v24  ;;  %v5054_v26 = vld [vmem:[#allocation2 + $0xb68] sm:$0xff]  ;;  %v5055_v28 = vld [vmem:[#allocation2 + $0xb70] sm:$0xff] }
 0x1cb   :  { %v4536_v27 = vadd.f32 -0.5, %v5054_v26  ;;  %v4537_v29 = vadd.f32 -0.5, %v5055_v28  ;;  %1410 = vst [vmem:[#allocation5 + $0xb38] sm:$0xff] %v4530_v15  ;;  %1411 = vst [vmem:[#allocation5 + $0xb40] sm:$0xff] %v4531_v17  ;;  %v5056_v30 = vld [vmem:[#allocation2 + $0xb78] sm:$0xff]  ;;  %v5057_v32 = vld [vmem:[#allocation2 + $0xb80] sm:$0xff] }
 0x1cc   :  { %1412 = vst [vmem:[#allocation5 + $0xb48] sm:$0xff] %v4532_v19  ;;  %1413 = vst [vmem:[#allocation5 + $0xb50] sm:$0xff] %v4533_v21  ;;  %v4538_v31 = vadd.f32 -0.5, %v5056_v30  ;;  %v4539_v33 = vadd.f32 -0.5, %v5057_v32  ;;  %v5058_v34 = vld [vmem:[#allocation2 + $0xb88] sm:$0xff]  ;;  %v5059_v36 = vld [vmem:[#allocation2 + $0xb90] sm:$0xff] }
 0x1cd   :  { %v4540_v35 = vadd.f32 -0.5, %v5058_v34  ;;  %v4541_v37 = vadd.f32 -0.5, %v5059_v36  ;;  %1414 = vst [vmem:[#allocation5 + $0xb58] sm:$0xff] %v4534_v23  ;;  %1415 = vst [vmem:[#allocation5 + $0xb60] sm:$0xff] %v4535_v25  ;;  %v5060_v38 = vld [vmem:[#allocation2 + $0xb98] sm:$0xff]  ;;  %v5061_v40 = vld [vmem:[#allocation2 + $0xba0] sm:$0xff] }
 0x1ce   :  { %1416 = vst [vmem:[#allocation5 + $0xb68] sm:$0xff] %v4536_v27  ;;  %1417 = vst [vmem:[#allocation5 + $0xb70] sm:$0xff] %v4537_v29  ;;  %v4542_v39 = vadd.f32 -0.5, %v5060_v38  ;;  %v4543_v41 = vadd.f32 -0.5, %v5061_v40  ;;  %v5062_v42 = vld [vmem:[#allocation2 + $0xba8] sm:$0xff]  ;;  %v5063_v44 = vld [vmem:[#allocation2 + $0xbb0] sm:$0xff] }
 0x1cf   :  { %v4544_v43 = vadd.f32 -0.5, %v5062_v42  ;;  %v4545_v45 = vadd.f32 -0.5, %v5063_v44  ;;  %1418 = vst [vmem:[#allocation5 + $0xb78] sm:$0xff] %v4538_v31  ;;  %1419 = vst [vmem:[#allocation5 + $0xb80] sm:$0xff] %v4539_v33  ;;  %v5064_v46 = vld [vmem:[#allocation2 + $0xbb8] sm:$0xff]  ;;  %v5065_v48 = vld [vmem:[#allocation2 + $0xbc0] sm:$0xff] }
 0x1d0   :  { %1420 = vst [vmem:[#allocation5 + $0xb88] sm:$0xff] %v4540_v35  ;;  %1421 = vst [vmem:[#allocation5 + $0xb90] sm:$0xff] %v4541_v37  ;;  %v4546_v47 = vadd.f32 -0.5, %v5064_v46  ;;  %v4547_v49 = vadd.f32 -0.5, %v5065_v48  ;;  %v5066_v50 = vld [vmem:[#allocation2 + $0xbc8] sm:$0xff]  ;;  %v5067_v52 = vld [vmem:[#allocation2 + $0xbd0] sm:$0xff] }
 0x1d1   :  { %v4548_v51 = vadd.f32 -0.5, %v5066_v50  ;;  %v4549_v53 = vadd.f32 -0.5, %v5067_v52  ;;  %1422 = vst [vmem:[#allocation5 + $0xb98] sm:$0xff] %v4542_v39  ;;  %1423 = vst [vmem:[#allocation5 + $0xba0] sm:$0xff] %v4543_v41  ;;  %v5068_v54 = vld [vmem:[#allocation2 + $0xbd8] sm:$0xff]  ;;  %v5069_v56 = vld [vmem:[#allocation2 + $0xbe0] sm:$0xff] }
 0x1d2   :  { %1424 = vst [vmem:[#allocation5 + $0xba8] sm:$0xff] %v4544_v43  ;;  %1425 = vst [vmem:[#allocation5 + $0xbb0] sm:$0xff] %v4545_v45  ;;  %v4550_v55 = vadd.f32 -0.5, %v5068_v54  ;;  %v4551_v57 = vadd.f32 -0.5, %v5069_v56  ;;  %v5070_v58 = vld [vmem:[#allocation2 + $0xbe8] sm:$0xff]  ;;  %v5071_v60 = vld [vmem:[#allocation2 + $0xbf0] sm:$0xff] }
 0x1d3   :  { %v4552_v59 = vadd.f32 -0.5, %v5070_v58  ;;  %v4553_v61 = vadd.f32 -0.5, %v5071_v60  ;;  %1426 = vst [vmem:[#allocation5 + $0xbb8] sm:$0xff] %v4546_v47  ;;  %1427 = vst [vmem:[#allocation5 + $0xbc0] sm:$0xff] %v4547_v49  ;;  %v5072_v62 = vld [vmem:[#allocation2 + $0xbf8] sm:$0xff]  ;;  %v5073_v0 = vld [vmem:[#allocation2 + $0xc00] sm:$0xff] }
 0x1d4   :  { %1428 = vst [vmem:[#allocation5 + $0xbc8] sm:$0xff] %v4548_v51  ;;  %1429 = vst [vmem:[#allocation5 + $0xbd0] sm:$0xff] %v4549_v53  ;;  %v4554_v63 = vadd.f32 -0.5, %v5072_v62  ;;  %v4555_v1 = vadd.f32 -0.5, %v5073_v0  ;;  %v5074_v2 = vld [vmem:[#allocation2 + $0xc08] sm:$0xff]  ;;  %v5075_v4 = vld [vmem:[#allocation2 + $0xc10] sm:$0xff] }
 0x1d5   :  { %v4556_v3 = vadd.f32 -0.5, %v5074_v2  ;;  %v4557_v5 = vadd.f32 -0.5, %v5075_v4  ;;  %1430 = vst [vmem:[#allocation5 + $0xbd8] sm:$0xff] %v4550_v55  ;;  %1431 = vst [vmem:[#allocation5 + $0xbe0] sm:$0xff] %v4551_v57  ;;  %v5076_v6 = vld [vmem:[#allocation2 + $0xc18] sm:$0xff]  ;;  %v5077_v8 = vld [vmem:[#allocation2 + $0xc20] sm:$0xff] }
 0x1d6   :  { %1432 = vst [vmem:[#allocation5 + $0xbe8] sm:$0xff] %v4552_v59  ;;  %1433 = vst [vmem:[#allocation5 + $0xbf0] sm:$0xff] %v4553_v61  ;;  %v4558_v7 = vadd.f32 -0.5, %v5076_v6  ;;  %v4559_v9 = vadd.f32 -0.5, %v5077_v8  ;;  %v5078_v10 = vld [vmem:[#allocation2 + $0xc28] sm:$0xff]  ;;  %v5079_v12 = vld [vmem:[#allocation2 + $0xc30] sm:$0xff] }
 0x1d7   :  { %v4560_v11 = vadd.f32 -0.5, %v5078_v10  ;;  %v4561_v13 = vadd.f32 -0.5, %v5079_v12  ;;  %1434 = vst [vmem:[#allocation5 + $0xbf8] sm:$0xff] %v4554_v63  ;;  %1435 = vst [vmem:[#allocation5 + $0xc00] sm:$0xff] %v4555_v1  ;;  %v5080_v14 = vld [vmem:[#allocation2 + $0xc38] sm:$0xff]  ;;  %v5081_v16 = vld [vmem:[#allocation2 + $0xc40] sm:$0xff] }
 0x1d8   :  { %1436 = vst [vmem:[#allocation5 + $0xc08] sm:$0xff] %v4556_v3  ;;  %1437 = vst [vmem:[#allocation5 + $0xc10] sm:$0xff] %v4557_v5  ;;  %v4562_v15 = vadd.f32 -0.5, %v5080_v14  ;;  %v4563_v17 = vadd.f32 -0.5, %v5081_v16  ;;  %v5082_v18 = vld [vmem:[#allocation2 + $0xc48] sm:$0xff]  ;;  %v5083_v20 = vld [vmem:[#allocation2 + $0xc50] sm:$0xff] }
 0x1d9   :  { %v4564_v19 = vadd.f32 -0.5, %v5082_v18  ;;  %v4565_v21 = vadd.f32 -0.5, %v5083_v20  ;;  %1438 = vst [vmem:[#allocation5 + $0xc18] sm:$0xff] %v4558_v7  ;;  %1439 = vst [vmem:[#allocation5 + $0xc20] sm:$0xff] %v4559_v9  ;;  %v5084_v22 = vld [vmem:[#allocation2 + $0xc58] sm:$0xff]  ;;  %v5085_v24 = vld [vmem:[#allocation2 + $0xc60] sm:$0xff] }
 0x1da   :  { %1440 = vst [vmem:[#allocation5 + $0xc28] sm:$0xff] %v4560_v11  ;;  %1441 = vst [vmem:[#allocation5 + $0xc30] sm:$0xff] %v4561_v13  ;;  %v4566_v23 = vadd.f32 -0.5, %v5084_v22  ;;  %v4567_v25 = vadd.f32 -0.5, %v5085_v24  ;;  %v5086_v26 = vld [vmem:[#allocation2 + $0xc68] sm:$0xff]  ;;  %v5087_v28 = vld [vmem:[#allocation2 + $0xc70] sm:$0xff] }
 0x1db   :  { %v4568_v27 = vadd.f32 -0.5, %v5086_v26  ;;  %v4569_v29 = vadd.f32 -0.5, %v5087_v28  ;;  %1442 = vst [vmem:[#allocation5 + $0xc38] sm:$0xff] %v4562_v15  ;;  %1443 = vst [vmem:[#allocation5 + $0xc40] sm:$0xff] %v4563_v17  ;;  %v5088_v30 = vld [vmem:[#allocation2 + $0xc78] sm:$0xff]  ;;  %v5089_v32 = vld [vmem:[#allocation2 + $0xc80] sm:$0xff] }
 0x1dc   :  { %1444 = vst [vmem:[#allocation5 + $0xc48] sm:$0xff] %v4564_v19  ;;  %1445 = vst [vmem:[#allocation5 + $0xc50] sm:$0xff] %v4565_v21  ;;  %v4570_v31 = vadd.f32 -0.5, %v5088_v30  ;;  %v4571_v33 = vadd.f32 -0.5, %v5089_v32  ;;  %v5090_v34 = vld [vmem:[#allocation2 + $0xc88] sm:$0xff]  ;;  %v5091_v36 = vld [vmem:[#allocation2 + $0xc90] sm:$0xff] }
 0x1dd   :  { %v4572_v35 = vadd.f32 -0.5, %v5090_v34  ;;  %v4573_v37 = vadd.f32 -0.5, %v5091_v36  ;;  %1446 = vst [vmem:[#allocation5 + $0xc58] sm:$0xff] %v4566_v23  ;;  %1447 = vst [vmem:[#allocation5 + $0xc60] sm:$0xff] %v4567_v25  ;;  %v5092_v38 = vld [vmem:[#allocation2 + $0xc98] sm:$0xff]  ;;  %v5093_v40 = vld [vmem:[#allocation2 + $0xca0] sm:$0xff] }
 0x1de   :  { %1448 = vst [vmem:[#allocation5 + $0xc68] sm:$0xff] %v4568_v27  ;;  %1449 = vst [vmem:[#allocation5 + $0xc70] sm:$0xff] %v4569_v29  ;;  %v4574_v39 = vadd.f32 -0.5, %v5092_v38  ;;  %v4575_v41 = vadd.f32 -0.5, %v5093_v40  ;;  %v5094_v42 = vld [vmem:[#allocation2 + $0xca8] sm:$0xff]  ;;  %v5095_v44 = vld [vmem:[#allocation2 + $0xcb0] sm:$0xff] }
 0x1df   :  { %v4576_v43 = vadd.f32 -0.5, %v5094_v42  ;;  %v4577_v45 = vadd.f32 -0.5, %v5095_v44  ;;  %1450 = vst [vmem:[#allocation5 + $0xc78] sm:$0xff] %v4570_v31  ;;  %1451 = vst [vmem:[#allocation5 + $0xc80] sm:$0xff] %v4571_v33  ;;  %v5096_v46 = vld [vmem:[#allocation2 + $0xcb8] sm:$0xff]  ;;  %v5097_v48 = vld [vmem:[#allocation2 + $0xcc0] sm:$0xff] }
 0x1e0   :  { %1452 = vst [vmem:[#allocation5 + $0xc88] sm:$0xff] %v4572_v35  ;;  %1453 = vst [vmem:[#allocation5 + $0xc90] sm:$0xff] %v4573_v37  ;;  %v4578_v47 = vadd.f32 -0.5, %v5096_v46  ;;  %v4579_v49 = vadd.f32 -0.5, %v5097_v48  ;;  %v5098_v50 = vld [vmem:[#allocation2 + $0xcc8] sm:$0xff]  ;;  %v5099_v52 = vld [vmem:[#allocation2 + $0xcd0] sm:$0xff] }
 0x1e1   :  { %v4580_v51 = vadd.f32 -0.5, %v5098_v50  ;;  %v4581_v53 = vadd.f32 -0.5, %v5099_v52  ;;  %1454 = vst [vmem:[#allocation5 + $0xc98] sm:$0xff] %v4574_v39  ;;  %1455 = vst [vmem:[#allocation5 + $0xca0] sm:$0xff] %v4575_v41  ;;  %v5100_v54 = vld [vmem:[#allocation2 + $0xcd8] sm:$0xff]  ;;  %v5101_v56 = vld [vmem:[#allocation2 + $0xce0] sm:$0xff] }
 0x1e2   :  { %1456 = vst [vmem:[#allocation5 + $0xca8] sm:$0xff] %v4576_v43  ;;  %1457 = vst [vmem:[#allocation5 + $0xcb0] sm:$0xff] %v4577_v45  ;;  %v4582_v55 = vadd.f32 -0.5, %v5100_v54  ;;  %v4583_v57 = vadd.f32 -0.5, %v5101_v56  ;;  %v5102_v58 = vld [vmem:[#allocation2 + $0xce8] sm:$0xff]  ;;  %v5103_v60 = vld [vmem:[#allocation2 + $0xcf0] sm:$0xff] }
 0x1e3   :  { %v4584_v59 = vadd.f32 -0.5, %v5102_v58  ;;  %v4585_v61 = vadd.f32 -0.5, %v5103_v60  ;;  %1458 = vst [vmem:[#allocation5 + $0xcb8] sm:$0xff] %v4578_v47  ;;  %1459 = vst [vmem:[#allocation5 + $0xcc0] sm:$0xff] %v4579_v49  ;;  %v5104_v62 = vld [vmem:[#allocation2 + $0xcf8] sm:$0xff]  ;;  %v5105_v0 = vld [vmem:[#allocation2 + $0xd00] sm:$0xff] }
 0x1e4   :  { %1460 = vst [vmem:[#allocation5 + $0xcc8] sm:$0xff] %v4580_v51  ;;  %1461 = vst [vmem:[#allocation5 + $0xcd0] sm:$0xff] %v4581_v53  ;;  %v4586_v63 = vadd.f32 -0.5, %v5104_v62  ;;  %v4587_v1 = vadd.f32 -0.5, %v5105_v0  ;;  %v5106_v2 = vld [vmem:[#allocation2 + $0xd08] sm:$0xff]  ;;  %v5107_v4 = vld [vmem:[#allocation2 + $0xd10] sm:$0xff] }
 0x1e5   :  { %v4588_v3 = vadd.f32 -0.5, %v5106_v2  ;;  %v4589_v5 = vadd.f32 -0.5, %v5107_v4  ;;  %1462 = vst [vmem:[#allocation5 + $0xcd8] sm:$0xff] %v4582_v55  ;;  %1463 = vst [vmem:[#allocation5 + $0xce0] sm:$0xff] %v4583_v57  ;;  %v5108_v6 = vld [vmem:[#allocation2 + $0xd18] sm:$0xff]  ;;  %v5109_v8 = vld [vmem:[#allocation2 + $0xd20] sm:$0xff] }
 0x1e6   :  { %1464 = vst [vmem:[#allocation5 + $0xce8] sm:$0xff] %v4584_v59  ;;  %1465 = vst [vmem:[#allocation5 + $0xcf0] sm:$0xff] %v4585_v61  ;;  %v4590_v7 = vadd.f32 -0.5, %v5108_v6  ;;  %v4591_v9 = vadd.f32 -0.5, %v5109_v8  ;;  %v5110_v10 = vld [vmem:[#allocation2 + $0xd28] sm:$0xff]  ;;  %v5111_v12 = vld [vmem:[#allocation2 + $0xd30] sm:$0xff] }
 0x1e7   :  { %v4592_v11 = vadd.f32 -0.5, %v5110_v10  ;;  %v4593_v13 = vadd.f32 -0.5, %v5111_v12  ;;  %1466 = vst [vmem:[#allocation5 + $0xcf8] sm:$0xff] %v4586_v63  ;;  %1467 = vst [vmem:[#allocation5 + $0xd00] sm:$0xff] %v4587_v1  ;;  %v5112_v14 = vld [vmem:[#allocation2 + $0xd38] sm:$0xff]  ;;  %v5113_v16 = vld [vmem:[#allocation2 + $0xd40] sm:$0xff] }
 0x1e8   :  { %1468 = vst [vmem:[#allocation5 + $0xd08] sm:$0xff] %v4588_v3  ;;  %1469 = vst [vmem:[#allocation5 + $0xd10] sm:$0xff] %v4589_v5  ;;  %v4594_v15 = vadd.f32 -0.5, %v5112_v14  ;;  %v4595_v17 = vadd.f32 -0.5, %v5113_v16  ;;  %v5114_v18 = vld [vmem:[#allocation2 + $0xd48] sm:$0xff]  ;;  %v5115_v20 = vld [vmem:[#allocation2 + $0xd50] sm:$0xff] }
 0x1e9   :  { %v4596_v19 = vadd.f32 -0.5, %v5114_v18  ;;  %v4597_v21 = vadd.f32 -0.5, %v5115_v20  ;;  %1470 = vst [vmem:[#allocation5 + $0xd18] sm:$0xff] %v4590_v7  ;;  %1471 = vst [vmem:[#allocation5 + $0xd20] sm:$0xff] %v4591_v9  ;;  %v5116_v22 = vld [vmem:[#allocation2 + $0xd58] sm:$0xff]  ;;  %v5117_v24 = vld [vmem:[#allocation2 + $0xd60] sm:$0xff] }
 0x1ea   :  { %1472 = vst [vmem:[#allocation5 + $0xd28] sm:$0xff] %v4592_v11  ;;  %1473 = vst [vmem:[#allocation5 + $0xd30] sm:$0xff] %v4593_v13  ;;  %v4598_v23 = vadd.f32 -0.5, %v5116_v22  ;;  %v4599_v25 = vadd.f32 -0.5, %v5117_v24  ;;  %v5118_v26 = vld [vmem:[#allocation2 + $0xd68] sm:$0xff]  ;;  %v5119_v28 = vld [vmem:[#allocation2 + $0xd70] sm:$0xff] }
 0x1eb   :  { %v4600_v27 = vadd.f32 -0.5, %v5118_v26  ;;  %v4601_v29 = vadd.f32 -0.5, %v5119_v28  ;;  %1474 = vst [vmem:[#allocation5 + $0xd38] sm:$0xff] %v4594_v15  ;;  %1475 = vst [vmem:[#allocation5 + $0xd40] sm:$0xff] %v4595_v17  ;;  %v5120_v30 = vld [vmem:[#allocation2 + $0xd78] sm:$0xff]  ;;  %v5121_v32 = vld [vmem:[#allocation2 + $0xd80] sm:$0xff] }
 0x1ec   :  { %1476 = vst [vmem:[#allocation5 + $0xd48] sm:$0xff] %v4596_v19  ;;  %1477 = vst [vmem:[#allocation5 + $0xd50] sm:$0xff] %v4597_v21  ;;  %v4602_v31 = vadd.f32 -0.5, %v5120_v30  ;;  %v4603_v33 = vadd.f32 -0.5, %v5121_v32  ;;  %v5122_v34 = vld [vmem:[#allocation2 + $0xd88] sm:$0xff]  ;;  %v5123_v36 = vld [vmem:[#allocation2 + $0xd90] sm:$0xff] }
 0x1ed   :  { %v4604_v35 = vadd.f32 -0.5, %v5122_v34  ;;  %v4605_v37 = vadd.f32 -0.5, %v5123_v36  ;;  %1478 = vst [vmem:[#allocation5 + $0xd58] sm:$0xff] %v4598_v23  ;;  %1479 = vst [vmem:[#allocation5 + $0xd60] sm:$0xff] %v4599_v25  ;;  %v5124_v38 = vld [vmem:[#allocation2 + $0xd98] sm:$0xff]  ;;  %v5125_v40 = vld [vmem:[#allocation2 + $0xda0] sm:$0xff] }
 0x1ee   :  { %1480 = vst [vmem:[#allocation5 + $0xd68] sm:$0xff] %v4600_v27  ;;  %1481 = vst [vmem:[#allocation5 + $0xd70] sm:$0xff] %v4601_v29  ;;  %v4606_v39 = vadd.f32 -0.5, %v5124_v38  ;;  %v4607_v41 = vadd.f32 -0.5, %v5125_v40  ;;  %v5126_v42 = vld [vmem:[#allocation2 + $0xda8] sm:$0xff]  ;;  %v5127_v44 = vld [vmem:[#allocation2 + $0xdb0] sm:$0xff] }
 0x1ef   :  { %v4608_v43 = vadd.f32 -0.5, %v5126_v42  ;;  %v4609_v45 = vadd.f32 -0.5, %v5127_v44  ;;  %1482 = vst [vmem:[#allocation5 + $0xd78] sm:$0xff] %v4602_v31  ;;  %1483 = vst [vmem:[#allocation5 + $0xd80] sm:$0xff] %v4603_v33  ;;  %v5128_v46 = vld [vmem:[#allocation2 + $0xdb8] sm:$0xff]  ;;  %v5129_v48 = vld [vmem:[#allocation2 + $0xdc0] sm:$0xff] }
 0x1f0   :  { %1484 = vst [vmem:[#allocation5 + $0xd88] sm:$0xff] %v4604_v35  ;;  %1485 = vst [vmem:[#allocation5 + $0xd90] sm:$0xff] %v4605_v37  ;;  %v4610_v47 = vadd.f32 -0.5, %v5128_v46  ;;  %v4611_v49 = vadd.f32 -0.5, %v5129_v48  ;;  %v5130_v50 = vld [vmem:[#allocation2 + $0xdc8] sm:$0xff]  ;;  %v5131_v52 = vld [vmem:[#allocation2 + $0xdd0] sm:$0xff] }
 0x1f1   :  { %v4612_v51 = vadd.f32 -0.5, %v5130_v50  ;;  %v4613_v53 = vadd.f32 -0.5, %v5131_v52  ;;  %1486 = vst [vmem:[#allocation5 + $0xd98] sm:$0xff] %v4606_v39  ;;  %1487 = vst [vmem:[#allocation5 + $0xda0] sm:$0xff] %v4607_v41  ;;  %v5132_v54 = vld [vmem:[#allocation2 + $0xdd8] sm:$0xff]  ;;  %v5133_v56 = vld [vmem:[#allocation2 + $0xde0] sm:$0xff] }
 0x1f2   :  { %1488 = vst [vmem:[#allocation5 + $0xda8] sm:$0xff] %v4608_v43  ;;  %1489 = vst [vmem:[#allocation5 + $0xdb0] sm:$0xff] %v4609_v45  ;;  %v4614_v55 = vadd.f32 -0.5, %v5132_v54  ;;  %v4615_v57 = vadd.f32 -0.5, %v5133_v56  ;;  %v5134_v58 = vld [vmem:[#allocation2 + $0xde8] sm:$0xff]  ;;  %v5135_v60 = vld [vmem:[#allocation2 + $0xdf0] sm:$0xff] }
 0x1f3   :  { %v4616_v59 = vadd.f32 -0.5, %v5134_v58  ;;  %v4617_v61 = vadd.f32 -0.5, %v5135_v60  ;;  %1490 = vst [vmem:[#allocation5 + $0xdb8] sm:$0xff] %v4610_v47  ;;  %1491 = vst [vmem:[#allocation5 + $0xdc0] sm:$0xff] %v4611_v49  ;;  %v5136_v62 = vld [vmem:[#allocation2 + $0xdf8] sm:$0xff]  ;;  %v5137_v0 = vld [vmem:[#allocation2 + $0xe00] sm:$0xff] }
 0x1f4   :  { %1492 = vst [vmem:[#allocation5 + $0xdc8] sm:$0xff] %v4612_v51  ;;  %1493 = vst [vmem:[#allocation5 + $0xdd0] sm:$0xff] %v4613_v53  ;;  %v4618_v63 = vadd.f32 -0.5, %v5136_v62  ;;  %v4619_v1 = vadd.f32 -0.5, %v5137_v0  ;;  %v5138_v2 = vld [vmem:[#allocation2 + $0xe08] sm:$0xff]  ;;  %v5139_v4 = vld [vmem:[#allocation2 + $0xe10] sm:$0xff] }
 0x1f5   :  { %v4620_v3 = vadd.f32 -0.5, %v5138_v2  ;;  %v4621_v5 = vadd.f32 -0.5, %v5139_v4  ;;  %1494 = vst [vmem:[#allocation5 + $0xdd8] sm:$0xff] %v4614_v55  ;;  %1495 = vst [vmem:[#allocation5 + $0xde0] sm:$0xff] %v4615_v57  ;;  %v5140_v6 = vld [vmem:[#allocation2 + $0xe18] sm:$0xff]  ;;  %v5141_v8 = vld [vmem:[#allocation2 + $0xe20] sm:$0xff] }
 0x1f6   :  { %1496 = vst [vmem:[#allocation5 + $0xde8] sm:$0xff] %v4616_v59  ;;  %1497 = vst [vmem:[#allocation5 + $0xdf0] sm:$0xff] %v4617_v61  ;;  %v4622_v7 = vadd.f32 -0.5, %v5140_v6  ;;  %v4623_v9 = vadd.f32 -0.5, %v5141_v8  ;;  %v5142_v10 = vld [vmem:[#allocation2 + $0xe28] sm:$0xff]  ;;  %v5143_v12 = vld [vmem:[#allocation2 + $0xe30] sm:$0xff] }
 0x1f7   :  { %v4624_v11 = vadd.f32 -0.5, %v5142_v10  ;;  %v4625_v13 = vadd.f32 -0.5, %v5143_v12  ;;  %1498 = vst [vmem:[#allocation5 + $0xdf8] sm:$0xff] %v4618_v63  ;;  %1499 = vst [vmem:[#allocation5 + $0xe00] sm:$0xff] %v4619_v1  ;;  %v5144_v14 = vld [vmem:[#allocation2 + $0xe38] sm:$0xff]  ;;  %v5145_v16 = vld [vmem:[#allocation2 + $0xe40] sm:$0xff] }
 0x1f8   :  { %1500 = vst [vmem:[#allocation5 + $0xe08] sm:$0xff] %v4620_v3  ;;  %1501 = vst [vmem:[#allocation5 + $0xe10] sm:$0xff] %v4621_v5  ;;  %v4626_v15 = vadd.f32 -0.5, %v5144_v14  ;;  %v4627_v17 = vadd.f32 -0.5, %v5145_v16  ;;  %v5146_v18 = vld [vmem:[#allocation2 + $0xe48] sm:$0xff]  ;;  %v5147_v20 = vld [vmem:[#allocation2 + $0xe50] sm:$0xff] }
 0x1f9   :  { %v4628_v19 = vadd.f32 -0.5, %v5146_v18  ;;  %v4629_v21 = vadd.f32 -0.5, %v5147_v20  ;;  %1502 = vst [vmem:[#allocation5 + $0xe18] sm:$0xff] %v4622_v7  ;;  %1503 = vst [vmem:[#allocation5 + $0xe20] sm:$0xff] %v4623_v9  ;;  %v5148_v22 = vld [vmem:[#allocation2 + $0xe58] sm:$0xff]  ;;  %v5149_v24 = vld [vmem:[#allocation2 + $0xe60] sm:$0xff] }
 0x1fa   :  { %1504 = vst [vmem:[#allocation5 + $0xe28] sm:$0xff] %v4624_v11  ;;  %1505 = vst [vmem:[#allocation5 + $0xe30] sm:$0xff] %v4625_v13  ;;  %v4630_v23 = vadd.f32 -0.5, %v5148_v22  ;;  %v4631_v25 = vadd.f32 -0.5, %v5149_v24  ;;  %v5150_v26 = vld [vmem:[#allocation2 + $0xe68] sm:$0xff]  ;;  %v5151_v28 = vld [vmem:[#allocation2 + $0xe70] sm:$0xff] }
 0x1fb   :  { %v4632_v27 = vadd.f32 -0.5, %v5150_v26  ;;  %v4633_v29 = vadd.f32 -0.5, %v5151_v28  ;;  %1506 = vst [vmem:[#allocation5 + $0xe38] sm:$0xff] %v4626_v15  ;;  %1507 = vst [vmem:[#allocation5 + $0xe40] sm:$0xff] %v4627_v17  ;;  %v5152_v30 = vld [vmem:[#allocation2 + $0xe78] sm:$0xff]  ;;  %v5153_v32 = vld [vmem:[#allocation2 + $0xe80] sm:$0xff] }
 0x1fc   :  { %1508 = vst [vmem:[#allocation5 + $0xe48] sm:$0xff] %v4628_v19  ;;  %1509 = vst [vmem:[#allocation5 + $0xe50] sm:$0xff] %v4629_v21  ;;  %v4634_v31 = vadd.f32 -0.5, %v5152_v30  ;;  %v4635_v33 = vadd.f32 -0.5, %v5153_v32  ;;  %v5154_v34 = vld [vmem:[#allocation2 + $0xe88] sm:$0xff]  ;;  %v5155_v36 = vld [vmem:[#allocation2 + $0xe90] sm:$0xff] }
 0x1fd   :  { %v4636_v35 = vadd.f32 -0.5, %v5154_v34  ;;  %v4637_v37 = vadd.f32 -0.5, %v5155_v36  ;;  %1510 = vst [vmem:[#allocation5 + $0xe58] sm:$0xff] %v4630_v23  ;;  %1511 = vst [vmem:[#allocation5 + $0xe60] sm:$0xff] %v4631_v25  ;;  %v5156_v38 = vld [vmem:[#allocation2 + $0xe98] sm:$0xff]  ;;  %v5157_v40 = vld [vmem:[#allocation2 + $0xea0] sm:$0xff] }
 0x1fe   :  { %1512 = vst [vmem:[#allocation5 + $0xe68] sm:$0xff] %v4632_v27  ;;  %1513 = vst [vmem:[#allocation5 + $0xe70] sm:$0xff] %v4633_v29  ;;  %v4638_v39 = vadd.f32 -0.5, %v5156_v38  ;;  %v4639_v41 = vadd.f32 -0.5, %v5157_v40  ;;  %v5158_v42 = vld [vmem:[#allocation2 + $0xea8] sm:$0xff]  ;;  %v5159_v44 = vld [vmem:[#allocation2 + $0xeb0] sm:$0xff] }
 0x1ff   :  { %v4640_v43 = vadd.f32 -0.5, %v5158_v42  ;;  %v4641_v45 = vadd.f32 -0.5, %v5159_v44  ;;  %1514 = vst [vmem:[#allocation5 + $0xe78] sm:$0xff] %v4634_v31  ;;  %1515 = vst [vmem:[#allocation5 + $0xe80] sm:$0xff] %v4635_v33  ;;  %v5160_v46 = vld [vmem:[#allocation2 + $0xeb8] sm:$0xff]  ;;  %v5161_v48 = vld [vmem:[#allocation2 + $0xec0] sm:$0xff] }
 0x200   :  { %1516 = vst [vmem:[#allocation5 + $0xe88] sm:$0xff] %v4636_v35  ;;  %1517 = vst [vmem:[#allocation5 + $0xe90] sm:$0xff] %v4637_v37  ;;  %v4642_v47 = vadd.f32 -0.5, %v5160_v46  ;;  %v4643_v49 = vadd.f32 -0.5, %v5161_v48  ;;  %v5162_v50 = vld [vmem:[#allocation2 + $0xec8] sm:$0xff]  ;;  %v5163_v52 = vld [vmem:[#allocation2 + $0xed0] sm:$0xff] }
 0x201   :  { %v4644_v51 = vadd.f32 -0.5, %v5162_v50  ;;  %v4645_v53 = vadd.f32 -0.5, %v5163_v52  ;;  %1518 = vst [vmem:[#allocation5 + $0xe98] sm:$0xff] %v4638_v39  ;;  %1519 = vst [vmem:[#allocation5 + $0xea0] sm:$0xff] %v4639_v41  ;;  %v5164_v54 = vld [vmem:[#allocation2 + $0xed8] sm:$0xff]  ;;  %v5165_v56 = vld [vmem:[#allocation2 + $0xee0] sm:$0xff] }
 0x202   :  { %1520 = vst [vmem:[#allocation5 + $0xea8] sm:$0xff] %v4640_v43  ;;  %1521 = vst [vmem:[#allocation5 + $0xeb0] sm:$0xff] %v4641_v45  ;;  %v4646_v55 = vadd.f32 -0.5, %v5164_v54  ;;  %v4647_v57 = vadd.f32 -0.5, %v5165_v56  ;;  %v5166_v58 = vld [vmem:[#allocation2 + $0xee8] sm:$0xff]  ;;  %v5167_v60 = vld [vmem:[#allocation2 + $0xef0] sm:$0xff] }
 0x203   :  { %v4648_v59 = vadd.f32 -0.5, %v5166_v58  ;;  %v4649_v61 = vadd.f32 -0.5, %v5167_v60  ;;  %1522 = vst [vmem:[#allocation5 + $0xeb8] sm:$0xff] %v4642_v47  ;;  %1523 = vst [vmem:[#allocation5 + $0xec0] sm:$0xff] %v4643_v49  ;;  %v5168_v62 = vld [vmem:[#allocation2 + $0xef8] sm:$0xff]  ;;  %v5169_v0 = vld [vmem:[#allocation2 + $0xf00] sm:$0xff] }
 0x204   :  { %1524 = vst [vmem:[#allocation5 + $0xec8] sm:$0xff] %v4644_v51  ;;  %1525 = vst [vmem:[#allocation5 + $0xed0] sm:$0xff] %v4645_v53  ;;  %v4650_v63 = vadd.f32 -0.5, %v5168_v62  ;;  %v4651_v1 = vadd.f32 -0.5, %v5169_v0  ;;  %v5170_v2 = vld [vmem:[#allocation2 + $0xf08] sm:$0xff]  ;;  %v5171_v4 = vld [vmem:[#allocation2 + $0xf10] sm:$0xff] }
 0x205   :  { %v4652_v3 = vadd.f32 -0.5, %v5170_v2  ;;  %v4653_v5 = vadd.f32 -0.5, %v5171_v4  ;;  %1526 = vst [vmem:[#allocation5 + $0xed8] sm:$0xff] %v4646_v55  ;;  %1527 = vst [vmem:[#allocation5 + $0xee0] sm:$0xff] %v4647_v57  ;;  %v5172_v6 = vld [vmem:[#allocation2 + $0xf18] sm:$0xff]  ;;  %v5173_v8 = vld [vmem:[#allocation2 + $0xf20] sm:$0xff] }
 0x206   :  { %1528 = vst [vmem:[#allocation5 + $0xee8] sm:$0xff] %v4648_v59  ;;  %1529 = vst [vmem:[#allocation5 + $0xef0] sm:$0xff] %v4649_v61  ;;  %v4654_v7 = vadd.f32 -0.5, %v5172_v6  ;;  %v4655_v9 = vadd.f32 -0.5, %v5173_v8  ;;  %v5174_v10 = vld [vmem:[#allocation2 + $0xf28] sm:$0xff]  ;;  %v5175_v12 = vld [vmem:[#allocation2 + $0xf30] sm:$0xff] }
 0x207   :  { %v4656_v11 = vadd.f32 -0.5, %v5174_v10  ;;  %v4657_v13 = vadd.f32 -0.5, %v5175_v12  ;;  %1530 = vst [vmem:[#allocation5 + $0xef8] sm:$0xff] %v4650_v63  ;;  %1531 = vst [vmem:[#allocation5 + $0xf00] sm:$0xff] %v4651_v1  ;;  %v5176_v14 = vld [vmem:[#allocation2 + $0xf38] sm:$0xff]  ;;  %v5177_v16 = vld [vmem:[#allocation2 + $0xf40] sm:$0xff] }
 0x208   :  { %1532 = vst [vmem:[#allocation5 + $0xf08] sm:$0xff] %v4652_v3  ;;  %1533 = vst [vmem:[#allocation5 + $0xf10] sm:$0xff] %v4653_v5  ;;  %v4658_v15 = vadd.f32 -0.5, %v5176_v14  ;;  %v4659_v17 = vadd.f32 -0.5, %v5177_v16  ;;  %v5178_v18 = vld [vmem:[#allocation2 + $0xf48] sm:$0xff]  ;;  %v5179_v20 = vld [vmem:[#allocation2 + $0xf50] sm:$0xff] }
 0x209   :  { %v4660_v19 = vadd.f32 -0.5, %v5178_v18  ;;  %v4661_v21 = vadd.f32 -0.5, %v5179_v20  ;;  %1534 = vst [vmem:[#allocation5 + $0xf18] sm:$0xff] %v4654_v7  ;;  %1535 = vst [vmem:[#allocation5 + $0xf20] sm:$0xff] %v4655_v9  ;;  %v5180_v22 = vld [vmem:[#allocation2 + $0xf58] sm:$0xff]  ;;  %v5181_v24 = vld [vmem:[#allocation2 + $0xf60] sm:$0xff] }
 0x20a   :  { %1536 = vst [vmem:[#allocation5 + $0xf28] sm:$0xff] %v4656_v11  ;;  %1537 = vst [vmem:[#allocation5 + $0xf30] sm:$0xff] %v4657_v13  ;;  %v4662_v23 = vadd.f32 -0.5, %v5180_v22  ;;  %v4663_v25 = vadd.f32 -0.5, %v5181_v24  ;;  %v5182_v26 = vld [vmem:[#allocation2 + $0xf68] sm:$0xff]  ;;  %v5183_v28 = vld [vmem:[#allocation2 + $0xf70] sm:$0xff] }
 0x20b   :  { %v4664_v27 = vadd.f32 -0.5, %v5182_v26  ;;  %v4665_v29 = vadd.f32 -0.5, %v5183_v28  ;;  %1538 = vst [vmem:[#allocation5 + $0xf38] sm:$0xff] %v4658_v15  ;;  %1539 = vst [vmem:[#allocation5 + $0xf40] sm:$0xff] %v4659_v17  ;;  %v5184_v30 = vld [vmem:[#allocation2 + $0xf78] sm:$0xff]  ;;  %v5185_v32 = vld [vmem:[#allocation2 + $0xf80] sm:$0xff] }
 0x20c   :  { %1540 = vst [vmem:[#allocation5 + $0xf48] sm:$0xff] %v4660_v19  ;;  %1541 = vst [vmem:[#allocation5 + $0xf50] sm:$0xff] %v4661_v21  ;;  %v4666_v31 = vadd.f32 -0.5, %v5184_v30  ;;  %v4667_v33 = vadd.f32 -0.5, %v5185_v32  ;;  %v5186_v34 = vld [vmem:[#allocation2 + $0xf88] sm:$0xff]  ;;  %v5187_v36 = vld [vmem:[#allocation2 + $0xf90] sm:$0xff] }
 0x20d   :  { %v4668_v35 = vadd.f32 -0.5, %v5186_v34  ;;  %v4669_v37 = vadd.f32 -0.5, %v5187_v36  ;;  %1542 = vst [vmem:[#allocation5 + $0xf58] sm:$0xff] %v4662_v23  ;;  %1543 = vst [vmem:[#allocation5 + $0xf60] sm:$0xff] %v4663_v25  ;;  %v5188_v38 = vld [vmem:[#allocation2 + $0xf98] sm:$0xff]  ;;  %v5189_v40 = vld [vmem:[#allocation2 + $0xfa0] sm:$0xff] }
 0x20e   :  { %1544 = vst [vmem:[#allocation5 + $0xf68] sm:$0xff] %v4664_v27  ;;  %1545 = vst [vmem:[#allocation5 + $0xf70] sm:$0xff] %v4665_v29  ;;  %v4670_v39 = vadd.f32 -0.5, %v5188_v38  ;;  %v4671_v41 = vadd.f32 -0.5, %v5189_v40  ;;  %v5190_v42 = vld [vmem:[#allocation2 + $0xfa8] sm:$0xff]  ;;  %v5191_v44 = vld [vmem:[#allocation2 + $0xfb0] sm:$0xff] }
 0x20f   :  { %v4672_v43 = vadd.f32 -0.5, %v5190_v42  ;;  %v4673_v45 = vadd.f32 -0.5, %v5191_v44  ;;  %1546 = vst [vmem:[#allocation5 + $0xf78] sm:$0xff] %v4666_v31  ;;  %1547 = vst [vmem:[#allocation5 + $0xf80] sm:$0xff] %v4667_v33  ;;  %v5192_v46 = vld [vmem:[#allocation2 + $0xfb8] sm:$0xff]  ;;  %v5193_v48 = vld [vmem:[#allocation2 + $0xfc0] sm:$0xff] }
 0x210   :  { %1548 = vst [vmem:[#allocation5 + $0xf88] sm:$0xff] %v4668_v35  ;;  %1549 = vst [vmem:[#allocation5 + $0xf90] sm:$0xff] %v4669_v37  ;;  %v4674_v47 = vadd.f32 -0.5, %v5192_v46  ;;  %v4675_v49 = vadd.f32 -0.5, %v5193_v48  ;;  %v5194_v50 = vld [vmem:[#allocation2 + $0xfc8] sm:$0xff]  ;;  %v5195_v52 = vld [vmem:[#allocation2 + $0xfd0] sm:$0xff] }
 0x211   :  { %v4676_v51 = vadd.f32 -0.5, %v5194_v50  ;;  %v4677_v53 = vadd.f32 -0.5, %v5195_v52  ;;  %1550 = vst [vmem:[#allocation5 + $0xf98] sm:$0xff] %v4670_v39  ;;  %1551 = vst [vmem:[#allocation5 + $0xfa0] sm:$0xff] %v4671_v41  ;;  %v5196_v54 = vld [vmem:[#allocation2 + $0xfd8] sm:$0xff]  ;;  %v5197_v56 = vld [vmem:[#allocation2 + $0xfe0] sm:$0xff] }
 0x212   :  { %1552 = vst [vmem:[#allocation5 + $0xfa8] sm:$0xff] %v4672_v43  ;;  %1553 = vst [vmem:[#allocation5 + $0xfb0] sm:$0xff] %v4673_v45  ;;  %v4678_v55 = vadd.f32 -0.5, %v5196_v54  ;;  %v4679_v57 = vadd.f32 -0.5, %v5197_v56  ;;  %v5198_v58 = vld [vmem:[#allocation2 + $0xfe8] sm:$0xff]  ;;  %v5199_v60 = vld [vmem:[#allocation2 + $0xff0] sm:$0xff] }
 0x213   :  { %v4680_v59 = vadd.f32 -0.5, %v5198_v58  ;;  %v4681_v61 = vadd.f32 -0.5, %v5199_v60  ;;  %1554 = vst [vmem:[#allocation5 + $0xfb8] sm:$0xff] %v4674_v47  ;;  %1555 = vst [vmem:[#allocation5 + $0xfc0] sm:$0xff] %v4675_v49  ;;  %v5200_v62 = vld [vmem:[#allocation2 + $0xff8] sm:$0xff]  ;;  %v5201_v0 = vld [vmem:[#allocation5] sm:$0xff] }
 0x214   :  { %1556 = vst [vmem:[#allocation5 + $0xfc8] sm:$0xff] %v4676_v51  ;;  %1557 = vst [vmem:[#allocation5 + $0xfd0] sm:$0xff] %v4677_v53  ;;  %v4682_v63 = vadd.f32 -0.5, %v5200_v62  ;;  %v2587_v1 = vand.u32 2147483647, %v5201_v0  ;;  %v5202_v2 = vld [vmem:[#allocation5 + $0x8] sm:$0xff] }
 0x215   :  { %v2588_v3 = vand.u32 2147483647, %v5202_v2  ;;  %1558 = vst [vmem:[#allocation5 + $0xfd8] sm:$0xff] %v4678_v55  ;;  %1559 = vst [vmem:[#allocation5 + $0xfe0] sm:$0xff] %v4679_v57  ;;  %v5203_v4 = vld [vmem:[#allocation5 + $0x10] sm:$0xff]  ;;  %v5204_v6 = vld [vmem:[#allocation5 + $0x18] sm:$0xff] }
 0x216   :  { %1560 = vst [vmem:[#allocation5 + $0xfe8] sm:$0xff] %v4680_v59  ;;  %1561 = vst [vmem:[#allocation5 + $0xff0] sm:$0xff] %v4681_v61  ;;  %v2589_v5 = vand.u32 2147483647, %v5203_v4  ;;  %v2590_v7 = vand.u32 2147483647, %v5204_v6 }
 0x217   :  { %v5205_v8 = vld [vmem:[#allocation5 + $0x20] sm:$0xff]  ;;  %1562 = vst [vmem:[#allocation5 + $0xff8] sm:$0xff] %v4682_v63  ;;  %v3099_v10 = vsub.f32 0.0, %v2587_v1  ;;  %v3100_v11 = vsub.f32 0.0, %v2588_v3  ;;  %v5206_v12 = vld [vmem:[#allocation5 + $0x28] sm:$0xff]  ;;  %v5207_v14 = vld [vmem:[#allocation5 + $0x30] sm:$0xff] }
 0x218   :  { %v2591_v9 = vand.u32 2147483647, %v5205_v8  ;;  %v2592_v13 = vand.u32 2147483647, %v5206_v12  ;;  %v2593_v15 = vand.u32 2147483647, %v5207_v14 }
 0x219   :  { %v3101_v16 = vsub.f32 0.0, %v2589_v5  ;;  %v3102_v17 = vsub.f32 0.0, %v2590_v7  ;;  %v5208_v19 = vld [vmem:[#allocation5 + $0x38] sm:$0xff]  ;;  %3611 = vst [vmem:[#allocation8] sm:$0xff] %v3099_v10  ;;  %3612 = vst [vmem:[#allocation8 + $0x8] sm:$0xff] %v3100_v11  ;;  %v5209_v23 = vld [vmem:[#allocation5 + $0x40] sm:$0xff] }
 0x21a   :  { %v3103_v18 = vsub.f32 0.0, %v2591_v9  ;;  %v2594_v20 = vand.u32 2147483647, %v5208_v19  ;;  %v3104_v21 = vsub.f32 0.0, %v2592_v13  ;;  %v3105_v22 = vsub.f32 0.0, %v2593_v15  ;;  %v5210_v25 = vld [vmem:[#allocation5 + $0x48] sm:$0xff] }
 0x21b   :  { %v2595_v24 = vand.u32 2147483647, %v5209_v23  ;;  %v2596_v26 = vand.u32 2147483647, %v5210_v25  ;;  %3613 = vst [vmem:[#allocation8 + $0x10] sm:$0xff] %v3101_v16  ;;  %3614 = vst [vmem:[#allocation8 + $0x18] sm:$0xff] %v3102_v17 }
 0x21c   :  { %3615 = vst [vmem:[#allocation8 + $0x20] sm:$0xff] %v3103_v18  ;;  %v3106_v27 = vsub.f32 0.0, %v2594_v20  ;;  %v5211_v28 = vld [vmem:[#allocation5 + $0x50] sm:$0xff]  ;;  %v5212_v30 = vld [vmem:[#allocation5 + $0x58] sm:$0xff]  ;;  %3616 = vst [vmem:[#allocation8 + $0x28] sm:$0xff] %v3104_v21 }
 0x21d   :  { %v2597_v29 = vand.u32 2147483647, %v5211_v28  ;;  %v2598_v31 = vand.u32 2147483647, %v5212_v30  ;;  %3617 = vst [vmem:[#allocation8 + $0x30] sm:$0xff] %v3105_v22  ;;  %v3107_v32 = vsub.f32 0.0, %v2595_v24 }
 0x21e   :  { %v3108_v33 = vsub.f32 0.0, %v2596_v26  ;;  %v5213_v34 = vld [vmem:[#allocation5 + $0x60] sm:$0xff]  ;;  %v5214_v36 = vld [vmem:[#allocation5 + $0x68] sm:$0xff]  ;;  %3618 = vst [vmem:[#allocation8 + $0x38] sm:$0xff] %v3106_v27  ;;  %v5215_v40 = vld [vmem:[#allocation5 + $0x70] sm:$0xff] }
 0x21f   :  { %v2599_v35 = vand.u32 2147483647, %v5213_v34  ;;  %v2600_v37 = vand.u32 2147483647, %v5214_v36  ;;  %v3109_v38 = vsub.f32 0.0, %v2597_v29  ;;  %v3110_v39 = vsub.f32 0.0, %v2598_v31 }
 0x220   :  { %v2601_v41 = vand.u32 2147483647, %v5215_v40  ;;  %v5216_v42 = vld [vmem:[#allocation5 + $0x78] sm:$0xff]  ;;  %3619 = vst [vmem:[#allocation8 + $0x40] sm:$0xff] %v3107_v32  ;;  %3620 = vst [vmem:[#allocation8 + $0x48] sm:$0xff] %v3108_v33  ;;  %v5217_v46 = vld [vmem:[#allocation5 + $0x80] sm:$0xff] }
 0x221   :  { %v2602_v43 = vand.u32 2147483647, %v5216_v42  ;;  %v3111_v44 = vsub.f32 0.0, %v2599_v35  ;;  %v3112_v45 = vsub.f32 0.0, %v2600_v37  ;;  %v2603_v47 = vand.u32 2147483647, %v5217_v46 }
 0x222   :  { %v5218_v48 = vld [vmem:[#allocation5 + $0x88] sm:$0xff]  ;;  %3621 = vst [vmem:[#allocation8 + $0x50] sm:$0xff] %v3109_v38  ;;  %3622 = vst [vmem:[#allocation8 + $0x58] sm:$0xff] %v3110_v39  ;;  %v3113_v50 = vsub.f32 0.0, %v2601_v41  ;;  %v5219_v52 = vld [vmem:[#allocation5 + $0x90] sm:$0xff] }
 0x223   :  { %v2604_v49 = vand.u32 2147483647, %v5218_v48  ;;  %v3114_v51 = vsub.f32 0.0, %v2602_v43  ;;  %v2605_v53 = vand.u32 2147483647, %v5219_v52  ;;  %v5220_v54 = vld [vmem:[#allocation5 + $0x98] sm:$0xff] }
 0x224   :  { %v2606_v55 = vand.u32 2147483647, %v5220_v54  ;;  %3623 = vst [vmem:[#allocation8 + $0x60] sm:$0xff] %v3111_v44  ;;  %3624 = vst [vmem:[#allocation8 + $0x68] sm:$0xff] %v3112_v45  ;;  %v3115_v56 = vsub.f32 0.0, %v2603_v47  ;;  %v5221_v58 = vld [vmem:[#allocation5 + $0xa0] sm:$0xff] }
 0x225   :  { %v3116_v57 = vsub.f32 0.0, %v2604_v49  ;;  %v2607_v59 = vand.u32 2147483647, %v5221_v58  ;;  %v5222_v60 = vld [vmem:[#allocation5 + $0xa8] sm:$0xff]  ;;  %3625 = vst [vmem:[#allocation8 + $0x70] sm:$0xff] %v3113_v50  ;;  %3626 = vst [vmem:[#allocation8 + $0x78] sm:$0xff] %v3114_v51 }
 0x226   :  { %v2608_v61 = vand.u32 2147483647, %v5222_v60  ;;  %v3117_v62 = vsub.f32 0.0, %v2605_v53  ;;  %v3118_v63 = vsub.f32 0.0, %v2606_v55  ;;  %v5223_v0 = vld [vmem:[#allocation5 + $0xb0] sm:$0xff]  ;;  %v5224_v2 = vld [vmem:[#allocation5 + $0xb8] sm:$0xff] }
 0x227   :  { %v2609_v1 = vand.u32 2147483647, %v5223_v0  ;;  %v2610_v3 = vand.u32 2147483647, %v5224_v2  ;;  %3627 = vst [vmem:[#allocation8 + $0x80] sm:$0xff] %v3115_v56  ;;  %3628 = vst [vmem:[#allocation8 + $0x88] sm:$0xff] %v3116_v57 }
 0x228   :  { %v3119_v4 = vsub.f32 0.0, %v2607_v59  ;;  %v3120_v5 = vsub.f32 0.0, %v2608_v61  ;;  %v5225_v6 = vld [vmem:[#allocation5 + $0xc0] sm:$0xff]  ;;  %v5226_v8 = vld [vmem:[#allocation5 + $0xc8] sm:$0xff]  ;;  %3629 = vst [vmem:[#allocation8 + $0x90] sm:$0xff] %v3117_v62  ;;  %3630 = vst [vmem:[#allocation8 + $0x98] sm:$0xff] %v3118_v63 }
 0x229   :  { %v2611_v7 = vand.u32 2147483647, %v5225_v6  ;;  %v2612_v9 = vand.u32 2147483647, %v5226_v8  ;;  %v3121_v10 = vsub.f32 0.0, %v2609_v1  ;;  %v3122_v11 = vsub.f32 0.0, %v2610_v3 }
 0x22a   :  { %v5227_v12 = vld [vmem:[#allocation5 + $0xd0] sm:$0xff]  ;;  %v5228_v14 = vld [vmem:[#allocation5 + $0xd8] sm:$0xff]  ;;  %3631 = vst [vmem:[#allocation8 + $0xa0] sm:$0xff] %v3119_v4  ;;  %3632 = vst [vmem:[#allocation8 + $0xa8] sm:$0xff] %v3120_v5 }
 0x22b   :  { %v2613_v13 = vand.u32 2147483647, %v5227_v12  ;;  %v2614_v15 = vand.u32 2147483647, %v5228_v14  ;;  %v3123_v16 = vsub.f32 0.0, %v2611_v7  ;;  %v3124_v17 = vsub.f32 0.0, %v2612_v9 }
 0x22c   :  { %v5229_v18 = vld [vmem:[#allocation5 + $0xe0] sm:$0xff]  ;;  %v5230_v20 = vld [vmem:[#allocation5 + $0xe8] sm:$0xff]  ;;  %3633 = vst [vmem:[#allocation8 + $0xb0] sm:$0xff] %v3121_v10  ;;  %3634 = vst [vmem:[#allocation8 + $0xb8] sm:$0xff] %v3122_v11 }
 0x22d   :  { %v2615_v19 = vand.u32 2147483647, %v5229_v18  ;;  %v2616_v21 = vand.u32 2147483647, %v5230_v20  ;;  %v3125_v22 = vsub.f32 0.0, %v2613_v13  ;;  %v3126_v23 = vsub.f32 0.0, %v2614_v15 }
 0x22e   :  { %v5231_v24 = vld [vmem:[#allocation5 + $0xf0] sm:$0xff]  ;;  %v5232_v26 = vld [vmem:[#allocation5 + $0xf8] sm:$0xff]  ;;  %3635 = vst [vmem:[#allocation8 + $0xc0] sm:$0xff] %v3123_v16  ;;  %3636 = vst [vmem:[#allocation8 + $0xc8] sm:$0xff] %v3124_v17 }
 0x22f   :  { %v2617_v25 = vand.u32 2147483647, %v5231_v24  ;;  %v2618_v27 = vand.u32 2147483647, %v5232_v26  ;;  %v3127_v28 = vsub.f32 0.0, %v2615_v19  ;;  %v3128_v29 = vsub.f32 0.0, %v2616_v21 }
 0x230   :  { %v5233_v30 = vld [vmem:[#allocation5 + $0x100] sm:$0xff]  ;;  %v5234_v32 = vld [vmem:[#allocation5 + $0x108] sm:$0xff]  ;;  %3637 = vst [vmem:[#allocation8 + $0xd0] sm:$0xff] %v3125_v22  ;;  %3638 = vst [vmem:[#allocation8 + $0xd8] sm:$0xff] %v3126_v23 }
 0x231   :  { %v2619_v31 = vand.u32 2147483647, %v5233_v30  ;;  %v2620_v33 = vand.u32 2147483647, %v5234_v32  ;;  %v3129_v34 = vsub.f32 0.0, %v2617_v25  ;;  %v3130_v35 = vsub.f32 0.0, %v2618_v27 }
 0x232   :  { %v5235_v36 = vld [vmem:[#allocation5 + $0x110] sm:$0xff]  ;;  %v5236_v38 = vld [vmem:[#allocation5 + $0x118] sm:$0xff]  ;;  %3639 = vst [vmem:[#allocation8 + $0xe0] sm:$0xff] %v3127_v28  ;;  %3640 = vst [vmem:[#allocation8 + $0xe8] sm:$0xff] %v3128_v29 }
 0x233   :  { %v2621_v37 = vand.u32 2147483647, %v5235_v36  ;;  %v2622_v39 = vand.u32 2147483647, %v5236_v38  ;;  %v3131_v40 = vsub.f32 0.0, %v2619_v31  ;;  %v3132_v41 = vsub.f32 0.0, %v2620_v33 }
 0x234   :  { %v5237_v42 = vld [vmem:[#allocation5 + $0x120] sm:$0xff]  ;;  %v5238_v44 = vld [vmem:[#allocation5 + $0x128] sm:$0xff]  ;;  %3641 = vst [vmem:[#allocation8 + $0xf0] sm:$0xff] %v3129_v34  ;;  %3642 = vst [vmem:[#allocation8 + $0xf8] sm:$0xff] %v3130_v35 }
 0x235   :  { %v2623_v43 = vand.u32 2147483647, %v5237_v42  ;;  %v2624_v45 = vand.u32 2147483647, %v5238_v44  ;;  %v3133_v46 = vsub.f32 0.0, %v2621_v37  ;;  %v3134_v47 = vsub.f32 0.0, %v2622_v39 }
 0x236   :  { %v5239_v48 = vld [vmem:[#allocation5 + $0x130] sm:$0xff]  ;;  %v5240_v50 = vld [vmem:[#allocation5 + $0x138] sm:$0xff]  ;;  %3643 = vst [vmem:[#allocation8 + $0x100] sm:$0xff] %v3131_v40  ;;  %3644 = vst [vmem:[#allocation8 + $0x108] sm:$0xff] %v3132_v41 }
 0x237   :  { %v2625_v49 = vand.u32 2147483647, %v5239_v48  ;;  %v2626_v51 = vand.u32 2147483647, %v5240_v50  ;;  %v3135_v52 = vsub.f32 0.0, %v2623_v43  ;;  %v3136_v53 = vsub.f32 0.0, %v2624_v45 }
 0x238   :  { %v5241_v54 = vld [vmem:[#allocation5 + $0x140] sm:$0xff]  ;;  %v5242_v56 = vld [vmem:[#allocation5 + $0x148] sm:$0xff]  ;;  %3645 = vst [vmem:[#allocation8 + $0x110] sm:$0xff] %v3133_v46  ;;  %3646 = vst [vmem:[#allocation8 + $0x118] sm:$0xff] %v3134_v47 }
 0x239   :  { %v2627_v55 = vand.u32 2147483647, %v5241_v54  ;;  %v2628_v57 = vand.u32 2147483647, %v5242_v56  ;;  %v3137_v58 = vsub.f32 0.0, %v2625_v49  ;;  %v3138_v59 = vsub.f32 0.0, %v2626_v51 }
 0x23a   :  { %v5243_v60 = vld [vmem:[#allocation5 + $0x150] sm:$0xff]  ;;  %v5244_v62 = vld [vmem:[#allocation5 + $0x158] sm:$0xff]  ;;  %3647 = vst [vmem:[#allocation8 + $0x120] sm:$0xff] %v3135_v52  ;;  %3648 = vst [vmem:[#allocation8 + $0x128] sm:$0xff] %v3136_v53 }
 0x23b   :  { %v2629_v61 = vand.u32 2147483647, %v5243_v60  ;;  %v2630_v63 = vand.u32 2147483647, %v5244_v62  ;;  %v3139_v0 = vsub.f32 0.0, %v2627_v55  ;;  %v3140_v1 = vsub.f32 0.0, %v2628_v57 }
 0x23c   :  { %v5245_v2 = vld [vmem:[#allocation5 + $0x160] sm:$0xff]  ;;  %v5246_v4 = vld [vmem:[#allocation5 + $0x168] sm:$0xff]  ;;  %3649 = vst [vmem:[#allocation8 + $0x130] sm:$0xff] %v3137_v58  ;;  %3650 = vst [vmem:[#allocation8 + $0x138] sm:$0xff] %v3138_v59 }
 0x23d   :  { %v2631_v3 = vand.u32 2147483647, %v5245_v2  ;;  %v2632_v5 = vand.u32 2147483647, %v5246_v4  ;;  %v3141_v6 = vsub.f32 0.0, %v2629_v61  ;;  %v3142_v7 = vsub.f32 0.0, %v2630_v63 }
 0x23e   :  { %v5247_v8 = vld [vmem:[#allocation5 + $0x170] sm:$0xff]  ;;  %v5248_v10 = vld [vmem:[#allocation5 + $0x178] sm:$0xff]  ;;  %3651 = vst [vmem:[#allocation8 + $0x140] sm:$0xff] %v3139_v0  ;;  %3652 = vst [vmem:[#allocation8 + $0x148] sm:$0xff] %v3140_v1 }
 0x23f   :  { %v2633_v9 = vand.u32 2147483647, %v5247_v8  ;;  %v2634_v11 = vand.u32 2147483647, %v5248_v10  ;;  %v3143_v12 = vsub.f32 0.0, %v2631_v3  ;;  %v3144_v13 = vsub.f32 0.0, %v2632_v5 }
 0x240   :  { %v5249_v14 = vld [vmem:[#allocation5 + $0x180] sm:$0xff]  ;;  %v5250_v16 = vld [vmem:[#allocation5 + $0x188] sm:$0xff]  ;;  %3653 = vst [vmem:[#allocation8 + $0x150] sm:$0xff] %v3141_v6  ;;  %3654 = vst [vmem:[#allocation8 + $0x158] sm:$0xff] %v3142_v7 }
 0x241   :  { %v2635_v15 = vand.u32 2147483647, %v5249_v14  ;;  %v2636_v17 = vand.u32 2147483647, %v5250_v16  ;;  %v3145_v18 = vsub.f32 0.0, %v2633_v9  ;;  %v3146_v19 = vsub.f32 0.0, %v2634_v11 }
 0x242   :  { %v5251_v20 = vld [vmem:[#allocation5 + $0x190] sm:$0xff]  ;;  %v5252_v22 = vld [vmem:[#allocation5 + $0x198] sm:$0xff]  ;;  %3655 = vst [vmem:[#allocation8 + $0x160] sm:$0xff] %v3143_v12  ;;  %3656 = vst [vmem:[#allocation8 + $0x168] sm:$0xff] %v3144_v13 }
 0x243   :  { %v2637_v21 = vand.u32 2147483647, %v5251_v20  ;;  %v2638_v23 = vand.u32 2147483647, %v5252_v22  ;;  %v3147_v24 = vsub.f32 0.0, %v2635_v15  ;;  %v3148_v25 = vsub.f32 0.0, %v2636_v17 }
 0x244   :  { %v5253_v26 = vld [vmem:[#allocation5 + $0x1a0] sm:$0xff]  ;;  %v5254_v28 = vld [vmem:[#allocation5 + $0x1a8] sm:$0xff]  ;;  %3657 = vst [vmem:[#allocation8 + $0x170] sm:$0xff] %v3145_v18  ;;  %3658 = vst [vmem:[#allocation8 + $0x178] sm:$0xff] %v3146_v19 }
 0x245   :  { %v2639_v27 = vand.u32 2147483647, %v5253_v26  ;;  %v2640_v29 = vand.u32 2147483647, %v5254_v28  ;;  %v3149_v30 = vsub.f32 0.0, %v2637_v21  ;;  %v3150_v31 = vsub.f32 0.0, %v2638_v23 }
 0x246   :  { %v5255_v32 = vld [vmem:[#allocation5 + $0x1b0] sm:$0xff]  ;;  %v5256_v34 = vld [vmem:[#allocation5 + $0x1b8] sm:$0xff]  ;;  %3659 = vst [vmem:[#allocation8 + $0x180] sm:$0xff] %v3147_v24  ;;  %3660 = vst [vmem:[#allocation8 + $0x188] sm:$0xff] %v3148_v25 }
 0x247   :  { %v2641_v33 = vand.u32 2147483647, %v5255_v32  ;;  %v2642_v35 = vand.u32 2147483647, %v5256_v34  ;;  %v3151_v36 = vsub.f32 0.0, %v2639_v27  ;;  %v3152_v37 = vsub.f32 0.0, %v2640_v29 }
 0x248   :  { %v5257_v38 = vld [vmem:[#allocation5 + $0x1c0] sm:$0xff]  ;;  %v5258_v40 = vld [vmem:[#allocation5 + $0x1c8] sm:$0xff]  ;;  %3661 = vst [vmem:[#allocation8 + $0x190] sm:$0xff] %v3149_v30  ;;  %3662 = vst [vmem:[#allocation8 + $0x198] sm:$0xff] %v3150_v31 }
 0x249   :  { %v2643_v39 = vand.u32 2147483647, %v5257_v38  ;;  %v2644_v41 = vand.u32 2147483647, %v5258_v40  ;;  %v3153_v42 = vsub.f32 0.0, %v2641_v33  ;;  %v3154_v43 = vsub.f32 0.0, %v2642_v35 }
 0x24a   :  { %v5259_v44 = vld [vmem:[#allocation5 + $0x1d0] sm:$0xff]  ;;  %v5260_v46 = vld [vmem:[#allocation5 + $0x1d8] sm:$0xff]  ;;  %3663 = vst [vmem:[#allocation8 + $0x1a0] sm:$0xff] %v3151_v36  ;;  %3664 = vst [vmem:[#allocation8 + $0x1a8] sm:$0xff] %v3152_v37 }
 0x24b   :  { %v2645_v45 = vand.u32 2147483647, %v5259_v44  ;;  %v2646_v47 = vand.u32 2147483647, %v5260_v46  ;;  %v3155_v48 = vsub.f32 0.0, %v2643_v39  ;;  %v3156_v49 = vsub.f32 0.0, %v2644_v41 }
 0x24c   :  { %v5261_v50 = vld [vmem:[#allocation5 + $0x1e0] sm:$0xff]  ;;  %v5262_v52 = vld [vmem:[#allocation5 + $0x1e8] sm:$0xff]  ;;  %3665 = vst [vmem:[#allocation8 + $0x1b0] sm:$0xff] %v3153_v42  ;;  %3666 = vst [vmem:[#allocation8 + $0x1b8] sm:$0xff] %v3154_v43 }
 0x24d   :  { %v2647_v51 = vand.u32 2147483647, %v5261_v50  ;;  %v2648_v53 = vand.u32 2147483647, %v5262_v52  ;;  %v3157_v54 = vsub.f32 0.0, %v2645_v45  ;;  %v3158_v55 = vsub.f32 0.0, %v2646_v47 }
 0x24e   :  { %v5263_v56 = vld [vmem:[#allocation5 + $0x1f0] sm:$0xff]  ;;  %v5264_v58 = vld [vmem:[#allocation5 + $0x1f8] sm:$0xff]  ;;  %3667 = vst [vmem:[#allocation8 + $0x1c0] sm:$0xff] %v3155_v48  ;;  %3668 = vst [vmem:[#allocation8 + $0x1c8] sm:$0xff] %v3156_v49 }
 0x24f   :  { %v2649_v57 = vand.u32 2147483647, %v5263_v56  ;;  %v2650_v59 = vand.u32 2147483647, %v5264_v58  ;;  %v3159_v60 = vsub.f32 0.0, %v2647_v51  ;;  %v3160_v61 = vsub.f32 0.0, %v2648_v53 }
 0x250   :  { %v5265_v62 = vld [vmem:[#allocation5 + $0x200] sm:$0xff]  ;;  %v5266_v0 = vld [vmem:[#allocation5 + $0x208] sm:$0xff]  ;;  %3669 = vst [vmem:[#allocation8 + $0x1d0] sm:$0xff] %v3157_v54  ;;  %3670 = vst [vmem:[#allocation8 + $0x1d8] sm:$0xff] %v3158_v55 }
 0x251   :  { %v2651_v63 = vand.u32 2147483647, %v5265_v62  ;;  %v2652_v1 = vand.u32 2147483647, %v5266_v0  ;;  %v3161_v2 = vsub.f32 0.0, %v2649_v57  ;;  %v3162_v3 = vsub.f32 0.0, %v2650_v59 }
 0x252   :  { %v5267_v4 = vld [vmem:[#allocation5 + $0x210] sm:$0xff]  ;;  %v5268_v6 = vld [vmem:[#allocation5 + $0x218] sm:$0xff]  ;;  %3671 = vst [vmem:[#allocation8 + $0x1e0] sm:$0xff] %v3159_v60  ;;  %3672 = vst [vmem:[#allocation8 + $0x1e8] sm:$0xff] %v3160_v61 }
 0x253   :  { %v2653_v5 = vand.u32 2147483647, %v5267_v4  ;;  %v2654_v7 = vand.u32 2147483647, %v5268_v6  ;;  %v3163_v8 = vsub.f32 0.0, %v2651_v63  ;;  %v3164_v9 = vsub.f32 0.0, %v2652_v1 }
 0x254   :  { %v5269_v10 = vld [vmem:[#allocation5 + $0x220] sm:$0xff]  ;;  %v5270_v12 = vld [vmem:[#allocation5 + $0x228] sm:$0xff]  ;;  %3673 = vst [vmem:[#allocation8 + $0x1f0] sm:$0xff] %v3161_v2  ;;  %3674 = vst [vmem:[#allocation8 + $0x1f8] sm:$0xff] %v3162_v3 }
 0x255   :  { %v2655_v11 = vand.u32 2147483647, %v5269_v10  ;;  %v2656_v13 = vand.u32 2147483647, %v5270_v12  ;;  %v3165_v14 = vsub.f32 0.0, %v2653_v5  ;;  %v3166_v15 = vsub.f32 0.0, %v2654_v7 }
 0x256   :  { %v5271_v16 = vld [vmem:[#allocation5 + $0x230] sm:$0xff]  ;;  %v5272_v18 = vld [vmem:[#allocation5 + $0x238] sm:$0xff]  ;;  %3675 = vst [vmem:[#allocation8 + $0x200] sm:$0xff] %v3163_v8  ;;  %3676 = vst [vmem:[#allocation8 + $0x208] sm:$0xff] %v3164_v9 }
 0x257   :  { %v2657_v17 = vand.u32 2147483647, %v5271_v16  ;;  %v2658_v19 = vand.u32 2147483647, %v5272_v18  ;;  %v3167_v20 = vsub.f32 0.0, %v2655_v11  ;;  %v3168_v21 = vsub.f32 0.0, %v2656_v13 }
 0x258   :  { %v5273_v22 = vld [vmem:[#allocation5 + $0x240] sm:$0xff]  ;;  %v5274_v24 = vld [vmem:[#allocation5 + $0x248] sm:$0xff]  ;;  %3677 = vst [vmem:[#allocation8 + $0x210] sm:$0xff] %v3165_v14  ;;  %3678 = vst [vmem:[#allocation8 + $0x218] sm:$0xff] %v3166_v15 }
 0x259   :  { %v2659_v23 = vand.u32 2147483647, %v5273_v22  ;;  %v2660_v25 = vand.u32 2147483647, %v5274_v24  ;;  %v3169_v26 = vsub.f32 0.0, %v2657_v17  ;;  %v3170_v27 = vsub.f32 0.0, %v2658_v19 }
 0x25a   :  { %v5275_v28 = vld [vmem:[#allocation5 + $0x250] sm:$0xff]  ;;  %v5276_v30 = vld [vmem:[#allocation5 + $0x258] sm:$0xff]  ;;  %3679 = vst [vmem:[#allocation8 + $0x220] sm:$0xff] %v3167_v20  ;;  %3680 = vst [vmem:[#allocation8 + $0x228] sm:$0xff] %v3168_v21 }
 0x25b   :  { %v2661_v29 = vand.u32 2147483647, %v5275_v28  ;;  %v2662_v31 = vand.u32 2147483647, %v5276_v30  ;;  %v3171_v32 = vsub.f32 0.0, %v2659_v23  ;;  %v3172_v33 = vsub.f32 0.0, %v2660_v25 }
 0x25c   :  { %v5277_v34 = vld [vmem:[#allocation5 + $0x260] sm:$0xff]  ;;  %v5278_v36 = vld [vmem:[#allocation5 + $0x268] sm:$0xff]  ;;  %3681 = vst [vmem:[#allocation8 + $0x230] sm:$0xff] %v3169_v26  ;;  %3682 = vst [vmem:[#allocation8 + $0x238] sm:$0xff] %v3170_v27 }
 0x25d   :  { %v2663_v35 = vand.u32 2147483647, %v5277_v34  ;;  %v2664_v37 = vand.u32 2147483647, %v5278_v36  ;;  %v3173_v38 = vsub.f32 0.0, %v2661_v29  ;;  %v3174_v39 = vsub.f32 0.0, %v2662_v31 }
 0x25e   :  { %v5279_v40 = vld [vmem:[#allocation5 + $0x270] sm:$0xff]  ;;  %v5280_v42 = vld [vmem:[#allocation5 + $0x278] sm:$0xff]  ;;  %3683 = vst [vmem:[#allocation8 + $0x240] sm:$0xff] %v3171_v32  ;;  %3684 = vst [vmem:[#allocation8 + $0x248] sm:$0xff] %v3172_v33 }
 0x25f   :  { %v2665_v41 = vand.u32 2147483647, %v5279_v40  ;;  %v2666_v43 = vand.u32 2147483647, %v5280_v42  ;;  %v3175_v44 = vsub.f32 0.0, %v2663_v35  ;;  %v3176_v45 = vsub.f32 0.0, %v2664_v37 }
 0x260   :  { %v5281_v46 = vld [vmem:[#allocation5 + $0x280] sm:$0xff]  ;;  %v5282_v48 = vld [vmem:[#allocation5 + $0x288] sm:$0xff]  ;;  %3685 = vst [vmem:[#allocation8 + $0x250] sm:$0xff] %v3173_v38  ;;  %3686 = vst [vmem:[#allocation8 + $0x258] sm:$0xff] %v3174_v39 }
 0x261   :  { %v2667_v47 = vand.u32 2147483647, %v5281_v46  ;;  %v2668_v49 = vand.u32 2147483647, %v5282_v48  ;;  %v3177_v50 = vsub.f32 0.0, %v2665_v41  ;;  %v3178_v51 = vsub.f32 0.0, %v2666_v43 }
 0x262   :  { %v5283_v52 = vld [vmem:[#allocation5 + $0x290] sm:$0xff]  ;;  %v5284_v54 = vld [vmem:[#allocation5 + $0x298] sm:$0xff]  ;;  %3687 = vst [vmem:[#allocation8 + $0x260] sm:$0xff] %v3175_v44  ;;  %3688 = vst [vmem:[#allocation8 + $0x268] sm:$0xff] %v3176_v45 }
 0x263   :  { %v2669_v53 = vand.u32 2147483647, %v5283_v52  ;;  %v2670_v55 = vand.u32 2147483647, %v5284_v54  ;;  %v3179_v56 = vsub.f32 0.0, %v2667_v47  ;;  %v3180_v57 = vsub.f32 0.0, %v2668_v49 }
 0x264   :  { %v5285_v58 = vld [vmem:[#allocation5 + $0x2a0] sm:$0xff]  ;;  %v5286_v60 = vld [vmem:[#allocation5 + $0x2a8] sm:$0xff]  ;;  %3689 = vst [vmem:[#allocation8 + $0x270] sm:$0xff] %v3177_v50  ;;  %3690 = vst [vmem:[#allocation8 + $0x278] sm:$0xff] %v3178_v51 }
 0x265   :  { %v2671_v59 = vand.u32 2147483647, %v5285_v58  ;;  %v2672_v61 = vand.u32 2147483647, %v5286_v60  ;;  %v3181_v62 = vsub.f32 0.0, %v2669_v53  ;;  %v3182_v63 = vsub.f32 0.0, %v2670_v55 }
 0x266   :  { %v5287_v0 = vld [vmem:[#allocation5 + $0x2b0] sm:$0xff]  ;;  %v5288_v2 = vld [vmem:[#allocation5 + $0x2b8] sm:$0xff]  ;;  %3691 = vst [vmem:[#allocation8 + $0x280] sm:$0xff] %v3179_v56  ;;  %3692 = vst [vmem:[#allocation8 + $0x288] sm:$0xff] %v3180_v57 }
 0x267   :  { %v2673_v1 = vand.u32 2147483647, %v5287_v0  ;;  %v2674_v3 = vand.u32 2147483647, %v5288_v2  ;;  %v3183_v4 = vsub.f32 0.0, %v2671_v59  ;;  %v3184_v5 = vsub.f32 0.0, %v2672_v61 }
 0x268   :  { %v5289_v6 = vld [vmem:[#allocation5 + $0x2c0] sm:$0xff]  ;;  %v5290_v8 = vld [vmem:[#allocation5 + $0x2c8] sm:$0xff]  ;;  %3693 = vst [vmem:[#allocation8 + $0x290] sm:$0xff] %v3181_v62  ;;  %3694 = vst [vmem:[#allocation8 + $0x298] sm:$0xff] %v3182_v63 }
 0x269   :  { %v2675_v7 = vand.u32 2147483647, %v5289_v6  ;;  %v2676_v9 = vand.u32 2147483647, %v5290_v8  ;;  %v3185_v10 = vsub.f32 0.0, %v2673_v1  ;;  %v3186_v11 = vsub.f32 0.0, %v2674_v3 }
 0x26a   :  { %v5291_v12 = vld [vmem:[#allocation5 + $0x2d0] sm:$0xff]  ;;  %v5292_v14 = vld [vmem:[#allocation5 + $0x2d8] sm:$0xff]  ;;  %3695 = vst [vmem:[#allocation8 + $0x2a0] sm:$0xff] %v3183_v4  ;;  %3696 = vst [vmem:[#allocation8 + $0x2a8] sm:$0xff] %v3184_v5 }
 0x26b   :  { %v2677_v13 = vand.u32 2147483647, %v5291_v12  ;;  %v2678_v15 = vand.u32 2147483647, %v5292_v14  ;;  %v3187_v16 = vsub.f32 0.0, %v2675_v7  ;;  %v3188_v17 = vsub.f32 0.0, %v2676_v9 }
 0x26c   :  { %v5293_v18 = vld [vmem:[#allocation5 + $0x2e0] sm:$0xff]  ;;  %v5294_v20 = vld [vmem:[#allocation5 + $0x2e8] sm:$0xff]  ;;  %3697 = vst [vmem:[#allocation8 + $0x2b0] sm:$0xff] %v3185_v10  ;;  %3698 = vst [vmem:[#allocation8 + $0x2b8] sm:$0xff] %v3186_v11 }
 0x26d   :  { %v2679_v19 = vand.u32 2147483647, %v5293_v18  ;;  %v2680_v21 = vand.u32 2147483647, %v5294_v20  ;;  %v3189_v22 = vsub.f32 0.0, %v2677_v13  ;;  %v3190_v23 = vsub.f32 0.0, %v2678_v15 }
 0x26e   :  { %v5295_v24 = vld [vmem:[#allocation5 + $0x2f0] sm:$0xff]  ;;  %v5296_v26 = vld [vmem:[#allocation5 + $0x2f8] sm:$0xff]  ;;  %3699 = vst [vmem:[#allocation8 + $0x2c0] sm:$0xff] %v3187_v16  ;;  %3700 = vst [vmem:[#allocation8 + $0x2c8] sm:$0xff] %v3188_v17 }
 0x26f   :  { %v2681_v25 = vand.u32 2147483647, %v5295_v24  ;;  %v2682_v27 = vand.u32 2147483647, %v5296_v26  ;;  %v3191_v28 = vsub.f32 0.0, %v2679_v19  ;;  %v3192_v29 = vsub.f32 0.0, %v2680_v21 }
 0x270   :  { %v5297_v30 = vld [vmem:[#allocation5 + $0x300] sm:$0xff]  ;;  %v5298_v32 = vld [vmem:[#allocation5 + $0x308] sm:$0xff]  ;;  %3701 = vst [vmem:[#allocation8 + $0x2d0] sm:$0xff] %v3189_v22  ;;  %3702 = vst [vmem:[#allocation8 + $0x2d8] sm:$0xff] %v3190_v23 }
 0x271   :  { %v2683_v31 = vand.u32 2147483647, %v5297_v30  ;;  %v2684_v33 = vand.u32 2147483647, %v5298_v32  ;;  %v3193_v34 = vsub.f32 0.0, %v2681_v25  ;;  %v3194_v35 = vsub.f32 0.0, %v2682_v27 }
 0x272   :  { %v5299_v36 = vld [vmem:[#allocation5 + $0x310] sm:$0xff]  ;;  %v5300_v38 = vld [vmem:[#allocation5 + $0x318] sm:$0xff]  ;;  %3703 = vst [vmem:[#allocation8 + $0x2e0] sm:$0xff] %v3191_v28  ;;  %3704 = vst [vmem:[#allocation8 + $0x2e8] sm:$0xff] %v3192_v29 }
 0x273   :  { %v2685_v37 = vand.u32 2147483647, %v5299_v36  ;;  %v2686_v39 = vand.u32 2147483647, %v5300_v38  ;;  %v3195_v40 = vsub.f32 0.0, %v2683_v31  ;;  %v3196_v41 = vsub.f32 0.0, %v2684_v33 }
 0x274   :  { %v5301_v42 = vld [vmem:[#allocation5 + $0x320] sm:$0xff]  ;;  %v5302_v44 = vld [vmem:[#allocation5 + $0x328] sm:$0xff]  ;;  %3705 = vst [vmem:[#allocation8 + $0x2f0] sm:$0xff] %v3193_v34  ;;  %3706 = vst [vmem:[#allocation8 + $0x2f8] sm:$0xff] %v3194_v35 }
 0x275   :  { %v2687_v43 = vand.u32 2147483647, %v5301_v42  ;;  %v2688_v45 = vand.u32 2147483647, %v5302_v44  ;;  %v3197_v46 = vsub.f32 0.0, %v2685_v37  ;;  %v3198_v47 = vsub.f32 0.0, %v2686_v39 }
 0x276   :  { %v5303_v48 = vld [vmem:[#allocation5 + $0x330] sm:$0xff]  ;;  %v5304_v50 = vld [vmem:[#allocation5 + $0x338] sm:$0xff]  ;;  %3707 = vst [vmem:[#allocation8 + $0x300] sm:$0xff] %v3195_v40  ;;  %3708 = vst [vmem:[#allocation8 + $0x308] sm:$0xff] %v3196_v41 }
 0x277   :  { %v2689_v49 = vand.u32 2147483647, %v5303_v48  ;;  %v2690_v51 = vand.u32 2147483647, %v5304_v50  ;;  %v3199_v52 = vsub.f32 0.0, %v2687_v43  ;;  %v3200_v53 = vsub.f32 0.0, %v2688_v45 }
 0x278   :  { %v5305_v54 = vld [vmem:[#allocation5 + $0x340] sm:$0xff]  ;;  %v5306_v56 = vld [vmem:[#allocation5 + $0x348] sm:$0xff]  ;;  %3709 = vst [vmem:[#allocation8 + $0x310] sm:$0xff] %v3197_v46  ;;  %3710 = vst [vmem:[#allocation8 + $0x318] sm:$0xff] %v3198_v47 }
 0x279   :  { %v2691_v55 = vand.u32 2147483647, %v5305_v54  ;;  %v2692_v57 = vand.u32 2147483647, %v5306_v56  ;;  %v3201_v58 = vsub.f32 0.0, %v2689_v49  ;;  %v3202_v59 = vsub.f32 0.0, %v2690_v51 }
 0x27a   :  { %v5307_v60 = vld [vmem:[#allocation5 + $0x350] sm:$0xff]  ;;  %v5308_v62 = vld [vmem:[#allocation5 + $0x358] sm:$0xff]  ;;  %3711 = vst [vmem:[#allocation8 + $0x320] sm:$0xff] %v3199_v52  ;;  %3712 = vst [vmem:[#allocation8 + $0x328] sm:$0xff] %v3200_v53 }
 0x27b   :  { %v2693_v61 = vand.u32 2147483647, %v5307_v60  ;;  %v2694_v63 = vand.u32 2147483647, %v5308_v62  ;;  %v3203_v0 = vsub.f32 0.0, %v2691_v55  ;;  %v3204_v1 = vsub.f32 0.0, %v2692_v57 }
 0x27c   :  { %v5309_v2 = vld [vmem:[#allocation5 + $0x360] sm:$0xff]  ;;  %v5310_v4 = vld [vmem:[#allocation5 + $0x368] sm:$0xff]  ;;  %3713 = vst [vmem:[#allocation8 + $0x330] sm:$0xff] %v3201_v58  ;;  %3714 = vst [vmem:[#allocation8 + $0x338] sm:$0xff] %v3202_v59 }
 0x27d   :  { %v2695_v3 = vand.u32 2147483647, %v5309_v2  ;;  %v2696_v5 = vand.u32 2147483647, %v5310_v4  ;;  %v3205_v6 = vsub.f32 0.0, %v2693_v61  ;;  %v3206_v7 = vsub.f32 0.0, %v2694_v63 }
 0x27e   :  { %v5311_v8 = vld [vmem:[#allocation5 + $0x370] sm:$0xff]  ;;  %v5312_v10 = vld [vmem:[#allocation5 + $0x378] sm:$0xff]  ;;  %3715 = vst [vmem:[#allocation8 + $0x340] sm:$0xff] %v3203_v0  ;;  %3716 = vst [vmem:[#allocation8 + $0x348] sm:$0xff] %v3204_v1 }
 0x27f   :  { %v2697_v9 = vand.u32 2147483647, %v5311_v8  ;;  %v2698_v11 = vand.u32 2147483647, %v5312_v10  ;;  %v3207_v12 = vsub.f32 0.0, %v2695_v3  ;;  %v3208_v13 = vsub.f32 0.0, %v2696_v5 }
 0x280   :  { %v5313_v14 = vld [vmem:[#allocation5 + $0x380] sm:$0xff]  ;;  %v5314_v16 = vld [vmem:[#allocation5 + $0x388] sm:$0xff]  ;;  %3717 = vst [vmem:[#allocation8 + $0x350] sm:$0xff] %v3205_v6  ;;  %3718 = vst [vmem:[#allocation8 + $0x358] sm:$0xff] %v3206_v7 }
 0x281   :  { %v2699_v15 = vand.u32 2147483647, %v5313_v14  ;;  %v2700_v17 = vand.u32 2147483647, %v5314_v16  ;;  %v3209_v18 = vsub.f32 0.0, %v2697_v9  ;;  %v3210_v19 = vsub.f32 0.0, %v2698_v11 }
 0x282   :  { %v5315_v20 = vld [vmem:[#allocation5 + $0x390] sm:$0xff]  ;;  %v5316_v22 = vld [vmem:[#allocation5 + $0x398] sm:$0xff]  ;;  %3719 = vst [vmem:[#allocation8 + $0x360] sm:$0xff] %v3207_v12  ;;  %3720 = vst [vmem:[#allocation8 + $0x368] sm:$0xff] %v3208_v13 }
 0x283   :  { %v2701_v21 = vand.u32 2147483647, %v5315_v20  ;;  %v2702_v23 = vand.u32 2147483647, %v5316_v22  ;;  %v3211_v24 = vsub.f32 0.0, %v2699_v15  ;;  %v3212_v25 = vsub.f32 0.0, %v2700_v17 }
 0x284   :  { %v5317_v26 = vld [vmem:[#allocation5 + $0x3a0] sm:$0xff]  ;;  %v5318_v28 = vld [vmem:[#allocation5 + $0x3a8] sm:$0xff]  ;;  %3721 = vst [vmem:[#allocation8 + $0x370] sm:$0xff] %v3209_v18  ;;  %3722 = vst [vmem:[#allocation8 + $0x378] sm:$0xff] %v3210_v19 }
 0x285   :  { %v2703_v27 = vand.u32 2147483647, %v5317_v26  ;;  %v2704_v29 = vand.u32 2147483647, %v5318_v28  ;;  %v3213_v30 = vsub.f32 0.0, %v2701_v21  ;;  %v3214_v31 = vsub.f32 0.0, %v2702_v23 }
 0x286   :  { %v5319_v32 = vld [vmem:[#allocation5 + $0x3b0] sm:$0xff]  ;;  %v5320_v34 = vld [vmem:[#allocation5 + $0x3b8] sm:$0xff]  ;;  %3723 = vst [vmem:[#allocation8 + $0x380] sm:$0xff] %v3211_v24  ;;  %3724 = vst [vmem:[#allocation8 + $0x388] sm:$0xff] %v3212_v25 }
 0x287   :  { %v2705_v33 = vand.u32 2147483647, %v5319_v32  ;;  %v2706_v35 = vand.u32 2147483647, %v5320_v34  ;;  %v3215_v36 = vsub.f32 0.0, %v2703_v27  ;;  %v3216_v37 = vsub.f32 0.0, %v2704_v29 }
 0x288   :  { %v5321_v38 = vld [vmem:[#allocation5 + $0x3c0] sm:$0xff]  ;;  %v5322_v40 = vld [vmem:[#allocation5 + $0x3c8] sm:$0xff]  ;;  %3725 = vst [vmem:[#allocation8 + $0x390] sm:$0xff] %v3213_v30  ;;  %3726 = vst [vmem:[#allocation8 + $0x398] sm:$0xff] %v3214_v31 }
 0x289   :  { %v2707_v39 = vand.u32 2147483647, %v5321_v38  ;;  %v2708_v41 = vand.u32 2147483647, %v5322_v40  ;;  %v3217_v42 = vsub.f32 0.0, %v2705_v33  ;;  %v3218_v43 = vsub.f32 0.0, %v2706_v35 }
 0x28a   :  { %v5323_v44 = vld [vmem:[#allocation5 + $0x3d0] sm:$0xff]  ;;  %v5324_v46 = vld [vmem:[#allocation5 + $0x3d8] sm:$0xff]  ;;  %3727 = vst [vmem:[#allocation8 + $0x3a0] sm:$0xff] %v3215_v36  ;;  %3728 = vst [vmem:[#allocation8 + $0x3a8] sm:$0xff] %v3216_v37 }
 0x28b   :  { %v2709_v45 = vand.u32 2147483647, %v5323_v44  ;;  %v2710_v47 = vand.u32 2147483647, %v5324_v46  ;;  %v3219_v48 = vsub.f32 0.0, %v2707_v39  ;;  %v3220_v49 = vsub.f32 0.0, %v2708_v41 }
 0x28c   :  { %v5325_v50 = vld [vmem:[#allocation5 + $0x3e0] sm:$0xff]  ;;  %v5326_v52 = vld [vmem:[#allocation5 + $0x3e8] sm:$0xff]  ;;  %3729 = vst [vmem:[#allocation8 + $0x3b0] sm:$0xff] %v3217_v42  ;;  %3730 = vst [vmem:[#allocation8 + $0x3b8] sm:$0xff] %v3218_v43 }
 0x28d   :  { %v2711_v51 = vand.u32 2147483647, %v5325_v50  ;;  %v2712_v53 = vand.u32 2147483647, %v5326_v52  ;;  %v3221_v54 = vsub.f32 0.0, %v2709_v45  ;;  %v3222_v55 = vsub.f32 0.0, %v2710_v47 }
 0x28e   :  { %v5327_v56 = vld [vmem:[#allocation5 + $0x3f0] sm:$0xff]  ;;  %v5328_v58 = vld [vmem:[#allocation5 + $0x3f8] sm:$0xff]  ;;  %3731 = vst [vmem:[#allocation8 + $0x3c0] sm:$0xff] %v3219_v48  ;;  %3732 = vst [vmem:[#allocation8 + $0x3c8] sm:$0xff] %v3220_v49 }
 0x28f   :  { %v2713_v57 = vand.u32 2147483647, %v5327_v56  ;;  %v2714_v59 = vand.u32 2147483647, %v5328_v58  ;;  %v3223_v60 = vsub.f32 0.0, %v2711_v51  ;;  %v3224_v61 = vsub.f32 0.0, %v2712_v53 }
 0x290   :  { %v5329_v62 = vld [vmem:[#allocation5 + $0x400] sm:$0xff]  ;;  %v5330_v0 = vld [vmem:[#allocation5 + $0x408] sm:$0xff]  ;;  %3733 = vst [vmem:[#allocation8 + $0x3d0] sm:$0xff] %v3221_v54  ;;  %3734 = vst [vmem:[#allocation8 + $0x3d8] sm:$0xff] %v3222_v55 }
 0x291   :  { %v2715_v63 = vand.u32 2147483647, %v5329_v62  ;;  %v2716_v1 = vand.u32 2147483647, %v5330_v0  ;;  %v3225_v2 = vsub.f32 0.0, %v2713_v57  ;;  %v3226_v3 = vsub.f32 0.0, %v2714_v59 }
 0x292   :  { %v5331_v4 = vld [vmem:[#allocation5 + $0x410] sm:$0xff]  ;;  %v5332_v6 = vld [vmem:[#allocation5 + $0x418] sm:$0xff]  ;;  %3735 = vst [vmem:[#allocation8 + $0x3e0] sm:$0xff] %v3223_v60  ;;  %3736 = vst [vmem:[#allocation8 + $0x3e8] sm:$0xff] %v3224_v61 }
 0x293   :  { %v2717_v5 = vand.u32 2147483647, %v5331_v4  ;;  %v2718_v7 = vand.u32 2147483647, %v5332_v6  ;;  %v3227_v8 = vsub.f32 0.0, %v2715_v63  ;;  %v3228_v9 = vsub.f32 0.0, %v2716_v1 }
 0x294   :  { %v5333_v10 = vld [vmem:[#allocation5 + $0x420] sm:$0xff]  ;;  %v5334_v12 = vld [vmem:[#allocation5 + $0x428] sm:$0xff]  ;;  %3737 = vst [vmem:[#allocation8 + $0x3f0] sm:$0xff] %v3225_v2  ;;  %3738 = vst [vmem:[#allocation8 + $0x3f8] sm:$0xff] %v3226_v3 }
 0x295   :  { %v2719_v11 = vand.u32 2147483647, %v5333_v10  ;;  %v2720_v13 = vand.u32 2147483647, %v5334_v12  ;;  %v3229_v14 = vsub.f32 0.0, %v2717_v5  ;;  %v3230_v15 = vsub.f32 0.0, %v2718_v7 }
 0x296   :  { %v5335_v16 = vld [vmem:[#allocation5 + $0x430] sm:$0xff]  ;;  %v5336_v18 = vld [vmem:[#allocation5 + $0x438] sm:$0xff]  ;;  %3739 = vst [vmem:[#allocation8 + $0x400] sm:$0xff] %v3227_v8  ;;  %3740 = vst [vmem:[#allocation8 + $0x408] sm:$0xff] %v3228_v9 }
 0x297   :  { %v2721_v17 = vand.u32 2147483647, %v5335_v16  ;;  %v2722_v19 = vand.u32 2147483647, %v5336_v18  ;;  %v3231_v20 = vsub.f32 0.0, %v2719_v11  ;;  %v3232_v21 = vsub.f32 0.0, %v2720_v13 }
 0x298   :  { %v5337_v22 = vld [vmem:[#allocation5 + $0x440] sm:$0xff]  ;;  %v5338_v24 = vld [vmem:[#allocation5 + $0x448] sm:$0xff]  ;;  %3741 = vst [vmem:[#allocation8 + $0x410] sm:$0xff] %v3229_v14  ;;  %3742 = vst [vmem:[#allocation8 + $0x418] sm:$0xff] %v3230_v15 }
 0x299   :  { %v2723_v23 = vand.u32 2147483647, %v5337_v22  ;;  %v2724_v25 = vand.u32 2147483647, %v5338_v24  ;;  %v3233_v26 = vsub.f32 0.0, %v2721_v17  ;;  %v3234_v27 = vsub.f32 0.0, %v2722_v19 }
 0x29a   :  { %v5339_v28 = vld [vmem:[#allocation5 + $0x450] sm:$0xff]  ;;  %v5340_v30 = vld [vmem:[#allocation5 + $0x458] sm:$0xff]  ;;  %3743 = vst [vmem:[#allocation8 + $0x420] sm:$0xff] %v3231_v20  ;;  %3744 = vst [vmem:[#allocation8 + $0x428] sm:$0xff] %v3232_v21 }
 0x29b   :  { %v2725_v29 = vand.u32 2147483647, %v5339_v28  ;;  %v2726_v31 = vand.u32 2147483647, %v5340_v30  ;;  %v3235_v32 = vsub.f32 0.0, %v2723_v23  ;;  %v3236_v33 = vsub.f32 0.0, %v2724_v25 }
 0x29c   :  { %v5341_v34 = vld [vmem:[#allocation5 + $0x460] sm:$0xff]  ;;  %v5342_v36 = vld [vmem:[#allocation5 + $0x468] sm:$0xff]  ;;  %3745 = vst [vmem:[#allocation8 + $0x430] sm:$0xff] %v3233_v26  ;;  %3746 = vst [vmem:[#allocation8 + $0x438] sm:$0xff] %v3234_v27 }
 0x29d   :  { %v2727_v35 = vand.u32 2147483647, %v5341_v34  ;;  %v2728_v37 = vand.u32 2147483647, %v5342_v36  ;;  %v3237_v38 = vsub.f32 0.0, %v2725_v29  ;;  %v3238_v39 = vsub.f32 0.0, %v2726_v31 }
 0x29e   :  { %v5343_v40 = vld [vmem:[#allocation5 + $0x470] sm:$0xff]  ;;  %v5344_v42 = vld [vmem:[#allocation5 + $0x478] sm:$0xff]  ;;  %3747 = vst [vmem:[#allocation8 + $0x440] sm:$0xff] %v3235_v32  ;;  %3748 = vst [vmem:[#allocation8 + $0x448] sm:$0xff] %v3236_v33 }
 0x29f   :  { %v2729_v41 = vand.u32 2147483647, %v5343_v40  ;;  %v2730_v43 = vand.u32 2147483647, %v5344_v42  ;;  %v3239_v44 = vsub.f32 0.0, %v2727_v35  ;;  %v3240_v45 = vsub.f32 0.0, %v2728_v37 }
 0x2a0   :  { %v5345_v46 = vld [vmem:[#allocation5 + $0x480] sm:$0xff]  ;;  %v5346_v48 = vld [vmem:[#allocation5 + $0x488] sm:$0xff]  ;;  %3749 = vst [vmem:[#allocation8 + $0x450] sm:$0xff] %v3237_v38  ;;  %3750 = vst [vmem:[#allocation8 + $0x458] sm:$0xff] %v3238_v39 }
 0x2a1   :  { %v2731_v47 = vand.u32 2147483647, %v5345_v46  ;;  %v2732_v49 = vand.u32 2147483647, %v5346_v48  ;;  %v3241_v50 = vsub.f32 0.0, %v2729_v41  ;;  %v3242_v51 = vsub.f32 0.0, %v2730_v43 }
 0x2a2   :  { %v5347_v52 = vld [vmem:[#allocation5 + $0x490] sm:$0xff]  ;;  %v5348_v54 = vld [vmem:[#allocation5 + $0x498] sm:$0xff]  ;;  %3751 = vst [vmem:[#allocation8 + $0x460] sm:$0xff] %v3239_v44  ;;  %3752 = vst [vmem:[#allocation8 + $0x468] sm:$0xff] %v3240_v45 }
 0x2a3   :  { %v2733_v53 = vand.u32 2147483647, %v5347_v52  ;;  %v2734_v55 = vand.u32 2147483647, %v5348_v54  ;;  %v3243_v56 = vsub.f32 0.0, %v2731_v47  ;;  %v3244_v57 = vsub.f32 0.0, %v2732_v49 }
 0x2a4   :  { %v5349_v58 = vld [vmem:[#allocation5 + $0x4a0] sm:$0xff]  ;;  %v5350_v60 = vld [vmem:[#allocation5 + $0x4a8] sm:$0xff]  ;;  %3753 = vst [vmem:[#allocation8 + $0x470] sm:$0xff] %v3241_v50  ;;  %3754 = vst [vmem:[#allocation8 + $0x478] sm:$0xff] %v3242_v51 }
 0x2a5   :  { %v2735_v59 = vand.u32 2147483647, %v5349_v58  ;;  %v2736_v61 = vand.u32 2147483647, %v5350_v60  ;;  %v3245_v62 = vsub.f32 0.0, %v2733_v53  ;;  %v3246_v63 = vsub.f32 0.0, %v2734_v55 }
 0x2a6   :  { %v5351_v0 = vld [vmem:[#allocation5 + $0x4b0] sm:$0xff]  ;;  %v5352_v2 = vld [vmem:[#allocation5 + $0x4b8] sm:$0xff]  ;;  %3755 = vst [vmem:[#allocation8 + $0x480] sm:$0xff] %v3243_v56  ;;  %3756 = vst [vmem:[#allocation8 + $0x488] sm:$0xff] %v3244_v57 }
 0x2a7   :  { %v2737_v1 = vand.u32 2147483647, %v5351_v0  ;;  %v2738_v3 = vand.u32 2147483647, %v5352_v2  ;;  %v3247_v4 = vsub.f32 0.0, %v2735_v59  ;;  %v3248_v5 = vsub.f32 0.0, %v2736_v61 }
 0x2a8   :  { %v5353_v6 = vld [vmem:[#allocation5 + $0x4c0] sm:$0xff]  ;;  %v5354_v8 = vld [vmem:[#allocation5 + $0x4c8] sm:$0xff]  ;;  %3757 = vst [vmem:[#allocation8 + $0x490] sm:$0xff] %v3245_v62  ;;  %3758 = vst [vmem:[#allocation8 + $0x498] sm:$0xff] %v3246_v63 }
 0x2a9   :  { %v2739_v7 = vand.u32 2147483647, %v5353_v6  ;;  %v2740_v9 = vand.u32 2147483647, %v5354_v8  ;;  %v3249_v10 = vsub.f32 0.0, %v2737_v1  ;;  %v3250_v11 = vsub.f32 0.0, %v2738_v3 }
 0x2aa   :  { %v5355_v12 = vld [vmem:[#allocation5 + $0x4d0] sm:$0xff]  ;;  %v5356_v14 = vld [vmem:[#allocation5 + $0x4d8] sm:$0xff]  ;;  %3759 = vst [vmem:[#allocation8 + $0x4a0] sm:$0xff] %v3247_v4  ;;  %3760 = vst [vmem:[#allocation8 + $0x4a8] sm:$0xff] %v3248_v5 }
 0x2ab   :  { %v2741_v13 = vand.u32 2147483647, %v5355_v12  ;;  %v2742_v15 = vand.u32 2147483647, %v5356_v14  ;;  %v3251_v16 = vsub.f32 0.0, %v2739_v7  ;;  %v3252_v17 = vsub.f32 0.0, %v2740_v9 }
 0x2ac   :  { %v5357_v18 = vld [vmem:[#allocation5 + $0x4e0] sm:$0xff]  ;;  %v5358_v20 = vld [vmem:[#allocation5 + $0x4e8] sm:$0xff]  ;;  %3761 = vst [vmem:[#allocation8 + $0x4b0] sm:$0xff] %v3249_v10  ;;  %3762 = vst [vmem:[#allocation8 + $0x4b8] sm:$0xff] %v3250_v11 }
 0x2ad   :  { %v2743_v19 = vand.u32 2147483647, %v5357_v18  ;;  %v2744_v21 = vand.u32 2147483647, %v5358_v20  ;;  %v3253_v22 = vsub.f32 0.0, %v2741_v13  ;;  %v3254_v23 = vsub.f32 0.0, %v2742_v15 }
 0x2ae   :  { %v5359_v24 = vld [vmem:[#allocation5 + $0x4f0] sm:$0xff]  ;;  %v5360_v26 = vld [vmem:[#allocation5 + $0x4f8] sm:$0xff]  ;;  %3763 = vst [vmem:[#allocation8 + $0x4c0] sm:$0xff] %v3251_v16  ;;  %3764 = vst [vmem:[#allocation8 + $0x4c8] sm:$0xff] %v3252_v17 }
 0x2af   :  { %v2745_v25 = vand.u32 2147483647, %v5359_v24  ;;  %v2746_v27 = vand.u32 2147483647, %v5360_v26  ;;  %v3255_v28 = vsub.f32 0.0, %v2743_v19  ;;  %v3256_v29 = vsub.f32 0.0, %v2744_v21 }
 0x2b0   :  { %v5361_v30 = vld [vmem:[#allocation5 + $0x500] sm:$0xff]  ;;  %v5362_v32 = vld [vmem:[#allocation5 + $0x508] sm:$0xff]  ;;  %3765 = vst [vmem:[#allocation8 + $0x4d0] sm:$0xff] %v3253_v22  ;;  %3766 = vst [vmem:[#allocation8 + $0x4d8] sm:$0xff] %v3254_v23 }
 0x2b1   :  { %v2747_v31 = vand.u32 2147483647, %v5361_v30  ;;  %v2748_v33 = vand.u32 2147483647, %v5362_v32  ;;  %v3257_v34 = vsub.f32 0.0, %v2745_v25  ;;  %v3258_v35 = vsub.f32 0.0, %v2746_v27 }
 0x2b2   :  { %v5363_v36 = vld [vmem:[#allocation5 + $0x510] sm:$0xff]  ;;  %v5364_v38 = vld [vmem:[#allocation5 + $0x518] sm:$0xff]  ;;  %3767 = vst [vmem:[#allocation8 + $0x4e0] sm:$0xff] %v3255_v28  ;;  %3768 = vst [vmem:[#allocation8 + $0x4e8] sm:$0xff] %v3256_v29 }
 0x2b3   :  { %v2749_v37 = vand.u32 2147483647, %v5363_v36  ;;  %v2750_v39 = vand.u32 2147483647, %v5364_v38  ;;  %v3259_v40 = vsub.f32 0.0, %v2747_v31  ;;  %v3260_v41 = vsub.f32 0.0, %v2748_v33 }
 0x2b4   :  { %v5365_v42 = vld [vmem:[#allocation5 + $0x520] sm:$0xff]  ;;  %v5366_v44 = vld [vmem:[#allocation5 + $0x528] sm:$0xff]  ;;  %3769 = vst [vmem:[#allocation8 + $0x4f0] sm:$0xff] %v3257_v34  ;;  %3770 = vst [vmem:[#allocation8 + $0x4f8] sm:$0xff] %v3258_v35 }
 0x2b5   :  { %v2751_v43 = vand.u32 2147483647, %v5365_v42  ;;  %v2752_v45 = vand.u32 2147483647, %v5366_v44  ;;  %v3261_v46 = vsub.f32 0.0, %v2749_v37  ;;  %v3262_v47 = vsub.f32 0.0, %v2750_v39 }
 0x2b6   :  { %v5367_v48 = vld [vmem:[#allocation5 + $0x530] sm:$0xff]  ;;  %v5368_v50 = vld [vmem:[#allocation5 + $0x538] sm:$0xff]  ;;  %3771 = vst [vmem:[#allocation8 + $0x500] sm:$0xff] %v3259_v40  ;;  %3772 = vst [vmem:[#allocation8 + $0x508] sm:$0xff] %v3260_v41 }
 0x2b7   :  { %v2753_v49 = vand.u32 2147483647, %v5367_v48  ;;  %v2754_v51 = vand.u32 2147483647, %v5368_v50  ;;  %v3263_v52 = vsub.f32 0.0, %v2751_v43  ;;  %v3264_v53 = vsub.f32 0.0, %v2752_v45 }
 0x2b8   :  { %v5369_v54 = vld [vmem:[#allocation5 + $0x540] sm:$0xff]  ;;  %v5370_v56 = vld [vmem:[#allocation5 + $0x548] sm:$0xff]  ;;  %3773 = vst [vmem:[#allocation8 + $0x510] sm:$0xff] %v3261_v46  ;;  %3774 = vst [vmem:[#allocation8 + $0x518] sm:$0xff] %v3262_v47 }
 0x2b9   :  { %v2755_v55 = vand.u32 2147483647, %v5369_v54  ;;  %v2756_v57 = vand.u32 2147483647, %v5370_v56  ;;  %v3265_v58 = vsub.f32 0.0, %v2753_v49  ;;  %v3266_v59 = vsub.f32 0.0, %v2754_v51 }
 0x2ba   :  { %v5371_v60 = vld [vmem:[#allocation5 + $0x550] sm:$0xff]  ;;  %v5372_v62 = vld [vmem:[#allocation5 + $0x558] sm:$0xff]  ;;  %3775 = vst [vmem:[#allocation8 + $0x520] sm:$0xff] %v3263_v52  ;;  %3776 = vst [vmem:[#allocation8 + $0x528] sm:$0xff] %v3264_v53 }
 0x2bb   :  { %v2757_v61 = vand.u32 2147483647, %v5371_v60  ;;  %v2758_v63 = vand.u32 2147483647, %v5372_v62  ;;  %v3267_v0 = vsub.f32 0.0, %v2755_v55  ;;  %v3268_v1 = vsub.f32 0.0, %v2756_v57 }
 0x2bc   :  { %v5373_v2 = vld [vmem:[#allocation5 + $0x560] sm:$0xff]  ;;  %v5374_v4 = vld [vmem:[#allocation5 + $0x568] sm:$0xff]  ;;  %3777 = vst [vmem:[#allocation8 + $0x530] sm:$0xff] %v3265_v58  ;;  %3778 = vst [vmem:[#allocation8 + $0x538] sm:$0xff] %v3266_v59 }
 0x2bd   :  { %v2759_v3 = vand.u32 2147483647, %v5373_v2  ;;  %v2760_v5 = vand.u32 2147483647, %v5374_v4  ;;  %v3269_v6 = vsub.f32 0.0, %v2757_v61  ;;  %v3270_v7 = vsub.f32 0.0, %v2758_v63 }
 0x2be   :  { %v5375_v8 = vld [vmem:[#allocation5 + $0x570] sm:$0xff]  ;;  %v5376_v10 = vld [vmem:[#allocation5 + $0x578] sm:$0xff]  ;;  %3779 = vst [vmem:[#allocation8 + $0x540] sm:$0xff] %v3267_v0  ;;  %3780 = vst [vmem:[#allocation8 + $0x548] sm:$0xff] %v3268_v1 }
 0x2bf   :  { %v2761_v9 = vand.u32 2147483647, %v5375_v8  ;;  %v2762_v11 = vand.u32 2147483647, %v5376_v10  ;;  %v3271_v12 = vsub.f32 0.0, %v2759_v3  ;;  %v3272_v13 = vsub.f32 0.0, %v2760_v5 }
 0x2c0   :  { %v5377_v14 = vld [vmem:[#allocation5 + $0x580] sm:$0xff]  ;;  %v5378_v16 = vld [vmem:[#allocation5 + $0x588] sm:$0xff]  ;;  %3781 = vst [vmem:[#allocation8 + $0x550] sm:$0xff] %v3269_v6  ;;  %3782 = vst [vmem:[#allocation8 + $0x558] sm:$0xff] %v3270_v7 }
 0x2c1   :  { %v2763_v15 = vand.u32 2147483647, %v5377_v14  ;;  %v2764_v17 = vand.u32 2147483647, %v5378_v16  ;;  %v3273_v18 = vsub.f32 0.0, %v2761_v9  ;;  %v3274_v19 = vsub.f32 0.0, %v2762_v11 }
 0x2c2   :  { %v5379_v20 = vld [vmem:[#allocation5 + $0x590] sm:$0xff]  ;;  %v5380_v22 = vld [vmem:[#allocation5 + $0x598] sm:$0xff]  ;;  %3783 = vst [vmem:[#allocation8 + $0x560] sm:$0xff] %v3271_v12  ;;  %3784 = vst [vmem:[#allocation8 + $0x568] sm:$0xff] %v3272_v13 }
 0x2c3   :  { %v2765_v21 = vand.u32 2147483647, %v5379_v20  ;;  %v2766_v23 = vand.u32 2147483647, %v5380_v22  ;;  %v3275_v24 = vsub.f32 0.0, %v2763_v15  ;;  %v3276_v25 = vsub.f32 0.0, %v2764_v17 }
 0x2c4   :  { %v5381_v26 = vld [vmem:[#allocation5 + $0x5a0] sm:$0xff]  ;;  %v5382_v28 = vld [vmem:[#allocation5 + $0x5a8] sm:$0xff]  ;;  %3785 = vst [vmem:[#allocation8 + $0x570] sm:$0xff] %v3273_v18  ;;  %3786 = vst [vmem:[#allocation8 + $0x578] sm:$0xff] %v3274_v19 }
 0x2c5   :  { %v2767_v27 = vand.u32 2147483647, %v5381_v26  ;;  %v2768_v29 = vand.u32 2147483647, %v5382_v28  ;;  %v3277_v30 = vsub.f32 0.0, %v2765_v21  ;;  %v3278_v31 = vsub.f32 0.0, %v2766_v23 }
 0x2c6   :  { %v5383_v32 = vld [vmem:[#allocation5 + $0x5b0] sm:$0xff]  ;;  %v5384_v34 = vld [vmem:[#allocation5 + $0x5b8] sm:$0xff]  ;;  %3787 = vst [vmem:[#allocation8 + $0x580] sm:$0xff] %v3275_v24  ;;  %3788 = vst [vmem:[#allocation8 + $0x588] sm:$0xff] %v3276_v25 }
 0x2c7   :  { %v2769_v33 = vand.u32 2147483647, %v5383_v32  ;;  %v2770_v35 = vand.u32 2147483647, %v5384_v34  ;;  %v3279_v36 = vsub.f32 0.0, %v2767_v27  ;;  %v3280_v37 = vsub.f32 0.0, %v2768_v29 }
 0x2c8   :  { %v5385_v38 = vld [vmem:[#allocation5 + $0x5c0] sm:$0xff]  ;;  %v5386_v40 = vld [vmem:[#allocation5 + $0x5c8] sm:$0xff]  ;;  %3789 = vst [vmem:[#allocation8 + $0x590] sm:$0xff] %v3277_v30  ;;  %3790 = vst [vmem:[#allocation8 + $0x598] sm:$0xff] %v3278_v31 }
 0x2c9   :  { %v2771_v39 = vand.u32 2147483647, %v5385_v38  ;;  %v2772_v41 = vand.u32 2147483647, %v5386_v40  ;;  %v3281_v42 = vsub.f32 0.0, %v2769_v33  ;;  %v3282_v43 = vsub.f32 0.0, %v2770_v35 }
 0x2ca   :  { %v5387_v44 = vld [vmem:[#allocation5 + $0x5d0] sm:$0xff]  ;;  %v5388_v46 = vld [vmem:[#allocation5 + $0x5d8] sm:$0xff]  ;;  %3791 = vst [vmem:[#allocation8 + $0x5a0] sm:$0xff] %v3279_v36  ;;  %3792 = vst [vmem:[#allocation8 + $0x5a8] sm:$0xff] %v3280_v37 }
 0x2cb   :  { %v2773_v45 = vand.u32 2147483647, %v5387_v44  ;;  %v2774_v47 = vand.u32 2147483647, %v5388_v46  ;;  %v3283_v48 = vsub.f32 0.0, %v2771_v39  ;;  %v3284_v49 = vsub.f32 0.0, %v2772_v41 }
 0x2cc   :  { %v5389_v50 = vld [vmem:[#allocation5 + $0x5e0] sm:$0xff]  ;;  %v5390_v52 = vld [vmem:[#allocation5 + $0x5e8] sm:$0xff]  ;;  %3793 = vst [vmem:[#allocation8 + $0x5b0] sm:$0xff] %v3281_v42  ;;  %3794 = vst [vmem:[#allocation8 + $0x5b8] sm:$0xff] %v3282_v43 }
 0x2cd   :  { %v2775_v51 = vand.u32 2147483647, %v5389_v50  ;;  %v2776_v53 = vand.u32 2147483647, %v5390_v52  ;;  %v3285_v54 = vsub.f32 0.0, %v2773_v45  ;;  %v3286_v55 = vsub.f32 0.0, %v2774_v47 }
 0x2ce   :  { %v5391_v56 = vld [vmem:[#allocation5 + $0x5f0] sm:$0xff]  ;;  %v5392_v58 = vld [vmem:[#allocation5 + $0x5f8] sm:$0xff]  ;;  %3795 = vst [vmem:[#allocation8 + $0x5c0] sm:$0xff] %v3283_v48  ;;  %3796 = vst [vmem:[#allocation8 + $0x5c8] sm:$0xff] %v3284_v49 }
 0x2cf   :  { %v2777_v57 = vand.u32 2147483647, %v5391_v56  ;;  %v2778_v59 = vand.u32 2147483647, %v5392_v58  ;;  %v3287_v60 = vsub.f32 0.0, %v2775_v51  ;;  %v3288_v61 = vsub.f32 0.0, %v2776_v53 }
 0x2d0   :  { %v5393_v62 = vld [vmem:[#allocation5 + $0x600] sm:$0xff]  ;;  %v5394_v0 = vld [vmem:[#allocation5 + $0x608] sm:$0xff]  ;;  %3797 = vst [vmem:[#allocation8 + $0x5d0] sm:$0xff] %v3285_v54  ;;  %3798 = vst [vmem:[#allocation8 + $0x5d8] sm:$0xff] %v3286_v55 }
 0x2d1   :  { %v2779_v63 = vand.u32 2147483647, %v5393_v62  ;;  %v2780_v1 = vand.u32 2147483647, %v5394_v0  ;;  %v3289_v2 = vsub.f32 0.0, %v2777_v57  ;;  %v3290_v3 = vsub.f32 0.0, %v2778_v59 }
 0x2d2   :  { %v5395_v4 = vld [vmem:[#allocation5 + $0x610] sm:$0xff]  ;;  %v5396_v6 = vld [vmem:[#allocation5 + $0x618] sm:$0xff]  ;;  %3799 = vst [vmem:[#allocation8 + $0x5e0] sm:$0xff] %v3287_v60  ;;  %3800 = vst [vmem:[#allocation8 + $0x5e8] sm:$0xff] %v3288_v61 }
 0x2d3   :  { %v2781_v5 = vand.u32 2147483647, %v5395_v4  ;;  %v2782_v7 = vand.u32 2147483647, %v5396_v6  ;;  %v3291_v8 = vsub.f32 0.0, %v2779_v63  ;;  %v3292_v9 = vsub.f32 0.0, %v2780_v1 }
 0x2d4   :  { %v5397_v10 = vld [vmem:[#allocation5 + $0x620] sm:$0xff]  ;;  %v5398_v12 = vld [vmem:[#allocation5 + $0x628] sm:$0xff]  ;;  %3801 = vst [vmem:[#allocation8 + $0x5f0] sm:$0xff] %v3289_v2  ;;  %3802 = vst [vmem:[#allocation8 + $0x5f8] sm:$0xff] %v3290_v3 }
 0x2d5   :  { %v2783_v11 = vand.u32 2147483647, %v5397_v10  ;;  %v2784_v13 = vand.u32 2147483647, %v5398_v12  ;;  %v3293_v14 = vsub.f32 0.0, %v2781_v5  ;;  %v3294_v15 = vsub.f32 0.0, %v2782_v7 }
 0x2d6   :  { %v5399_v16 = vld [vmem:[#allocation5 + $0x630] sm:$0xff]  ;;  %v5400_v18 = vld [vmem:[#allocation5 + $0x638] sm:$0xff]  ;;  %3803 = vst [vmem:[#allocation8 + $0x600] sm:$0xff] %v3291_v8  ;;  %3804 = vst [vmem:[#allocation8 + $0x608] sm:$0xff] %v3292_v9 }
 0x2d7   :  { %v2785_v17 = vand.u32 2147483647, %v5399_v16  ;;  %v2786_v19 = vand.u32 2147483647, %v5400_v18  ;;  %v3295_v20 = vsub.f32 0.0, %v2783_v11  ;;  %v3296_v21 = vsub.f32 0.0, %v2784_v13 }
 0x2d8   :  { %v5401_v22 = vld [vmem:[#allocation5 + $0x640] sm:$0xff]  ;;  %v5402_v24 = vld [vmem:[#allocation5 + $0x648] sm:$0xff]  ;;  %3805 = vst [vmem:[#allocation8 + $0x610] sm:$0xff] %v3293_v14  ;;  %3806 = vst [vmem:[#allocation8 + $0x618] sm:$0xff] %v3294_v15 }
 0x2d9   :  { %v2787_v23 = vand.u32 2147483647, %v5401_v22  ;;  %v2788_v25 = vand.u32 2147483647, %v5402_v24  ;;  %v3297_v26 = vsub.f32 0.0, %v2785_v17  ;;  %v3298_v27 = vsub.f32 0.0, %v2786_v19 }
 0x2da   :  { %v5403_v28 = vld [vmem:[#allocation5 + $0x650] sm:$0xff]  ;;  %v5404_v30 = vld [vmem:[#allocation5 + $0x658] sm:$0xff]  ;;  %3807 = vst [vmem:[#allocation8 + $0x620] sm:$0xff] %v3295_v20  ;;  %3808 = vst [vmem:[#allocation8 + $0x628] sm:$0xff] %v3296_v21 }
 0x2db   :  { %v2789_v29 = vand.u32 2147483647, %v5403_v28  ;;  %v2790_v31 = vand.u32 2147483647, %v5404_v30  ;;  %v3299_v32 = vsub.f32 0.0, %v2787_v23  ;;  %v3300_v33 = vsub.f32 0.0, %v2788_v25 }
 0x2dc   :  { %v5405_v34 = vld [vmem:[#allocation5 + $0x660] sm:$0xff]  ;;  %v5406_v36 = vld [vmem:[#allocation5 + $0x668] sm:$0xff]  ;;  %3809 = vst [vmem:[#allocation8 + $0x630] sm:$0xff] %v3297_v26  ;;  %3810 = vst [vmem:[#allocation8 + $0x638] sm:$0xff] %v3298_v27 }
 0x2dd   :  { %v2791_v35 = vand.u32 2147483647, %v5405_v34  ;;  %v2792_v37 = vand.u32 2147483647, %v5406_v36  ;;  %v3301_v38 = vsub.f32 0.0, %v2789_v29  ;;  %v3302_v39 = vsub.f32 0.0, %v2790_v31 }
 0x2de   :  { %v5407_v40 = vld [vmem:[#allocation5 + $0x670] sm:$0xff]  ;;  %v5408_v42 = vld [vmem:[#allocation5 + $0x678] sm:$0xff]  ;;  %3811 = vst [vmem:[#allocation8 + $0x640] sm:$0xff] %v3299_v32  ;;  %3812 = vst [vmem:[#allocation8 + $0x648] sm:$0xff] %v3300_v33 }
 0x2df   :  { %v2793_v41 = vand.u32 2147483647, %v5407_v40  ;;  %v2794_v43 = vand.u32 2147483647, %v5408_v42  ;;  %v3303_v44 = vsub.f32 0.0, %v2791_v35  ;;  %v3304_v45 = vsub.f32 0.0, %v2792_v37 }
 0x2e0   :  { %v5409_v46 = vld [vmem:[#allocation5 + $0x680] sm:$0xff]  ;;  %v5410_v48 = vld [vmem:[#allocation5 + $0x688] sm:$0xff]  ;;  %3813 = vst [vmem:[#allocation8 + $0x650] sm:$0xff] %v3301_v38  ;;  %3814 = vst [vmem:[#allocation8 + $0x658] sm:$0xff] %v3302_v39 }
 0x2e1   :  { %v2795_v47 = vand.u32 2147483647, %v5409_v46  ;;  %v2796_v49 = vand.u32 2147483647, %v5410_v48  ;;  %v3305_v50 = vsub.f32 0.0, %v2793_v41  ;;  %v3306_v51 = vsub.f32 0.0, %v2794_v43 }
 0x2e2   :  { %v5411_v52 = vld [vmem:[#allocation5 + $0x690] sm:$0xff]  ;;  %v5412_v54 = vld [vmem:[#allocation5 + $0x698] sm:$0xff]  ;;  %3815 = vst [vmem:[#allocation8 + $0x660] sm:$0xff] %v3303_v44  ;;  %3816 = vst [vmem:[#allocation8 + $0x668] sm:$0xff] %v3304_v45 }
 0x2e3   :  { %v2797_v53 = vand.u32 2147483647, %v5411_v52  ;;  %v2798_v55 = vand.u32 2147483647, %v5412_v54  ;;  %v3307_v56 = vsub.f32 0.0, %v2795_v47  ;;  %v3308_v57 = vsub.f32 0.0, %v2796_v49 }
 0x2e4   :  { %v5413_v58 = vld [vmem:[#allocation5 + $0x6a0] sm:$0xff]  ;;  %v5414_v60 = vld [vmem:[#allocation5 + $0x6a8] sm:$0xff]  ;;  %3817 = vst [vmem:[#allocation8 + $0x670] sm:$0xff] %v3305_v50  ;;  %3818 = vst [vmem:[#allocation8 + $0x678] sm:$0xff] %v3306_v51 }
 0x2e5   :  { %v2799_v59 = vand.u32 2147483647, %v5413_v58  ;;  %v2800_v61 = vand.u32 2147483647, %v5414_v60  ;;  %v3309_v62 = vsub.f32 0.0, %v2797_v53  ;;  %v3310_v63 = vsub.f32 0.0, %v2798_v55 }
 0x2e6   :  { %v5415_v0 = vld [vmem:[#allocation5 + $0x6b0] sm:$0xff]  ;;  %v5416_v2 = vld [vmem:[#allocation5 + $0x6b8] sm:$0xff]  ;;  %3819 = vst [vmem:[#allocation8 + $0x680] sm:$0xff] %v3307_v56  ;;  %3820 = vst [vmem:[#allocation8 + $0x688] sm:$0xff] %v3308_v57 }
 0x2e7   :  { %v2801_v1 = vand.u32 2147483647, %v5415_v0  ;;  %v2802_v3 = vand.u32 2147483647, %v5416_v2  ;;  %v3311_v4 = vsub.f32 0.0, %v2799_v59  ;;  %v3312_v5 = vsub.f32 0.0, %v2800_v61 }
 0x2e8   :  { %v5417_v6 = vld [vmem:[#allocation5 + $0x6c0] sm:$0xff]  ;;  %v5418_v8 = vld [vmem:[#allocation5 + $0x6c8] sm:$0xff]  ;;  %3821 = vst [vmem:[#allocation8 + $0x690] sm:$0xff] %v3309_v62  ;;  %3822 = vst [vmem:[#allocation8 + $0x698] sm:$0xff] %v3310_v63 }
 0x2e9   :  { %v2803_v7 = vand.u32 2147483647, %v5417_v6  ;;  %v2804_v9 = vand.u32 2147483647, %v5418_v8  ;;  %v3313_v10 = vsub.f32 0.0, %v2801_v1  ;;  %v3314_v11 = vsub.f32 0.0, %v2802_v3 }
 0x2ea   :  { %v5419_v12 = vld [vmem:[#allocation5 + $0x6d0] sm:$0xff]  ;;  %v5420_v14 = vld [vmem:[#allocation5 + $0x6d8] sm:$0xff]  ;;  %3823 = vst [vmem:[#allocation8 + $0x6a0] sm:$0xff] %v3311_v4  ;;  %3824 = vst [vmem:[#allocation8 + $0x6a8] sm:$0xff] %v3312_v5 }
 0x2eb   :  { %v2805_v13 = vand.u32 2147483647, %v5419_v12  ;;  %v2806_v15 = vand.u32 2147483647, %v5420_v14  ;;  %v3315_v16 = vsub.f32 0.0, %v2803_v7  ;;  %v3316_v17 = vsub.f32 0.0, %v2804_v9 }
 0x2ec   :  { %v5421_v18 = vld [vmem:[#allocation5 + $0x6e0] sm:$0xff]  ;;  %v5422_v20 = vld [vmem:[#allocation5 + $0x6e8] sm:$0xff]  ;;  %3825 = vst [vmem:[#allocation8 + $0x6b0] sm:$0xff] %v3313_v10  ;;  %3826 = vst [vmem:[#allocation8 + $0x6b8] sm:$0xff] %v3314_v11 }
 0x2ed   :  { %v2807_v19 = vand.u32 2147483647, %v5421_v18  ;;  %v2808_v21 = vand.u32 2147483647, %v5422_v20  ;;  %v3317_v22 = vsub.f32 0.0, %v2805_v13  ;;  %v3318_v23 = vsub.f32 0.0, %v2806_v15 }
 0x2ee   :  { %v5423_v24 = vld [vmem:[#allocation5 + $0x6f0] sm:$0xff]  ;;  %v5424_v26 = vld [vmem:[#allocation5 + $0x6f8] sm:$0xff]  ;;  %3827 = vst [vmem:[#allocation8 + $0x6c0] sm:$0xff] %v3315_v16  ;;  %3828 = vst [vmem:[#allocation8 + $0x6c8] sm:$0xff] %v3316_v17 }
 0x2ef   :  { %v2809_v25 = vand.u32 2147483647, %v5423_v24  ;;  %v2810_v27 = vand.u32 2147483647, %v5424_v26  ;;  %v3319_v28 = vsub.f32 0.0, %v2807_v19  ;;  %v3320_v29 = vsub.f32 0.0, %v2808_v21 }
 0x2f0   :  { %v5425_v30 = vld [vmem:[#allocation5 + $0x700] sm:$0xff]  ;;  %v5426_v32 = vld [vmem:[#allocation5 + $0x708] sm:$0xff]  ;;  %3829 = vst [vmem:[#allocation8 + $0x6d0] sm:$0xff] %v3317_v22  ;;  %3830 = vst [vmem:[#allocation8 + $0x6d8] sm:$0xff] %v3318_v23 }
 0x2f1   :  { %v2811_v31 = vand.u32 2147483647, %v5425_v30  ;;  %v2812_v33 = vand.u32 2147483647, %v5426_v32  ;;  %v3321_v34 = vsub.f32 0.0, %v2809_v25  ;;  %v3322_v35 = vsub.f32 0.0, %v2810_v27 }
 0x2f2   :  { %v5427_v36 = vld [vmem:[#allocation5 + $0x710] sm:$0xff]  ;;  %v5428_v38 = vld [vmem:[#allocation5 + $0x718] sm:$0xff]  ;;  %3831 = vst [vmem:[#allocation8 + $0x6e0] sm:$0xff] %v3319_v28  ;;  %3832 = vst [vmem:[#allocation8 + $0x6e8] sm:$0xff] %v3320_v29 }
 0x2f3   :  { %v2813_v37 = vand.u32 2147483647, %v5427_v36  ;;  %v2814_v39 = vand.u32 2147483647, %v5428_v38  ;;  %v3323_v40 = vsub.f32 0.0, %v2811_v31  ;;  %v3324_v41 = vsub.f32 0.0, %v2812_v33 }
 0x2f4   :  { %v5429_v42 = vld [vmem:[#allocation5 + $0x720] sm:$0xff]  ;;  %v5430_v44 = vld [vmem:[#allocation5 + $0x728] sm:$0xff]  ;;  %3833 = vst [vmem:[#allocation8 + $0x6f0] sm:$0xff] %v3321_v34  ;;  %3834 = vst [vmem:[#allocation8 + $0x6f8] sm:$0xff] %v3322_v35 }
 0x2f5   :  { %v2815_v43 = vand.u32 2147483647, %v5429_v42  ;;  %v2816_v45 = vand.u32 2147483647, %v5430_v44  ;;  %v3325_v46 = vsub.f32 0.0, %v2813_v37  ;;  %v3326_v47 = vsub.f32 0.0, %v2814_v39 }
 0x2f6   :  { %v5431_v48 = vld [vmem:[#allocation5 + $0x730] sm:$0xff]  ;;  %v5432_v50 = vld [vmem:[#allocation5 + $0x738] sm:$0xff]  ;;  %3835 = vst [vmem:[#allocation8 + $0x700] sm:$0xff] %v3323_v40  ;;  %3836 = vst [vmem:[#allocation8 + $0x708] sm:$0xff] %v3324_v41 }
 0x2f7   :  { %v2817_v49 = vand.u32 2147483647, %v5431_v48  ;;  %v2818_v51 = vand.u32 2147483647, %v5432_v50  ;;  %v3327_v52 = vsub.f32 0.0, %v2815_v43  ;;  %v3328_v53 = vsub.f32 0.0, %v2816_v45 }
 0x2f8   :  { %v5433_v54 = vld [vmem:[#allocation5 + $0x740] sm:$0xff]  ;;  %v5434_v56 = vld [vmem:[#allocation5 + $0x748] sm:$0xff]  ;;  %3837 = vst [vmem:[#allocation8 + $0x710] sm:$0xff] %v3325_v46  ;;  %3838 = vst [vmem:[#allocation8 + $0x718] sm:$0xff] %v3326_v47 }
 0x2f9   :  { %v2819_v55 = vand.u32 2147483647, %v5433_v54  ;;  %v2820_v57 = vand.u32 2147483647, %v5434_v56  ;;  %v3329_v58 = vsub.f32 0.0, %v2817_v49  ;;  %v3330_v59 = vsub.f32 0.0, %v2818_v51 }
 0x2fa   :  { %v5435_v60 = vld [vmem:[#allocation5 + $0x750] sm:$0xff]  ;;  %v5436_v62 = vld [vmem:[#allocation5 + $0x758] sm:$0xff]  ;;  %3839 = vst [vmem:[#allocation8 + $0x720] sm:$0xff] %v3327_v52  ;;  %3840 = vst [vmem:[#allocation8 + $0x728] sm:$0xff] %v3328_v53 }
 0x2fb   :  { %v2821_v61 = vand.u32 2147483647, %v5435_v60  ;;  %v2822_v63 = vand.u32 2147483647, %v5436_v62  ;;  %v3331_v0 = vsub.f32 0.0, %v2819_v55  ;;  %v3332_v1 = vsub.f32 0.0, %v2820_v57 }
 0x2fc   :  { %v5437_v2 = vld [vmem:[#allocation5 + $0x760] sm:$0xff]  ;;  %v5438_v4 = vld [vmem:[#allocation5 + $0x768] sm:$0xff]  ;;  %3841 = vst [vmem:[#allocation8 + $0x730] sm:$0xff] %v3329_v58  ;;  %3842 = vst [vmem:[#allocation8 + $0x738] sm:$0xff] %v3330_v59 }
 0x2fd   :  { %v2823_v3 = vand.u32 2147483647, %v5437_v2  ;;  %v2824_v5 = vand.u32 2147483647, %v5438_v4  ;;  %v3333_v6 = vsub.f32 0.0, %v2821_v61  ;;  %v3334_v7 = vsub.f32 0.0, %v2822_v63 }
 0x2fe   :  { %v5439_v8 = vld [vmem:[#allocation5 + $0x770] sm:$0xff]  ;;  %v5440_v10 = vld [vmem:[#allocation5 + $0x778] sm:$0xff]  ;;  %3843 = vst [vmem:[#allocation8 + $0x740] sm:$0xff] %v3331_v0  ;;  %3844 = vst [vmem:[#allocation8 + $0x748] sm:$0xff] %v3332_v1 }
 0x2ff   :  { %v2825_v9 = vand.u32 2147483647, %v5439_v8  ;;  %v2826_v11 = vand.u32 2147483647, %v5440_v10  ;;  %v3335_v12 = vsub.f32 0.0, %v2823_v3  ;;  %v3336_v13 = vsub.f32 0.0, %v2824_v5 }
 0x300   :  { %v5441_v14 = vld [vmem:[#allocation5 + $0x780] sm:$0xff]  ;;  %v5442_v16 = vld [vmem:[#allocation5 + $0x788] sm:$0xff]  ;;  %3845 = vst [vmem:[#allocation8 + $0x750] sm:$0xff] %v3333_v6  ;;  %3846 = vst [vmem:[#allocation8 + $0x758] sm:$0xff] %v3334_v7 }
 0x301   :  { %v2827_v15 = vand.u32 2147483647, %v5441_v14  ;;  %v2828_v17 = vand.u32 2147483647, %v5442_v16  ;;  %v3337_v18 = vsub.f32 0.0, %v2825_v9  ;;  %v3338_v19 = vsub.f32 0.0, %v2826_v11 }
 0x302   :  { %v5443_v20 = vld [vmem:[#allocation5 + $0x790] sm:$0xff]  ;;  %v5444_v22 = vld [vmem:[#allocation5 + $0x798] sm:$0xff]  ;;  %3847 = vst [vmem:[#allocation8 + $0x760] sm:$0xff] %v3335_v12  ;;  %3848 = vst [vmem:[#allocation8 + $0x768] sm:$0xff] %v3336_v13 }
 0x303   :  { %v2829_v21 = vand.u32 2147483647, %v5443_v20  ;;  %v2830_v23 = vand.u32 2147483647, %v5444_v22  ;;  %v3339_v24 = vsub.f32 0.0, %v2827_v15  ;;  %v3340_v25 = vsub.f32 0.0, %v2828_v17 }
 0x304   :  { %v5445_v26 = vld [vmem:[#allocation5 + $0x7a0] sm:$0xff]  ;;  %v5446_v28 = vld [vmem:[#allocation5 + $0x7a8] sm:$0xff]  ;;  %3849 = vst [vmem:[#allocation8 + $0x770] sm:$0xff] %v3337_v18  ;;  %3850 = vst [vmem:[#allocation8 + $0x778] sm:$0xff] %v3338_v19 }
 0x305   :  { %v2831_v27 = vand.u32 2147483647, %v5445_v26  ;;  %v2832_v29 = vand.u32 2147483647, %v5446_v28  ;;  %v3341_v30 = vsub.f32 0.0, %v2829_v21  ;;  %v3342_v31 = vsub.f32 0.0, %v2830_v23 }
 0x306   :  { %v5447_v32 = vld [vmem:[#allocation5 + $0x7b0] sm:$0xff]  ;;  %v5448_v34 = vld [vmem:[#allocation5 + $0x7b8] sm:$0xff]  ;;  %3851 = vst [vmem:[#allocation8 + $0x780] sm:$0xff] %v3339_v24  ;;  %3852 = vst [vmem:[#allocation8 + $0x788] sm:$0xff] %v3340_v25 }
 0x307   :  { %v2833_v33 = vand.u32 2147483647, %v5447_v32  ;;  %v2834_v35 = vand.u32 2147483647, %v5448_v34  ;;  %v3343_v36 = vsub.f32 0.0, %v2831_v27  ;;  %v3344_v37 = vsub.f32 0.0, %v2832_v29 }
 0x308   :  { %v5449_v38 = vld [vmem:[#allocation5 + $0x7c0] sm:$0xff]  ;;  %v5450_v40 = vld [vmem:[#allocation5 + $0x7c8] sm:$0xff]  ;;  %3853 = vst [vmem:[#allocation8 + $0x790] sm:$0xff] %v3341_v30  ;;  %3854 = vst [vmem:[#allocation8 + $0x798] sm:$0xff] %v3342_v31 }
 0x309   :  { %v2835_v39 = vand.u32 2147483647, %v5449_v38  ;;  %v2836_v41 = vand.u32 2147483647, %v5450_v40  ;;  %v3345_v42 = vsub.f32 0.0, %v2833_v33  ;;  %v3346_v43 = vsub.f32 0.0, %v2834_v35 }
 0x30a   :  { %v5451_v44 = vld [vmem:[#allocation5 + $0x7d0] sm:$0xff]  ;;  %v5452_v46 = vld [vmem:[#allocation5 + $0x7d8] sm:$0xff]  ;;  %3855 = vst [vmem:[#allocation8 + $0x7a0] sm:$0xff] %v3343_v36  ;;  %3856 = vst [vmem:[#allocation8 + $0x7a8] sm:$0xff] %v3344_v37 }
 0x30b   :  { %v2837_v45 = vand.u32 2147483647, %v5451_v44  ;;  %v2838_v47 = vand.u32 2147483647, %v5452_v46  ;;  %v3347_v48 = vsub.f32 0.0, %v2835_v39  ;;  %v3348_v49 = vsub.f32 0.0, %v2836_v41 }
 0x30c   :  { %v5453_v50 = vld [vmem:[#allocation5 + $0x7e0] sm:$0xff]  ;;  %v5454_v52 = vld [vmem:[#allocation5 + $0x7e8] sm:$0xff]  ;;  %3857 = vst [vmem:[#allocation8 + $0x7b0] sm:$0xff] %v3345_v42  ;;  %3858 = vst [vmem:[#allocation8 + $0x7b8] sm:$0xff] %v3346_v43 }
 0x30d   :  { %v2839_v51 = vand.u32 2147483647, %v5453_v50  ;;  %v2840_v53 = vand.u32 2147483647, %v5454_v52  ;;  %v3349_v54 = vsub.f32 0.0, %v2837_v45  ;;  %v3350_v55 = vsub.f32 0.0, %v2838_v47 }
 0x30e   :  { %v5455_v56 = vld [vmem:[#allocation5 + $0x7f0] sm:$0xff]  ;;  %v5456_v58 = vld [vmem:[#allocation5 + $0x7f8] sm:$0xff]  ;;  %3859 = vst [vmem:[#allocation8 + $0x7c0] sm:$0xff] %v3347_v48  ;;  %3860 = vst [vmem:[#allocation8 + $0x7c8] sm:$0xff] %v3348_v49 }
 0x30f   :  { %v2841_v57 = vand.u32 2147483647, %v5455_v56  ;;  %v2842_v59 = vand.u32 2147483647, %v5456_v58  ;;  %v3351_v60 = vsub.f32 0.0, %v2839_v51  ;;  %v3352_v61 = vsub.f32 0.0, %v2840_v53 }
 0x310   :  { %v5457_v62 = vld [vmem:[#allocation5 + $0x800] sm:$0xff]  ;;  %v5458_v0 = vld [vmem:[#allocation5 + $0x808] sm:$0xff]  ;;  %3861 = vst [vmem:[#allocation8 + $0x7d0] sm:$0xff] %v3349_v54  ;;  %3862 = vst [vmem:[#allocation8 + $0x7d8] sm:$0xff] %v3350_v55 }
 0x311   :  { %v2843_v63 = vand.u32 2147483647, %v5457_v62  ;;  %v2844_v1 = vand.u32 2147483647, %v5458_v0  ;;  %v3353_v2 = vsub.f32 0.0, %v2841_v57  ;;  %v3354_v3 = vsub.f32 0.0, %v2842_v59 }
 0x312   :  { %v5459_v4 = vld [vmem:[#allocation5 + $0x810] sm:$0xff]  ;;  %v5460_v6 = vld [vmem:[#allocation5 + $0x818] sm:$0xff]  ;;  %3863 = vst [vmem:[#allocation8 + $0x7e0] sm:$0xff] %v3351_v60  ;;  %3864 = vst [vmem:[#allocation8 + $0x7e8] sm:$0xff] %v3352_v61 }
 0x313   :  { %v2845_v5 = vand.u32 2147483647, %v5459_v4  ;;  %v2846_v7 = vand.u32 2147483647, %v5460_v6  ;;  %v3355_v8 = vsub.f32 0.0, %v2843_v63  ;;  %v3356_v9 = vsub.f32 0.0, %v2844_v1 }
 0x314   :  { %v5461_v10 = vld [vmem:[#allocation5 + $0x820] sm:$0xff]  ;;  %v5462_v12 = vld [vmem:[#allocation5 + $0x828] sm:$0xff]  ;;  %3865 = vst [vmem:[#allocation8 + $0x7f0] sm:$0xff] %v3353_v2  ;;  %3866 = vst [vmem:[#allocation8 + $0x7f8] sm:$0xff] %v3354_v3 }
 0x315   :  { %v2847_v11 = vand.u32 2147483647, %v5461_v10  ;;  %v2848_v13 = vand.u32 2147483647, %v5462_v12  ;;  %v3357_v14 = vsub.f32 0.0, %v2845_v5  ;;  %v3358_v15 = vsub.f32 0.0, %v2846_v7 }
 0x316   :  { %v5463_v16 = vld [vmem:[#allocation5 + $0x830] sm:$0xff]  ;;  %v5464_v18 = vld [vmem:[#allocation5 + $0x838] sm:$0xff]  ;;  %3867 = vst [vmem:[#allocation8 + $0x800] sm:$0xff] %v3355_v8  ;;  %3868 = vst [vmem:[#allocation8 + $0x808] sm:$0xff] %v3356_v9 }
 0x317   :  { %v2849_v17 = vand.u32 2147483647, %v5463_v16  ;;  %v2850_v19 = vand.u32 2147483647, %v5464_v18  ;;  %v3359_v20 = vsub.f32 0.0, %v2847_v11  ;;  %v3360_v21 = vsub.f32 0.0, %v2848_v13 }
 0x318   :  { %v5465_v22 = vld [vmem:[#allocation5 + $0x840] sm:$0xff]  ;;  %v5466_v24 = vld [vmem:[#allocation5 + $0x848] sm:$0xff]  ;;  %3869 = vst [vmem:[#allocation8 + $0x810] sm:$0xff] %v3357_v14  ;;  %3870 = vst [vmem:[#allocation8 + $0x818] sm:$0xff] %v3358_v15 }
 0x319   :  { %v2851_v23 = vand.u32 2147483647, %v5465_v22  ;;  %v2852_v25 = vand.u32 2147483647, %v5466_v24  ;;  %v3361_v26 = vsub.f32 0.0, %v2849_v17  ;;  %v3362_v27 = vsub.f32 0.0, %v2850_v19 }
 0x31a   :  { %v5467_v28 = vld [vmem:[#allocation5 + $0x850] sm:$0xff]  ;;  %v5468_v30 = vld [vmem:[#allocation5 + $0x858] sm:$0xff]  ;;  %3871 = vst [vmem:[#allocation8 + $0x820] sm:$0xff] %v3359_v20  ;;  %3872 = vst [vmem:[#allocation8 + $0x828] sm:$0xff] %v3360_v21 }
 0x31b   :  { %v2853_v29 = vand.u32 2147483647, %v5467_v28  ;;  %v2854_v31 = vand.u32 2147483647, %v5468_v30  ;;  %v3363_v32 = vsub.f32 0.0, %v2851_v23  ;;  %v3364_v33 = vsub.f32 0.0, %v2852_v25 }
 0x31c   :  { %v5469_v34 = vld [vmem:[#allocation5 + $0x860] sm:$0xff]  ;;  %v5470_v36 = vld [vmem:[#allocation5 + $0x868] sm:$0xff]  ;;  %3873 = vst [vmem:[#allocation8 + $0x830] sm:$0xff] %v3361_v26  ;;  %3874 = vst [vmem:[#allocation8 + $0x838] sm:$0xff] %v3362_v27 }
 0x31d   :  { %v2855_v35 = vand.u32 2147483647, %v5469_v34  ;;  %v2856_v37 = vand.u32 2147483647, %v5470_v36  ;;  %v3365_v38 = vsub.f32 0.0, %v2853_v29  ;;  %v3366_v39 = vsub.f32 0.0, %v2854_v31 }
 0x31e   :  { %v5471_v40 = vld [vmem:[#allocation5 + $0x870] sm:$0xff]  ;;  %v5472_v42 = vld [vmem:[#allocation5 + $0x878] sm:$0xff]  ;;  %3875 = vst [vmem:[#allocation8 + $0x840] sm:$0xff] %v3363_v32  ;;  %3876 = vst [vmem:[#allocation8 + $0x848] sm:$0xff] %v3364_v33 }
 0x31f   :  { %v2857_v41 = vand.u32 2147483647, %v5471_v40  ;;  %v2858_v43 = vand.u32 2147483647, %v5472_v42  ;;  %v3367_v44 = vsub.f32 0.0, %v2855_v35  ;;  %v3368_v45 = vsub.f32 0.0, %v2856_v37 }
 0x320   :  { %v5473_v46 = vld [vmem:[#allocation5 + $0x880] sm:$0xff]  ;;  %v5474_v48 = vld [vmem:[#allocation5 + $0x888] sm:$0xff]  ;;  %3877 = vst [vmem:[#allocation8 + $0x850] sm:$0xff] %v3365_v38  ;;  %3878 = vst [vmem:[#allocation8 + $0x858] sm:$0xff] %v3366_v39 }
 0x321   :  { %v2859_v47 = vand.u32 2147483647, %v5473_v46  ;;  %v2860_v49 = vand.u32 2147483647, %v5474_v48  ;;  %v3369_v50 = vsub.f32 0.0, %v2857_v41  ;;  %v3370_v51 = vsub.f32 0.0, %v2858_v43 }
 0x322   :  { %v5475_v52 = vld [vmem:[#allocation5 + $0x890] sm:$0xff]  ;;  %v5476_v54 = vld [vmem:[#allocation5 + $0x898] sm:$0xff]  ;;  %3879 = vst [vmem:[#allocation8 + $0x860] sm:$0xff] %v3367_v44  ;;  %3880 = vst [vmem:[#allocation8 + $0x868] sm:$0xff] %v3368_v45 }
 0x323   :  { %v2861_v53 = vand.u32 2147483647, %v5475_v52  ;;  %v2862_v55 = vand.u32 2147483647, %v5476_v54  ;;  %v3371_v56 = vsub.f32 0.0, %v2859_v47  ;;  %v3372_v57 = vsub.f32 0.0, %v2860_v49 }
 0x324   :  { %v5477_v58 = vld [vmem:[#allocation5 + $0x8a0] sm:$0xff]  ;;  %v5478_v60 = vld [vmem:[#allocation5 + $0x8a8] sm:$0xff]  ;;  %3881 = vst [vmem:[#allocation8 + $0x870] sm:$0xff] %v3369_v50  ;;  %3882 = vst [vmem:[#allocation8 + $0x878] sm:$0xff] %v3370_v51 }
 0x325   :  { %v2863_v59 = vand.u32 2147483647, %v5477_v58  ;;  %v2864_v61 = vand.u32 2147483647, %v5478_v60  ;;  %v3373_v62 = vsub.f32 0.0, %v2861_v53  ;;  %v3374_v63 = vsub.f32 0.0, %v2862_v55 }
 0x326   :  { %v5479_v0 = vld [vmem:[#allocation5 + $0x8b0] sm:$0xff]  ;;  %v5480_v2 = vld [vmem:[#allocation5 + $0x8b8] sm:$0xff]  ;;  %3883 = vst [vmem:[#allocation8 + $0x880] sm:$0xff] %v3371_v56  ;;  %3884 = vst [vmem:[#allocation8 + $0x888] sm:$0xff] %v3372_v57 }
 0x327   :  { %v2865_v1 = vand.u32 2147483647, %v5479_v0  ;;  %v2866_v3 = vand.u32 2147483647, %v5480_v2  ;;  %v3375_v4 = vsub.f32 0.0, %v2863_v59  ;;  %v3376_v5 = vsub.f32 0.0, %v2864_v61 }
 0x328   :  { %v5481_v6 = vld [vmem:[#allocation5 + $0x8c0] sm:$0xff]  ;;  %v5482_v8 = vld [vmem:[#allocation5 + $0x8c8] sm:$0xff]  ;;  %3885 = vst [vmem:[#allocation8 + $0x890] sm:$0xff] %v3373_v62  ;;  %3886 = vst [vmem:[#allocation8 + $0x898] sm:$0xff] %v3374_v63 }
 0x329   :  { %v2867_v7 = vand.u32 2147483647, %v5481_v6  ;;  %v2868_v9 = vand.u32 2147483647, %v5482_v8  ;;  %v3377_v10 = vsub.f32 0.0, %v2865_v1  ;;  %v3378_v11 = vsub.f32 0.0, %v2866_v3 }
 0x32a   :  { %v5483_v12 = vld [vmem:[#allocation5 + $0x8d0] sm:$0xff]  ;;  %v5484_v14 = vld [vmem:[#allocation5 + $0x8d8] sm:$0xff]  ;;  %3887 = vst [vmem:[#allocation8 + $0x8a0] sm:$0xff] %v3375_v4  ;;  %3888 = vst [vmem:[#allocation8 + $0x8a8] sm:$0xff] %v3376_v5 }
 0x32b   :  { %v2869_v13 = vand.u32 2147483647, %v5483_v12  ;;  %v2870_v15 = vand.u32 2147483647, %v5484_v14  ;;  %v3379_v16 = vsub.f32 0.0, %v2867_v7  ;;  %v3380_v17 = vsub.f32 0.0, %v2868_v9 }
 0x32c   :  { %v5485_v18 = vld [vmem:[#allocation5 + $0x8e0] sm:$0xff]  ;;  %v5486_v20 = vld [vmem:[#allocation5 + $0x8e8] sm:$0xff]  ;;  %3889 = vst [vmem:[#allocation8 + $0x8b0] sm:$0xff] %v3377_v10  ;;  %3890 = vst [vmem:[#allocation8 + $0x8b8] sm:$0xff] %v3378_v11 }
 0x32d   :  { %v2871_v19 = vand.u32 2147483647, %v5485_v18  ;;  %v2872_v21 = vand.u32 2147483647, %v5486_v20  ;;  %v3381_v22 = vsub.f32 0.0, %v2869_v13  ;;  %v3382_v23 = vsub.f32 0.0, %v2870_v15 }
 0x32e   :  { %v5487_v24 = vld [vmem:[#allocation5 + $0x8f0] sm:$0xff]  ;;  %v5488_v26 = vld [vmem:[#allocation5 + $0x8f8] sm:$0xff]  ;;  %3891 = vst [vmem:[#allocation8 + $0x8c0] sm:$0xff] %v3379_v16  ;;  %3892 = vst [vmem:[#allocation8 + $0x8c8] sm:$0xff] %v3380_v17 }
 0x32f   :  { %v2873_v25 = vand.u32 2147483647, %v5487_v24  ;;  %v2874_v27 = vand.u32 2147483647, %v5488_v26  ;;  %v3383_v28 = vsub.f32 0.0, %v2871_v19  ;;  %v3384_v29 = vsub.f32 0.0, %v2872_v21 }
 0x330   :  { %v5489_v30 = vld [vmem:[#allocation5 + $0x900] sm:$0xff]  ;;  %v5490_v32 = vld [vmem:[#allocation5 + $0x908] sm:$0xff]  ;;  %3893 = vst [vmem:[#allocation8 + $0x8d0] sm:$0xff] %v3381_v22  ;;  %3894 = vst [vmem:[#allocation8 + $0x8d8] sm:$0xff] %v3382_v23 }
 0x331   :  { %v2875_v31 = vand.u32 2147483647, %v5489_v30  ;;  %v2876_v33 = vand.u32 2147483647, %v5490_v32  ;;  %v3385_v34 = vsub.f32 0.0, %v2873_v25  ;;  %v3386_v35 = vsub.f32 0.0, %v2874_v27 }
 0x332   :  { %v5491_v36 = vld [vmem:[#allocation5 + $0x910] sm:$0xff]  ;;  %v5492_v38 = vld [vmem:[#allocation5 + $0x918] sm:$0xff]  ;;  %3895 = vst [vmem:[#allocation8 + $0x8e0] sm:$0xff] %v3383_v28  ;;  %3896 = vst [vmem:[#allocation8 + $0x8e8] sm:$0xff] %v3384_v29 }
 0x333   :  { %v2877_v37 = vand.u32 2147483647, %v5491_v36  ;;  %v2878_v39 = vand.u32 2147483647, %v5492_v38  ;;  %v3387_v40 = vsub.f32 0.0, %v2875_v31  ;;  %v3388_v41 = vsub.f32 0.0, %v2876_v33 }
 0x334   :  { %v5493_v42 = vld [vmem:[#allocation5 + $0x920] sm:$0xff]  ;;  %v5494_v44 = vld [vmem:[#allocation5 + $0x928] sm:$0xff]  ;;  %3897 = vst [vmem:[#allocation8 + $0x8f0] sm:$0xff] %v3385_v34  ;;  %3898 = vst [vmem:[#allocation8 + $0x8f8] sm:$0xff] %v3386_v35 }
 0x335   :  { %v2879_v43 = vand.u32 2147483647, %v5493_v42  ;;  %v2880_v45 = vand.u32 2147483647, %v5494_v44  ;;  %v3389_v46 = vsub.f32 0.0, %v2877_v37  ;;  %v3390_v47 = vsub.f32 0.0, %v2878_v39 }
 0x336   :  { %v5495_v48 = vld [vmem:[#allocation5 + $0x930] sm:$0xff]  ;;  %v5496_v50 = vld [vmem:[#allocation5 + $0x938] sm:$0xff]  ;;  %3899 = vst [vmem:[#allocation8 + $0x900] sm:$0xff] %v3387_v40  ;;  %3900 = vst [vmem:[#allocation8 + $0x908] sm:$0xff] %v3388_v41 }
 0x337   :  { %v2881_v49 = vand.u32 2147483647, %v5495_v48  ;;  %v2882_v51 = vand.u32 2147483647, %v5496_v50  ;;  %v3391_v52 = vsub.f32 0.0, %v2879_v43  ;;  %v3392_v53 = vsub.f32 0.0, %v2880_v45 }
 0x338   :  { %v5497_v54 = vld [vmem:[#allocation5 + $0x940] sm:$0xff]  ;;  %v5498_v56 = vld [vmem:[#allocation5 + $0x948] sm:$0xff]  ;;  %3901 = vst [vmem:[#allocation8 + $0x910] sm:$0xff] %v3389_v46  ;;  %3902 = vst [vmem:[#allocation8 + $0x918] sm:$0xff] %v3390_v47 }
 0x339   :  { %v2883_v55 = vand.u32 2147483647, %v5497_v54  ;;  %v2884_v57 = vand.u32 2147483647, %v5498_v56  ;;  %v3393_v58 = vsub.f32 0.0, %v2881_v49  ;;  %v3394_v59 = vsub.f32 0.0, %v2882_v51 }
 0x33a   :  { %v5499_v60 = vld [vmem:[#allocation5 + $0x950] sm:$0xff]  ;;  %v5500_v62 = vld [vmem:[#allocation5 + $0x958] sm:$0xff]  ;;  %3903 = vst [vmem:[#allocation8 + $0x920] sm:$0xff] %v3391_v52  ;;  %3904 = vst [vmem:[#allocation8 + $0x928] sm:$0xff] %v3392_v53 }
 0x33b   :  { %v2885_v61 = vand.u32 2147483647, %v5499_v60  ;;  %v2886_v63 = vand.u32 2147483647, %v5500_v62  ;;  %v3395_v0 = vsub.f32 0.0, %v2883_v55  ;;  %v3396_v1 = vsub.f32 0.0, %v2884_v57 }
 0x33c   :  { %v5501_v2 = vld [vmem:[#allocation5 + $0x960] sm:$0xff]  ;;  %v5502_v4 = vld [vmem:[#allocation5 + $0x968] sm:$0xff]  ;;  %3905 = vst [vmem:[#allocation8 + $0x930] sm:$0xff] %v3393_v58  ;;  %3906 = vst [vmem:[#allocation8 + $0x938] sm:$0xff] %v3394_v59 }
 0x33d   :  { %v2887_v3 = vand.u32 2147483647, %v5501_v2  ;;  %v2888_v5 = vand.u32 2147483647, %v5502_v4  ;;  %v3397_v6 = vsub.f32 0.0, %v2885_v61  ;;  %v3398_v7 = vsub.f32 0.0, %v2886_v63 }
 0x33e   :  { %v5503_v8 = vld [vmem:[#allocation5 + $0x970] sm:$0xff]  ;;  %v5504_v10 = vld [vmem:[#allocation5 + $0x978] sm:$0xff]  ;;  %3907 = vst [vmem:[#allocation8 + $0x940] sm:$0xff] %v3395_v0  ;;  %3908 = vst [vmem:[#allocation8 + $0x948] sm:$0xff] %v3396_v1 }
 0x33f   :  { %v2889_v9 = vand.u32 2147483647, %v5503_v8  ;;  %v2890_v11 = vand.u32 2147483647, %v5504_v10  ;;  %v3399_v12 = vsub.f32 0.0, %v2887_v3  ;;  %v3400_v13 = vsub.f32 0.0, %v2888_v5 }
 0x340   :  { %v5505_v14 = vld [vmem:[#allocation5 + $0x980] sm:$0xff]  ;;  %v5506_v16 = vld [vmem:[#allocation5 + $0x988] sm:$0xff]  ;;  %3909 = vst [vmem:[#allocation8 + $0x950] sm:$0xff] %v3397_v6  ;;  %3910 = vst [vmem:[#allocation8 + $0x958] sm:$0xff] %v3398_v7 }
 0x341   :  { %v2891_v15 = vand.u32 2147483647, %v5505_v14  ;;  %v2892_v17 = vand.u32 2147483647, %v5506_v16  ;;  %v3401_v18 = vsub.f32 0.0, %v2889_v9  ;;  %v3402_v19 = vsub.f32 0.0, %v2890_v11 }
 0x342   :  { %v5507_v20 = vld [vmem:[#allocation5 + $0x990] sm:$0xff]  ;;  %v5508_v22 = vld [vmem:[#allocation5 + $0x998] sm:$0xff]  ;;  %3911 = vst [vmem:[#allocation8 + $0x960] sm:$0xff] %v3399_v12  ;;  %3912 = vst [vmem:[#allocation8 + $0x968] sm:$0xff] %v3400_v13 }
 0x343   :  { %v2893_v21 = vand.u32 2147483647, %v5507_v20  ;;  %v2894_v23 = vand.u32 2147483647, %v5508_v22  ;;  %v3403_v24 = vsub.f32 0.0, %v2891_v15  ;;  %v3404_v25 = vsub.f32 0.0, %v2892_v17 }
 0x344   :  { %v5509_v26 = vld [vmem:[#allocation5 + $0x9a0] sm:$0xff]  ;;  %v5510_v28 = vld [vmem:[#allocation5 + $0x9a8] sm:$0xff]  ;;  %3913 = vst [vmem:[#allocation8 + $0x970] sm:$0xff] %v3401_v18  ;;  %3914 = vst [vmem:[#allocation8 + $0x978] sm:$0xff] %v3402_v19 }
 0x345   :  { %v2895_v27 = vand.u32 2147483647, %v5509_v26  ;;  %v2896_v29 = vand.u32 2147483647, %v5510_v28  ;;  %v3405_v30 = vsub.f32 0.0, %v2893_v21  ;;  %v3406_v31 = vsub.f32 0.0, %v2894_v23 }
 0x346   :  { %v5511_v32 = vld [vmem:[#allocation5 + $0x9b0] sm:$0xff]  ;;  %v5512_v34 = vld [vmem:[#allocation5 + $0x9b8] sm:$0xff]  ;;  %3915 = vst [vmem:[#allocation8 + $0x980] sm:$0xff] %v3403_v24  ;;  %3916 = vst [vmem:[#allocation8 + $0x988] sm:$0xff] %v3404_v25 }
 0x347   :  { %v2897_v33 = vand.u32 2147483647, %v5511_v32  ;;  %v2898_v35 = vand.u32 2147483647, %v5512_v34  ;;  %v3407_v36 = vsub.f32 0.0, %v2895_v27  ;;  %v3408_v37 = vsub.f32 0.0, %v2896_v29 }
 0x348   :  { %v5513_v38 = vld [vmem:[#allocation5 + $0x9c0] sm:$0xff]  ;;  %v5514_v40 = vld [vmem:[#allocation5 + $0x9c8] sm:$0xff]  ;;  %3917 = vst [vmem:[#allocation8 + $0x990] sm:$0xff] %v3405_v30  ;;  %3918 = vst [vmem:[#allocation8 + $0x998] sm:$0xff] %v3406_v31 }
 0x349   :  { %v2899_v39 = vand.u32 2147483647, %v5513_v38  ;;  %v2900_v41 = vand.u32 2147483647, %v5514_v40  ;;  %v3409_v42 = vsub.f32 0.0, %v2897_v33  ;;  %v3410_v43 = vsub.f32 0.0, %v2898_v35 }
 0x34a   :  { %v5515_v44 = vld [vmem:[#allocation5 + $0x9d0] sm:$0xff]  ;;  %v5516_v46 = vld [vmem:[#allocation5 + $0x9d8] sm:$0xff]  ;;  %3919 = vst [vmem:[#allocation8 + $0x9a0] sm:$0xff] %v3407_v36  ;;  %3920 = vst [vmem:[#allocation8 + $0x9a8] sm:$0xff] %v3408_v37 }
 0x34b   :  { %v2901_v45 = vand.u32 2147483647, %v5515_v44  ;;  %v2902_v47 = vand.u32 2147483647, %v5516_v46  ;;  %v3411_v48 = vsub.f32 0.0, %v2899_v39  ;;  %v3412_v49 = vsub.f32 0.0, %v2900_v41 }
 0x34c   :  { %v5517_v50 = vld [vmem:[#allocation5 + $0x9e0] sm:$0xff]  ;;  %v5518_v52 = vld [vmem:[#allocation5 + $0x9e8] sm:$0xff]  ;;  %3921 = vst [vmem:[#allocation8 + $0x9b0] sm:$0xff] %v3409_v42  ;;  %3922 = vst [vmem:[#allocation8 + $0x9b8] sm:$0xff] %v3410_v43 }
 0x34d   :  { %v2903_v51 = vand.u32 2147483647, %v5517_v50  ;;  %v2904_v53 = vand.u32 2147483647, %v5518_v52  ;;  %v3413_v54 = vsub.f32 0.0, %v2901_v45  ;;  %v3414_v55 = vsub.f32 0.0, %v2902_v47 }
 0x34e   :  { %v5519_v56 = vld [vmem:[#allocation5 + $0x9f0] sm:$0xff]  ;;  %v5520_v58 = vld [vmem:[#allocation5 + $0x9f8] sm:$0xff]  ;;  %3923 = vst [vmem:[#allocation8 + $0x9c0] sm:$0xff] %v3411_v48  ;;  %3924 = vst [vmem:[#allocation8 + $0x9c8] sm:$0xff] %v3412_v49 }
 0x34f   :  { %v2905_v57 = vand.u32 2147483647, %v5519_v56  ;;  %v2906_v59 = vand.u32 2147483647, %v5520_v58  ;;  %v3415_v60 = vsub.f32 0.0, %v2903_v51  ;;  %v3416_v61 = vsub.f32 0.0, %v2904_v53 }
 0x350   :  { %v5521_v62 = vld [vmem:[#allocation5 + $0xa00] sm:$0xff]  ;;  %v5522_v0 = vld [vmem:[#allocation5 + $0xa08] sm:$0xff]  ;;  %3925 = vst [vmem:[#allocation8 + $0x9d0] sm:$0xff] %v3413_v54  ;;  %3926 = vst [vmem:[#allocation8 + $0x9d8] sm:$0xff] %v3414_v55 }
 0x351   :  { %v2907_v63 = vand.u32 2147483647, %v5521_v62  ;;  %v2908_v1 = vand.u32 2147483647, %v5522_v0  ;;  %v3417_v2 = vsub.f32 0.0, %v2905_v57  ;;  %v3418_v3 = vsub.f32 0.0, %v2906_v59 }
 0x352   :  { %v5523_v4 = vld [vmem:[#allocation5 + $0xa10] sm:$0xff]  ;;  %v5524_v6 = vld [vmem:[#allocation5 + $0xa18] sm:$0xff]  ;;  %3927 = vst [vmem:[#allocation8 + $0x9e0] sm:$0xff] %v3415_v60  ;;  %3928 = vst [vmem:[#allocation8 + $0x9e8] sm:$0xff] %v3416_v61 }
 0x353   :  { %v2909_v5 = vand.u32 2147483647, %v5523_v4  ;;  %v2910_v7 = vand.u32 2147483647, %v5524_v6  ;;  %v3419_v8 = vsub.f32 0.0, %v2907_v63  ;;  %v3420_v9 = vsub.f32 0.0, %v2908_v1 }
 0x354   :  { %v5525_v10 = vld [vmem:[#allocation5 + $0xa20] sm:$0xff]  ;;  %v5526_v12 = vld [vmem:[#allocation5 + $0xa28] sm:$0xff]  ;;  %3929 = vst [vmem:[#allocation8 + $0x9f0] sm:$0xff] %v3417_v2  ;;  %3930 = vst [vmem:[#allocation8 + $0x9f8] sm:$0xff] %v3418_v3 }
 0x355   :  { %v2911_v11 = vand.u32 2147483647, %v5525_v10  ;;  %v2912_v13 = vand.u32 2147483647, %v5526_v12  ;;  %v3421_v14 = vsub.f32 0.0, %v2909_v5  ;;  %v3422_v15 = vsub.f32 0.0, %v2910_v7 }
 0x356   :  { %v5527_v16 = vld [vmem:[#allocation5 + $0xa30] sm:$0xff]  ;;  %v5528_v18 = vld [vmem:[#allocation5 + $0xa38] sm:$0xff]  ;;  %3931 = vst [vmem:[#allocation8 + $0xa00] sm:$0xff] %v3419_v8  ;;  %3932 = vst [vmem:[#allocation8 + $0xa08] sm:$0xff] %v3420_v9 }
 0x357   :  { %v2913_v17 = vand.u32 2147483647, %v5527_v16  ;;  %v2914_v19 = vand.u32 2147483647, %v5528_v18  ;;  %v3423_v20 = vsub.f32 0.0, %v2911_v11  ;;  %v3424_v21 = vsub.f32 0.0, %v2912_v13 }
 0x358   :  { %v5529_v22 = vld [vmem:[#allocation5 + $0xa40] sm:$0xff]  ;;  %v5530_v24 = vld [vmem:[#allocation5 + $0xa48] sm:$0xff]  ;;  %3933 = vst [vmem:[#allocation8 + $0xa10] sm:$0xff] %v3421_v14  ;;  %3934 = vst [vmem:[#allocation8 + $0xa18] sm:$0xff] %v3422_v15 }
 0x359   :  { %v2915_v23 = vand.u32 2147483647, %v5529_v22  ;;  %v2916_v25 = vand.u32 2147483647, %v5530_v24  ;;  %v3425_v26 = vsub.f32 0.0, %v2913_v17  ;;  %v3426_v27 = vsub.f32 0.0, %v2914_v19 }
 0x35a   :  { %v5531_v28 = vld [vmem:[#allocation5 + $0xa50] sm:$0xff]  ;;  %v5532_v30 = vld [vmem:[#allocation5 + $0xa58] sm:$0xff]  ;;  %3935 = vst [vmem:[#allocation8 + $0xa20] sm:$0xff] %v3423_v20  ;;  %3936 = vst [vmem:[#allocation8 + $0xa28] sm:$0xff] %v3424_v21 }
 0x35b   :  { %v2917_v29 = vand.u32 2147483647, %v5531_v28  ;;  %v2918_v31 = vand.u32 2147483647, %v5532_v30  ;;  %v3427_v32 = vsub.f32 0.0, %v2915_v23  ;;  %v3428_v33 = vsub.f32 0.0, %v2916_v25 }
 0x35c   :  { %v5533_v34 = vld [vmem:[#allocation5 + $0xa60] sm:$0xff]  ;;  %v5534_v36 = vld [vmem:[#allocation5 + $0xa68] sm:$0xff]  ;;  %3937 = vst [vmem:[#allocation8 + $0xa30] sm:$0xff] %v3425_v26  ;;  %3938 = vst [vmem:[#allocation8 + $0xa38] sm:$0xff] %v3426_v27 }
 0x35d   :  { %v2919_v35 = vand.u32 2147483647, %v5533_v34  ;;  %v2920_v37 = vand.u32 2147483647, %v5534_v36  ;;  %v3429_v38 = vsub.f32 0.0, %v2917_v29  ;;  %v3430_v39 = vsub.f32 0.0, %v2918_v31 }
 0x35e   :  { %v5535_v40 = vld [vmem:[#allocation5 + $0xa70] sm:$0xff]  ;;  %v5536_v42 = vld [vmem:[#allocation5 + $0xa78] sm:$0xff]  ;;  %3939 = vst [vmem:[#allocation8 + $0xa40] sm:$0xff] %v3427_v32  ;;  %3940 = vst [vmem:[#allocation8 + $0xa48] sm:$0xff] %v3428_v33 }
 0x35f   :  { %v2921_v41 = vand.u32 2147483647, %v5535_v40  ;;  %v2922_v43 = vand.u32 2147483647, %v5536_v42  ;;  %v3431_v44 = vsub.f32 0.0, %v2919_v35  ;;  %v3432_v45 = vsub.f32 0.0, %v2920_v37 }
 0x360   :  { %v5537_v46 = vld [vmem:[#allocation5 + $0xa80] sm:$0xff]  ;;  %v5538_v48 = vld [vmem:[#allocation5 + $0xa88] sm:$0xff]  ;;  %3941 = vst [vmem:[#allocation8 + $0xa50] sm:$0xff] %v3429_v38  ;;  %3942 = vst [vmem:[#allocation8 + $0xa58] sm:$0xff] %v3430_v39 }
 0x361   :  { %v2923_v47 = vand.u32 2147483647, %v5537_v46  ;;  %v2924_v49 = vand.u32 2147483647, %v5538_v48  ;;  %v3433_v50 = vsub.f32 0.0, %v2921_v41  ;;  %v3434_v51 = vsub.f32 0.0, %v2922_v43 }
 0x362   :  { %v5539_v52 = vld [vmem:[#allocation5 + $0xa90] sm:$0xff]  ;;  %v5540_v54 = vld [vmem:[#allocation5 + $0xa98] sm:$0xff]  ;;  %3943 = vst [vmem:[#allocation8 + $0xa60] sm:$0xff] %v3431_v44  ;;  %3944 = vst [vmem:[#allocation8 + $0xa68] sm:$0xff] %v3432_v45 }
 0x363   :  { %v2925_v53 = vand.u32 2147483647, %v5539_v52  ;;  %v2926_v55 = vand.u32 2147483647, %v5540_v54  ;;  %v3435_v56 = vsub.f32 0.0, %v2923_v47  ;;  %v3436_v57 = vsub.f32 0.0, %v2924_v49 }
 0x364   :  { %v5541_v58 = vld [vmem:[#allocation5 + $0xaa0] sm:$0xff]  ;;  %v5542_v60 = vld [vmem:[#allocation5 + $0xaa8] sm:$0xff]  ;;  %3945 = vst [vmem:[#allocation8 + $0xa70] sm:$0xff] %v3433_v50  ;;  %3946 = vst [vmem:[#allocation8 + $0xa78] sm:$0xff] %v3434_v51 }
 0x365   :  { %v2927_v59 = vand.u32 2147483647, %v5541_v58  ;;  %v2928_v61 = vand.u32 2147483647, %v5542_v60  ;;  %v3437_v62 = vsub.f32 0.0, %v2925_v53  ;;  %v3438_v63 = vsub.f32 0.0, %v2926_v55 }
 0x366   :  { %v5543_v0 = vld [vmem:[#allocation5 + $0xab0] sm:$0xff]  ;;  %v5544_v2 = vld [vmem:[#allocation5 + $0xab8] sm:$0xff]  ;;  %3947 = vst [vmem:[#allocation8 + $0xa80] sm:$0xff] %v3435_v56  ;;  %3948 = vst [vmem:[#allocation8 + $0xa88] sm:$0xff] %v3436_v57 }
 0x367   :  { %v2929_v1 = vand.u32 2147483647, %v5543_v0  ;;  %v2930_v3 = vand.u32 2147483647, %v5544_v2  ;;  %v3439_v4 = vsub.f32 0.0, %v2927_v59  ;;  %v3440_v5 = vsub.f32 0.0, %v2928_v61 }
 0x368   :  { %v5545_v6 = vld [vmem:[#allocation5 + $0xac0] sm:$0xff]  ;;  %v5546_v8 = vld [vmem:[#allocation5 + $0xac8] sm:$0xff]  ;;  %3949 = vst [vmem:[#allocation8 + $0xa90] sm:$0xff] %v3437_v62  ;;  %3950 = vst [vmem:[#allocation8 + $0xa98] sm:$0xff] %v3438_v63 }
 0x369   :  { %v2931_v7 = vand.u32 2147483647, %v5545_v6  ;;  %v2932_v9 = vand.u32 2147483647, %v5546_v8  ;;  %v3441_v10 = vsub.f32 0.0, %v2929_v1  ;;  %v3442_v11 = vsub.f32 0.0, %v2930_v3 }
 0x36a   :  { %v5547_v12 = vld [vmem:[#allocation5 + $0xad0] sm:$0xff]  ;;  %v5548_v14 = vld [vmem:[#allocation5 + $0xad8] sm:$0xff]  ;;  %3951 = vst [vmem:[#allocation8 + $0xaa0] sm:$0xff] %v3439_v4  ;;  %3952 = vst [vmem:[#allocation8 + $0xaa8] sm:$0xff] %v3440_v5 }
 0x36b   :  { %v2933_v13 = vand.u32 2147483647, %v5547_v12  ;;  %v2934_v15 = vand.u32 2147483647, %v5548_v14  ;;  %v3443_v16 = vsub.f32 0.0, %v2931_v7  ;;  %v3444_v17 = vsub.f32 0.0, %v2932_v9 }
 0x36c   :  { %v5549_v18 = vld [vmem:[#allocation5 + $0xae0] sm:$0xff]  ;;  %v5550_v20 = vld [vmem:[#allocation5 + $0xae8] sm:$0xff]  ;;  %3953 = vst [vmem:[#allocation8 + $0xab0] sm:$0xff] %v3441_v10  ;;  %3954 = vst [vmem:[#allocation8 + $0xab8] sm:$0xff] %v3442_v11 }
 0x36d   :  { %v2935_v19 = vand.u32 2147483647, %v5549_v18  ;;  %v2936_v21 = vand.u32 2147483647, %v5550_v20  ;;  %v3445_v22 = vsub.f32 0.0, %v2933_v13  ;;  %v3446_v23 = vsub.f32 0.0, %v2934_v15 }
 0x36e   :  { %v5551_v24 = vld [vmem:[#allocation5 + $0xaf0] sm:$0xff]  ;;  %v5552_v26 = vld [vmem:[#allocation5 + $0xaf8] sm:$0xff]  ;;  %3955 = vst [vmem:[#allocation8 + $0xac0] sm:$0xff] %v3443_v16  ;;  %3956 = vst [vmem:[#allocation8 + $0xac8] sm:$0xff] %v3444_v17 }
 0x36f   :  { %v2937_v25 = vand.u32 2147483647, %v5551_v24  ;;  %v2938_v27 = vand.u32 2147483647, %v5552_v26  ;;  %v3447_v28 = vsub.f32 0.0, %v2935_v19  ;;  %v3448_v29 = vsub.f32 0.0, %v2936_v21 }
 0x370   :  { %v5553_v30 = vld [vmem:[#allocation5 + $0xb00] sm:$0xff]  ;;  %v5554_v32 = vld [vmem:[#allocation5 + $0xb08] sm:$0xff]  ;;  %3957 = vst [vmem:[#allocation8 + $0xad0] sm:$0xff] %v3445_v22  ;;  %3958 = vst [vmem:[#allocation8 + $0xad8] sm:$0xff] %v3446_v23 }
 0x371   :  { %v2939_v31 = vand.u32 2147483647, %v5553_v30  ;;  %v2940_v33 = vand.u32 2147483647, %v5554_v32  ;;  %v3449_v34 = vsub.f32 0.0, %v2937_v25  ;;  %v3450_v35 = vsub.f32 0.0, %v2938_v27 }
 0x372   :  { %v5555_v36 = vld [vmem:[#allocation5 + $0xb10] sm:$0xff]  ;;  %v5556_v38 = vld [vmem:[#allocation5 + $0xb18] sm:$0xff]  ;;  %3959 = vst [vmem:[#allocation8 + $0xae0] sm:$0xff] %v3447_v28  ;;  %3960 = vst [vmem:[#allocation8 + $0xae8] sm:$0xff] %v3448_v29 }
 0x373   :  { %v2941_v37 = vand.u32 2147483647, %v5555_v36  ;;  %v2942_v39 = vand.u32 2147483647, %v5556_v38  ;;  %v3451_v40 = vsub.f32 0.0, %v2939_v31  ;;  %v3452_v41 = vsub.f32 0.0, %v2940_v33 }
 0x374   :  { %v5557_v42 = vld [vmem:[#allocation5 + $0xb20] sm:$0xff]  ;;  %v5558_v44 = vld [vmem:[#allocation5 + $0xb28] sm:$0xff]  ;;  %3961 = vst [vmem:[#allocation8 + $0xaf0] sm:$0xff] %v3449_v34  ;;  %3962 = vst [vmem:[#allocation8 + $0xaf8] sm:$0xff] %v3450_v35 }
 0x375   :  { %v2943_v43 = vand.u32 2147483647, %v5557_v42  ;;  %v2944_v45 = vand.u32 2147483647, %v5558_v44  ;;  %v3453_v46 = vsub.f32 0.0, %v2941_v37  ;;  %v3454_v47 = vsub.f32 0.0, %v2942_v39 }
 0x376   :  { %v5559_v48 = vld [vmem:[#allocation5 + $0xb30] sm:$0xff]  ;;  %v5560_v50 = vld [vmem:[#allocation5 + $0xb38] sm:$0xff]  ;;  %3963 = vst [vmem:[#allocation8 + $0xb00] sm:$0xff] %v3451_v40  ;;  %3964 = vst [vmem:[#allocation8 + $0xb08] sm:$0xff] %v3452_v41 }
 0x377   :  { %v2945_v49 = vand.u32 2147483647, %v5559_v48  ;;  %v2946_v51 = vand.u32 2147483647, %v5560_v50  ;;  %v3455_v52 = vsub.f32 0.0, %v2943_v43  ;;  %v3456_v53 = vsub.f32 0.0, %v2944_v45 }
 0x378   :  { %v5561_v54 = vld [vmem:[#allocation5 + $0xb40] sm:$0xff]  ;;  %v5562_v56 = vld [vmem:[#allocation5 + $0xb48] sm:$0xff]  ;;  %3965 = vst [vmem:[#allocation8 + $0xb10] sm:$0xff] %v3453_v46  ;;  %3966 = vst [vmem:[#allocation8 + $0xb18] sm:$0xff] %v3454_v47 }
 0x379   :  { %v2947_v55 = vand.u32 2147483647, %v5561_v54  ;;  %v2948_v57 = vand.u32 2147483647, %v5562_v56  ;;  %v3457_v58 = vsub.f32 0.0, %v2945_v49  ;;  %v3458_v59 = vsub.f32 0.0, %v2946_v51 }
 0x37a   :  { %v5563_v60 = vld [vmem:[#allocation5 + $0xb50] sm:$0xff]  ;;  %v5564_v62 = vld [vmem:[#allocation5 + $0xb58] sm:$0xff]  ;;  %3967 = vst [vmem:[#allocation8 + $0xb20] sm:$0xff] %v3455_v52  ;;  %3968 = vst [vmem:[#allocation8 + $0xb28] sm:$0xff] %v3456_v53 }
 0x37b   :  { %v2949_v61 = vand.u32 2147483647, %v5563_v60  ;;  %v2950_v63 = vand.u32 2147483647, %v5564_v62  ;;  %v3459_v0 = vsub.f32 0.0, %v2947_v55  ;;  %v3460_v1 = vsub.f32 0.0, %v2948_v57 }
 0x37c   :  { %v5565_v2 = vld [vmem:[#allocation5 + $0xb60] sm:$0xff]  ;;  %v5566_v4 = vld [vmem:[#allocation5 + $0xb68] sm:$0xff]  ;;  %3969 = vst [vmem:[#allocation8 + $0xb30] sm:$0xff] %v3457_v58  ;;  %3970 = vst [vmem:[#allocation8 + $0xb38] sm:$0xff] %v3458_v59 }
 0x37d   :  { %v2951_v3 = vand.u32 2147483647, %v5565_v2  ;;  %v2952_v5 = vand.u32 2147483647, %v5566_v4  ;;  %v3461_v6 = vsub.f32 0.0, %v2949_v61  ;;  %v3462_v7 = vsub.f32 0.0, %v2950_v63 }
 0x37e   :  { %v5567_v8 = vld [vmem:[#allocation5 + $0xb70] sm:$0xff]  ;;  %v5568_v10 = vld [vmem:[#allocation5 + $0xb78] sm:$0xff]  ;;  %3971 = vst [vmem:[#allocation8 + $0xb40] sm:$0xff] %v3459_v0  ;;  %3972 = vst [vmem:[#allocation8 + $0xb48] sm:$0xff] %v3460_v1 }
 0x37f   :  { %v2953_v9 = vand.u32 2147483647, %v5567_v8  ;;  %v2954_v11 = vand.u32 2147483647, %v5568_v10  ;;  %v3463_v12 = vsub.f32 0.0, %v2951_v3  ;;  %v3464_v13 = vsub.f32 0.0, %v2952_v5 }
 0x380   :  { %v5569_v14 = vld [vmem:[#allocation5 + $0xb80] sm:$0xff]  ;;  %v5570_v16 = vld [vmem:[#allocation5 + $0xb88] sm:$0xff]  ;;  %3973 = vst [vmem:[#allocation8 + $0xb50] sm:$0xff] %v3461_v6  ;;  %3974 = vst [vmem:[#allocation8 + $0xb58] sm:$0xff] %v3462_v7 }
 0x381   :  { %v2955_v15 = vand.u32 2147483647, %v5569_v14  ;;  %v2956_v17 = vand.u32 2147483647, %v5570_v16  ;;  %v3465_v18 = vsub.f32 0.0, %v2953_v9  ;;  %v3466_v19 = vsub.f32 0.0, %v2954_v11 }
 0x382   :  { %v5571_v20 = vld [vmem:[#allocation5 + $0xb90] sm:$0xff]  ;;  %v5572_v22 = vld [vmem:[#allocation5 + $0xb98] sm:$0xff]  ;;  %3975 = vst [vmem:[#allocation8 + $0xb60] sm:$0xff] %v3463_v12  ;;  %3976 = vst [vmem:[#allocation8 + $0xb68] sm:$0xff] %v3464_v13 }
 0x383   :  { %v2957_v21 = vand.u32 2147483647, %v5571_v20  ;;  %v2958_v23 = vand.u32 2147483647, %v5572_v22  ;;  %v3467_v24 = vsub.f32 0.0, %v2955_v15  ;;  %v3468_v25 = vsub.f32 0.0, %v2956_v17 }
 0x384   :  { %v5573_v26 = vld [vmem:[#allocation5 + $0xba0] sm:$0xff]  ;;  %v5574_v28 = vld [vmem:[#allocation5 + $0xba8] sm:$0xff]  ;;  %3977 = vst [vmem:[#allocation8 + $0xb70] sm:$0xff] %v3465_v18  ;;  %3978 = vst [vmem:[#allocation8 + $0xb78] sm:$0xff] %v3466_v19 }
 0x385   :  { %v2959_v27 = vand.u32 2147483647, %v5573_v26  ;;  %v2960_v29 = vand.u32 2147483647, %v5574_v28  ;;  %v3469_v30 = vsub.f32 0.0, %v2957_v21  ;;  %v3470_v31 = vsub.f32 0.0, %v2958_v23 }
 0x386   :  { %v5575_v32 = vld [vmem:[#allocation5 + $0xbb0] sm:$0xff]  ;;  %v5576_v34 = vld [vmem:[#allocation5 + $0xbb8] sm:$0xff]  ;;  %3979 = vst [vmem:[#allocation8 + $0xb80] sm:$0xff] %v3467_v24  ;;  %3980 = vst [vmem:[#allocation8 + $0xb88] sm:$0xff] %v3468_v25 }
 0x387   :  { %v2961_v33 = vand.u32 2147483647, %v5575_v32  ;;  %v2962_v35 = vand.u32 2147483647, %v5576_v34  ;;  %v3471_v36 = vsub.f32 0.0, %v2959_v27  ;;  %v3472_v37 = vsub.f32 0.0, %v2960_v29 }
 0x388   :  { %v5577_v38 = vld [vmem:[#allocation5 + $0xbc0] sm:$0xff]  ;;  %v5578_v40 = vld [vmem:[#allocation5 + $0xbc8] sm:$0xff]  ;;  %3981 = vst [vmem:[#allocation8 + $0xb90] sm:$0xff] %v3469_v30  ;;  %3982 = vst [vmem:[#allocation8 + $0xb98] sm:$0xff] %v3470_v31 }
 0x389   :  { %v2963_v39 = vand.u32 2147483647, %v5577_v38  ;;  %v2964_v41 = vand.u32 2147483647, %v5578_v40  ;;  %v3473_v42 = vsub.f32 0.0, %v2961_v33  ;;  %v3474_v43 = vsub.f32 0.0, %v2962_v35 }
 0x38a   :  { %v5579_v44 = vld [vmem:[#allocation5 + $0xbd0] sm:$0xff]  ;;  %v5580_v46 = vld [vmem:[#allocation5 + $0xbd8] sm:$0xff]  ;;  %3983 = vst [vmem:[#allocation8 + $0xba0] sm:$0xff] %v3471_v36  ;;  %3984 = vst [vmem:[#allocation8 + $0xba8] sm:$0xff] %v3472_v37 }
 0x38b   :  { %v2965_v45 = vand.u32 2147483647, %v5579_v44  ;;  %v2966_v47 = vand.u32 2147483647, %v5580_v46  ;;  %v3475_v48 = vsub.f32 0.0, %v2963_v39  ;;  %v3476_v49 = vsub.f32 0.0, %v2964_v41 }
 0x38c   :  { %v5581_v50 = vld [vmem:[#allocation5 + $0xbe0] sm:$0xff]  ;;  %v5582_v52 = vld [vmem:[#allocation5 + $0xbe8] sm:$0xff]  ;;  %3985 = vst [vmem:[#allocation8 + $0xbb0] sm:$0xff] %v3473_v42  ;;  %3986 = vst [vmem:[#allocation8 + $0xbb8] sm:$0xff] %v3474_v43 }
 0x38d   :  { %v2967_v51 = vand.u32 2147483647, %v5581_v50  ;;  %v2968_v53 = vand.u32 2147483647, %v5582_v52  ;;  %v3477_v54 = vsub.f32 0.0, %v2965_v45  ;;  %v3478_v55 = vsub.f32 0.0, %v2966_v47 }
 0x38e   :  { %v5583_v56 = vld [vmem:[#allocation5 + $0xbf0] sm:$0xff]  ;;  %v5584_v58 = vld [vmem:[#allocation5 + $0xbf8] sm:$0xff]  ;;  %3987 = vst [vmem:[#allocation8 + $0xbc0] sm:$0xff] %v3475_v48  ;;  %3988 = vst [vmem:[#allocation8 + $0xbc8] sm:$0xff] %v3476_v49 }
 0x38f   :  { %v2969_v57 = vand.u32 2147483647, %v5583_v56  ;;  %v2970_v59 = vand.u32 2147483647, %v5584_v58  ;;  %v3479_v60 = vsub.f32 0.0, %v2967_v51  ;;  %v3480_v61 = vsub.f32 0.0, %v2968_v53 }
 0x390   :  { %v5585_v62 = vld [vmem:[#allocation5 + $0xc00] sm:$0xff]  ;;  %v5586_v0 = vld [vmem:[#allocation5 + $0xc08] sm:$0xff]  ;;  %3989 = vst [vmem:[#allocation8 + $0xbd0] sm:$0xff] %v3477_v54  ;;  %3990 = vst [vmem:[#allocation8 + $0xbd8] sm:$0xff] %v3478_v55 }
 0x391   :  { %v2971_v63 = vand.u32 2147483647, %v5585_v62  ;;  %v2972_v1 = vand.u32 2147483647, %v5586_v0  ;;  %v3481_v2 = vsub.f32 0.0, %v2969_v57  ;;  %v3482_v3 = vsub.f32 0.0, %v2970_v59 }
 0x392   :  { %v5587_v4 = vld [vmem:[#allocation5 + $0xc10] sm:$0xff]  ;;  %v5588_v6 = vld [vmem:[#allocation5 + $0xc18] sm:$0xff]  ;;  %3991 = vst [vmem:[#allocation8 + $0xbe0] sm:$0xff] %v3479_v60  ;;  %3992 = vst [vmem:[#allocation8 + $0xbe8] sm:$0xff] %v3480_v61 }
 0x393   :  { %v2973_v5 = vand.u32 2147483647, %v5587_v4  ;;  %v2974_v7 = vand.u32 2147483647, %v5588_v6  ;;  %v3483_v8 = vsub.f32 0.0, %v2971_v63  ;;  %v3484_v9 = vsub.f32 0.0, %v2972_v1 }
 0x394   :  { %v5589_v10 = vld [vmem:[#allocation5 + $0xc20] sm:$0xff]  ;;  %v5590_v12 = vld [vmem:[#allocation5 + $0xc28] sm:$0xff]  ;;  %3993 = vst [vmem:[#allocation8 + $0xbf0] sm:$0xff] %v3481_v2  ;;  %3994 = vst [vmem:[#allocation8 + $0xbf8] sm:$0xff] %v3482_v3 }
 0x395   :  { %v2975_v11 = vand.u32 2147483647, %v5589_v10  ;;  %v2976_v13 = vand.u32 2147483647, %v5590_v12  ;;  %v3485_v14 = vsub.f32 0.0, %v2973_v5  ;;  %v3486_v15 = vsub.f32 0.0, %v2974_v7 }
 0x396   :  { %v5591_v16 = vld [vmem:[#allocation5 + $0xc30] sm:$0xff]  ;;  %v5592_v18 = vld [vmem:[#allocation5 + $0xc38] sm:$0xff]  ;;  %3995 = vst [vmem:[#allocation8 + $0xc00] sm:$0xff] %v3483_v8  ;;  %3996 = vst [vmem:[#allocation8 + $0xc08] sm:$0xff] %v3484_v9 }
 0x397   :  { %v2977_v17 = vand.u32 2147483647, %v5591_v16  ;;  %v2978_v19 = vand.u32 2147483647, %v5592_v18  ;;  %v3487_v20 = vsub.f32 0.0, %v2975_v11  ;;  %v3488_v21 = vsub.f32 0.0, %v2976_v13 }
 0x398   :  { %v5593_v22 = vld [vmem:[#allocation5 + $0xc40] sm:$0xff]  ;;  %v5594_v24 = vld [vmem:[#allocation5 + $0xc48] sm:$0xff]  ;;  %3997 = vst [vmem:[#allocation8 + $0xc10] sm:$0xff] %v3485_v14  ;;  %3998 = vst [vmem:[#allocation8 + $0xc18] sm:$0xff] %v3486_v15 }
 0x399   :  { %v2979_v23 = vand.u32 2147483647, %v5593_v22  ;;  %v2980_v25 = vand.u32 2147483647, %v5594_v24  ;;  %v3489_v26 = vsub.f32 0.0, %v2977_v17  ;;  %v3490_v27 = vsub.f32 0.0, %v2978_v19 }
 0x39a   :  { %v5595_v28 = vld [vmem:[#allocation5 + $0xc50] sm:$0xff]  ;;  %v5596_v30 = vld [vmem:[#allocation5 + $0xc58] sm:$0xff]  ;;  %3999 = vst [vmem:[#allocation8 + $0xc20] sm:$0xff] %v3487_v20  ;;  %4000 = vst [vmem:[#allocation8 + $0xc28] sm:$0xff] %v3488_v21 }
 0x39b   :  { %v2981_v29 = vand.u32 2147483647, %v5595_v28  ;;  %v2982_v31 = vand.u32 2147483647, %v5596_v30  ;;  %v3491_v32 = vsub.f32 0.0, %v2979_v23  ;;  %v3492_v33 = vsub.f32 0.0, %v2980_v25 }
 0x39c   :  { %v5597_v34 = vld [vmem:[#allocation5 + $0xc60] sm:$0xff]  ;;  %v5598_v36 = vld [vmem:[#allocation5 + $0xc68] sm:$0xff]  ;;  %4001 = vst [vmem:[#allocation8 + $0xc30] sm:$0xff] %v3489_v26  ;;  %4002 = vst [vmem:[#allocation8 + $0xc38] sm:$0xff] %v3490_v27 }
 0x39d   :  { %v2983_v35 = vand.u32 2147483647, %v5597_v34  ;;  %v2984_v37 = vand.u32 2147483647, %v5598_v36  ;;  %v3493_v38 = vsub.f32 0.0, %v2981_v29  ;;  %v3494_v39 = vsub.f32 0.0, %v2982_v31 }
 0x39e   :  { %v5599_v40 = vld [vmem:[#allocation5 + $0xc70] sm:$0xff]  ;;  %v5600_v42 = vld [vmem:[#allocation5 + $0xc78] sm:$0xff]  ;;  %4003 = vst [vmem:[#allocation8 + $0xc40] sm:$0xff] %v3491_v32  ;;  %4004 = vst [vmem:[#allocation8 + $0xc48] sm:$0xff] %v3492_v33 }
 0x39f   :  { %v2985_v41 = vand.u32 2147483647, %v5599_v40  ;;  %v2986_v43 = vand.u32 2147483647, %v5600_v42  ;;  %v3495_v44 = vsub.f32 0.0, %v2983_v35  ;;  %v3496_v45 = vsub.f32 0.0, %v2984_v37 }
 0x3a0   :  { %v5601_v46 = vld [vmem:[#allocation5 + $0xc80] sm:$0xff]  ;;  %v5602_v48 = vld [vmem:[#allocation5 + $0xc88] sm:$0xff]  ;;  %4005 = vst [vmem:[#allocation8 + $0xc50] sm:$0xff] %v3493_v38  ;;  %4006 = vst [vmem:[#allocation8 + $0xc58] sm:$0xff] %v3494_v39 }
 0x3a1   :  { %v2987_v47 = vand.u32 2147483647, %v5601_v46  ;;  %v2988_v49 = vand.u32 2147483647, %v5602_v48  ;;  %v3497_v50 = vsub.f32 0.0, %v2985_v41  ;;  %v3498_v51 = vsub.f32 0.0, %v2986_v43 }
 0x3a2   :  { %v5603_v52 = vld [vmem:[#allocation5 + $0xc90] sm:$0xff]  ;;  %v5604_v54 = vld [vmem:[#allocation5 + $0xc98] sm:$0xff]  ;;  %4007 = vst [vmem:[#allocation8 + $0xc60] sm:$0xff] %v3495_v44  ;;  %4008 = vst [vmem:[#allocation8 + $0xc68] sm:$0xff] %v3496_v45 }
 0x3a3   :  { %v2989_v53 = vand.u32 2147483647, %v5603_v52  ;;  %v2990_v55 = vand.u32 2147483647, %v5604_v54  ;;  %v3499_v56 = vsub.f32 0.0, %v2987_v47  ;;  %v3500_v57 = vsub.f32 0.0, %v2988_v49 }
 0x3a4   :  { %v5605_v58 = vld [vmem:[#allocation5 + $0xca0] sm:$0xff]  ;;  %v5606_v60 = vld [vmem:[#allocation5 + $0xca8] sm:$0xff]  ;;  %4009 = vst [vmem:[#allocation8 + $0xc70] sm:$0xff] %v3497_v50  ;;  %4010 = vst [vmem:[#allocation8 + $0xc78] sm:$0xff] %v3498_v51 }
 0x3a5   :  { %v2991_v59 = vand.u32 2147483647, %v5605_v58  ;;  %v2992_v61 = vand.u32 2147483647, %v5606_v60  ;;  %v3501_v62 = vsub.f32 0.0, %v2989_v53  ;;  %v3502_v63 = vsub.f32 0.0, %v2990_v55 }
 0x3a6   :  { %v5607_v0 = vld [vmem:[#allocation5 + $0xcb0] sm:$0xff]  ;;  %v5608_v2 = vld [vmem:[#allocation5 + $0xcb8] sm:$0xff]  ;;  %4011 = vst [vmem:[#allocation8 + $0xc80] sm:$0xff] %v3499_v56  ;;  %4012 = vst [vmem:[#allocation8 + $0xc88] sm:$0xff] %v3500_v57 }
 0x3a7   :  { %v2993_v1 = vand.u32 2147483647, %v5607_v0  ;;  %v2994_v3 = vand.u32 2147483647, %v5608_v2  ;;  %v3503_v4 = vsub.f32 0.0, %v2991_v59  ;;  %v3504_v5 = vsub.f32 0.0, %v2992_v61 }
 0x3a8   :  { %v5609_v6 = vld [vmem:[#allocation5 + $0xcc0] sm:$0xff]  ;;  %v5610_v8 = vld [vmem:[#allocation5 + $0xcc8] sm:$0xff]  ;;  %4013 = vst [vmem:[#allocation8 + $0xc90] sm:$0xff] %v3501_v62  ;;  %4014 = vst [vmem:[#allocation8 + $0xc98] sm:$0xff] %v3502_v63 }
 0x3a9   :  { %v2995_v7 = vand.u32 2147483647, %v5609_v6  ;;  %v2996_v9 = vand.u32 2147483647, %v5610_v8  ;;  %v3505_v10 = vsub.f32 0.0, %v2993_v1  ;;  %v3506_v11 = vsub.f32 0.0, %v2994_v3 }
 0x3aa   :  { %v5611_v12 = vld [vmem:[#allocation5 + $0xcd0] sm:$0xff]  ;;  %v5612_v14 = vld [vmem:[#allocation5 + $0xcd8] sm:$0xff]  ;;  %4015 = vst [vmem:[#allocation8 + $0xca0] sm:$0xff] %v3503_v4  ;;  %4016 = vst [vmem:[#allocation8 + $0xca8] sm:$0xff] %v3504_v5 }
 0x3ab   :  { %v2997_v13 = vand.u32 2147483647, %v5611_v12  ;;  %v2998_v15 = vand.u32 2147483647, %v5612_v14  ;;  %v3507_v16 = vsub.f32 0.0, %v2995_v7  ;;  %v3508_v17 = vsub.f32 0.0, %v2996_v9 }
 0x3ac   :  { %v5613_v18 = vld [vmem:[#allocation5 + $0xce0] sm:$0xff]  ;;  %v5614_v20 = vld [vmem:[#allocation5 + $0xce8] sm:$0xff]  ;;  %4017 = vst [vmem:[#allocation8 + $0xcb0] sm:$0xff] %v3505_v10  ;;  %4018 = vst [vmem:[#allocation8 + $0xcb8] sm:$0xff] %v3506_v11 }
 0x3ad   :  { %v2999_v19 = vand.u32 2147483647, %v5613_v18  ;;  %v3000_v21 = vand.u32 2147483647, %v5614_v20  ;;  %v3509_v22 = vsub.f32 0.0, %v2997_v13  ;;  %v3510_v23 = vsub.f32 0.0, %v2998_v15 }
 0x3ae   :  { %v5615_v24 = vld [vmem:[#allocation5 + $0xcf0] sm:$0xff]  ;;  %v5616_v26 = vld [vmem:[#allocation5 + $0xcf8] sm:$0xff]  ;;  %4019 = vst [vmem:[#allocation8 + $0xcc0] sm:$0xff] %v3507_v16  ;;  %4020 = vst [vmem:[#allocation8 + $0xcc8] sm:$0xff] %v3508_v17 }
 0x3af   :  { %v3001_v25 = vand.u32 2147483647, %v5615_v24  ;;  %v3002_v27 = vand.u32 2147483647, %v5616_v26  ;;  %v3511_v28 = vsub.f32 0.0, %v2999_v19  ;;  %v3512_v29 = vsub.f32 0.0, %v3000_v21 }
 0x3b0   :  { %v5617_v30 = vld [vmem:[#allocation5 + $0xd00] sm:$0xff]  ;;  %v5618_v32 = vld [vmem:[#allocation5 + $0xd08] sm:$0xff]  ;;  %4021 = vst [vmem:[#allocation8 + $0xcd0] sm:$0xff] %v3509_v22  ;;  %4022 = vst [vmem:[#allocation8 + $0xcd8] sm:$0xff] %v3510_v23 }
 0x3b1   :  { %v3003_v31 = vand.u32 2147483647, %v5617_v30  ;;  %v3004_v33 = vand.u32 2147483647, %v5618_v32  ;;  %v3513_v34 = vsub.f32 0.0, %v3001_v25  ;;  %v3514_v35 = vsub.f32 0.0, %v3002_v27 }
 0x3b2   :  { %v5619_v36 = vld [vmem:[#allocation5 + $0xd10] sm:$0xff]  ;;  %v5620_v38 = vld [vmem:[#allocation5 + $0xd18] sm:$0xff]  ;;  %4023 = vst [vmem:[#allocation8 + $0xce0] sm:$0xff] %v3511_v28  ;;  %4024 = vst [vmem:[#allocation8 + $0xce8] sm:$0xff] %v3512_v29 }
 0x3b3   :  { %v3005_v37 = vand.u32 2147483647, %v5619_v36  ;;  %v3006_v39 = vand.u32 2147483647, %v5620_v38  ;;  %v3515_v40 = vsub.f32 0.0, %v3003_v31  ;;  %v3516_v41 = vsub.f32 0.0, %v3004_v33 }
 0x3b4   :  { %v5621_v42 = vld [vmem:[#allocation5 + $0xd20] sm:$0xff]  ;;  %v5622_v44 = vld [vmem:[#allocation5 + $0xd28] sm:$0xff]  ;;  %4025 = vst [vmem:[#allocation8 + $0xcf0] sm:$0xff] %v3513_v34  ;;  %4026 = vst [vmem:[#allocation8 + $0xcf8] sm:$0xff] %v3514_v35 }
 0x3b5   :  { %v3007_v43 = vand.u32 2147483647, %v5621_v42  ;;  %v3008_v45 = vand.u32 2147483647, %v5622_v44  ;;  %v3517_v46 = vsub.f32 0.0, %v3005_v37  ;;  %v3518_v47 = vsub.f32 0.0, %v3006_v39 }
 0x3b6   :  { %v5623_v48 = vld [vmem:[#allocation5 + $0xd30] sm:$0xff]  ;;  %v5624_v50 = vld [vmem:[#allocation5 + $0xd38] sm:$0xff]  ;;  %4027 = vst [vmem:[#allocation8 + $0xd00] sm:$0xff] %v3515_v40  ;;  %4028 = vst [vmem:[#allocation8 + $0xd08] sm:$0xff] %v3516_v41 }
 0x3b7   :  { %v3009_v49 = vand.u32 2147483647, %v5623_v48  ;;  %v3010_v51 = vand.u32 2147483647, %v5624_v50  ;;  %v3519_v52 = vsub.f32 0.0, %v3007_v43  ;;  %v3520_v53 = vsub.f32 0.0, %v3008_v45 }
 0x3b8   :  { %v5625_v54 = vld [vmem:[#allocation5 + $0xd40] sm:$0xff]  ;;  %v5626_v56 = vld [vmem:[#allocation5 + $0xd48] sm:$0xff]  ;;  %4029 = vst [vmem:[#allocation8 + $0xd10] sm:$0xff] %v3517_v46  ;;  %4030 = vst [vmem:[#allocation8 + $0xd18] sm:$0xff] %v3518_v47 }
 0x3b9   :  { %v3011_v55 = vand.u32 2147483647, %v5625_v54  ;;  %v3012_v57 = vand.u32 2147483647, %v5626_v56  ;;  %v3521_v58 = vsub.f32 0.0, %v3009_v49  ;;  %v3522_v59 = vsub.f32 0.0, %v3010_v51 }
 0x3ba   :  { %v5627_v60 = vld [vmem:[#allocation5 + $0xd50] sm:$0xff]  ;;  %v5628_v62 = vld [vmem:[#allocation5 + $0xd58] sm:$0xff]  ;;  %4031 = vst [vmem:[#allocation8 + $0xd20] sm:$0xff] %v3519_v52  ;;  %4032 = vst [vmem:[#allocation8 + $0xd28] sm:$0xff] %v3520_v53 }
 0x3bb   :  { %v3013_v61 = vand.u32 2147483647, %v5627_v60  ;;  %v3014_v63 = vand.u32 2147483647, %v5628_v62  ;;  %v3523_v0 = vsub.f32 0.0, %v3011_v55  ;;  %v3524_v1 = vsub.f32 0.0, %v3012_v57 }
 0x3bc   :  { %v5629_v2 = vld [vmem:[#allocation5 + $0xd60] sm:$0xff]  ;;  %v5630_v4 = vld [vmem:[#allocation5 + $0xd68] sm:$0xff]  ;;  %4033 = vst [vmem:[#allocation8 + $0xd30] sm:$0xff] %v3521_v58  ;;  %4034 = vst [vmem:[#allocation8 + $0xd38] sm:$0xff] %v3522_v59 }
 0x3bd   :  { %v3015_v3 = vand.u32 2147483647, %v5629_v2  ;;  %v3016_v5 = vand.u32 2147483647, %v5630_v4  ;;  %v3525_v6 = vsub.f32 0.0, %v3013_v61  ;;  %v3526_v7 = vsub.f32 0.0, %v3014_v63 }
 0x3be   :  { %v5631_v8 = vld [vmem:[#allocation5 + $0xd70] sm:$0xff]  ;;  %v5632_v10 = vld [vmem:[#allocation5 + $0xd78] sm:$0xff]  ;;  %4035 = vst [vmem:[#allocation8 + $0xd40] sm:$0xff] %v3523_v0  ;;  %4036 = vst [vmem:[#allocation8 + $0xd48] sm:$0xff] %v3524_v1 }
 0x3bf   :  { %v3017_v9 = vand.u32 2147483647, %v5631_v8  ;;  %v3018_v11 = vand.u32 2147483647, %v5632_v10  ;;  %v3527_v12 = vsub.f32 0.0, %v3015_v3  ;;  %v3528_v13 = vsub.f32 0.0, %v3016_v5 }
 0x3c0   :  { %v5633_v14 = vld [vmem:[#allocation5 + $0xd80] sm:$0xff]  ;;  %v5634_v16 = vld [vmem:[#allocation5 + $0xd88] sm:$0xff]  ;;  %4037 = vst [vmem:[#allocation8 + $0xd50] sm:$0xff] %v3525_v6  ;;  %4038 = vst [vmem:[#allocation8 + $0xd58] sm:$0xff] %v3526_v7 }
 0x3c1   :  { %v3019_v15 = vand.u32 2147483647, %v5633_v14  ;;  %v3020_v17 = vand.u32 2147483647, %v5634_v16  ;;  %v3529_v18 = vsub.f32 0.0, %v3017_v9  ;;  %v3530_v19 = vsub.f32 0.0, %v3018_v11 }
 0x3c2   :  { %v5635_v20 = vld [vmem:[#allocation5 + $0xd90] sm:$0xff]  ;;  %v5636_v22 = vld [vmem:[#allocation5 + $0xd98] sm:$0xff]  ;;  %4039 = vst [vmem:[#allocation8 + $0xd60] sm:$0xff] %v3527_v12  ;;  %4040 = vst [vmem:[#allocation8 + $0xd68] sm:$0xff] %v3528_v13 }
 0x3c3   :  { %v3021_v21 = vand.u32 2147483647, %v5635_v20  ;;  %v3022_v23 = vand.u32 2147483647, %v5636_v22  ;;  %v3531_v24 = vsub.f32 0.0, %v3019_v15  ;;  %v3532_v25 = vsub.f32 0.0, %v3020_v17 }
 0x3c4   :  { %v5637_v26 = vld [vmem:[#allocation5 + $0xda0] sm:$0xff]  ;;  %v5638_v28 = vld [vmem:[#allocation5 + $0xda8] sm:$0xff]  ;;  %4041 = vst [vmem:[#allocation8 + $0xd70] sm:$0xff] %v3529_v18  ;;  %4042 = vst [vmem:[#allocation8 + $0xd78] sm:$0xff] %v3530_v19 }
 0x3c5   :  { %v3023_v27 = vand.u32 2147483647, %v5637_v26  ;;  %v3024_v29 = vand.u32 2147483647, %v5638_v28  ;;  %v3533_v30 = vsub.f32 0.0, %v3021_v21  ;;  %v3534_v31 = vsub.f32 0.0, %v3022_v23 }
 0x3c6   :  { %v5639_v32 = vld [vmem:[#allocation5 + $0xdb0] sm:$0xff]  ;;  %v5640_v34 = vld [vmem:[#allocation5 + $0xdb8] sm:$0xff]  ;;  %4043 = vst [vmem:[#allocation8 + $0xd80] sm:$0xff] %v3531_v24  ;;  %4044 = vst [vmem:[#allocation8 + $0xd88] sm:$0xff] %v3532_v25 }
 0x3c7   :  { %v3025_v33 = vand.u32 2147483647, %v5639_v32  ;;  %v3026_v35 = vand.u32 2147483647, %v5640_v34  ;;  %v3535_v36 = vsub.f32 0.0, %v3023_v27  ;;  %v3536_v37 = vsub.f32 0.0, %v3024_v29 }
 0x3c8   :  { %v5641_v38 = vld [vmem:[#allocation5 + $0xdc0] sm:$0xff]  ;;  %v5642_v40 = vld [vmem:[#allocation5 + $0xdc8] sm:$0xff]  ;;  %4045 = vst [vmem:[#allocation8 + $0xd90] sm:$0xff] %v3533_v30  ;;  %4046 = vst [vmem:[#allocation8 + $0xd98] sm:$0xff] %v3534_v31 }
 0x3c9   :  { %v3027_v39 = vand.u32 2147483647, %v5641_v38  ;;  %v3028_v41 = vand.u32 2147483647, %v5642_v40  ;;  %v3537_v42 = vsub.f32 0.0, %v3025_v33  ;;  %v3538_v43 = vsub.f32 0.0, %v3026_v35 }
 0x3ca   :  { %v5643_v44 = vld [vmem:[#allocation5 + $0xdd0] sm:$0xff]  ;;  %v5644_v46 = vld [vmem:[#allocation5 + $0xdd8] sm:$0xff]  ;;  %4047 = vst [vmem:[#allocation8 + $0xda0] sm:$0xff] %v3535_v36  ;;  %4048 = vst [vmem:[#allocation8 + $0xda8] sm:$0xff] %v3536_v37 }
 0x3cb   :  { %v3029_v45 = vand.u32 2147483647, %v5643_v44  ;;  %v3030_v47 = vand.u32 2147483647, %v5644_v46  ;;  %v3539_v48 = vsub.f32 0.0, %v3027_v39  ;;  %v3540_v49 = vsub.f32 0.0, %v3028_v41 }
 0x3cc   :  { %v5645_v50 = vld [vmem:[#allocation5 + $0xde0] sm:$0xff]  ;;  %v5646_v52 = vld [vmem:[#allocation5 + $0xde8] sm:$0xff]  ;;  %4049 = vst [vmem:[#allocation8 + $0xdb0] sm:$0xff] %v3537_v42  ;;  %4050 = vst [vmem:[#allocation8 + $0xdb8] sm:$0xff] %v3538_v43 }
 0x3cd   :  { %v3031_v51 = vand.u32 2147483647, %v5645_v50  ;;  %v3032_v53 = vand.u32 2147483647, %v5646_v52  ;;  %v3541_v54 = vsub.f32 0.0, %v3029_v45  ;;  %v3542_v55 = vsub.f32 0.0, %v3030_v47 }
 0x3ce   :  { %v5647_v56 = vld [vmem:[#allocation5 + $0xdf0] sm:$0xff]  ;;  %v5648_v58 = vld [vmem:[#allocation5 + $0xdf8] sm:$0xff]  ;;  %4051 = vst [vmem:[#allocation8 + $0xdc0] sm:$0xff] %v3539_v48  ;;  %4052 = vst [vmem:[#allocation8 + $0xdc8] sm:$0xff] %v3540_v49 }
 0x3cf   :  { %v3033_v57 = vand.u32 2147483647, %v5647_v56  ;;  %v3034_v59 = vand.u32 2147483647, %v5648_v58  ;;  %v3543_v60 = vsub.f32 0.0, %v3031_v51  ;;  %v3544_v61 = vsub.f32 0.0, %v3032_v53 }
 0x3d0   :  { %v5649_v62 = vld [vmem:[#allocation5 + $0xe00] sm:$0xff]  ;;  %v5650_v0 = vld [vmem:[#allocation5 + $0xe08] sm:$0xff]  ;;  %4053 = vst [vmem:[#allocation8 + $0xdd0] sm:$0xff] %v3541_v54  ;;  %4054 = vst [vmem:[#allocation8 + $0xdd8] sm:$0xff] %v3542_v55 }
 0x3d1   :  { %v3035_v63 = vand.u32 2147483647, %v5649_v62  ;;  %v3036_v1 = vand.u32 2147483647, %v5650_v0  ;;  %v3545_v2 = vsub.f32 0.0, %v3033_v57  ;;  %v3546_v3 = vsub.f32 0.0, %v3034_v59 }
 0x3d2   :  { %v5651_v4 = vld [vmem:[#allocation5 + $0xe10] sm:$0xff]  ;;  %v5652_v6 = vld [vmem:[#allocation5 + $0xe18] sm:$0xff]  ;;  %4055 = vst [vmem:[#allocation8 + $0xde0] sm:$0xff] %v3543_v60  ;;  %4056 = vst [vmem:[#allocation8 + $0xde8] sm:$0xff] %v3544_v61 }
 0x3d3   :  { %v3037_v5 = vand.u32 2147483647, %v5651_v4  ;;  %v3038_v7 = vand.u32 2147483647, %v5652_v6  ;;  %v3547_v8 = vsub.f32 0.0, %v3035_v63  ;;  %v3548_v9 = vsub.f32 0.0, %v3036_v1 }
 0x3d4   :  { %v5653_v10 = vld [vmem:[#allocation5 + $0xe20] sm:$0xff]  ;;  %v5654_v12 = vld [vmem:[#allocation5 + $0xe28] sm:$0xff]  ;;  %4057 = vst [vmem:[#allocation8 + $0xdf0] sm:$0xff] %v3545_v2  ;;  %4058 = vst [vmem:[#allocation8 + $0xdf8] sm:$0xff] %v3546_v3 }
 0x3d5   :  { %v3039_v11 = vand.u32 2147483647, %v5653_v10  ;;  %v3040_v13 = vand.u32 2147483647, %v5654_v12  ;;  %v3549_v14 = vsub.f32 0.0, %v3037_v5  ;;  %v3550_v15 = vsub.f32 0.0, %v3038_v7 }
 0x3d6   :  { %v5655_v16 = vld [vmem:[#allocation5 + $0xe30] sm:$0xff]  ;;  %v5656_v18 = vld [vmem:[#allocation5 + $0xe38] sm:$0xff]  ;;  %4059 = vst [vmem:[#allocation8 + $0xe00] sm:$0xff] %v3547_v8  ;;  %4060 = vst [vmem:[#allocation8 + $0xe08] sm:$0xff] %v3548_v9 }
 0x3d7   :  { %v3041_v17 = vand.u32 2147483647, %v5655_v16  ;;  %v3042_v19 = vand.u32 2147483647, %v5656_v18  ;;  %v3551_v20 = vsub.f32 0.0, %v3039_v11  ;;  %v3552_v21 = vsub.f32 0.0, %v3040_v13 }
 0x3d8   :  { %v5657_v22 = vld [vmem:[#allocation5 + $0xe40] sm:$0xff]  ;;  %v5658_v24 = vld [vmem:[#allocation5 + $0xe48] sm:$0xff]  ;;  %4061 = vst [vmem:[#allocation8 + $0xe10] sm:$0xff] %v3549_v14  ;;  %4062 = vst [vmem:[#allocation8 + $0xe18] sm:$0xff] %v3550_v15 }
 0x3d9   :  { %v3043_v23 = vand.u32 2147483647, %v5657_v22  ;;  %v3044_v25 = vand.u32 2147483647, %v5658_v24  ;;  %v3553_v26 = vsub.f32 0.0, %v3041_v17  ;;  %v3554_v27 = vsub.f32 0.0, %v3042_v19 }
 0x3da   :  { %v5659_v28 = vld [vmem:[#allocation5 + $0xe50] sm:$0xff]  ;;  %v5660_v30 = vld [vmem:[#allocation5 + $0xe58] sm:$0xff]  ;;  %4063 = vst [vmem:[#allocation8 + $0xe20] sm:$0xff] %v3551_v20  ;;  %4064 = vst [vmem:[#allocation8 + $0xe28] sm:$0xff] %v3552_v21 }
 0x3db   :  { %v3045_v29 = vand.u32 2147483647, %v5659_v28  ;;  %v3046_v31 = vand.u32 2147483647, %v5660_v30  ;;  %v3555_v32 = vsub.f32 0.0, %v3043_v23  ;;  %v3556_v33 = vsub.f32 0.0, %v3044_v25 }
 0x3dc   :  { %v5661_v34 = vld [vmem:[#allocation5 + $0xe60] sm:$0xff]  ;;  %v5662_v36 = vld [vmem:[#allocation5 + $0xe68] sm:$0xff]  ;;  %4065 = vst [vmem:[#allocation8 + $0xe30] sm:$0xff] %v3553_v26  ;;  %4066 = vst [vmem:[#allocation8 + $0xe38] sm:$0xff] %v3554_v27 }
 0x3dd   :  { %v3047_v35 = vand.u32 2147483647, %v5661_v34  ;;  %v3048_v37 = vand.u32 2147483647, %v5662_v36  ;;  %v3557_v38 = vsub.f32 0.0, %v3045_v29  ;;  %v3558_v39 = vsub.f32 0.0, %v3046_v31 }
 0x3de   :  { %v5663_v40 = vld [vmem:[#allocation5 + $0xe70] sm:$0xff]  ;;  %v5664_v42 = vld [vmem:[#allocation5 + $0xe78] sm:$0xff]  ;;  %4067 = vst [vmem:[#allocation8 + $0xe40] sm:$0xff] %v3555_v32  ;;  %4068 = vst [vmem:[#allocation8 + $0xe48] sm:$0xff] %v3556_v33 }
 0x3df   :  { %v3049_v41 = vand.u32 2147483647, %v5663_v40  ;;  %v3050_v43 = vand.u32 2147483647, %v5664_v42  ;;  %v3559_v44 = vsub.f32 0.0, %v3047_v35  ;;  %v3560_v45 = vsub.f32 0.0, %v3048_v37 }
 0x3e0   :  { %v5665_v46 = vld [vmem:[#allocation5 + $0xe80] sm:$0xff]  ;;  %v5666_v48 = vld [vmem:[#allocation5 + $0xe88] sm:$0xff]  ;;  %4069 = vst [vmem:[#allocation8 + $0xe50] sm:$0xff] %v3557_v38  ;;  %4070 = vst [vmem:[#allocation8 + $0xe58] sm:$0xff] %v3558_v39 }
 0x3e1   :  { %v3051_v47 = vand.u32 2147483647, %v5665_v46  ;;  %v3052_v49 = vand.u32 2147483647, %v5666_v48  ;;  %v3561_v50 = vsub.f32 0.0, %v3049_v41  ;;  %v3562_v51 = vsub.f32 0.0, %v3050_v43 }
 0x3e2   :  { %v5667_v52 = vld [vmem:[#allocation5 + $0xe90] sm:$0xff]  ;;  %v5668_v54 = vld [vmem:[#allocation5 + $0xe98] sm:$0xff]  ;;  %4071 = vst [vmem:[#allocation8 + $0xe60] sm:$0xff] %v3559_v44  ;;  %4072 = vst [vmem:[#allocation8 + $0xe68] sm:$0xff] %v3560_v45 }
 0x3e3   :  { %v3053_v53 = vand.u32 2147483647, %v5667_v52  ;;  %v3054_v55 = vand.u32 2147483647, %v5668_v54  ;;  %v3563_v56 = vsub.f32 0.0, %v3051_v47  ;;  %v3564_v57 = vsub.f32 0.0, %v3052_v49 }
 0x3e4   :  { %v5669_v58 = vld [vmem:[#allocation5 + $0xea0] sm:$0xff]  ;;  %v5670_v60 = vld [vmem:[#allocation5 + $0xea8] sm:$0xff]  ;;  %4073 = vst [vmem:[#allocation8 + $0xe70] sm:$0xff] %v3561_v50  ;;  %4074 = vst [vmem:[#allocation8 + $0xe78] sm:$0xff] %v3562_v51 }
 0x3e5   :  { %v3055_v59 = vand.u32 2147483647, %v5669_v58  ;;  %v3056_v61 = vand.u32 2147483647, %v5670_v60  ;;  %v3565_v62 = vsub.f32 0.0, %v3053_v53  ;;  %v3566_v63 = vsub.f32 0.0, %v3054_v55 }
 0x3e6   :  { %v5671_v0 = vld [vmem:[#allocation5 + $0xeb0] sm:$0xff]  ;;  %v5672_v2 = vld [vmem:[#allocation5 + $0xeb8] sm:$0xff]  ;;  %4075 = vst [vmem:[#allocation8 + $0xe80] sm:$0xff] %v3563_v56  ;;  %4076 = vst [vmem:[#allocation8 + $0xe88] sm:$0xff] %v3564_v57 }
 0x3e7   :  { %v3057_v1 = vand.u32 2147483647, %v5671_v0  ;;  %v3058_v3 = vand.u32 2147483647, %v5672_v2  ;;  %v3567_v4 = vsub.f32 0.0, %v3055_v59  ;;  %v3568_v5 = vsub.f32 0.0, %v3056_v61 }
 0x3e8   :  { %v5673_v6 = vld [vmem:[#allocation5 + $0xec0] sm:$0xff]  ;;  %v5674_v8 = vld [vmem:[#allocation5 + $0xec8] sm:$0xff]  ;;  %4077 = vst [vmem:[#allocation8 + $0xe90] sm:$0xff] %v3565_v62  ;;  %4078 = vst [vmem:[#allocation8 + $0xe98] sm:$0xff] %v3566_v63 }
 0x3e9   :  { %v3059_v7 = vand.u32 2147483647, %v5673_v6  ;;  %v3060_v9 = vand.u32 2147483647, %v5674_v8  ;;  %v3569_v10 = vsub.f32 0.0, %v3057_v1  ;;  %v3570_v11 = vsub.f32 0.0, %v3058_v3 }
 0x3ea   :  { %v5675_v12 = vld [vmem:[#allocation5 + $0xed0] sm:$0xff]  ;;  %v5676_v14 = vld [vmem:[#allocation5 + $0xed8] sm:$0xff]  ;;  %4079 = vst [vmem:[#allocation8 + $0xea0] sm:$0xff] %v3567_v4  ;;  %4080 = vst [vmem:[#allocation8 + $0xea8] sm:$0xff] %v3568_v5 }
 0x3eb   :  { %v3061_v13 = vand.u32 2147483647, %v5675_v12  ;;  %v3062_v15 = vand.u32 2147483647, %v5676_v14  ;;  %v3571_v16 = vsub.f32 0.0, %v3059_v7  ;;  %v3572_v17 = vsub.f32 0.0, %v3060_v9 }
 0x3ec   :  { %v5677_v18 = vld [vmem:[#allocation5 + $0xee0] sm:$0xff]  ;;  %v5678_v20 = vld [vmem:[#allocation5 + $0xee8] sm:$0xff]  ;;  %4081 = vst [vmem:[#allocation8 + $0xeb0] sm:$0xff] %v3569_v10  ;;  %4082 = vst [vmem:[#allocation8 + $0xeb8] sm:$0xff] %v3570_v11 }
 0x3ed   :  { %v3063_v19 = vand.u32 2147483647, %v5677_v18  ;;  %v3064_v21 = vand.u32 2147483647, %v5678_v20  ;;  %v3573_v22 = vsub.f32 0.0, %v3061_v13  ;;  %v3574_v23 = vsub.f32 0.0, %v3062_v15 }
 0x3ee   :  { %v5679_v24 = vld [vmem:[#allocation5 + $0xef0] sm:$0xff]  ;;  %v5680_v26 = vld [vmem:[#allocation5 + $0xef8] sm:$0xff]  ;;  %4083 = vst [vmem:[#allocation8 + $0xec0] sm:$0xff] %v3571_v16  ;;  %4084 = vst [vmem:[#allocation8 + $0xec8] sm:$0xff] %v3572_v17 }
 0x3ef   :  { %v3065_v25 = vand.u32 2147483647, %v5679_v24  ;;  %v3066_v27 = vand.u32 2147483647, %v5680_v26  ;;  %v3575_v28 = vsub.f32 0.0, %v3063_v19  ;;  %v3576_v29 = vsub.f32 0.0, %v3064_v21 }
 0x3f0   :  { %v5681_v30 = vld [vmem:[#allocation5 + $0xf00] sm:$0xff]  ;;  %v5682_v32 = vld [vmem:[#allocation5 + $0xf08] sm:$0xff]  ;;  %4085 = vst [vmem:[#allocation8 + $0xed0] sm:$0xff] %v3573_v22  ;;  %4086 = vst [vmem:[#allocation8 + $0xed8] sm:$0xff] %v3574_v23 }
 0x3f1   :  { %v3067_v31 = vand.u32 2147483647, %v5681_v30  ;;  %v3068_v33 = vand.u32 2147483647, %v5682_v32  ;;  %v3577_v34 = vsub.f32 0.0, %v3065_v25  ;;  %v3578_v35 = vsub.f32 0.0, %v3066_v27 }
 0x3f2   :  { %v5683_v36 = vld [vmem:[#allocation5 + $0xf10] sm:$0xff]  ;;  %v5684_v38 = vld [vmem:[#allocation5 + $0xf18] sm:$0xff]  ;;  %4087 = vst [vmem:[#allocation8 + $0xee0] sm:$0xff] %v3575_v28  ;;  %4088 = vst [vmem:[#allocation8 + $0xee8] sm:$0xff] %v3576_v29 }
 0x3f3   :  { %v3069_v37 = vand.u32 2147483647, %v5683_v36  ;;  %v3070_v39 = vand.u32 2147483647, %v5684_v38  ;;  %v3579_v40 = vsub.f32 0.0, %v3067_v31  ;;  %v3580_v41 = vsub.f32 0.0, %v3068_v33 }
 0x3f4   :  { %v5685_v42 = vld [vmem:[#allocation5 + $0xf20] sm:$0xff]  ;;  %v5686_v44 = vld [vmem:[#allocation5 + $0xf28] sm:$0xff]  ;;  %4089 = vst [vmem:[#allocation8 + $0xef0] sm:$0xff] %v3577_v34  ;;  %4090 = vst [vmem:[#allocation8 + $0xef8] sm:$0xff] %v3578_v35 }
 0x3f5   :  { %v3071_v43 = vand.u32 2147483647, %v5685_v42  ;;  %v3072_v45 = vand.u32 2147483647, %v5686_v44  ;;  %v3581_v46 = vsub.f32 0.0, %v3069_v37  ;;  %v3582_v47 = vsub.f32 0.0, %v3070_v39 }
 0x3f6   :  { %v5687_v48 = vld [vmem:[#allocation5 + $0xf30] sm:$0xff]  ;;  %v5688_v50 = vld [vmem:[#allocation5 + $0xf38] sm:$0xff]  ;;  %4091 = vst [vmem:[#allocation8 + $0xf00] sm:$0xff] %v3579_v40  ;;  %4092 = vst [vmem:[#allocation8 + $0xf08] sm:$0xff] %v3580_v41 }
 0x3f7   :  { %v3073_v49 = vand.u32 2147483647, %v5687_v48  ;;  %v3074_v51 = vand.u32 2147483647, %v5688_v50  ;;  %v3583_v52 = vsub.f32 0.0, %v3071_v43  ;;  %v3584_v53 = vsub.f32 0.0, %v3072_v45 }
 0x3f8   :  { %v5689_v54 = vld [vmem:[#allocation5 + $0xf40] sm:$0xff]  ;;  %v5690_v56 = vld [vmem:[#allocation5 + $0xf48] sm:$0xff]  ;;  %4093 = vst [vmem:[#allocation8 + $0xf10] sm:$0xff] %v3581_v46  ;;  %4094 = vst [vmem:[#allocation8 + $0xf18] sm:$0xff] %v3582_v47 }
 0x3f9   :  { %v3075_v55 = vand.u32 2147483647, %v5689_v54  ;;  %v3076_v57 = vand.u32 2147483647, %v5690_v56  ;;  %v3585_v58 = vsub.f32 0.0, %v3073_v49  ;;  %v3586_v59 = vsub.f32 0.0, %v3074_v51 }
 0x3fa   :  { %v5691_v60 = vld [vmem:[#allocation5 + $0xf50] sm:$0xff]  ;;  %v5692_v62 = vld [vmem:[#allocation5 + $0xf58] sm:$0xff]  ;;  %4095 = vst [vmem:[#allocation8 + $0xf20] sm:$0xff] %v3583_v52  ;;  %4096 = vst [vmem:[#allocation8 + $0xf28] sm:$0xff] %v3584_v53 }
 0x3fb   :  { %v3077_v61 = vand.u32 2147483647, %v5691_v60  ;;  %v3078_v63 = vand.u32 2147483647, %v5692_v62  ;;  %v3587_v0 = vsub.f32 0.0, %v3075_v55  ;;  %v3588_v1 = vsub.f32 0.0, %v3076_v57 }
 0x3fc   :  { %v5693_v2 = vld [vmem:[#allocation5 + $0xf60] sm:$0xff]  ;;  %v5694_v4 = vld [vmem:[#allocation5 + $0xf68] sm:$0xff]  ;;  %4097 = vst [vmem:[#allocation8 + $0xf30] sm:$0xff] %v3585_v58  ;;  %4098 = vst [vmem:[#allocation8 + $0xf38] sm:$0xff] %v3586_v59 }
 0x3fd   :  { %v3079_v3 = vand.u32 2147483647, %v5693_v2  ;;  %v3080_v5 = vand.u32 2147483647, %v5694_v4  ;;  %v3589_v6 = vsub.f32 0.0, %v3077_v61  ;;  %v3590_v7 = vsub.f32 0.0, %v3078_v63 }
 0x3fe   :  { %v5695_v8 = vld [vmem:[#allocation5 + $0xf70] sm:$0xff]  ;;  %v5696_v10 = vld [vmem:[#allocation5 + $0xf78] sm:$0xff]  ;;  %4099 = vst [vmem:[#allocation8 + $0xf40] sm:$0xff] %v3587_v0  ;;  %4100 = vst [vmem:[#allocation8 + $0xf48] sm:$0xff] %v3588_v1 }
 0x3ff   :  { %v3081_v9 = vand.u32 2147483647, %v5695_v8  ;;  %v3082_v11 = vand.u32 2147483647, %v5696_v10  ;;  %v3591_v12 = vsub.f32 0.0, %v3079_v3  ;;  %v3592_v13 = vsub.f32 0.0, %v3080_v5 }
 0x400   :  { %v5697_v14 = vld [vmem:[#allocation5 + $0xf80] sm:$0xff]  ;;  %v5698_v16 = vld [vmem:[#allocation5 + $0xf88] sm:$0xff]  ;;  %4101 = vst [vmem:[#allocation8 + $0xf50] sm:$0xff] %v3589_v6  ;;  %4102 = vst [vmem:[#allocation8 + $0xf58] sm:$0xff] %v3590_v7 }
 0x401   :  { %v3083_v15 = vand.u32 2147483647, %v5697_v14  ;;  %v3084_v17 = vand.u32 2147483647, %v5698_v16  ;;  %v3593_v18 = vsub.f32 0.0, %v3081_v9  ;;  %v3594_v19 = vsub.f32 0.0, %v3082_v11 }
 0x402   :  { %v5699_v20 = vld [vmem:[#allocation5 + $0xf90] sm:$0xff]  ;;  %v5700_v22 = vld [vmem:[#allocation5 + $0xf98] sm:$0xff]  ;;  %4103 = vst [vmem:[#allocation8 + $0xf60] sm:$0xff] %v3591_v12  ;;  %4104 = vst [vmem:[#allocation8 + $0xf68] sm:$0xff] %v3592_v13 }
 0x403   :  { %v3085_v21 = vand.u32 2147483647, %v5699_v20  ;;  %v3086_v23 = vand.u32 2147483647, %v5700_v22  ;;  %v3595_v24 = vsub.f32 0.0, %v3083_v15  ;;  %v3596_v25 = vsub.f32 0.0, %v3084_v17 }
 0x404   :  { %v5701_v26 = vld [vmem:[#allocation5 + $0xfa0] sm:$0xff]  ;;  %v5702_v28 = vld [vmem:[#allocation5 + $0xfa8] sm:$0xff]  ;;  %4105 = vst [vmem:[#allocation8 + $0xf70] sm:$0xff] %v3593_v18  ;;  %4106 = vst [vmem:[#allocation8 + $0xf78] sm:$0xff] %v3594_v19 }
 0x405   :  { %v3087_v27 = vand.u32 2147483647, %v5701_v26  ;;  %v3088_v29 = vand.u32 2147483647, %v5702_v28  ;;  %v3597_v30 = vsub.f32 0.0, %v3085_v21  ;;  %v3598_v31 = vsub.f32 0.0, %v3086_v23 }
 0x406   :  { %v5703_v32 = vld [vmem:[#allocation5 + $0xfb0] sm:$0xff]  ;;  %v5704_v34 = vld [vmem:[#allocation5 + $0xfb8] sm:$0xff]  ;;  %4107 = vst [vmem:[#allocation8 + $0xf80] sm:$0xff] %v3595_v24  ;;  %4108 = vst [vmem:[#allocation8 + $0xf88] sm:$0xff] %v3596_v25 }
 0x407   :  { %v3089_v33 = vand.u32 2147483647, %v5703_v32  ;;  %v3090_v35 = vand.u32 2147483647, %v5704_v34  ;;  %v3599_v36 = vsub.f32 0.0, %v3087_v27  ;;  %v3600_v37 = vsub.f32 0.0, %v3088_v29 }
 0x408   :  { %v5705_v38 = vld [vmem:[#allocation5 + $0xfc0] sm:$0xff]  ;;  %v5706_v40 = vld [vmem:[#allocation5 + $0xfc8] sm:$0xff]  ;;  %4109 = vst [vmem:[#allocation8 + $0xf90] sm:$0xff] %v3597_v30  ;;  %4110 = vst [vmem:[#allocation8 + $0xf98] sm:$0xff] %v3598_v31 }
 0x409   :  { %v3091_v39 = vand.u32 2147483647, %v5705_v38  ;;  %v3092_v41 = vand.u32 2147483647, %v5706_v40  ;;  %v3601_v42 = vsub.f32 0.0, %v3089_v33  ;;  %v3602_v43 = vsub.f32 0.0, %v3090_v35 }
 0x40a   :  { %v5707_v44 = vld [vmem:[#allocation5 + $0xfd0] sm:$0xff]  ;;  %v5708_v46 = vld [vmem:[#allocation5 + $0xfd8] sm:$0xff]  ;;  %4111 = vst [vmem:[#allocation8 + $0xfa0] sm:$0xff] %v3599_v36  ;;  %4112 = vst [vmem:[#allocation8 + $0xfa8] sm:$0xff] %v3600_v37 }
 0x40b   :  { %v3093_v45 = vand.u32 2147483647, %v5707_v44  ;;  %v3094_v47 = vand.u32 2147483647, %v5708_v46  ;;  %v3603_v48 = vsub.f32 0.0, %v3091_v39  ;;  %v3604_v49 = vsub.f32 0.0, %v3092_v41 }
 0x40c   :  { %v5709_v50 = vld [vmem:[#allocation5 + $0xfe0] sm:$0xff]  ;;  %v5710_v52 = vld [vmem:[#allocation5 + $0xfe8] sm:$0xff]  ;;  %4113 = vst [vmem:[#allocation8 + $0xfb0] sm:$0xff] %v3601_v42  ;;  %4114 = vst [vmem:[#allocation8 + $0xfb8] sm:$0xff] %v3602_v43 }
 0x40d   :  { %v3095_v51 = vand.u32 2147483647, %v5709_v50  ;;  %v3096_v53 = vand.u32 2147483647, %v5710_v52  ;;  %v3605_v54 = vsub.f32 0.0, %v3093_v45  ;;  %v3606_v55 = vsub.f32 0.0, %v3094_v47 }
 0x40e   :  { %v5711_v56 = vld [vmem:[#allocation5 + $0xff0] sm:$0xff]  ;;  %v5712_v58 = vld [vmem:[#allocation5 + $0xff8] sm:$0xff]  ;;  %4115 = vst [vmem:[#allocation8 + $0xfc0] sm:$0xff] %v3603_v48  ;;  %4116 = vst [vmem:[#allocation8 + $0xfc8] sm:$0xff] %v3604_v49 }
 0x40f   :  { %v3097_v57 = vand.u32 2147483647, %v5711_v56  ;;  %v3098_v59 = vand.u32 2147483647, %v5712_v58  ;;  %v3607_v60 = vsub.f32 0.0, %v3095_v51  ;;  %v3608_v61 = vsub.f32 0.0, %v3096_v53 }
 0x410   :  { %4117 = vst [vmem:[#allocation8 + $0xfd0] sm:$0xff] %v3605_v54  ;;  %4118 = vst [vmem:[#allocation8 + $0xfd8] sm:$0xff] %v3606_v55 }
 0x411   :  { %v3609_v62 = vsub.f32 0.0, %v3097_v57  ;;  %v3610_v63 = vsub.f32 0.0, %v3098_v59  ;;  %4119 = vst [vmem:[#allocation8 + $0xfe0] sm:$0xff] %v3607_v60  ;;  %4120 = vst [vmem:[#allocation8 + $0xfe8] sm:$0xff] %v3608_v61 }
 0x413   :  { %4121 = vst [vmem:[#allocation8 + $0xff0] sm:$0xff] %v3609_v62  ;;  %4122 = vst [vmem:[#allocation8 + $0xff8] sm:$0xff] %v3610_v63 }
 0x414   :  { %5746 = shalt.err (!%p5743_p12)
}
 0x415   :  { %s5747_s5 = scalar_lea.hbm %s5902_s2, 65536 }
 0x416   :  { %p5748_p13 = scmp.ne.s32.totalorder %s5902_s2, %s5747_s5  ;;  %p5751_p0 = scmp.lt.u32.totalorder %s5747_s5, %s5902_s2 }
 0x418   :  { %p5753_p1 = pnand %p5751_p0, %p5748_p13 }
 0x41a   :  { %5756 = shalt.err (!%p5753_p1)
}
 0x41b   :  { %4146 = dma.vmem_to_hbm [thread:$0]  %s4141_s26, 65536, %s5902_s2, [#allocation7], %s5808_s22, %s5808_s22, %s5809_s23  }
 0x41c   :  { %s5757_s12 = scalar_lea.vmem %s5848_s28, 65536  ;;  %p5762_p3 = scmp.lt.s32.totalorder %s5848_s28, %s5848_s28 }
 0x41d   :  { %p5758_p2 = scmp.ne.s32.totalorder %s5848_s28, %s5757_s12  ;;  %p5763_p4 = scmp.lt.s32.totalorder %s5757_s12, %s5757_s12 }
 0x41f   :  { %p5764_p5 = por %p5763_p4, %p5762_p3 }
 0x421   :  { %p5765_p6 = pnand %p5764_p5, %p5758_p2 }
 0x423   :  { %5768 = shalt.err (!%p5765_p6)
}
 0x424   :  { %s5769_s15 = scalar_lea.hbm %s5901_s1, 65536 }
 0x425   :  { %p5770_p7 = scmp.ne.s32.totalorder %s5901_s1, %s5769_s15  ;;  %p5773_p8 = scmp.lt.u32.totalorder %s5769_s15, %s5901_s1 }
 0x427   :  { %p5775_p9 = pnand %p5773_p8, %p5770_p7 }
 0x429   :  { %5778 = shalt.err (!%p5775_p9)
}
 0x42a   :  { %4134 = dma.vmem_to_hbm [thread:$0]  %s5848_s28, 65536, %s5901_s1, [#allocation4], %s5808_s22, %s5808_s22, %s5809_s23  }
 0x42b   :  { %s5812_s21 = smov [#allocation8]  }
 0x42c   :  { %s4152_s24 = sshll.u32 %s5812_s21, 4  ;;  %s4153_s24 = int_to_ptr.vmem [resolvable:$true] %s4152_s24 }
 0x42d   :  { %s5779_s25 = scalar_lea.vmem %s4153_s24, 65536  ;;  %p5784_p11 = scmp.lt.s32.totalorder %s4153_s24, %s4153_s24 }
 0x42e   :  { %p5780_p10 = scmp.ne.s32.totalorder %s4153_s24, %s5779_s25  ;;  %p5785_p12 = scmp.lt.s32.totalorder %s5779_s25, %s5779_s25 }
 0x430   :  { %p5786_p13 = por %p5785_p12, %p5784_p11 }
 0x432   :  { %p5787_p0 = pnand %p5786_p13, %p5780_p10 }
 0x434   :  { %5790 = shalt.err (!%p5787_p0)
}
 0x435   :  { %s5791_s27 = scalar_lea.hbm %s5903_s3, 65536 }
 0x436   :  { %p5792_p1 = scmp.ne.s32.totalorder %s5903_s3, %s5791_s27  ;;  %p5795_p2 = scmp.lt.u32.totalorder %s5791_s27, %s5903_s3 }
 0x438   :  { %p5797_p3 = pnand %p5795_p2, %p5792_p1 }
 0x43a   :  { %5800 = shalt.err (!%p5797_p3)
}
 0x43b   :  { %4158 = dma.vmem_to_hbm [thread:$0]  %s4153_s24, 65536, %s5903_s3, [#allocation7], %s5808_s22, %s5808_s22, %s5809_s23  }
 0x43c   :  { %5803 = dma.done.wait [#allocation4], 65536  }
 0x43d   :  { %5804 = vsyncadd [#allocation4], 4294901760 }
 0x43e   :  { %5805 = dma.done.wait [#allocation7], 131072  }
 0x43f   :  { %5806 = vsyncadd [#allocation7], 4294836224 }
 0x440   :  { %4168 = vsyncpa [#allocation3], 1 }
 0x441   :  { %4169 = vsyncpa [#allocation4], 1 }
 0x442   :  { %4170 = vsyncpa [#allocation7], 1 }

</bundles_post_ra>
